<compile_context>
chip_gen: v7x
topology: tpu7x:2x2x1
jax: 0.10.0
libtpu: 0.0.40
codegen_flags: <defaults>
</compile_context>

<pallas_src>
import functools
import math

import jax
import jax.numpy as jnp
from jax.experimental import pallas as pl
from jax.experimental.pallas import tpu as pltpu

F32 = jnp.float32
BF16 = jnp.bfloat16

# ----------------------------- model dimensions -----------------------------
B = 2                  # batch
C = 3                  # image channels
H = W = 16             # image spatial
PATCH = 4
N_PATCH = (H // PATCH) * (W // PATCH)   # 16
S_IMG = N_PATCH + 1                     # 17 = CLS + patches
S_IMG_PAD = 24                          # padded to a multiple of 8 sublanes
L = 8                  # text sequence length
VOCAB = 64
D = 32                 # hidden size
N_HEADS = 4
HEAD_DIM = D // N_HEADS
MLP = 64
PROJ = 16              # projection dim (vision_proj / text_proj)
N_LAYERS = 2           # layers per encoder (tiny synthetic encoders)
TEMP = 0.07            # ALBEF contrastive temperature

SELF_KEYS = ("wq", "bq", "wk", "bk", "wv", "bv", "wo", "bo",
             "ln1g", "ln1b", "w1", "b1", "w2", "b2", "ln2g", "ln2b")      # 16
CROSS_KEYS = ("wxq", "bxq", "wxk", "bxk", "wxv", "bxv", "wxo", "bxo",
              "lnxg", "lnxb")                                             # 10
N_SELF = len(SELF_KEYS)
N_FULL = N_SELF + len(CROSS_KEYS)

_VMEM = pl.BlockSpec(memory_space=pltpu.MemorySpace.VMEM)


# --------------------------- in-kernel math helpers ---------------------------
def _bdot(a, b):
    # bf16 MXU inputs (weights are stored bf16), f32 accumulation.
    return jnp.dot(a.astype(BF16), b, preferred_element_type=jnp.float32)


def _ln(x, g, b):
    mu = jnp.mean(x, axis=-1, keepdims=True)
    xc = x - mu
    var = jnp.mean(xc * xc, axis=-1, keepdims=True)
    return xc * jax.lax.rsqrt(var + 1e-12) * g + b


def _softmax_last(s):
    s = s - jnp.max(s, axis=-1, keepdims=True)
    p = jnp.exp(s)
    return p / jnp.sum(p, axis=-1, keepdims=True)


def _log_softmax(x):
    z = x - jnp.max(x, axis=-1, keepdims=True)
    return z - jnp.log(jnp.sum(jnp.exp(z), axis=-1, keepdims=True))


def _l2norm(y):
    n = jnp.sqrt(jnp.sum(y * y, axis=-1, keepdims=True))
    return y / jnp.maximum(n, 1e-12)


def _mha(xq, xkv, wq, bq, wk, bk, wv, bv, wo, bo, mask):
    # Per-head weights are stored (H, D, dh) / (H, dh, D): no lane extraction
    # of activations and no last-axis concat; the out-proj is accumulated.
    Bb, Sq, Dd = xq.shape
    Sk = xkv.shape[1]
    xq2 = xq.reshape(Bb * Sq, Dd)
    xk2 = xkv.reshape(Bb * Sk, Dd)
    scale = 1.0 / math.sqrt(HEAD_DIM)
    acc = None
    for hh in range(N_HEADS):
        qh = (_bdot(xq2, wq[hh]) + bq[hh]).reshape(Bb, Sq, HEAD_DIM)
        kh = (_bdot(xk2, wk[hh]) + bk[hh]).reshape(Bb, Sk, HEAD_DIM)
        vh = (_bdot(xk2, wv[hh]) + bv[hh]).reshape(Bb, Sk, HEAD_DIM)
        s = jnp.einsum("bqd,bkd->bqk", qh.astype(BF16), kh.astype(BF16),
                       preferred_element_type=jnp.float32) * scale + mask
        p = _softmax_last(s)
        oh = jnp.einsum("bqk,bkd->bqd", p.astype(BF16), vh.astype(BF16),
                        preferred_element_type=jnp.float32)
        contrib = _bdot(oh.reshape(Bb * Sq, HEAD_DIM), wo[hh])
        acc = contrib if acc is None else acc + contrib
    return (acc + bo).reshape(Bb, Sq, Dd)


def _layer_fwd(x, w, self_mask, cross_kv=None, cross_mask=None):
    # post-LN transformer layer (optionally with cross-attention).
    Bb, S, Dd = x.shape
    h = _mha(x, x, w["wq"], w["bq"], w["wk"], w["bk"], w["wv"], w["bv"],
             w["wo"], w["bo"], self_mask)
    x = _ln(x + h, w["ln1g"], w["ln1b"])
    if cross_kv is not None:
        h = _mha(x, cross_kv, w["wxq"], w["bxq"], w["wxk"], w["bxk"],
                 w["wxv"], w["bxv"], w["wxo"], w["bxo"], cross_mask)
        x = _ln(x + h, w["lnxg"], w["lnxb"])
    x2 = x.reshape(Bb * S, Dd)
    ff = _bdot(x2, w["w1"]) + w["b1"]
    ff = jax.nn.gelu(ff, approximate=True)   # TODO(synk): PyTorch nn.GELU default is exact erf.
    ff = (_bdot(ff, w["w2"]) + w["b2"]).reshape(Bb, S, Dd)
    return _ln(x + ff, w["ln2g"], w["ln2b"])


def _unpack_layers(lrefs, keys, l):
    return {k: lrefs[i][l] for i, k in enumerate(keys)}


# ------------------------------- fused kernels --------------------------------
def _vision_kernel(*refs):
    # patch linear (pre-padded input) + folded CLS/pos/bias + layers + final LN
    # + fused vision_proj + L2 normalize.
    patches_ref, poscls_ref, pw_ref = refs[:3]
    lrefs = refs[3:3 + N_SELF]
    lnfg_ref, lnfb_ref, wvp_ref, bvp_ref = refs[3 + N_SELF:7 + N_SELF]
    o_ref = refs[7 + N_SELF]
    feat_ref = refs[8 + N_SELF]

    Bb = patches_ref.shape[0]
    emb = _bdot(patches_ref[...].reshape(Bb * S_IMG_PAD, -1), pw_ref[...])
    x = emb.reshape(Bb, S_IMG_PAD, D) + poscls_ref[...]

    # padded key columns are invalid; mask materialized once for the kernel.
    col = jax.lax.broadcasted_iota(jnp.int32, (1, S_IMG_PAD, S_IMG_PAD), 2)
    self_mask = jnp.broadcast_to(jnp.where(col < S_IMG, 0.0, -1e9).astype(F32),
                                 (Bb, S_IMG_PAD, S_IMG_PAD))

    for l in range(N_LAYERS):
        x = _layer_fwd(x, _unpack_layers(lrefs, SELF_KEYS, l), self_mask)
    x = _ln(x, lnfg_ref[...], lnfb_ref[...])
    o_ref[...] = x
    feat_ref[...] = _l2norm(_bdot(x[:, 0, :], wvp_ref[...]) + bvp_ref[...])


def _text_kernel(*refs):
    # text encoder + final LN + fused text_proj + L2 normalize (eval path).
    x_ref, mask_ref = refs[:2]
    lrefs = refs[2:2 + N_SELF]
    lnfg_ref, lnfb_ref, wtp_ref, btp_ref = refs[2 + N_SELF:6 + N_SELF]
    o_ref = refs[6 + N_SELF]
    feat_ref = refs[7 + N_SELF]

    x = x_ref[...]
    Bb, Ll, _ = x.shape
    self_mask = jnp.broadcast_to(mask_ref[...], (Bb, Ll, Ll))
    for l in range(N_LAYERS):
        x = _layer_fwd(x, _unpack_layers(lrefs, SELF_KEYS, l), self_mask)
    x = _ln(x, lnfg_ref[...], lnfb_ref[...])
    o_ref[...] = x
    feat_ref[...] = _l2norm(_bdot(x[:, 0, :], wtp_ref[...]) + btp_ref[...])


def _mm_eval_kernel(*refs):
    # multimodal encoder (whole batch) + fused ITM head -> (Bm, 2) logits.
    x_ref, mask_ref, img_ref = refs[:3]
    lrefs = refs[3:3 + N_FULL]
    witm_ref, bitm_ref = refs[3 + N_FULL:5 + N_FULL]
    o_ref = refs[5 + N_FULL]

    x = x_ref[...]
    img = img_ref[...]
    Bm, Ll, _ = x.shape
    Sk = img.shape[1]
    self_mask = jnp.broadcast_to(mask_ref[...], (Bm, Ll, Ll))
    col = jax.lax.broadcasted_iota(jnp.int32, (1, Ll, Sk), 2)
    cross_mask = jnp.broadcast_to(jnp.where(col < S_IMG, 0.0, -1e9).astype(F32),
                                  (Bm, Ll, Sk))
    for l in range(N_LAYERS):
        x = _layer_fwd(x, _unpack_layers(lrefs, SELF_KEYS + CROSS_KEYS, l),
                       self_mask, cross_kv=img, cross_mask=cross_mask)
    o_ref[...] = _bdot(x[:, 0, :], witm_ref[...]) + bitm_ref[...]


def _train_kernel(*refs, alpha, inv_temp, n_pos):
    # text encoder + ITC loss + 3B multimodal encoder + ITM head + CE, all fused.
    xt_ref, tmask_ref, img_ref, imgfeat_ref, simt_ref = refs[:5]
    i = 5
    txt_lrefs = refs[i:i + N_SELF]; i += N_SELF
    tlng_ref, tlnb_ref, wtp_ref, btp_ref = refs[i:i + 4]; i += 4
    mm_lrefs = refs[i:i + N_FULL]; i += N_FULL
    witm_ref, bitm_ref = refs[i:i + 2]; i += 2
    loss_ref = refs[i]

    # ---------------- text encoder ----------------
    x = xt_ref[...]
    Bb, Ll, _ = x.shape
    tmask = jnp.broadcast_to(tmask_ref[...], (Bb, Ll, Ll))
    for l in range(N_LAYERS):
        x = _layer_fwd(x, _unpack_layers(txt_lrefs, SELF_KEYS, l), tmask)
    text_embed = _ln(x, tlng_ref[...], tlnb_ref[...])            # (B, L, D)

    # ---------------- ITC (proj + normalize + similarity + loss) ----------------
    text_feat = _l2norm(_bdot(text_embed[:, 0, :], wtp_ref[...]) + btp_ref[...])
    image_feat = imgfeat_ref[...]                                 # already normalized
    sim_i2t = jax.lax.dot_general(image_feat, text_feat, (((1,), (1,)), ((), ())),
                                  preferred_element_type=jnp.float32) * inv_temp
    sim_t2i = jax.lax.dot_general(text_feat, image_feat, (((1,), (1,)), ((), ())),
                                  preferred_element_type=jnp.float32) * inv_temp
    # TODO(synk): momentum encoders + feature queues omitted; momentum sims = current sims.
    sim_i2t_m, sim_t2i_m = sim_i2t, sim_t2i
    tgt = simt_ref[...]
    n = tgt.shape[0]
    t_i2t = alpha * _softmax_last(sim_i2t_m) + (1.0 - alpha) * tgt
    t_t2i = alpha * _softmax_last(sim_t2i_m) + (1.0 - alpha) * tgt
    li = -jnp.sum(jnp.sum(_log_softmax(sim_i2t) * t_i2t, axis=-1, keepdims=True),
                  axis=0, keepdims=True) / n
    lt = -jnp.sum(jnp.sum(_log_softmax(sim_t2i) * t_t2i, axis=-1, keepdims=True),
                  axis=0, keepdims=True) / n
    itc = 0.5 * (li + lt)

    # -------- multimodal: [pos | (neg text, pos image) | (pos text, neg image)] --------
    # TODO(synk): hard-negative multinomial sampling replaced with a deterministic roll.
    img = img_ref[...]                                            # (B, S_IMG_PAD, D)
    t_neg = jnp.concatenate([text_embed[1:], text_embed[:1]], axis=0)
    m_neg = jnp.concatenate([tmask[1:], tmask[:1]], axis=0)
    i_neg = jnp.concatenate([img[1:], img[:1]], axis=0)
    x_all = jnp.concatenate([text_embed, t_neg, text_embed], axis=0)   # (3B, L, D)
    m_all = jnp.concatenate([tmask, m_neg, tmask], axis=0)             # (3B, L, L)
    img_all = jnp.concatenate([img, img, i_neg], axis=0)               # (3B, S_PAD, D)
    col = jax.lax.broadcasted_iota(jnp.int32, (1, Ll, S_IMG_PAD), 2)
    cross_mask = jnp.broadcast_to(jnp.where(col < S_IMG, 0.0, -1e9).astype(F32),
                                  (3 * Bb, Ll, S_IMG_PAD))

    y = x_all
    for l in range(N_LAYERS):
        y = _layer_fwd(y, _unpack_layers(mm_lrefs, SELF_KEYS + CROSS_KEYS, l),
                       m_all, cross_kv=img_all, cross_mask=cross_mask)

    # ---------------- ITM head + cross-entropy ----------------
    logits = _bdot(y[:, 0, :], witm_ref[...]) + bitm_ref[...]     # (3B, 2)
    row = jax.lax.broadcasted_iota(jnp.int32, logits.shape, 0)
    colz = jax.lax.broadcasted_iota(jnp.int32, logits.shape, 1)
    onehot = jnp.where(row < n_pos, colz == 1, colz == 0).astype(F32)
    per = -jnp.sum(_log_softmax(logits) * onehot, axis=-1, keepdims=True)
    itm = jnp.sum(per, axis=0, keepdims=True) / logits.shape[0]

    loss_ref[...] = itc + itm


# ------------------------------ kernel wrappers -------------------------------
def _pcall(kernel, out_shape, args):
    if isinstance(out_shape, tuple):
        out_specs = tuple(_VMEM for _ in out_shape)
    else:
        out_specs = _VMEM
    return pl.pallas_call(
        kernel,
        out_shape=out_shape,
        in_specs=[_VMEM] * len(args),
        out_specs=out_specs,
    )(*args)


def vision_encoder(image, P):
    Bb = image.shape[0]
    # im2col patchify (NCHW -> (B, Np, C*ph*pw)); padded to the 24-row sequence
    # (row 0 = CLS slot, rows 17.. = pad) so the kernel needs no scatter/scratch.
    x = image.reshape(Bb, C, H // PATCH, PATCH, W // PATCH, PATCH)
    x = x.transpose(0, 2, 4, 1, 3, 5).reshape(Bb, N_PATCH, C * PATCH * PATCH)
    patches = jnp.pad(x, ((0, 0), (1, S_IMG_PAD - S_IMG), (0, 0)))
    lw = P["vit_layers"]
    args = ([patches, P["pos_cls"], P["patch_w"]]
            + [lw[k] for k in SELF_KEYS]
            + [P["vit_ln_g"], P["vit_ln_b"], P["vis_proj"]["w"], P["vis_proj"]["b"]])
    return _pcall(_vision_kernel,
                  (jax.ShapeDtypeStruct((Bb, S_IMG_PAD, D), F32),
                   jax.ShapeDtypeStruct((Bb, PROJ), F32)),
                  args)


def text_encoder(text, text_atts, P):
    Bb, Ll = text.shape
    # TODO(synk): token-embedding gather stays in XLA outside the kernel.
    x = jnp.take(P["tok_emb"], text, axis=0) + P["pos_txt"]
    mask = ((1.0 - text_atts.astype(F32)) * -1e9).reshape(Bb, 1, Ll)
    lw = P["txt_layers"]
    args = ([x, mask] + [lw[k] for k in SELF_KEYS]
            + [P["txt_ln_g"], P["txt_ln_b"], P["txt_proj"]["w"], P["txt_proj"]["b"]])
    return _pcall(_text_kernel,
                  (jax.ShapeDtypeStruct((Bb, Ll, D), F32),
                   jax.ShapeDtypeStruct((Bb, PROJ), F32)),
                  args)


# ------------------------------ top-level model -------------------------------
def _encode_image(image, P):
    embed_pad, feat = vision_encoder(image, P)
    return embed_pad[:, :S_IMG, :], feat               # un-padded, as the spec returns


def _encode_text(text, text_atts, P):
    return text_encoder(text, text_atts, P)


def _image_text_matching_score(image_embed, text_embed, text_atts, P):
    Si = image_embed.shape[1]
    if Si < S_IMG_PAD:
        image_embed = jnp.pad(image_embed, ((0, 0), (0, S_IMG_PAD - Si), (0, 0)))
    Bm, Ll, _ = text_embed.shape
    mask = ((1.0 - text_atts.astype(F32)) * -1e9).reshape(Bm, 1, Ll)
    args = ([text_embed, mask, image_embed]
            + [P["mm_layers"][k] for k in SELF_KEYS + CROSS_KEYS]
            + [P["itm"]["w"], P["itm"]["b"]])
    logits = _pcall(_mm_eval_kernel, jax.ShapeDtypeStruct((Bm, 2), F32), args)
    return logits[:, 1]


def _train_forward(image, text, text_atts, idx, alpha, P):
    Bb = image.shape[0]
    image_embed, image_feat = vision_encoder(image, P)             # pallas_call #1

    x = jnp.take(P["tok_emb"], text, axis=0) + P["pos_txt"]
    mask = ((1.0 - text_atts.astype(F32)) * -1e9).reshape(Bb, 1, text.shape[1])
    pos_mask = (idx[:, None] == idx[None, :]).astype(F32)
    sim_targets = pos_mask / jnp.sum(pos_mask, axis=1, keepdims=True)

    args = ([x, mask, image_embed, image_feat, sim_targets]
            + [P["txt_layers"][k] for k in SELF_KEYS]
            + [P["txt_ln_g"], P["txt_ln_b"], P["txt_proj"]["w"], P["txt_proj"]["b"]]
            + [P["mm_layers"][k] for k in SELF_KEYS + CROSS_KEYS]
            + [P["itm"]["w"], P["itm"]["b"]])
    loss = _pcall(functools.partial(_train_kernel, alpha=float(alpha),
                                    inv_temp=1.0 / TEMP, n_pos=Bb),
                  jax.ShapeDtypeStruct((1, 1), F32), args)         # pallas_call #2
    return loss[0, 0]


def albef_forward(P, image=None, text=None, text_atts=None, idx=None,
                  alpha=0.0, input_type=None, is_train=True):
    if is_train:
        return _train_forward(image, text, text_atts, idx, alpha, P)
    if input_type == "image":
        return _encode_image(image, P)
    if input_type == "text":
        return _encode_text(text, text_atts, P)
    if input_type == "multimodal":
        # multimodal eval takes precomputed image/text embeddings (ALBEF convention).
        return _image_text_matching_score(image, text, text_atts, P)
    raise ValueError("input_type must be image, text, or multimodal")


# ------------------------------- parameter init -------------------------------
def _init_proj(key, din, dout):
    return {"w": (jax.random.normal(key, (din, dout), F32) * 0.02).astype(BF16),
            "b": jnp.zeros((1, dout), F32)}


def _init_layer_stack(key, n_layers, cross=False):
    ks = jax.random.split(key, 12)

    def dense(k, din, dout):
        return (jax.random.normal(k, (n_layers, din, dout), F32) * 0.02).astype(BF16)

    def heads_out(k, din):
        # (layers, din, D) split along output columns -> (layers, H, din, dh)
        w = jax.random.normal(k, (n_layers, din, D), F32) * 0.02
        return w.reshape(n_layers, din, N_HEADS, HEAD_DIM).transpose(0, 2, 1, 3).astype(BF16)

    def heads_in(k):
        # (layers, D, D) split along input rows -> (layers, H, dh, D)
        w = jax.random.normal(k, (n_layers, D, D), F32) * 0.02
        return w.reshape(n_layers, N_HEADS, HEAD_DIM, D).astype(BF16)

    zeros_h = jnp.zeros((n_layers, N_HEADS, 1, HEAD_DIM), F32)
    zeros_d = jnp.zeros((n_layers, 1, D), F32)
    ones_d = jnp.ones((n_layers, 1, D), F32)

    p = {
        "wq": heads_out(ks[0], D), "bq": zeros_h,
        "wk": heads_out(ks[1], D), "bk": zeros_h,
        "wv": heads_out(ks[2], D), "bv": zeros_h,
        "wo": heads_in(ks[3]), "bo": zeros_d,
        "ln1g": ones_d, "ln1b": zeros_d,
        "w1": dense(ks[4], D, MLP), "b1": jnp.zeros((n_layers, 1, MLP), F32),
        "w2": dense(ks[5], MLP, D), "b2": zeros_d,
        "ln2g": ones_d, "ln2b": zeros_d,
    }
    if cross:
        p.update({
            "wxq": heads_out(ks[6], D), "bxq": zeros_h,
            "wxk": heads_out(ks[7], D), "bxk": zeros_h,
            "wxv": heads_out(ks[8], D), "bxv": zeros_h,
            "wxo": heads_in(ks[9]), "bxo": zeros_d,
            "lnxg": ones_d, "lnxb": zeros_d,
        })
    return p


def init_params(key):
    ks = jax.random.split(key, 16)
    P = {}
    pw = jax.random.normal(ks[0], (C * PATCH * PATCH, D), F32) * 0.02
    pb = jnp.zeros((1, D), F32)
    P["patch_w"] = pw.astype(BF16)
    cls = jax.random.normal(ks[1], (1, 1, D), F32) * 0.02
    pos = jax.random.normal(ks[2], (1, S_IMG, D), F32) * 0.02
    # fold CLS token + positional embedding + patch-linear bias into one additive table
    poscls = jnp.zeros((1, S_IMG_PAD, D), F32)
    poscls = poscls.at[:, 0, :].set(cls[:, 0, :] + pos[:, 0, :])
    poscls = poscls.at[:, 1:S_IMG, :].set(pos[:, 1:, :] + pb)
    P["pos_cls"] = poscls
    P["vit_layers"] = _init_layer_stack(ks[3], N_LAYERS)
    P["vit_ln_g"] = jnp.ones((1, D), F32)
    P["vit_ln_b"] = jnp.zeros((1, D), F32)
    P["tok_emb"] = jax.random.normal(ks[5], (VOCAB, D), F32) * 0.02
    P["pos_txt"] = jax.random.normal(ks[6], (1, L, D), F32) * 0.02
    P["txt_layers"] = _init_layer_stack(ks[7], N_LAYERS)
    P["txt_ln_g"] = jnp.ones((1, D), F32)
    P["txt_ln_b"] = jnp.zeros((1, D), F32)
    P["mm_layers"] = _init_layer_stack(ks[9], N_LAYERS, cross=True)
    P["vis_proj"] = _init_proj(ks[11], D, PROJ)
    P["txt_proj"] = _init_proj(ks[12], D, PROJ)
    P["itm"] = _init_proj(ks[13], D, 2)
    return P


# ------------------------------------ main ------------------------------------
if __name__ == "__main__":
    key = jax.random.PRNGKey(0)
    pkey, ikey, tkey = jax.random.split(key, 3)
    params = init_params(pkey)

    image = jax.random.normal(ikey, (B, C, H, W), F32)       # NCHW, like PyTorch
    text = jax.random.randint(tkey, (B, L), 0, VOCAB)
    text_atts = jnp.array([[1] * L, [1] * (L - 2) + [0, 0]], dtype=jnp.int32)
    idx = jnp.arange(B, dtype=jnp.int32)

    # training path: ITC + ITM loss (scalar) — 2 pallas_calls total
    loss = albef_forward(params, image=image, text=text, text_atts=text_atts,
                         idx=idx, alpha=0.0, is_train=True)

    # eval paths — 1 pallas_call each
    img_embed, img_feat = albef_forward(params, image=image,
                                        is_train=False, input_type="image")
    txt_embed, txt_feat = albef_forward(params, text=text, text_atts=text_atts,
                                        is_train=False, input_type="text")
    score = albef_forward(params, image=img_embed, text=txt_embed,
                          text_atts=text_atts, is_train=False,
                          input_type="multimodal")

    jax.block_until_ready((loss, img_embed, img_feat, txt_embed, txt_feat, score))
    print("KERNEL_OK")
</pallas_src>

<mosaic_0001>
module attributes {stable_mosaic.version = 11 : i64} {
  func.func @_vision_kernel(%arg0: memref<2x24x48xf32, #tpu.memory_space<vmem>>, %arg1: memref<1x24x32xf32, #tpu.memory_space<vmem>>, %arg2: memref<48x32xbf16, #tpu.memory_space<vmem>>, %arg3: memref<2x4x32x8xbf16, #tpu.memory_space<vmem>>, %arg4: memref<2x4x1x8xf32, #tpu.memory_space<vmem>>, %arg5: memref<2x4x32x8xbf16, #tpu.memory_space<vmem>>, %arg6: memref<2x4x1x8xf32, #tpu.memory_space<vmem>>, %arg7: memref<2x4x32x8xbf16, #tpu.memory_space<vmem>>, %arg8: memref<2x4x1x8xf32, #tpu.memory_space<vmem>>, %arg9: memref<2x4x8x32xbf16, #tpu.memory_space<vmem>>, %arg10: memref<2x1x32xf32, #tpu.memory_space<vmem>>, %arg11: memref<2x1x32xf32, #tpu.memory_space<vmem>>, %arg12: memref<2x1x32xf32, #tpu.memory_space<vmem>>, %arg13: memref<2x32x64xbf16, #tpu.memory_space<vmem>>, %arg14: memref<2x1x64xf32, #tpu.memory_space<vmem>>, %arg15: memref<2x64x32xbf16, #tpu.memory_space<vmem>>, %arg16: memref<2x1x32xf32, #tpu.memory_space<vmem>>, %arg17: memref<2x1x32xf32, #tpu.memory_space<vmem>>, %arg18: memref<2x1x32xf32, #tpu.memory_space<vmem>>, %arg19: memref<1x32xf32, #tpu.memory_space<vmem>>, %arg20: memref<1x32xf32, #tpu.memory_space<vmem>>, %arg21: memref<32x16xbf16, #tpu.memory_space<vmem>>, %arg22: memref<1x16xf32, #tpu.memory_space<vmem>>, %arg23: memref<2x24x32xf32, #tpu.memory_space<vmem>>, %arg24: memref<2x16xf32, #tpu.memory_space<vmem>>) attributes {dimension_semantics = [], scalar_prefetch = 0 : i64, scratch_operands = 0 : i64, tpu.core_type = #tpu.core_type<tc>} {
    %c0 = arith.constant 0 : index
    %c0_0 = arith.constant 0 : index
    %c0_1 = arith.constant 0 : index
    %0 = vector.load %arg0[%c0, %c0_0, %c0_1] : memref<2x24x48xf32, #tpu.memory_space<vmem>>, vector<2x24x48xf32>
    %1 = vector.shape_cast %0 : vector<2x24x48xf32> to vector<48x48xf32>
    %c0_2 = arith.constant 0 : index
    %c0_3 = arith.constant 0 : index
    %2 = vector.load %arg2[%c0_2, %c0_3] : memref<48x32xbf16, #tpu.memory_space<vmem>>, vector<48x32xbf16>
    %3 = arith.truncf %1 : vector<48x48xf32> to vector<48x48xbf16>
    %cst = arith.constant dense<0.000000e+00> : vector<48x32xf32>
    %4 = tpu.matmul %3, %2, %cst {dimension_numbers = #tpu.dot_dimension_numbers<[1], [0], [0], [1], [0, 0, 1, 1], [], []>} : vector<48x48xbf16>, vector<48x32xbf16>, vector<48x32xf32> -> vector<48x32xf32>
    %5 = vector.shape_cast %4 : vector<48x32xf32> to vector<2x24x32xf32>
    %c0_4 = arith.constant 0 : index
    %c0_5 = arith.constant 0 : index
    %c0_6 = arith.constant 0 : index
    %6 = vector.load %arg1[%c0_4, %c0_5, %c0_6] : memref<1x24x32xf32, #tpu.memory_space<vmem>>, vector<1x24x32xf32>
    %7 = vector.broadcast %6 : vector<1x24x32xf32> to vector<2x24x32xf32>
    %8 = arith.addf %5, %7 : vector<2x24x32xf32>
    %9 = tpu.iota {dimensions = array<i32: 2>} : vector<1x24x24xi32>
    %c17_i32 = arith.constant 17 : i32
    %10 = vector.broadcast %c17_i32 : i32 to vector<1x24x24xi32>
    %11 = arith.cmpi slt, %9, %10 : vector<1x24x24xi32>
    %cst_7 = arith.constant 0.000000e+00 : f32
    %cst_8 = arith.constant -1.000000e+09 : f32
    %12 = vector.broadcast %cst_7 : f32 to vector<1x24x24xf32>
    %13 = vector.broadcast %cst_8 : f32 to vector<1x24x24xf32>
    %14 = arith.select %11, %12, %13 : vector<1x24x24xi1>, vector<1x24x24xf32>
    %15 = vector.shape_cast %14 : vector<1x24x24xf32> to vector<1x24x24xf32>
    %16 = vector.broadcast %15 : vector<1x24x24xf32> to vector<2x24x24xf32>
    %c0_9 = arith.constant 0 : index
    %c0_10 = arith.constant 0 : index
    %c0_11 = arith.constant 0 : index
    %c0_12 = arith.constant 0 : index
    %17 = vector.load %arg3[%c0_9, %c0_10, %c0_11, %c0_12] : memref<2x4x32x8xbf16, #tpu.memory_space<vmem>>, vector<1x4x32x8xbf16>
    %18 = vector.shape_cast %17 : vector<1x4x32x8xbf16> to vector<4x32x8xbf16>
    %c0_13 = arith.constant 0 : index
    %c0_14 = arith.constant 0 : index
    %c0_15 = arith.constant 0 : index
    %c0_16 = arith.constant 0 : index
    %19 = vector.load %arg4[%c0_13, %c0_14, %c0_15, %c0_16] : memref<2x4x1x8xf32, #tpu.memory_space<vmem>>, vector<1x4x1x8xf32>
    %20 = vector.shape_cast %19 : vector<1x4x1x8xf32> to vector<4x1x8xf32>
    %c0_17 = arith.constant 0 : index
    %c0_18 = arith.constant 0 : index
    %c0_19 = arith.constant 0 : index
    %c0_20 = arith.constant 0 : index
    %21 = vector.load %arg5[%c0_17, %c0_18, %c0_19, %c0_20] : memref<2x4x32x8xbf16, #tpu.memory_space<vmem>>, vector<1x4x32x8xbf16>
    %22 = vector.shape_cast %21 : vector<1x4x32x8xbf16> to vector<4x32x8xbf16>
    %c0_21 = arith.constant 0 : index
    %c0_22 = arith.constant 0 : index
    %c0_23 = arith.constant 0 : index
    %c0_24 = arith.constant 0 : index
    %23 = vector.load %arg6[%c0_21, %c0_22, %c0_23, %c0_24] : memref<2x4x1x8xf32, #tpu.memory_space<vmem>>, vector<1x4x1x8xf32>
    %24 = vector.shape_cast %23 : vector<1x4x1x8xf32> to vector<4x1x8xf32>
    %c0_25 = arith.constant 0 : index
    %c0_26 = arith.constant 0 : index
    %c0_27 = arith.constant 0 : index
    %c0_28 = arith.constant 0 : index
    %25 = vector.load %arg7[%c0_25, %c0_26, %c0_27, %c0_28] : memref<2x4x32x8xbf16, #tpu.memory_space<vmem>>, vector<1x4x32x8xbf16>
    %26 = vector.shape_cast %25 : vector<1x4x32x8xbf16> to vector<4x32x8xbf16>
    %c0_29 = arith.constant 0 : index
    %c0_30 = arith.constant 0 : index
    %c0_31 = arith.constant 0 : index
    %c0_32 = arith.constant 0 : index
    %27 = vector.load %arg8[%c0_29, %c0_30, %c0_31, %c0_32] : memref<2x4x1x8xf32, #tpu.memory_space<vmem>>, vector<1x4x1x8xf32>
    %28 = vector.shape_cast %27 : vector<1x4x1x8xf32> to vector<4x1x8xf32>
    %c0_33 = arith.constant 0 : index
    %c0_34 = arith.constant 0 : index
    %c0_35 = arith.constant 0 : index
    %c0_36 = arith.constant 0 : index
    %29 = vector.load %arg9[%c0_33, %c0_34, %c0_35, %c0_36] : memref<2x4x8x32xbf16, #tpu.memory_space<vmem>>, vector<1x4x8x32xbf16>
    %30 = vector.shape_cast %29 : vector<1x4x8x32xbf16> to vector<4x8x32xbf16>
    %c0_37 = arith.constant 0 : index
    %c0_38 = arith.constant 0 : index
    %c0_39 = arith.constant 0 : index
    %31 = vector.load %arg10[%c0_37, %c0_38, %c0_39] : memref<2x1x32xf32, #tpu.memory_space<vmem>>, vector<1x1x32xf32>
    %32 = vector.shape_cast %31 : vector<1x1x32xf32> to vector<1x32xf32>
    %c0_40 = arith.constant 0 : index
    %c0_41 = arith.constant 0 : index
    %c0_42 = arith.constant 0 : index
    %33 = vector.load %arg11[%c0_40, %c0_41, %c0_42] : memref<2x1x32xf32, #tpu.memory_space<vmem>>, vector<1x1x32xf32>
    %34 = vector.shape_cast %33 : vector<1x1x32xf32> to vector<1x32xf32>
    %c0_43 = arith.constant 0 : index
    %c0_44 = arith.constant 0 : index
    %c0_45 = arith.constant 0 : index
    %35 = vector.load %arg12[%c0_43, %c0_44, %c0_45] : memref<2x1x32xf32, #tpu.memory_space<vmem>>, vector<1x1x32xf32>
    %36 = vector.shape_cast %35 : vector<1x1x32xf32> to vector<1x32xf32>
    %c0_46 = arith.constant 0 : index
    %c0_47 = arith.constant 0 : index
    %c0_48 = arith.constant 0 : index
    %37 = vector.load %arg13[%c0_46, %c0_47, %c0_48] : memref<2x32x64xbf16, #tpu.memory_space<vmem>>, vector<1x32x64xbf16>
    %38 = vector.shape_cast %37 : vector<1x32x64xbf16> to vector<32x64xbf16>
    %c0_49 = arith.constant 0 : index
    %c0_50 = arith.constant 0 : index
    %c0_51 = arith.constant 0 : index
    %39 = vector.load %arg14[%c0_49, %c0_50, %c0_51] : memref<2x1x64xf32, #tpu.memory_space<vmem>>, vector<1x1x64xf32>
    %40 = vector.shape_cast %39 : vector<1x1x64xf32> to vector<1x64xf32>
    %c0_52 = arith.constant 0 : index
    %c0_53 = arith.constant 0 : index
    %c0_54 = arith.constant 0 : index
    %41 = vector.load %arg15[%c0_52, %c0_53, %c0_54] : memref<2x64x32xbf16, #tpu.memory_space<vmem>>, vector<1x64x32xbf16>
    %42 = vector.shape_cast %41 : vector<1x64x32xbf16> to vector<64x32xbf16>
    %c0_55 = arith.constant 0 : index
    %c0_56 = arith.constant 0 : index
    %c0_57 = arith.constant 0 : index
    %43 = vector.load %arg16[%c0_55, %c0_56, %c0_57] : memref<2x1x32xf32, #tpu.memory_space<vmem>>, vector<1x1x32xf32>
    %44 = vector.shape_cast %43 : vector<1x1x32xf32> to vector<1x32xf32>
    %c0_58 = arith.constant 0 : index
    %c0_59 = arith.constant 0 : index
    %c0_60 = arith.constant 0 : index
    %45 = vector.load %arg17[%c0_58, %c0_59, %c0_60] : memref<2x1x32xf32, #tpu.memory_space<vmem>>, vector<1x1x32xf32>
    %46 = vector.shape_cast %45 : vector<1x1x32xf32> to vector<1x32xf32>
    %c0_61 = arith.constant 0 : index
    %c0_62 = arith.constant 0 : index
    %c0_63 = arith.constant 0 : index
    %47 = vector.load %arg18[%c0_61, %c0_62, %c0_63] : memref<2x1x32xf32, #tpu.memory_space<vmem>>, vector<1x1x32xf32>
    %48 = vector.shape_cast %47 : vector<1x1x32xf32> to vector<1x32xf32>
    %49 = vector.shape_cast %8 : vector<2x24x32xf32> to vector<48x32xf32>
    %50 = vector.shape_cast %8 : vector<2x24x32xf32> to vector<48x32xf32>
    %51 = vector.extract_strided_slice %18 {offsets = [0, 0, 0], sizes = [1, 32, 8], strides = [1, 1, 1]} : vector<4x32x8xbf16> to vector<1x32x8xbf16>
    %52 = vector.shape_cast %51 : vector<1x32x8xbf16> to vector<32x8xbf16>
    %53 = arith.truncf %49 : vector<48x32xf32> to vector<48x32xbf16>
    %cst_64 = arith.constant dense<0.000000e+00> : vector<48x8xf32>
    %54 = tpu.matmul %53, %52, %cst_64 {dimension_numbers = #tpu.dot_dimension_numbers<[1], [0], [0], [1], [0, 0, 1, 1], [], []>} : vector<48x32xbf16>, vector<32x8xbf16>, vector<48x8xf32> -> vector<48x8xf32>
    %55 = vector.extract_strided_slice %20 {offsets = [0, 0, 0], sizes = [1, 1, 8], strides = [1, 1, 1]} : vector<4x1x8xf32> to vector<1x1x8xf32>
    %56 = vector.shape_cast %55 : vector<1x1x8xf32> to vector<1x8xf32>
    %57 = vector.broadcast %56 : vector<1x8xf32> to vector<48x8xf32>
    %58 = arith.addf %54, %57 : vector<48x8xf32>
    %59 = vector.shape_cast %58 : vector<48x8xf32> to vector<2x24x8xf32>
    %60 = vector.extract_strided_slice %22 {offsets = [0, 0, 0], sizes = [1, 32, 8], strides = [1, 1, 1]} : vector<4x32x8xbf16> to vector<1x32x8xbf16>
    %61 = vector.shape_cast %60 : vector<1x32x8xbf16> to vector<32x8xbf16>
    %62 = arith.truncf %50 : vector<48x32xf32> to vector<48x32xbf16>
    %cst_65 = arith.constant dense<0.000000e+00> : vector<48x8xf32>
    %63 = tpu.matmul %62, %61, %cst_65 {dimension_numbers = #tpu.dot_dimension_numbers<[1], [0], [0], [1], [0, 0, 1, 1], [], []>} : vector<48x32xbf16>, vector<32x8xbf16>, vector<48x8xf32> -> vector<48x8xf32>
    %64 = vector.extract_strided_slice %24 {offsets = [0, 0, 0], sizes = [1, 1, 8], strides = [1, 1, 1]} : vector<4x1x8xf32> to vector<1x1x8xf32>
    %65 = vector.shape_cast %64 : vector<1x1x8xf32> to vector<1x8xf32>
    %66 = vector.broadcast %65 : vector<1x8xf32> to vector<48x8xf32>
    %67 = arith.addf %63, %66 : vector<48x8xf32>
    %68 = vector.shape_cast %67 : vector<48x8xf32> to vector<2x24x8xf32>
    %69 = vector.extract_strided_slice %26 {offsets = [0, 0, 0], sizes = [1, 32, 8], strides = [1, 1, 1]} : vector<4x32x8xbf16> to vector<1x32x8xbf16>
    %70 = vector.shape_cast %69 : vector<1x32x8xbf16> to vector<32x8xbf16>
    %71 = arith.truncf %50 : vector<48x32xf32> to vector<48x32xbf16>
    %cst_66 = arith.constant dense<0.000000e+00> : vector<48x8xf32>
    %72 = tpu.matmul %71, %70, %cst_66 {dimension_numbers = #tpu.dot_dimension_numbers<[1], [0], [0], [1], [0, 0, 1, 1], [], []>} : vector<48x32xbf16>, vector<32x8xbf16>, vector<48x8xf32> -> vector<48x8xf32>
    %73 = vector.extract_strided_slice %28 {offsets = [0, 0, 0], sizes = [1, 1, 8], strides = [1, 1, 1]} : vector<4x1x8xf32> to vector<1x1x8xf32>
    %74 = vector.shape_cast %73 : vector<1x1x8xf32> to vector<1x8xf32>
    %75 = vector.broadcast %74 : vector<1x8xf32> to vector<48x8xf32>
    %76 = arith.addf %72, %75 : vector<48x8xf32>
    %77 = vector.shape_cast %76 : vector<48x8xf32> to vector<2x24x8xf32>
    %78 = arith.truncf %59 : vector<2x24x8xf32> to vector<2x24x8xbf16>
    %79 = arith.truncf %68 : vector<2x24x8xf32> to vector<2x24x8xbf16>
    "tpu.trace_start"() <{level = 10 : i32, message = "bqd,bkd->bqk"}> : () -> ()
    %cst_67 = arith.constant dense<0.000000e+00> : vector<2x24x24xf32>
    %80 = tpu.matmul %78, %79, %cst_67 {dimension_numbers = #tpu.dot_dimension_numbers<[2], [2], [1], [1], [0, 0, 0, 1, 1, 1], [0], [0]>} : vector<2x24x8xbf16>, vector<2x24x8xbf16>, vector<2x24x24xf32> -> vector<2x24x24xf32>
    "tpu.trace_stop"() : () -> ()
    %cst_68 = arith.constant 0.353553385 : f32
    %81 = vector.broadcast %cst_68 : f32 to vector<2x24x24xf32>
    %82 = arith.mulf %80, %81 : vector<2x24x24xf32>
    %83 = arith.addf %82, %16 : vector<2x24x24xf32>
    %cst_69 = arith.constant dense<0xFF800000> : vector<2x24xf32>
    %84 = vector.multi_reduction <maximumf>, %83, %cst_69 [2] : vector<2x24x24xf32> to vector<2x24xf32>
    %85 = vector.shape_cast %84 : vector<2x24xf32> to vector<2x24x1xf32>
    %86 = vector.broadcast %85 : vector<2x24x1xf32> to vector<2x24x24xf32>
    %87 = arith.subf %83, %86 : vector<2x24x24xf32>
    %88 = math.exp %87 : vector<2x24x24xf32>
    %cst_70 = arith.constant dense<0.000000e+00> : vector<2x24xf32>
    %89 = vector.multi_reduction <add>, %88, %cst_70 [2] : vector<2x24x24xf32> to vector<2x24xf32>
    %90 = vector.shape_cast %89 : vector<2x24xf32> to vector<2x24x1xf32>
    %91 = vector.broadcast %90 : vector<2x24x1xf32> to vector<2x24x24xf32>
    %92 = arith.divf %88, %91 : vector<2x24x24xf32>
    %93 = arith.truncf %92 : vector<2x24x24xf32> to vector<2x24x24xbf16>
    %94 = arith.truncf %77 : vector<2x24x8xf32> to vector<2x24x8xbf16>
    "tpu.trace_start"() <{level = 10 : i32, message = "bqk,bkd->bqd"}> : () -> ()
    %cst_71 = arith.constant dense<0.000000e+00> : vector<2x24x8xf32>
    %95 = tpu.matmul %93, %94, %cst_71 {dimension_numbers = #tpu.dot_dimension_numbers<[2], [1], [1], [2], [0, 0, 0, 1, 1, 2], [0], [0]>} : vector<2x24x24xbf16>, vector<2x24x8xbf16>, vector<2x24x8xf32> -> vector<2x24x8xf32>
    "tpu.trace_stop"() : () -> ()
    %96 = vector.shape_cast %95 : vector<2x24x8xf32> to vector<48x8xf32>
    %97 = vector.extract_strided_slice %30 {offsets = [0, 0, 0], sizes = [1, 8, 32], strides = [1, 1, 1]} : vector<4x8x32xbf16> to vector<1x8x32xbf16>
    %98 = vector.shape_cast %97 : vector<1x8x32xbf16> to vector<8x32xbf16>
    %99 = arith.truncf %96 : vector<48x8xf32> to vector<48x8xbf16>
    %cst_72 = arith.constant dense<0.000000e+00> : vector<48x32xf32>
    %100 = tpu.matmul %99, %98, %cst_72 {dimension_numbers = #tpu.dot_dimension_numbers<[1], [0], [0], [1], [0, 0, 1, 1], [], []>} : vector<48x8xbf16>, vector<8x32xbf16>, vector<48x32xf32> -> vector<48x32xf32>
    %101 = vector.extract_strided_slice %18 {offsets = [1, 0, 0], sizes = [1, 32, 8], strides = [1, 1, 1]} : vector<4x32x8xbf16> to vector<1x32x8xbf16>
    %102 = vector.shape_cast %101 : vector<1x32x8xbf16> to vector<32x8xbf16>
    %103 = arith.truncf %49 : vector<48x32xf32> to vector<48x32xbf16>
    %cst_73 = arith.constant dense<0.000000e+00> : vector<48x8xf32>
    %104 = tpu.matmul %103, %102, %cst_73 {dimension_numbers = #tpu.dot_dimension_numbers<[1], [0], [0], [1], [0, 0, 1, 1], [], []>} : vector<48x32xbf16>, vector<32x8xbf16>, vector<48x8xf32> -> vector<48x8xf32>
    %105 = vector.extract_strided_slice %20 {offsets = [1, 0, 0], sizes = [1, 1, 8], strides = [1, 1, 1]} : vector<4x1x8xf32> to vector<1x1x8xf32>
    %106 = vector.shape_cast %105 : vector<1x1x8xf32> to vector<1x8xf32>
    %107 = vector.broadcast %106 : vector<1x8xf32> to vector<48x8xf32>
    %108 = arith.addf %104, %107 : vector<48x8xf32>
    %109 = vector.shape_cast %108 : vector<48x8xf32> to vector<2x24x8xf32>
    %110 = vector.extract_strided_slice %22 {offsets = [1, 0, 0], sizes = [1, 32, 8], strides = [1, 1, 1]} : vector<4x32x8xbf16> to vector<1x32x8xbf16>
    %111 = vector.shape_cast %110 : vector<1x32x8xbf16> to vector<32x8xbf16>
    %112 = arith.truncf %50 : vector<48x32xf32> to vector<48x32xbf16>
    %cst_74 = arith.constant dense<0.000000e+00> : vector<48x8xf32>
    %113 = tpu.matmul %112, %111, %cst_74 {dimension_numbers = #tpu.dot_dimension_numbers<[1], [0], [0], [1], [0, 0, 1, 1], [], []>} : vector<48x32xbf16>, vector<32x8xbf16>, vector<48x8xf32> -> vector<48x8xf32>
    %114 = vector.extract_strided_slice %24 {offsets = [1, 0, 0], sizes = [1, 1, 8], strides = [1, 1, 1]} : vector<4x1x8xf32> to vector<1x1x8xf32>
    %115 = vector.shape_cast %114 : vector<1x1x8xf32> to vector<1x8xf32>
    %116 = vector.broadcast %115 : vector<1x8xf32> to vector<48x8xf32>
    %117 = arith.addf %113, %116 : vector<48x8xf32>
    %118 = vector.shape_cast %117 : vector<48x8xf32> to vector<2x24x8xf32>
    %119 = vector.extract_strided_slice %26 {offsets = [1, 0, 0], sizes = [1, 32, 8], strides = [1, 1, 1]} : vector<4x32x8xbf16> to vector<1x32x8xbf16>
    %120 = vector.shape_cast %119 : vector<1x32x8xbf16> to vector<32x8xbf16>
    %121 = arith.truncf %50 : vector<48x32xf32> to vector<48x32xbf16>
    %cst_75 = arith.constant dense<0.000000e+00> : vector<48x8xf32>
    %122 = tpu.matmul %121, %120, %cst_75 {dimension_numbers = #tpu.dot_dimension_numbers<[1], [0], [0], [1], [0, 0, 1, 1], [], []>} : vector<48x32xbf16>, vector<32x8xbf16>, vector<48x8xf32> -> vector<48x8xf32>
    %123 = vector.extract_strided_slice %28 {offsets = [1, 0, 0], sizes = [1, 1, 8], strides = [1, 1, 1]} : vector<4x1x8xf32> to vector<1x1x8xf32>
    %124 = vector.shape_cast %123 : vector<1x1x8xf32> to vector<1x8xf32>
    %125 = vector.broadcast %124 : vector<1x8xf32> to vector<48x8xf32>
    %126 = arith.addf %122, %125 : vector<48x8xf32>
    %127 = vector.shape_cast %126 : vector<48x8xf32> to vector<2x24x8xf32>
    %128 = arith.truncf %109 : vector<2x24x8xf32> to vector<2x24x8xbf16>
    %129 = arith.truncf %118 : vector<2x24x8xf32> to vector<2x24x8xbf16>
    "tpu.trace_start"() <{level = 10 : i32, message = "bqd,bkd->bqk"}> : () -> ()
    %cst_76 = arith.constant dense<0.000000e+00> : vector<2x24x24xf32>
    %130 = tpu.matmul %128, %129, %cst_76 {dimension_numbers = #tpu.dot_dimension_numbers<[2], [2], [1], [1], [0, 0, 0, 1, 1, 1], [0], [0]>} : vector<2x24x8xbf16>, vector<2x24x8xbf16>, vector<2x24x24xf32> -> vector<2x24x24xf32>
    "tpu.trace_stop"() : () -> ()
    %cst_77 = arith.constant 0.353553385 : f32
    %131 = vector.broadcast %cst_77 : f32 to vector<2x24x24xf32>
    %132 = arith.mulf %130, %131 : vector<2x24x24xf32>
    %133 = arith.addf %132, %16 : vector<2x24x24xf32>
    %cst_78 = arith.constant dense<0xFF800000> : vector<2x24xf32>
    %134 = vector.multi_reduction <maximumf>, %133, %cst_78 [2] : vector<2x24x24xf32> to vector<2x24xf32>
    %135 = vector.shape_cast %134 : vector<2x24xf32> to vector<2x24x1xf32>
    %136 = vector.broadcast %135 : vector<2x24x1xf32> to vector<2x24x24xf32>
    %137 = arith.subf %133, %136 : vector<2x24x24xf32>
    %138 = math.exp %137 : vector<2x24x24xf32>
    %cst_79 = arith.constant dense<0.000000e+00> : vector<2x24xf32>
    %139 = vector.multi_reduction <add>, %138, %cst_79 [2] : vector<2x24x24xf32> to vector<2x24xf32>
    %140 = vector.shape_cast %139 : vector<2x24xf32> to vector<2x24x1xf32>
    %141 = vector.broadcast %140 : vector<2x24x1xf32> to vector<2x24x24xf32>
    %142 = arith.divf %138, %141 : vector<2x24x24xf32>
    %143 = arith.truncf %142 : vector<2x24x24xf32> to vector<2x24x24xbf16>
    %144 = arith.truncf %127 : vector<2x24x8xf32> to vector<2x24x8xbf16>
    "tpu.trace_start"() <{level = 10 : i32, message = "bqk,bkd->bqd"}> : () -> ()
    %cst_80 = arith.constant dense<0.000000e+00> : vector<2x24x8xf32>
    %145 = tpu.matmul %143, %144, %cst_80 {dimension_numbers = #tpu.dot_dimension_numbers<[2], [1], [1], [2], [0, 0, 0, 1, 1, 2], [0], [0]>} : vector<2x24x24xbf16>, vector<2x24x8xbf16>, vector<2x24x8xf32> -> vector<2x24x8xf32>
    "tpu.trace_stop"() : () -> ()
    %146 = vector.shape_cast %145 : vector<2x24x8xf32> to vector<48x8xf32>
    %147 = vector.extract_strided_slice %30 {offsets = [1, 0, 0], sizes = [1, 8, 32], strides = [1, 1, 1]} : vector<4x8x32xbf16> to vector<1x8x32xbf16>
    %148 = vector.shape_cast %147 : vector<1x8x32xbf16> to vector<8x32xbf16>
    %149 = arith.truncf %146 : vector<48x8xf32> to vector<48x8xbf16>
    %cst_81 = arith.constant dense<0.000000e+00> : vector<48x32xf32>
    %150 = tpu.matmul %149, %148, %cst_81 {dimension_numbers = #tpu.dot_dimension_numbers<[1], [0], [0], [1], [0, 0, 1, 1], [], []>} : vector<48x8xbf16>, vector<8x32xbf16>, vector<48x32xf32> -> vector<48x32xf32>
    %151 = arith.addf %100, %150 : vector<48x32xf32>
    %152 = vector.extract_strided_slice %18 {offsets = [2, 0, 0], sizes = [1, 32, 8], strides = [1, 1, 1]} : vector<4x32x8xbf16> to vector<1x32x8xbf16>
    %153 = vector.shape_cast %152 : vector<1x32x8xbf16> to vector<32x8xbf16>
    %154 = arith.truncf %49 : vector<48x32xf32> to vector<48x32xbf16>
    %cst_82 = arith.constant dense<0.000000e+00> : vector<48x8xf32>
    %155 = tpu.matmul %154, %153, %cst_82 {dimension_numbers = #tpu.dot_dimension_numbers<[1], [0], [0], [1], [0, 0, 1, 1], [], []>} : vector<48x32xbf16>, vector<32x8xbf16>, vector<48x8xf32> -> vector<48x8xf32>
    %156 = vector.extract_strided_slice %20 {offsets = [2, 0, 0], sizes = [1, 1, 8], strides = [1, 1, 1]} : vector<4x1x8xf32> to vector<1x1x8xf32>
    %157 = vector.shape_cast %156 : vector<1x1x8xf32> to vector<1x8xf32>
    %158 = vector.broadcast %157 : vector<1x8xf32> to vector<48x8xf32>
    %159 = arith.addf %155, %158 : vector<48x8xf32>
    %160 = vector.shape_cast %159 : vector<48x8xf32> to vector<2x24x8xf32>
    %161 = vector.extract_strided_slice %22 {offsets = [2, 0, 0], sizes = [1, 32, 8], strides = [1, 1, 1]} : vector<4x32x8xbf16> to vector<1x32x8xbf16>
    %162 = vector.shape_cast %161 : vector<1x32x8xbf16> to vector<32x8xbf16>
    %163 = arith.truncf %50 : vector<48x32xf32> to vector<48x32xbf16>
    %cst_83 = arith.constant dense<0.000000e+00> : vector<48x8xf32>
    %164 = tpu.matmul %163, %162, %cst_83 {dimension_numbers = #tpu.dot_dimension_numbers<[1], [0], [0], [1], [0, 0, 1, 1], [], []>} : vector<48x32xbf16>, vector<32x8xbf16>, vector<48x8xf32> -> vector<48x8xf32>
    %165 = vector.extract_strided_slice %24 {offsets = [2, 0, 0], sizes = [1, 1, 8], strides = [1, 1, 1]} : vector<4x1x8xf32> to vector<1x1x8xf32>
    %166 = vector.shape_cast %165 : vector<1x1x8xf32> to vector<1x8xf32>
    %167 = vector.broadcast %166 : vector<1x8xf32> to vector<48x8xf32>
    %168 = arith.addf %164, %167 : vector<48x8xf32>
    %169 = vector.shape_cast %168 : vector<48x8xf32> to vector<2x24x8xf32>
    %170 = vector.extract_strided_slice %26 {offsets = [2, 0, 0], sizes = [1, 32, 8], strides = [1, 1, 1]} : vector<4x32x8xbf16> to vector<1x32x8xbf16>
    %171 = vector.shape_cast %170 : vector<1x32x8xbf16> to vector<32x8xbf16>
    %172 = arith.truncf %50 : vector<48x32xf32> to vector<48x32xbf16>
    %cst_84 = arith.constant dense<0.000000e+00> : vector<48x8xf32>
    %173 = tpu.matmul %172, %171, %cst_84 {dimension_numbers = #tpu.dot_dimension_numbers<[1], [0], [0], [1], [0, 0, 1, 1], [], []>} : vector<48x32xbf16>, vector<32x8xbf16>, vector<48x8xf32> -> vector<48x8xf32>
    %174 = vector.extract_strided_slice %28 {offsets = [2, 0, 0], sizes = [1, 1, 8], strides = [1, 1, 1]} : vector<4x1x8xf32> to vector<1x1x8xf32>
    %175 = vector.shape_cast %174 : vector<1x1x8xf32> to vector<1x8xf32>
    %176 = vector.broadcast %175 : vector<1x8xf32> to vector<48x8xf32>
    %177 = arith.addf %173, %176 : vector<48x8xf32>
    %178 = vector.shape_cast %177 : vector<48x8xf32> to vector<2x24x8xf32>
    %179 = arith.truncf %160 : vector<2x24x8xf32> to vector<2x24x8xbf16>
    %180 = arith.truncf %169 : vector<2x24x8xf32> to vector<2x24x8xbf16>
    "tpu.trace_start"() <{level = 10 : i32, message = "bqd,bkd->bqk"}> : () -> ()
    %cst_85 = arith.constant dense<0.000000e+00> : vector<2x24x24xf32>
    %181 = tpu.matmul %179, %180, %cst_85 {dimension_numbers = #tpu.dot_dimension_numbers<[2], [2], [1], [1], [0, 0, 0, 1, 1, 1], [0], [0]>} : vector<2x24x8xbf16>, vector<2x24x8xbf16>, vector<2x24x24xf32> -> vector<2x24x24xf32>
    "tpu.trace_stop"() : () -> ()
    %cst_86 = arith.constant 0.353553385 : f32
    %182 = vector.broadcast %cst_86 : f32 to vector<2x24x24xf32>
    %183 = arith.mulf %181, %182 : vector<2x24x24xf32>
    %184 = arith.addf %183, %16 : vector<2x24x24xf32>
    %cst_87 = arith.constant dense<0xFF800000> : vector<2x24xf32>
    %185 = vector.multi_reduction <maximumf>, %184, %cst_87 [2] : vector<2x24x24xf32> to vector<2x24xf32>
    %186 = vector.shape_cast %185 : vector<2x24xf32> to vector<2x24x1xf32>
    %187 = vector.broadcast %186 : vector<2x24x1xf32> to vector<2x24x24xf32>
    %188 = arith.subf %184, %187 : vector<2x24x24xf32>
    %189 = math.exp %188 : vector<2x24x24xf32>
    %cst_88 = arith.constant dense<0.000000e+00> : vector<2x24xf32>
    %190 = vector.multi_reduction <add>, %189, %cst_88 [2] : vector<2x24x24xf32> to vector<2x24xf32>
    %191 = vector.shape_cast %190 : vector<2x24xf32> to vector<2x24x1xf32>
    %192 = vector.broadcast %191 : vector<2x24x1xf32> to vector<2x24x24xf32>
    %193 = arith.divf %189, %192 : vector<2x24x24xf32>
    %194 = arith.truncf %193 : vector<2x24x24xf32> to vector<2x24x24xbf16>
    %195 = arith.truncf %178 : vector<2x24x8xf32> to vector<2x24x8xbf16>
    "tpu.trace_start"() <{level = 10 : i32, message = "bqk,bkd->bqd"}> : () -> ()
    %cst_89 = arith.constant dense<0.000000e+00> : vector<2x24x8xf32>
    %196 = tpu.matmul %194, %195, %cst_89 {dimension_numbers = #tpu.dot_dimension_numbers<[2], [1], [1], [2], [0, 0, 0, 1, 1, 2], [0], [0]>} : vector<2x24x24xbf16>, vector<2x24x8xbf16>, vector<2x24x8xf32> -> vector<2x24x8xf32>
    "tpu.trace_stop"() : () -> ()
    %197 = vector.shape_cast %196 : vector<2x24x8xf32> to vector<48x8xf32>
    %198 = vector.extract_strided_slice %30 {offsets = [2, 0, 0], sizes = [1, 8, 32], strides = [1, 1, 1]} : vector<4x8x32xbf16> to vector<1x8x32xbf16>
    %199 = vector.shape_cast %198 : vector<1x8x32xbf16> to vector<8x32xbf16>
    %200 = arith.truncf %197 : vector<48x8xf32> to vector<48x8xbf16>
    %cst_90 = arith.constant dense<0.000000e+00> : vector<48x32xf32>
    %201 = tpu.matmul %200, %199, %cst_90 {dimension_numbers = #tpu.dot_dimension_numbers<[1], [0], [0], [1], [0, 0, 1, 1], [], []>} : vector<48x8xbf16>, vector<8x32xbf16>, vector<48x32xf32> -> vector<48x32xf32>
    %202 = arith.addf %151, %201 : vector<48x32xf32>
    %203 = vector.extract_strided_slice %18 {offsets = [3, 0, 0], sizes = [1, 32, 8], strides = [1, 1, 1]} : vector<4x32x8xbf16> to vector<1x32x8xbf16>
    %204 = vector.shape_cast %203 : vector<1x32x8xbf16> to vector<32x8xbf16>
    %205 = arith.truncf %49 : vector<48x32xf32> to vector<48x32xbf16>
    %cst_91 = arith.constant dense<0.000000e+00> : vector<48x8xf32>
    %206 = tpu.matmul %205, %204, %cst_91 {dimension_numbers = #tpu.dot_dimension_numbers<[1], [0], [0], [1], [0, 0, 1, 1], [], []>} : vector<48x32xbf16>, vector<32x8xbf16>, vector<48x8xf32> -> vector<48x8xf32>
    %207 = vector.extract_strided_slice %20 {offsets = [3, 0, 0], sizes = [1, 1, 8], strides = [1, 1, 1]} : vector<4x1x8xf32> to vector<1x1x8xf32>
    %208 = vector.shape_cast %207 : vector<1x1x8xf32> to vector<1x8xf32>
    %209 = vector.broadcast %208 : vector<1x8xf32> to vector<48x8xf32>
    %210 = arith.addf %206, %209 : vector<48x8xf32>
    %211 = vector.shape_cast %210 : vector<48x8xf32> to vector<2x24x8xf32>
    %212 = vector.extract_strided_slice %22 {offsets = [3, 0, 0], sizes = [1, 32, 8], strides = [1, 1, 1]} : vector<4x32x8xbf16> to vector<1x32x8xbf16>
    %213 = vector.shape_cast %212 : vector<1x32x8xbf16> to vector<32x8xbf16>
    %214 = arith.truncf %50 : vector<48x32xf32> to vector<48x32xbf16>
    %cst_92 = arith.constant dense<0.000000e+00> : vector<48x8xf32>
    %215 = tpu.matmul %214, %213, %cst_92 {dimension_numbers = #tpu.dot_dimension_numbers<[1], [0], [0], [1], [0, 0, 1, 1], [], []>} : vector<48x32xbf16>, vector<32x8xbf16>, vector<48x8xf32> -> vector<48x8xf32>
    %216 = vector.extract_strided_slice %24 {offsets = [3, 0, 0], sizes = [1, 1, 8], strides = [1, 1, 1]} : vector<4x1x8xf32> to vector<1x1x8xf32>
    %217 = vector.shape_cast %216 : vector<1x1x8xf32> to vector<1x8xf32>
    %218 = vector.broadcast %217 : vector<1x8xf32> to vector<48x8xf32>
    %219 = arith.addf %215, %218 : vector<48x8xf32>
    %220 = vector.shape_cast %219 : vector<48x8xf32> to vector<2x24x8xf32>
    %221 = vector.extract_strided_slice %26 {offsets = [3, 0, 0], sizes = [1, 32, 8], strides = [1, 1, 1]} : vector<4x32x8xbf16> to vector<1x32x8xbf16>
    %222 = vector.shape_cast %221 : vector<1x32x8xbf16> to vector<32x8xbf16>
    %223 = arith.truncf %50 : vector<48x32xf32> to vector<48x32xbf16>
    %cst_93 = arith.constant dense<0.000000e+00> : vector<48x8xf32>
    %224 = tpu.matmul %223, %222, %cst_93 {dimension_numbers = #tpu.dot_dimension_numbers<[1], [0], [0], [1], [0, 0, 1, 1], [], []>} : vector<48x32xbf16>, vector<32x8xbf16>, vector<48x8xf32> -> vector<48x8xf32>
    %225 = vector.extract_strided_slice %28 {offsets = [3, 0, 0], sizes = [1, 1, 8], strides = [1, 1, 1]} : vector<4x1x8xf32> to vector<1x1x8xf32>
    %226 = vector.shape_cast %225 : vector<1x1x8xf32> to vector<1x8xf32>
    %227 = vector.broadcast %226 : vector<1x8xf32> to vector<48x8xf32>
    %228 = arith.addf %224, %227 : vector<48x8xf32>
    %229 = vector.shape_cast %228 : vector<48x8xf32> to vector<2x24x8xf32>
    %230 = arith.truncf %211 : vector<2x24x8xf32> to vector<2x24x8xbf16>
    %231 = arith.truncf %220 : vector<2x24x8xf32> to vector<2x24x8xbf16>
    "tpu.trace_start"() <{level = 10 : i32, message = "bqd,bkd->bqk"}> : () -> ()
    %cst_94 = arith.constant dense<0.000000e+00> : vector<2x24x24xf32>
    %232 = tpu.matmul %230, %231, %cst_94 {dimension_numbers = #tpu.dot_dimension_numbers<[2], [2], [1], [1], [0, 0, 0, 1, 1, 1], [0], [0]>} : vector<2x24x8xbf16>, vector<2x24x8xbf16>, vector<2x24x24xf32> -> vector<2x24x24xf32>
    "tpu.trace_stop"() : () -> ()
    %cst_95 = arith.constant 0.353553385 : f32
    %233 = vector.broadcast %cst_95 : f32 to vector<2x24x24xf32>
    %234 = arith.mulf %232, %233 : vector<2x24x24xf32>
    %235 = arith.addf %234, %16 : vector<2x24x24xf32>
    %cst_96 = arith.constant dense<0xFF800000> : vector<2x24xf32>
    %236 = vector.multi_reduction <maximumf>, %235, %cst_96 [2] : vector<2x24x24xf32> to vector<2x24xf32>
    %237 = vector.shape_cast %236 : vector<2x24xf32> to vector<2x24x1xf32>
    %238 = vector.broadcast %237 : vector<2x24x1xf32> to vector<2x24x24xf32>
    %239 = arith.subf %235, %238 : vector<2x24x24xf32>
    %240 = math.exp %239 : vector<2x24x24xf32>
    %cst_97 = arith.constant dense<0.000000e+00> : vector<2x24xf32>
    %241 = vector.multi_reduction <add>, %240, %cst_97 [2] : vector<2x24x24xf32> to vector<2x24xf32>
    %242 = vector.shape_cast %241 : vector<2x24xf32> to vector<2x24x1xf32>
    %243 = vector.broadcast %242 : vector<2x24x1xf32> to vector<2x24x24xf32>
    %244 = arith.divf %240, %243 : vector<2x24x24xf32>
    %245 = arith.truncf %244 : vector<2x24x24xf32> to vector<2x24x24xbf16>
    %246 = arith.truncf %229 : vector<2x24x8xf32> to vector<2x24x8xbf16>
    "tpu.trace_start"() <{level = 10 : i32, message = "bqk,bkd->bqd"}> : () -> ()
    %cst_98 = arith.constant dense<0.000000e+00> : vector<2x24x8xf32>
    %247 = tpu.matmul %245, %246, %cst_98 {dimension_numbers = #tpu.dot_dimension_numbers<[2], [1], [1], [2], [0, 0, 0, 1, 1, 2], [0], [0]>} : vector<2x24x24xbf16>, vector<2x24x8xbf16>, vector<2x24x8xf32> -> vector<2x24x8xf32>
    "tpu.trace_stop"() : () -> ()
    %248 = vector.shape_cast %247 : vector<2x24x8xf32> to vector<48x8xf32>
    %249 = vector.extract_strided_slice %30 {offsets = [3, 0, 0], sizes = [1, 8, 32], strides = [1, 1, 1]} : vector<4x8x32xbf16> to vector<1x8x32xbf16>
    %250 = vector.shape_cast %249 : vector<1x8x32xbf16> to vector<8x32xbf16>
    %251 = arith.truncf %248 : vector<48x8xf32> to vector<48x8xbf16>
    %cst_99 = arith.constant dense<0.000000e+00> : vector<48x32xf32>
    %252 = tpu.matmul %251, %250, %cst_99 {dimension_numbers = #tpu.dot_dimension_numbers<[1], [0], [0], [1], [0, 0, 1, 1], [], []>} : vector<48x8xbf16>, vector<8x32xbf16>, vector<48x32xf32> -> vector<48x32xf32>
    %253 = arith.addf %202, %252 : vector<48x32xf32>
    %254 = vector.broadcast %32 : vector<1x32xf32> to vector<48x32xf32>
    %255 = arith.addf %253, %254 : vector<48x32xf32>
    %256 = vector.shape_cast %255 : vector<48x32xf32> to vector<2x24x32xf32>
    %257 = arith.addf %8, %256 : vector<2x24x32xf32>
    %cst_100 = arith.constant dense<0.000000e+00> : vector<2x24xf32>
    %258 = vector.multi_reduction <add>, %257, %cst_100 [2] : vector<2x24x32xf32> to vector<2x24xf32>
    %259 = vector.shape_cast %258 : vector<2x24xf32> to vector<2x24x1xf32>
    %cst_101 = arith.constant 3.200000e+01 : f32
    %260 = vector.broadcast %cst_101 : f32 to vector<2x24x1xf32>
    %261 = arith.divf %259, %260 : vector<2x24x1xf32>
    %262 = vector.broadcast %261 : vector<2x24x1xf32> to vector<2x24x32xf32>
    %263 = arith.subf %257, %262 : vector<2x24x32xf32>
    %264 = arith.mulf %263, %263 : vector<2x24x32xf32>
    %cst_102 = arith.constant dense<0.000000e+00> : vector<2x24xf32>
    %265 = vector.multi_reduction <add>, %264, %cst_102 [2] : vector<2x24x32xf32> to vector<2x24xf32>
    %266 = vector.shape_cast %265 : vector<2x24xf32> to vector<2x24x1xf32>
    %cst_103 = arith.constant 3.200000e+01 : f32
    %267 = vector.broadcast %cst_103 : f32 to vector<2x24x1xf32>
    %268 = arith.divf %266, %267 : vector<2x24x1xf32>
    %cst_104 = arith.constant 9.99999996E-13 : f32
    %269 = vector.broadcast %cst_104 : f32 to vector<2x24x1xf32>
    %270 = arith.addf %268, %269 : vector<2x24x1xf32>
    %271 = math.rsqrt %270 : vector<2x24x1xf32>
    %272 = vector.broadcast %271 : vector<2x24x1xf32> to vector<2x24x32xf32>
    %273 = arith.mulf %263, %272 : vector<2x24x32xf32>
    %274 = vector.shape_cast %34 : vector<1x32xf32> to vector<1x1x32xf32>
    %275 = vector.broadcast %274 : vector<1x1x32xf32> to vector<2x24x32xf32>
    %276 = arith.mulf %273, %275 : vector<2x24x32xf32>
    %277 = vector.shape_cast %36 : vector<1x32xf32> to vector<1x1x32xf32>
    %278 = vector.broadcast %277 : vector<1x1x32xf32> to vector<2x24x32xf32>
    %279 = arith.addf %276, %278 : vector<2x24x32xf32>
    %280 = vector.shape_cast %279 : vector<2x24x32xf32> to vector<48x32xf32>
    %281 = arith.truncf %280 : vector<48x32xf32> to vector<48x32xbf16>
    %cst_105 = arith.constant dense<0.000000e+00> : vector<48x64xf32>
    %282 = tpu.matmul %281, %38, %cst_105 {dimension_numbers = #tpu.dot_dimension_numbers<[1], [0], [0], [1], [0, 0, 1, 1], [], []>} : vector<48x32xbf16>, vector<32x64xbf16>, vector<48x64xf32> -> vector<48x64xf32>
    %283 = vector.broadcast %40 : vector<1x64xf32> to vector<48x64xf32>
    %284 = arith.addf %282, %283 : vector<48x64xf32>
    %285 = arith.mulf %284, %284 : vector<48x64xf32>
    %286 = arith.mulf %284, %285 : vector<48x64xf32>
    %cst_106 = arith.constant 4.471500e-02 : f32
    %287 = vector.broadcast %cst_106 : f32 to vector<48x64xf32>
    %288 = arith.mulf %287, %286 : vector<48x64xf32>
    %289 = arith.addf %284, %288 : vector<48x64xf32>
    %cst_107 = arith.constant 0.797884583 : f32
    %290 = vector.broadcast %cst_107 : f32 to vector<48x64xf32>
    %291 = arith.mulf %290, %289 : vector<48x64xf32>
    %292 = math.tanh %291 : vector<48x64xf32>
    %cst_108 = arith.constant 1.000000e+00 : f32
    %293 = vector.broadcast %cst_108 : f32 to vector<48x64xf32>
    %294 = arith.addf %293, %292 : vector<48x64xf32>
    %cst_109 = arith.constant 5.000000e-01 : f32
    %295 = vector.broadcast %cst_109 : f32 to vector<48x64xf32>
    %296 = arith.mulf %295, %294 : vector<48x64xf32>
    %297 = arith.mulf %284, %296 : vector<48x64xf32>
    %298 = arith.truncf %297 : vector<48x64xf32> to vector<48x64xbf16>
    %cst_110 = arith.constant dense<0.000000e+00> : vector<48x32xf32>
    %299 = tpu.matmul %298, %42, %cst_110 {dimension_numbers = #tpu.dot_dimension_numbers<[1], [0], [0], [1], [0, 0, 1, 1], [], []>} : vector<48x64xbf16>, vector<64x32xbf16>, vector<48x32xf32> -> vector<48x32xf32>
    %300 = vector.broadcast %44 : vector<1x32xf32> to vector<48x32xf32>
    %301 = arith.addf %299, %300 : vector<48x32xf32>
    %302 = vector.shape_cast %301 : vector<48x32xf32> to vector<2x24x32xf32>
    %303 = arith.addf %279, %302 : vector<2x24x32xf32>
    %cst_111 = arith.constant dense<0.000000e+00> : vector<2x24xf32>
    %304 = vector.multi_reduction <add>, %303, %cst_111 [2] : vector<2x24x32xf32> to vector<2x24xf32>
    %305 = vector.shape_cast %304 : vector<2x24xf32> to vector<2x24x1xf32>
    %cst_112 = arith.constant 3.200000e+01 : f32
    %306 = vector.broadcast %cst_112 : f32 to vector<2x24x1xf32>
    %307 = arith.divf %305, %306 : vector<2x24x1xf32>
    %308 = vector.broadcast %307 : vector<2x24x1xf32> to vector<2x24x32xf32>
    %309 = arith.subf %303, %308 : vector<2x24x32xf32>
    %310 = arith.mulf %309, %309 : vector<2x24x32xf32>
    %cst_113 = arith.constant dense<0.000000e+00> : vector<2x24xf32>
    %311 = vector.multi_reduction <add>, %310, %cst_113 [2] : vector<2x24x32xf32> to vector<2x24xf32>
    %312 = vector.shape_cast %311 : vector<2x24xf32> to vector<2x24x1xf32>
    %cst_114 = arith.constant 3.200000e+01 : f32
    %313 = vector.broadcast %cst_114 : f32 to vector<2x24x1xf32>
    %314 = arith.divf %312, %313 : vector<2x24x1xf32>
    %cst_115 = arith.constant 9.99999996E-13 : f32
    %315 = vector.broadcast %cst_115 : f32 to vector<2x24x1xf32>
    %316 = arith.addf %314, %315 : vector<2x24x1xf32>
    %317 = math.rsqrt %316 : vector<2x24x1xf32>
    %318 = vector.broadcast %317 : vector<2x24x1xf32> to vector<2x24x32xf32>
    %319 = arith.mulf %309, %318 : vector<2x24x32xf32>
    %320 = vector.shape_cast %46 : vector<1x32xf32> to vector<1x1x32xf32>
    %321 = vector.broadcast %320 : vector<1x1x32xf32> to vector<2x24x32xf32>
    %322 = arith.mulf %319, %321 : vector<2x24x32xf32>
    %323 = vector.shape_cast %48 : vector<1x32xf32> to vector<1x1x32xf32>
    %324 = vector.broadcast %323 : vector<1x1x32xf32> to vector<2x24x32xf32>
    %325 = arith.addf %322, %324 : vector<2x24x32xf32>
    %c1 = arith.constant 1 : index
    %c0_116 = arith.constant 0 : index
    %c0_117 = arith.constant 0 : index
    %c0_118 = arith.constant 0 : index
    %326 = vector.load %arg3[%c1, %c0_116, %c0_117, %c0_118] : memref<2x4x32x8xbf16, #tpu.memory_space<vmem>>, vector<1x4x32x8xbf16>
    %327 = vector.shape_cast %326 : vector<1x4x32x8xbf16> to vector<4x32x8xbf16>
    %c1_119 = arith.constant 1 : index
    %c0_120 = arith.constant 0 : index
    %c0_121 = arith.constant 0 : index
    %c0_122 = arith.constant 0 : index
    %328 = vector.load %arg4[%c1_119, %c0_120, %c0_121, %c0_122] : memref<2x4x1x8xf32, #tpu.memory_space<vmem>>, vector<1x4x1x8xf32>
    %329 = vector.shape_cast %328 : vector<1x4x1x8xf32> to vector<4x1x8xf32>
    %c1_123 = arith.constant 1 : index
    %c0_124 = arith.constant 0 : index
    %c0_125 = arith.constant 0 : index
    %c0_126 = arith.constant 0 : index
    %330 = vector.load %arg5[%c1_123, %c0_124, %c0_125, %c0_126] : memref<2x4x32x8xbf16, #tpu.memory_space<vmem>>, vector<1x4x32x8xbf16>
    %331 = vector.shape_cast %330 : vector<1x4x32x8xbf16> to vector<4x32x8xbf16>
    %c1_127 = arith.constant 1 : index
    %c0_128 = arith.constant 0 : index
    %c0_129 = arith.constant 0 : index
    %c0_130 = arith.constant 0 : index
    %332 = vector.load %arg6[%c1_127, %c0_128, %c0_129, %c0_130] : memref<2x4x1x8xf32, #tpu.memory_space<vmem>>, vector<1x4x1x8xf32>
    %333 = vector.shape_cast %332 : vector<1x4x1x8xf32> to vector<4x1x8xf32>
    %c1_131 = arith.constant 1 : index
    %c0_132 = arith.constant 0 : index
    %c0_133 = arith.constant 0 : index
    %c0_134 = arith.constant 0 : index
    %334 = vector.load %arg7[%c1_131, %c0_132, %c0_133, %c0_134] : memref<2x4x32x8xbf16, #tpu.memory_space<vmem>>, vector<1x4x32x8xbf16>
    %335 = vector.shape_cast %334 : vector<1x4x32x8xbf16> to vector<4x32x8xbf16>
    %c1_135 = arith.constant 1 : index
    %c0_136 = arith.constant 0 : index
    %c0_137 = arith.constant 0 : index
    %c0_138 = arith.constant 0 : index
    %336 = vector.load %arg8[%c1_135, %c0_136, %c0_137, %c0_138] : memref<2x4x1x8xf32, #tpu.memory_space<vmem>>, vector<1x4x1x8xf32>
    %337 = vector.shape_cast %336 : vector<1x4x1x8xf32> to vector<4x1x8xf32>
    %c1_139 = arith.constant 1 : index
    %c0_140 = arith.constant 0 : index
    %c0_141 = arith.constant 0 : index
    %c0_142 = arith.constant 0 : index
    %338 = vector.load %arg9[%c1_139, %c0_140, %c0_141, %c0_142] : memref<2x4x8x32xbf16, #tpu.memory_space<vmem>>, vector<1x4x8x32xbf16>
    %339 = vector.shape_cast %338 : vector<1x4x8x32xbf16> to vector<4x8x32xbf16>
    %c1_143 = arith.constant 1 : index
    %c0_144 = arith.constant 0 : index
    %c0_145 = arith.constant 0 : index
    %340 = vector.load %arg10[%c1_143, %c0_144, %c0_145] : memref<2x1x32xf32, #tpu.memory_space<vmem>>, vector<1x1x32xf32>
    %341 = vector.shape_cast %340 : vector<1x1x32xf32> to vector<1x32xf32>
    %c1_146 = arith.constant 1 : index
    %c0_147 = arith.constant 0 : index
    %c0_148 = arith.constant 0 : index
    %342 = vector.load %arg11[%c1_146, %c0_147, %c0_148] : memref<2x1x32xf32, #tpu.memory_space<vmem>>, vector<1x1x32xf32>
    %343 = vector.shape_cast %342 : vector<1x1x32xf32> to vector<1x32xf32>
    %c1_149 = arith.constant 1 : index
    %c0_150 = arith.constant 0 : index
    %c0_151 = arith.constant 0 : index
    %344 = vector.load %arg12[%c1_149, %c0_150, %c0_151] : memref<2x1x32xf32, #tpu.memory_space<vmem>>, vector<1x1x32xf32>
    %345 = vector.shape_cast %344 : vector<1x1x32xf32> to vector<1x32xf32>
    %c1_152 = arith.constant 1 : index
    %c0_153 = arith.constant 0 : index
    %c0_154 = arith.constant 0 : index
    %346 = vector.load %arg13[%c1_152, %c0_153, %c0_154] : memref<2x32x64xbf16, #tpu.memory_space<vmem>>, vector<1x32x64xbf16>
    %347 = vector.shape_cast %346 : vector<1x32x64xbf16> to vector<32x64xbf16>
    %c1_155 = arith.constant 1 : index
    %c0_156 = arith.constant 0 : index
    %c0_157 = arith.constant 0 : index
    %348 = vector.load %arg14[%c1_155, %c0_156, %c0_157] : memref<2x1x64xf32, #tpu.memory_space<vmem>>, vector<1x1x64xf32>
    %349 = vector.shape_cast %348 : vector<1x1x64xf32> to vector<1x64xf32>
    %c1_158 = arith.constant 1 : index
    %c0_159 = arith.constant 0 : index
    %c0_160 = arith.constant 0 : index
    %350 = vector.load %arg15[%c1_158, %c0_159, %c0_160] : memref<2x64x32xbf16, #tpu.memory_space<vmem>>, vector<1x64x32xbf16>
    %351 = vector.shape_cast %350 : vector<1x64x32xbf16> to vector<64x32xbf16>
    %c1_161 = arith.constant 1 : index
    %c0_162 = arith.constant 0 : index
    %c0_163 = arith.constant 0 : index
    %352 = vector.load %arg16[%c1_161, %c0_162, %c0_163] : memref<2x1x32xf32, #tpu.memory_space<vmem>>, vector<1x1x32xf32>
    %353 = vector.shape_cast %352 : vector<1x1x32xf32> to vector<1x32xf32>
    %c1_164 = arith.constant 1 : index
    %c0_165 = arith.constant 0 : index
    %c0_166 = arith.constant 0 : index
    %354 = vector.load %arg17[%c1_164, %c0_165, %c0_166] : memref<2x1x32xf32, #tpu.memory_space<vmem>>, vector<1x1x32xf32>
    %355 = vector.shape_cast %354 : vector<1x1x32xf32> to vector<1x32xf32>
    %c1_167 = arith.constant 1 : index
    %c0_168 = arith.constant 0 : index
    %c0_169 = arith.constant 0 : index
    %356 = vector.load %arg18[%c1_167, %c0_168, %c0_169] : memref<2x1x32xf32, #tpu.memory_space<vmem>>, vector<1x1x32xf32>
    %357 = vector.shape_cast %356 : vector<1x1x32xf32> to vector<1x32xf32>
    %358 = vector.shape_cast %325 : vector<2x24x32xf32> to vector<48x32xf32>
    %359 = vector.shape_cast %325 : vector<2x24x32xf32> to vector<48x32xf32>
    %360 = vector.extract_strided_slice %327 {offsets = [0, 0, 0], sizes = [1, 32, 8], strides = [1, 1, 1]} : vector<4x32x8xbf16> to vector<1x32x8xbf16>
    %361 = vector.shape_cast %360 : vector<1x32x8xbf16> to vector<32x8xbf16>
    %362 = arith.truncf %358 : vector<48x32xf32> to vector<48x32xbf16>
    %cst_170 = arith.constant dense<0.000000e+00> : vector<48x8xf32>
    %363 = tpu.matmul %362, %361, %cst_170 {dimension_numbers = #tpu.dot_dimension_numbers<[1], [0], [0], [1], [0, 0, 1, 1], [], []>} : vector<48x32xbf16>, vector<32x8xbf16>, vector<48x8xf32> -> vector<48x8xf32>
    %364 = vector.extract_strided_slice %329 {offsets = [0, 0, 0], sizes = [1, 1, 8], strides = [1, 1, 1]} : vector<4x1x8xf32> to vector<1x1x8xf32>
    %365 = vector.shape_cast %364 : vector<1x1x8xf32> to vector<1x8xf32>
    %366 = vector.broadcast %365 : vector<1x8xf32> to vector<48x8xf32>
    %367 = arith.addf %363, %366 : vector<48x8xf32>
    %368 = vector.shape_cast %367 : vector<48x8xf32> to vector<2x24x8xf32>
    %369 = vector.extract_strided_slice %331 {offsets = [0, 0, 0], sizes = [1, 32, 8], strides = [1, 1, 1]} : vector<4x32x8xbf16> to vector<1x32x8xbf16>
    %370 = vector.shape_cast %369 : vector<1x32x8xbf16> to vector<32x8xbf16>
    %371 = arith.truncf %359 : vector<48x32xf32> to vector<48x32xbf16>
    %cst_171 = arith.constant dense<0.000000e+00> : vector<48x8xf32>
    %372 = tpu.matmul %371, %370, %cst_171 {dimension_numbers = #tpu.dot_dimension_numbers<[1], [0], [0], [1], [0, 0, 1, 1], [], []>} : vector<48x32xbf16>, vector<32x8xbf16>, vector<48x8xf32> -> vector<48x8xf32>
    %373 = vector.extract_strided_slice %333 {offsets = [0, 0, 0], sizes = [1, 1, 8], strides = [1, 1, 1]} : vector<4x1x8xf32> to vector<1x1x8xf32>
    %374 = vector.shape_cast %373 : vector<1x1x8xf32> to vector<1x8xf32>
    %375 = vector.broadcast %374 : vector<1x8xf32> to vector<48x8xf32>
    %376 = arith.addf %372, %375 : vector<48x8xf32>
    %377 = vector.shape_cast %376 : vector<48x8xf32> to vector<2x24x8xf32>
    %378 = vector.extract_strided_slice %335 {offsets = [0, 0, 0], sizes = [1, 32, 8], strides = [1, 1, 1]} : vector<4x32x8xbf16> to vector<1x32x8xbf16>
    %379 = vector.shape_cast %378 : vector<1x32x8xbf16> to vector<32x8xbf16>
    %380 = arith.truncf %359 : vector<48x32xf32> to vector<48x32xbf16>
    %cst_172 = arith.constant dense<0.000000e+00> : vector<48x8xf32>
    %381 = tpu.matmul %380, %379, %cst_172 {dimension_numbers = #tpu.dot_dimension_numbers<[1], [0], [0], [1], [0, 0, 1, 1], [], []>} : vector<48x32xbf16>, vector<32x8xbf16>, vector<48x8xf32> -> vector<48x8xf32>
    %382 = vector.extract_strided_slice %337 {offsets = [0, 0, 0], sizes = [1, 1, 8], strides = [1, 1, 1]} : vector<4x1x8xf32> to vector<1x1x8xf32>
    %383 = vector.shape_cast %382 : vector<1x1x8xf32> to vector<1x8xf32>
    %384 = vector.broadcast %383 : vector<1x8xf32> to vector<48x8xf32>
    %385 = arith.addf %381, %384 : vector<48x8xf32>
    %386 = vector.shape_cast %385 : vector<48x8xf32> to vector<2x24x8xf32>
    %387 = arith.truncf %368 : vector<2x24x8xf32> to vector<2x24x8xbf16>
    %388 = arith.truncf %377 : vector<2x24x8xf32> to vector<2x24x8xbf16>
    "tpu.trace_start"() <{level = 10 : i32, message = "bqd,bkd->bqk"}> : () -> ()
    %cst_173 = arith.constant dense<0.000000e+00> : vector<2x24x24xf32>
    %389 = tpu.matmul %387, %388, %cst_173 {dimension_numbers = #tpu.dot_dimension_numbers<[2], [2], [1], [1], [0, 0, 0, 1, 1, 1], [0], [0]>} : vector<2x24x8xbf16>, vector<2x24x8xbf16>, vector<2x24x24xf32> -> vector<2x24x24xf32>
    "tpu.trace_stop"() : () -> ()
    %cst_174 = arith.constant 0.353553385 : f32
    %390 = vector.broadcast %cst_174 : f32 to vector<2x24x24xf32>
    %391 = arith.mulf %389, %390 : vector<2x24x24xf32>
    %392 = arith.addf %391, %16 : vector<2x24x24xf32>
    %cst_175 = arith.constant dense<0xFF800000> : vector<2x24xf32>
    %393 = vector.multi_reduction <maximumf>, %392, %cst_175 [2] : vector<2x24x24xf32> to vector<2x24xf32>
    %394 = vector.shape_cast %393 : vector<2x24xf32> to vector<2x24x1xf32>
    %395 = vector.broadcast %394 : vector<2x24x1xf32> to vector<2x24x24xf32>
    %396 = arith.subf %392, %395 : vector<2x24x24xf32>
    %397 = math.exp %396 : vector<2x24x24xf32>
    %cst_176 = arith.constant dense<0.000000e+00> : vector<2x24xf32>
    %398 = vector.multi_reduction <add>, %397, %cst_176 [2] : vector<2x24x24xf32> to vector<2x24xf32>
    %399 = vector.shape_cast %398 : vector<2x24xf32> to vector<2x24x1xf32>
    %400 = vector.broadcast %399 : vector<2x24x1xf32> to vector<2x24x24xf32>
    %401 = arith.divf %397, %400 : vector<2x24x24xf32>
    %402 = arith.truncf %401 : vector<2x24x24xf32> to vector<2x24x24xbf16>
    %403 = arith.truncf %386 : vector<2x24x8xf32> to vector<2x24x8xbf16>
    "tpu.trace_start"() <{level = 10 : i32, message = "bqk,bkd->bqd"}> : () -> ()
    %cst_177 = arith.constant dense<0.000000e+00> : vector<2x24x8xf32>
    %404 = tpu.matmul %402, %403, %cst_177 {dimension_numbers = #tpu.dot_dimension_numbers<[2], [1], [1], [2], [0, 0, 0, 1, 1, 2], [0], [0]>} : vector<2x24x24xbf16>, vector<2x24x8xbf16>, vector<2x24x8xf32> -> vector<2x24x8xf32>
    "tpu.trace_stop"() : () -> ()
    %405 = vector.shape_cast %404 : vector<2x24x8xf32> to vector<48x8xf32>
    %406 = vector.extract_strided_slice %339 {offsets = [0, 0, 0], sizes = [1, 8, 32], strides = [1, 1, 1]} : vector<4x8x32xbf16> to vector<1x8x32xbf16>
    %407 = vector.shape_cast %406 : vector<1x8x32xbf16> to vector<8x32xbf16>
    %408 = arith.truncf %405 : vector<48x8xf32> to vector<48x8xbf16>
    %cst_178 = arith.constant dense<0.000000e+00> : vector<48x32xf32>
    %409 = tpu.matmul %408, %407, %cst_178 {dimension_numbers = #tpu.dot_dimension_numbers<[1], [0], [0], [1], [0, 0, 1, 1], [], []>} : vector<48x8xbf16>, vector<8x32xbf16>, vector<48x32xf32> -> vector<48x32xf32>
    %410 = vector.extract_strided_slice %327 {offsets = [1, 0, 0], sizes = [1, 32, 8], strides = [1, 1, 1]} : vector<4x32x8xbf16> to vector<1x32x8xbf16>
    %411 = vector.shape_cast %410 : vector<1x32x8xbf16> to vector<32x8xbf16>
    %412 = arith.truncf %358 : vector<48x32xf32> to vector<48x32xbf16>
    %cst_179 = arith.constant dense<0.000000e+00> : vector<48x8xf32>
    %413 = tpu.matmul %412, %411, %cst_179 {dimension_numbers = #tpu.dot_dimension_numbers<[1], [0], [0], [1], [0, 0, 1, 1], [], []>} : vector<48x32xbf16>, vector<32x8xbf16>, vector<48x8xf32> -> vector<48x8xf32>
    %414 = vector.extract_strided_slice %329 {offsets = [1, 0, 0], sizes = [1, 1, 8], strides = [1, 1, 1]} : vector<4x1x8xf32> to vector<1x1x8xf32>
    %415 = vector.shape_cast %414 : vector<1x1x8xf32> to vector<1x8xf32>
    %416 = vector.broadcast %415 : vector<1x8xf32> to vector<48x8xf32>
    %417 = arith.addf %413, %416 : vector<48x8xf32>
    %418 = vector.shape_cast %417 : vector<48x8xf32> to vector<2x24x8xf32>
    %419 = vector.extract_strided_slice %331 {offsets = [1, 0, 0], sizes = [1, 32, 8], strides = [1, 1, 1]} : vector<4x32x8xbf16> to vector<1x32x8xbf16>
    %420 = vector.shape_cast %419 : vector<1x32x8xbf16> to vector<32x8xbf16>
    %421 = arith.truncf %359 : vector<48x32xf32> to vector<48x32xbf16>
    %cst_180 = arith.constant dense<0.000000e+00> : vector<48x8xf32>
    %422 = tpu.matmul %421, %420, %cst_180 {dimension_numbers = #tpu.dot_dimension_numbers<[1], [0], [0], [1], [0, 0, 1, 1], [], []>} : vector<48x32xbf16>, vector<32x8xbf16>, vector<48x8xf32> -> vector<48x8xf32>
    %423 = vector.extract_strided_slice %333 {offsets = [1, 0, 0], sizes = [1, 1, 8], strides = [1, 1, 1]} : vector<4x1x8xf32> to vector<1x1x8xf32>
    %424 = vector.shape_cast %423 : vector<1x1x8xf32> to vector<1x8xf32>
    %425 = vector.broadcast %424 : vector<1x8xf32> to vector<48x8xf32>
    %426 = arith.addf %422, %425 : vector<48x8xf32>
    %427 = vector.shape_cast %426 : vector<48x8xf32> to vector<2x24x8xf32>
    %428 = vector.extract_strided_slice %335 {offsets = [1, 0, 0], sizes = [1, 32, 8], strides = [1, 1, 1]} : vector<4x32x8xbf16> to vector<1x32x8xbf16>
    %429 = vector.shape_cast %428 : vector<1x32x8xbf16> to vector<32x8xbf16>
    %430 = arith.truncf %359 : vector<48x32xf32> to vector<48x32xbf16>
    %cst_181 = arith.constant dense<0.000000e+00> : vector<48x8xf32>
    %431 = tpu.matmul %430, %429, %cst_181 {dimension_numbers = #tpu.dot_dimension_numbers<[1], [0], [0], [1], [0, 0, 1, 1], [], []>} : vector<48x32xbf16>, vector<32x8xbf16>, vector<48x8xf32> -> vector<48x8xf32>
    %432 = vector.extract_strided_slice %337 {offsets = [1, 0, 0], sizes = [1, 1, 8], strides = [1, 1, 1]} : vector<4x1x8xf32> to vector<1x1x8xf32>
    %433 = vector.shape_cast %432 : vector<1x1x8xf32> to vector<1x8xf32>
    %434 = vector.broadcast %433 : vector<1x8xf32> to vector<48x8xf32>
    %435 = arith.addf %431, %434 : vector<48x8xf32>
    %436 = vector.shape_cast %435 : vector<48x8xf32> to vector<2x24x8xf32>
    %437 = arith.truncf %418 : vector<2x24x8xf32> to vector<2x24x8xbf16>
    %438 = arith.truncf %427 : vector<2x24x8xf32> to vector<2x24x8xbf16>
    "tpu.trace_start"() <{level = 10 : i32, message = "bqd,bkd->bqk"}> : () -> ()
    %cst_182 = arith.constant dense<0.000000e+00> : vector<2x24x24xf32>
    %439 = tpu.matmul %437, %438, %cst_182 {dimension_numbers = #tpu.dot_dimension_numbers<[2], [2], [1], [1], [0, 0, 0, 1, 1, 1], [0], [0]>} : vector<2x24x8xbf16>, vector<2x24x8xbf16>, vector<2x24x24xf32> -> vector<2x24x24xf32>
    "tpu.trace_stop"() : () -> ()
    %cst_183 = arith.constant 0.353553385 : f32
    %440 = vector.broadcast %cst_183 : f32 to vector<2x24x24xf32>
    %441 = arith.mulf %439, %440 : vector<2x24x24xf32>
    %442 = arith.addf %441, %16 : vector<2x24x24xf32>
    %cst_184 = arith.constant dense<0xFF800000> : vector<2x24xf32>
    %443 = vector.multi_reduction <maximumf>, %442, %cst_184 [2] : vector<2x24x24xf32> to vector<2x24xf32>
    %444 = vector.shape_cast %443 : vector<2x24xf32> to vector<2x24x1xf32>
    %445 = vector.broadcast %444 : vector<2x24x1xf32> to vector<2x24x24xf32>
    %446 = arith.subf %442, %445 : vector<2x24x24xf32>
    %447 = math.exp %446 : vector<2x24x24xf32>
    %cst_185 = arith.constant dense<0.000000e+00> : vector<2x24xf32>
    %448 = vector.multi_reduction <add>, %447, %cst_185 [2] : vector<2x24x24xf32> to vector<2x24xf32>
    %449 = vector.shape_cast %448 : vector<2x24xf32> to vector<2x24x1xf32>
    %450 = vector.broadcast %449 : vector<2x24x1xf32> to vector<2x24x24xf32>
    %451 = arith.divf %447, %450 : vector<2x24x24xf32>
    %452 = arith.truncf %451 : vector<2x24x24xf32> to vector<2x24x24xbf16>
    %453 = arith.truncf %436 : vector<2x24x8xf32> to vector<2x24x8xbf16>
    "tpu.trace_start"() <{level = 10 : i32, message = "bqk,bkd->bqd"}> : () -> ()
    %cst_186 = arith.constant dense<0.000000e+00> : vector<2x24x8xf32>
    %454 = tpu.matmul %452, %453, %cst_186 {dimension_numbers = #tpu.dot_dimension_numbers<[2], [1], [1], [2], [0, 0, 0, 1, 1, 2], [0], [0]>} : vector<2x24x24xbf16>, vector<2x24x8xbf16>, vector<2x24x8xf32> -> vector<2x24x8xf32>
    "tpu.trace_stop"() : () -> ()
    %455 = vector.shape_cast %454 : vector<2x24x8xf32> to vector<48x8xf32>
    %456 = vector.extract_strided_slice %339 {offsets = [1, 0, 0], sizes = [1, 8, 32], strides = [1, 1, 1]} : vector<4x8x32xbf16> to vector<1x8x32xbf16>
    %457 = vector.shape_cast %456 : vector<1x8x32xbf16> to vector<8x32xbf16>
    %458 = arith.truncf %455 : vector<48x8xf32> to vector<48x8xbf16>
    %cst_187 = arith.constant dense<0.000000e+00> : vector<48x32xf32>
    %459 = tpu.matmul %458, %457, %cst_187 {dimension_numbers = #tpu.dot_dimension_numbers<[1], [0], [0], [1], [0, 0, 1, 1], [], []>} : vector<48x8xbf16>, vector<8x32xbf16>, vector<48x32xf32> -> vector<48x32xf32>
    %460 = arith.addf %409, %459 : vector<48x32xf32>
    %461 = vector.extract_strided_slice %327 {offsets = [2, 0, 0], sizes = [1, 32, 8], strides = [1, 1, 1]} : vector<4x32x8xbf16> to vector<1x32x8xbf16>
    %462 = vector.shape_cast %461 : vector<1x32x8xbf16> to vector<32x8xbf16>
    %463 = arith.truncf %358 : vector<48x32xf32> to vector<48x32xbf16>
    %cst_188 = arith.constant dense<0.000000e+00> : vector<48x8xf32>
    %464 = tpu.matmul %463, %462, %cst_188 {dimension_numbers = #tpu.dot_dimension_numbers<[1], [0], [0], [1], [0, 0, 1, 1], [], []>} : vector<48x32xbf16>, vector<32x8xbf16>, vector<48x8xf32> -> vector<48x8xf32>
    %465 = vector.extract_strided_slice %329 {offsets = [2, 0, 0], sizes = [1, 1, 8], strides = [1, 1, 1]} : vector<4x1x8xf32> to vector<1x1x8xf32>
    %466 = vector.shape_cast %465 : vector<1x1x8xf32> to vector<1x8xf32>
    %467 = vector.broadcast %466 : vector<1x8xf32> to vector<48x8xf32>
    %468 = arith.addf %464, %467 : vector<48x8xf32>
    %469 = vector.shape_cast %468 : vector<48x8xf32> to vector<2x24x8xf32>
    %470 = vector.extract_strided_slice %331 {offsets = [2, 0, 0], sizes = [1, 32, 8], strides = [1, 1, 1]} : vector<4x32x8xbf16> to vector<1x32x8xbf16>
    %471 = vector.shape_cast %470 : vector<1x32x8xbf16> to vector<32x8xbf16>
    %472 = arith.truncf %359 : vector<48x32xf32> to vector<48x32xbf16>
    %cst_189 = arith.constant dense<0.000000e+00> : vector<48x8xf32>
    %473 = tpu.matmul %472, %471, %cst_189 {dimension_numbers = #tpu.dot_dimension_numbers<[1], [0], [0], [1], [0, 0, 1, 1], [], []>} : vector<48x32xbf16>, vector<32x8xbf16>, vector<48x8xf32> -> vector<48x8xf32>
    %474 = vector.extract_strided_slice %333 {offsets = [2, 0, 0], sizes = [1, 1, 8], strides = [1, 1, 1]} : vector<4x1x8xf32> to vector<1x1x8xf32>
    %475 = vector.shape_cast %474 : vector<1x1x8xf32> to vector<1x8xf32>
    %476 = vector.broadcast %475 : vector<1x8xf32> to vector<48x8xf32>
    %477 = arith.addf %473, %476 : vector<48x8xf32>
    %478 = vector.shape_cast %477 : vector<48x8xf32> to vector<2x24x8xf32>
    %479 = vector.extract_strided_slice %335 {offsets = [2, 0, 0], sizes = [1, 32, 8], strides = [1, 1, 1]} : vector<4x32x8xbf16> to vector<1x32x8xbf16>
    %480 = vector.shape_cast %479 : vector<1x32x8xbf16> to vector<32x8xbf16>
    %481 = arith.truncf %359 : vector<48x32xf32> to vector<48x32xbf16>
    %cst_190 = arith.constant dense<0.000000e+00> : vector<48x8xf32>
    %482 = tpu.matmul %481, %480, %cst_190 {dimension_numbers = #tpu.dot_dimension_numbers<[1], [0], [0], [1], [0, 0, 1, 1], [], []>} : vector<48x32xbf16>, vector<32x8xbf16>, vector<48x8xf32> -> vector<48x8xf32>
    %483 = vector.extract_strided_slice %337 {offsets = [2, 0, 0], sizes = [1, 1, 8], strides = [1, 1, 1]} : vector<4x1x8xf32> to vector<1x1x8xf32>
    %484 = vector.shape_cast %483 : vector<1x1x8xf32> to vector<1x8xf32>
    %485 = vector.broadcast %484 : vector<1x8xf32> to vector<48x8xf32>
    %486 = arith.addf %482, %485 : vector<48x8xf32>
    %487 = vector.shape_cast %486 : vector<48x8xf32> to vector<2x24x8xf32>
    %488 = arith.truncf %469 : vector<2x24x8xf32> to vector<2x24x8xbf16>
    %489 = arith.truncf %478 : vector<2x24x8xf32> to vector<2x24x8xbf16>
    "tpu.trace_start"() <{level = 10 : i32, message = "bqd,bkd->bqk"}> : () -> ()
    %cst_191 = arith.constant dense<0.000000e+00> : vector<2x24x24xf32>
    %490 = tpu.matmul %488, %489, %cst_191 {dimension_numbers = #tpu.dot_dimension_numbers<[2], [2], [1], [1], [0, 0, 0, 1, 1, 1], [0], [0]>} : vector<2x24x8xbf16>, vector<2x24x8xbf16>, vector<2x24x24xf32> -> vector<2x24x24xf32>
    "tpu.trace_stop"() : () -> ()
    %cst_192 = arith.constant 0.353553385 : f32
    %491 = vector.broadcast %cst_192 : f32 to vector<2x24x24xf32>
    %492 = arith.mulf %490, %491 : vector<2x24x24xf32>
    %493 = arith.addf %492, %16 : vector<2x24x24xf32>
    %cst_193 = arith.constant dense<0xFF800000> : vector<2x24xf32>
    %494 = vector.multi_reduction <maximumf>, %493, %cst_193 [2] : vector<2x24x24xf32> to vector<2x24xf32>
    %495 = vector.shape_cast %494 : vector<2x24xf32> to vector<2x24x1xf32>
    %496 = vector.broadcast %495 : vector<2x24x1xf32> to vector<2x24x24xf32>
    %497 = arith.subf %493, %496 : vector<2x24x24xf32>
    %498 = math.exp %497 : vector<2x24x24xf32>
    %cst_194 = arith.constant dense<0.000000e+00> : vector<2x24xf32>
    %499 = vector.multi_reduction <add>, %498, %cst_194 [2] : vector<2x24x24xf32> to vector<2x24xf32>
    %500 = vector.shape_cast %499 : vector<2x24xf32> to vector<2x24x1xf32>
    %501 = vector.broadcast %500 : vector<2x24x1xf32> to vector<2x24x24xf32>
    %502 = arith.divf %498, %501 : vector<2x24x24xf32>
    %503 = arith.truncf %502 : vector<2x24x24xf32> to vector<2x24x24xbf16>
    %504 = arith.truncf %487 : vector<2x24x8xf32> to vector<2x24x8xbf16>
    "tpu.trace_start"() <{level = 10 : i32, message = "bqk,bkd->bqd"}> : () -> ()
    %cst_195 = arith.constant dense<0.000000e+00> : vector<2x24x8xf32>
    %505 = tpu.matmul %503, %504, %cst_195 {dimension_numbers = #tpu.dot_dimension_numbers<[2], [1], [1], [2], [0, 0, 0, 1, 1, 2], [0], [0]>} : vector<2x24x24xbf16>, vector<2x24x8xbf16>, vector<2x24x8xf32> -> vector<2x24x8xf32>
    "tpu.trace_stop"() : () -> ()
    %506 = vector.shape_cast %505 : vector<2x24x8xf32> to vector<48x8xf32>
    %507 = vector.extract_strided_slice %339 {offsets = [2, 0, 0], sizes = [1, 8, 32], strides = [1, 1, 1]} : vector<4x8x32xbf16> to vector<1x8x32xbf16>
    %508 = vector.shape_cast %507 : vector<1x8x32xbf16> to vector<8x32xbf16>
    %509 = arith.truncf %506 : vector<48x8xf32> to vector<48x8xbf16>
    %cst_196 = arith.constant dense<0.000000e+00> : vector<48x32xf32>
    %510 = tpu.matmul %509, %508, %cst_196 {dimension_numbers = #tpu.dot_dimension_numbers<[1], [0], [0], [1], [0, 0, 1, 1], [], []>} : vector<48x8xbf16>, vector<8x32xbf16>, vector<48x32xf32> -> vector<48x32xf32>
    %511 = arith.addf %460, %510 : vector<48x32xf32>
    %512 = vector.extract_strided_slice %327 {offsets = [3, 0, 0], sizes = [1, 32, 8], strides = [1, 1, 1]} : vector<4x32x8xbf16> to vector<1x32x8xbf16>
    %513 = vector.shape_cast %512 : vector<1x32x8xbf16> to vector<32x8xbf16>
    %514 = arith.truncf %358 : vector<48x32xf32> to vector<48x32xbf16>
    %cst_197 = arith.constant dense<0.000000e+00> : vector<48x8xf32>
    %515 = tpu.matmul %514, %513, %cst_197 {dimension_numbers = #tpu.dot_dimension_numbers<[1], [0], [0], [1], [0, 0, 1, 1], [], []>} : vector<48x32xbf16>, vector<32x8xbf16>, vector<48x8xf32> -> vector<48x8xf32>
    %516 = vector.extract_strided_slice %329 {offsets = [3, 0, 0], sizes = [1, 1, 8], strides = [1, 1, 1]} : vector<4x1x8xf32> to vector<1x1x8xf32>
    %517 = vector.shape_cast %516 : vector<1x1x8xf32> to vector<1x8xf32>
    %518 = vector.broadcast %517 : vector<1x8xf32> to vector<48x8xf32>
    %519 = arith.addf %515, %518 : vector<48x8xf32>
    %520 = vector.shape_cast %519 : vector<48x8xf32> to vector<2x24x8xf32>
    %521 = vector.extract_strided_slice %331 {offsets = [3, 0, 0], sizes = [1, 32, 8], strides = [1, 1, 1]} : vector<4x32x8xbf16> to vector<1x32x8xbf16>
    %522 = vector.shape_cast %521 : vector<1x32x8xbf16> to vector<32x8xbf16>
    %523 = arith.truncf %359 : vector<48x32xf32> to vector<48x32xbf16>
    %cst_198 = arith.constant dense<0.000000e+00> : vector<48x8xf32>
    %524 = tpu.matmul %523, %522, %cst_198 {dimension_numbers = #tpu.dot_dimension_numbers<[1], [0], [0], [1], [0, 0, 1, 1], [], []>} : vector<48x32xbf16>, vector<32x8xbf16>, vector<48x8xf32> -> vector<48x8xf32>
    %525 = vector.extract_strided_slice %333 {offsets = [3, 0, 0], sizes = [1, 1, 8], strides = [1, 1, 1]} : vector<4x1x8xf32> to vector<1x1x8xf32>
    %526 = vector.shape_cast %525 : vector<1x1x8xf32> to vector<1x8xf32>
    %527 = vector.broadcast %526 : vector<1x8xf32> to vector<48x8xf32>
    %528 = arith.addf %524, %527 : vector<48x8xf32>
    %529 = vector.shape_cast %528 : vector<48x8xf32> to vector<2x24x8xf32>
    %530 = vector.extract_strided_slice %335 {offsets = [3, 0, 0], sizes = [1, 32, 8], strides = [1, 1, 1]} : vector<4x32x8xbf16> to vector<1x32x8xbf16>
    %531 = vector.shape_cast %530 : vector<1x32x8xbf16> to vector<32x8xbf16>
    %532 = arith.truncf %359 : vector<48x32xf32> to vector<48x32xbf16>
    %cst_199 = arith.constant dense<0.000000e+00> : vector<48x8xf32>
    %533 = tpu.matmul %532, %531, %cst_199 {dimension_numbers = #tpu.dot_dimension_numbers<[1], [0], [0], [1], [0, 0, 1, 1], [], []>} : vector<48x32xbf16>, vector<32x8xbf16>, vector<48x8xf32> -> vector<48x8xf32>
    %534 = vector.extract_strided_slice %337 {offsets = [3, 0, 0], sizes = [1, 1, 8], strides = [1, 1, 1]} : vector<4x1x8xf32> to vector<1x1x8xf32>
    %535 = vector.shape_cast %534 : vector<1x1x8xf32> to vector<1x8xf32>
    %536 = vector.broadcast %535 : vector<1x8xf32> to vector<48x8xf32>
    %537 = arith.addf %533, %536 : vector<48x8xf32>
    %538 = vector.shape_cast %537 : vector<48x8xf32> to vector<2x24x8xf32>
    %539 = arith.truncf %520 : vector<2x24x8xf32> to vector<2x24x8xbf16>
    %540 = arith.truncf %529 : vector<2x24x8xf32> to vector<2x24x8xbf16>
    "tpu.trace_start"() <{level = 10 : i32, message = "bqd,bkd->bqk"}> : () -> ()
    %cst_200 = arith.constant dense<0.000000e+00> : vector<2x24x24xf32>
    %541 = tpu.matmul %539, %540, %cst_200 {dimension_numbers = #tpu.dot_dimension_numbers<[2], [2], [1], [1], [0, 0, 0, 1, 1, 1], [0], [0]>} : vector<2x24x8xbf16>, vector<2x24x8xbf16>, vector<2x24x24xf32> -> vector<2x24x24xf32>
    "tpu.trace_stop"() : () -> ()
    %cst_201 = arith.constant 0.353553385 : f32
    %542 = vector.broadcast %cst_201 : f32 to vector<2x24x24xf32>
    %543 = arith.mulf %541, %542 : vector<2x24x24xf32>
    %544 = arith.addf %543, %16 : vector<2x24x24xf32>
    %cst_202 = arith.constant dense<0xFF800000> : vector<2x24xf32>
    %545 = vector.multi_reduction <maximumf>, %544, %cst_202 [2] : vector<2x24x24xf32> to vector<2x24xf32>
    %546 = vector.shape_cast %545 : vector<2x24xf32> to vector<2x24x1xf32>
    %547 = vector.broadcast %546 : vector<2x24x1xf32> to vector<2x24x24xf32>
    %548 = arith.subf %544, %547 : vector<2x24x24xf32>
    %549 = math.exp %548 : vector<2x24x24xf32>
    %cst_203 = arith.constant dense<0.000000e+00> : vector<2x24xf32>
    %550 = vector.multi_reduction <add>, %549, %cst_203 [2] : vector<2x24x24xf32> to vector<2x24xf32>
    %551 = vector.shape_cast %550 : vector<2x24xf32> to vector<2x24x1xf32>
    %552 = vector.broadcast %551 : vector<2x24x1xf32> to vector<2x24x24xf32>
    %553 = arith.divf %549, %552 : vector<2x24x24xf32>
    %554 = arith.truncf %553 : vector<2x24x24xf32> to vector<2x24x24xbf16>
    %555 = arith.truncf %538 : vector<2x24x8xf32> to vector<2x24x8xbf16>
    "tpu.trace_start"() <{level = 10 : i32, message = "bqk,bkd->bqd"}> : () -> ()
    %cst_204 = arith.constant dense<0.000000e+00> : vector<2x24x8xf32>
    %556 = tpu.matmul %554, %555, %cst_204 {dimension_numbers = #tpu.dot_dimension_numbers<[2], [1], [1], [2], [0, 0, 0, 1, 1, 2], [0], [0]>} : vector<2x24x24xbf16>, vector<2x24x8xbf16>, vector<2x24x8xf32> -> vector<2x24x8xf32>
    "tpu.trace_stop"() : () -> ()
    %557 = vector.shape_cast %556 : vector<2x24x8xf32> to vector<48x8xf32>
    %558 = vector.extract_strided_slice %339 {offsets = [3, 0, 0], sizes = [1, 8, 32], strides = [1, 1, 1]} : vector<4x8x32xbf16> to vector<1x8x32xbf16>
    %559 = vector.shape_cast %558 : vector<1x8x32xbf16> to vector<8x32xbf16>
    %560 = arith.truncf %557 : vector<48x8xf32> to vector<48x8xbf16>
    %cst_205 = arith.constant dense<0.000000e+00> : vector<48x32xf32>
    %561 = tpu.matmul %560, %559, %cst_205 {dimension_numbers = #tpu.dot_dimension_numbers<[1], [0], [0], [1], [0, 0, 1, 1], [], []>} : vector<48x8xbf16>, vector<8x32xbf16>, vector<48x32xf32> -> vector<48x32xf32>
    %562 = arith.addf %511, %561 : vector<48x32xf32>
    %563 = vector.broadcast %341 : vector<1x32xf32> to vector<48x32xf32>
    %564 = arith.addf %562, %563 : vector<48x32xf32>
    %565 = vector.shape_cast %564 : vector<48x32xf32> to vector<2x24x32xf32>
    %566 = arith.addf %325, %565 : vector<2x24x32xf32>
    %cst_206 = arith.constant dense<0.000000e+00> : vector<2x24xf32>
    %567 = vector.multi_reduction <add>, %566, %cst_206 [2] : vector<2x24x32xf32> to vector<2x24xf32>
    %568 = vector.shape_cast %567 : vector<2x24xf32> to vector<2x24x1xf32>
    %cst_207 = arith.constant 3.200000e+01 : f32
    %569 = vector.broadcast %cst_207 : f32 to vector<2x24x1xf32>
    %570 = arith.divf %568, %569 : vector<2x24x1xf32>
    %571 = vector.broadcast %570 : vector<2x24x1xf32> to vector<2x24x32xf32>
    %572 = arith.subf %566, %571 : vector<2x24x32xf32>
    %573 = arith.mulf %572, %572 : vector<2x24x32xf32>
    %cst_208 = arith.constant dense<0.000000e+00> : vector<2x24xf32>
    %574 = vector.multi_reduction <add>, %573, %cst_208 [2] : vector<2x24x32xf32> to vector<2x24xf32>
    %575 = vector.shape_cast %574 : vector<2x24xf32> to vector<2x24x1xf32>
    %cst_209 = arith.constant 3.200000e+01 : f32
    %576 = vector.broadcast %cst_209 : f32 to vector<2x24x1xf32>
    %577 = arith.divf %575, %576 : vector<2x24x1xf32>
    %cst_210 = arith.constant 9.99999996E-13 : f32
    %578 = vector.broadcast %cst_210 : f32 to vector<2x24x1xf32>
    %579 = arith.addf %577, %578 : vector<2x24x1xf32>
    %580 = math.rsqrt %579 : vector<2x24x1xf32>
    %581 = vector.broadcast %580 : vector<2x24x1xf32> to vector<2x24x32xf32>
    %582 = arith.mulf %572, %581 : vector<2x24x32xf32>
    %583 = vector.shape_cast %343 : vector<1x32xf32> to vector<1x1x32xf32>
    %584 = vector.broadcast %583 : vector<1x1x32xf32> to vector<2x24x32xf32>
    %585 = arith.mulf %582, %584 : vector<2x24x32xf32>
    %586 = vector.shape_cast %345 : vector<1x32xf32> to vector<1x1x32xf32>
    %587 = vector.broadcast %586 : vector<1x1x32xf32> to vector<2x24x32xf32>
    %588 = arith.addf %585, %587 : vector<2x24x32xf32>
    %589 = vector.shape_cast %588 : vector<2x24x32xf32> to vector<48x32xf32>
    %590 = arith.truncf %589 : vector<48x32xf32> to vector<48x32xbf16>
    %cst_211 = arith.constant dense<0.000000e+00> : vector<48x64xf32>
    %591 = tpu.matmul %590, %347, %cst_211 {dimension_numbers = #tpu.dot_dimension_numbers<[1], [0], [0], [1], [0, 0, 1, 1], [], []>} : vector<48x32xbf16>, vector<32x64xbf16>, vector<48x64xf32> -> vector<48x64xf32>
    %592 = vector.broadcast %349 : vector<1x64xf32> to vector<48x64xf32>
    %593 = arith.addf %591, %592 : vector<48x64xf32>
    %594 = arith.mulf %593, %593 : vector<48x64xf32>
    %595 = arith.mulf %593, %594 : vector<48x64xf32>
    %cst_212 = arith.constant 4.471500e-02 : f32
    %596 = vector.broadcast %cst_212 : f32 to vector<48x64xf32>
    %597 = arith.mulf %596, %595 : vector<48x64xf32>
    %598 = arith.addf %593, %597 : vector<48x64xf32>
    %cst_213 = arith.constant 0.797884583 : f32
    %599 = vector.broadcast %cst_213 : f32 to vector<48x64xf32>
    %600 = arith.mulf %599, %598 : vector<48x64xf32>
    %601 = math.tanh %600 : vector<48x64xf32>
    %cst_214 = arith.constant 1.000000e+00 : f32
    %602 = vector.broadcast %cst_214 : f32 to vector<48x64xf32>
    %603 = arith.addf %602, %601 : vector<48x64xf32>
    %cst_215 = arith.constant 5.000000e-01 : f32
    %604 = vector.broadcast %cst_215 : f32 to vector<48x64xf32>
    %605 = arith.mulf %604, %603 : vector<48x64xf32>
    %606 = arith.mulf %593, %605 : vector<48x64xf32>
    %607 = arith.truncf %606 : vector<48x64xf32> to vector<48x64xbf16>
    %cst_216 = arith.constant dense<0.000000e+00> : vector<48x32xf32>
    %608 = tpu.matmul %607, %351, %cst_216 {dimension_numbers = #tpu.dot_dimension_numbers<[1], [0], [0], [1], [0, 0, 1, 1], [], []>} : vector<48x64xbf16>, vector<64x32xbf16>, vector<48x32xf32> -> vector<48x32xf32>
    %609 = vector.broadcast %353 : vector<1x32xf32> to vector<48x32xf32>
    %610 = arith.addf %608, %609 : vector<48x32xf32>
    %611 = vector.shape_cast %610 : vector<48x32xf32> to vector<2x24x32xf32>
    %612 = arith.addf %588, %611 : vector<2x24x32xf32>
    %cst_217 = arith.constant dense<0.000000e+00> : vector<2x24xf32>
    %613 = vector.multi_reduction <add>, %612, %cst_217 [2] : vector<2x24x32xf32> to vector<2x24xf32>
    %614 = vector.shape_cast %613 : vector<2x24xf32> to vector<2x24x1xf32>
    %cst_218 = arith.constant 3.200000e+01 : f32
    %615 = vector.broadcast %cst_218 : f32 to vector<2x24x1xf32>
    %616 = arith.divf %614, %615 : vector<2x24x1xf32>
    %617 = vector.broadcast %616 : vector<2x24x1xf32> to vector<2x24x32xf32>
    %618 = arith.subf %612, %617 : vector<2x24x32xf32>
    %619 = arith.mulf %618, %618 : vector<2x24x32xf32>
    %cst_219 = arith.constant dense<0.000000e+00> : vector<2x24xf32>
    %620 = vector.multi_reduction <add>, %619, %cst_219 [2] : vector<2x24x32xf32> to vector<2x24xf32>
    %621 = vector.shape_cast %620 : vector<2x24xf32> to vector<2x24x1xf32>
    %cst_220 = arith.constant 3.200000e+01 : f32
    %622 = vector.broadcast %cst_220 : f32 to vector<2x24x1xf32>
    %623 = arith.divf %621, %622 : vector<2x24x1xf32>
    %cst_221 = arith.constant 9.99999996E-13 : f32
    %624 = vector.broadcast %cst_221 : f32 to vector<2x24x1xf32>
    %625 = arith.addf %623, %624 : vector<2x24x1xf32>
    %626 = math.rsqrt %625 : vector<2x24x1xf32>
    %627 = vector.broadcast %626 : vector<2x24x1xf32> to vector<2x24x32xf32>
    %628 = arith.mulf %618, %627 : vector<2x24x32xf32>
    %629 = vector.shape_cast %355 : vector<1x32xf32> to vector<1x1x32xf32>
    %630 = vector.broadcast %629 : vector<1x1x32xf32> to vector<2x24x32xf32>
    %631 = arith.mulf %628, %630 : vector<2x24x32xf32>
    %632 = vector.shape_cast %357 : vector<1x32xf32> to vector<1x1x32xf32>
    %633 = vector.broadcast %632 : vector<1x1x32xf32> to vector<2x24x32xf32>
    %634 = arith.addf %631, %633 : vector<2x24x32xf32>
    %c0_222 = arith.constant 0 : index
    %c0_223 = arith.constant 0 : index
    %635 = vector.load %arg19[%c0_222, %c0_223] : memref<1x32xf32, #tpu.memory_space<vmem>>, vector<1x32xf32>
    %c0_224 = arith.constant 0 : index
    %c0_225 = arith.constant 0 : index
    %636 = vector.load %arg20[%c0_224, %c0_225] : memref<1x32xf32, #tpu.memory_space<vmem>>, vector<1x32xf32>
    %cst_226 = arith.constant dense<0.000000e+00> : vector<2x24xf32>
    %637 = vector.multi_reduction <add>, %634, %cst_226 [2] : vector<2x24x32xf32> to vector<2x24xf32>
    %638 = vector.shape_cast %637 : vector<2x24xf32> to vector<2x24x1xf32>
    %cst_227 = arith.constant 3.200000e+01 : f32
    %639 = vector.broadcast %cst_227 : f32 to vector<2x24x1xf32>
    %640 = arith.divf %638, %639 : vector<2x24x1xf32>
    %641 = vector.broadcast %640 : vector<2x24x1xf32> to vector<2x24x32xf32>
    %642 = arith.subf %634, %641 : vector<2x24x32xf32>
    %643 = arith.mulf %642, %642 : vector<2x24x32xf32>
    %cst_228 = arith.constant dense<0.000000e+00> : vector<2x24xf32>
    %644 = vector.multi_reduction <add>, %643, %cst_228 [2] : vector<2x24x32xf32> to vector<2x24xf32>
    %645 = vector.shape_cast %644 : vector<2x24xf32> to vector<2x24x1xf32>
    %cst_229 = arith.constant 3.200000e+01 : f32
    %646 = vector.broadcast %cst_229 : f32 to vector<2x24x1xf32>
    %647 = arith.divf %645, %646 : vector<2x24x1xf32>
    %cst_230 = arith.constant 9.99999996E-13 : f32
    %648 = vector.broadcast %cst_230 : f32 to vector<2x24x1xf32>
    %649 = arith.addf %647, %648 : vector<2x24x1xf32>
    %650 = math.rsqrt %649 : vector<2x24x1xf32>
    %651 = vector.broadcast %650 : vector<2x24x1xf32> to vector<2x24x32xf32>
    %652 = arith.mulf %642, %651 : vector<2x24x32xf32>
    %653 = vector.shape_cast %635 : vector<1x32xf32> to vector<1x1x32xf32>
    %654 = vector.broadcast %653 : vector<1x1x32xf32> to vector<2x24x32xf32>
    %655 = arith.mulf %652, %654 : vector<2x24x32xf32>
    %656 = vector.shape_cast %636 : vector<1x32xf32> to vector<1x1x32xf32>
    %657 = vector.broadcast %656 : vector<1x1x32xf32> to vector<2x24x32xf32>
    %658 = arith.addf %655, %657 : vector<2x24x32xf32>
    %c0_231 = arith.constant 0 : index
    %c0_232 = arith.constant 0 : index
    %c0_233 = arith.constant 0 : index
    %659 = vector.load %arg23[%c0_231, %c0_232, %c0_233] : memref<2x24x32xf32, #tpu.memory_space<vmem>>, vector<2x24x32xf32>
    tpu.vector_store %arg23[%c0_231, %c0_232, %c0_233], %658 {strides = array<i32>} : memref<2x24x32xf32, #tpu.memory_space<vmem>>, vector<2x24x32xf32>,
    %660 = vector.extract_strided_slice %658 {offsets = [0, 0, 0], sizes = [2, 1, 32], strides = [1, 1, 1]} : vector<2x24x32xf32> to vector<2x1x32xf32>
    %661 = vector.shape_cast %660 : vector<2x1x32xf32> to vector<2x32xf32>
    %c0_234 = arith.constant 0 : index
    %c0_235 = arith.constant 0 : index
    %662 = vector.load %arg21[%c0_234, %c0_235] : memref<32x16xbf16, #tpu.memory_space<vmem>>, vector<32x16xbf16>
    %663 = arith.truncf %661 : vector<2x32xf32> to vector<2x32xbf16>
    %cst_236 = arith.constant dense<0.000000e+00> : vector<2x16xf32>
    %664 = tpu.matmul %663, %662, %cst_236 {dimension_numbers = #tpu.dot_dimension_numbers<[1], [0], [0], [1], [0, 0, 1, 1], [], []>} : vector<2x32xbf16>, vector<32x16xbf16>, vector<2x16xf32> -> vector<2x16xf32>
    %c0_237 = arith.constant 0 : index
    %c0_238 = arith.constant 0 : index
    %665 = vector.load %arg22[%c0_237, %c0_238] : memref<1x16xf32, #tpu.memory_space<vmem>>, vector<1x16xf32>
    %666 = vector.broadcast %665 : vector<1x16xf32> to vector<2x16xf32>
    %667 = arith.addf %664, %666 : vector<2x16xf32>
    %668 = arith.mulf %667, %667 : vector<2x16xf32>
    %cst_239 = arith.constant dense<0.000000e+00> : vector<2xf32>
    %669 = vector.multi_reduction <add>, %668, %cst_239 [1] : vector<2x16xf32> to vector<2xf32>
    %670 = vector.shape_cast %669 : vector<2xf32> to vector<2x1xf32>
    %671 = math.sqrt %670 : vector<2x1xf32>
    %cst_240 = arith.constant 9.99999996E-13 : f32
    %672 = vector.broadcast %cst_240 : f32 to vector<2x1xf32>
    %673 = arith.maximumf %671, %672 : vector<2x1xf32>
    %674 = vector.broadcast %673 : vector<2x1xf32> to vector<2x16xf32>
    %675 = arith.divf %667, %674 : vector<2x16xf32>
    %c0_241 = arith.constant 0 : index
    %c0_242 = arith.constant 0 : index
    %676 = vector.load %arg24[%c0_241, %c0_242] : memref<2x16xf32, #tpu.memory_space<vmem>>, vector<2x16xf32>
    tpu.vector_store %arg24[%c0_241, %c0_242], %675 {strides = array<i32>} : memref<2x16xf32, #tpu.memory_space<vmem>>, vector<2x16xf32>,
    return
  }
}

</mosaic_0001>

<bundles_post_ra>
// kernel: tpu_custom_call.1
= control target key start
LH: loop header
LB: loop body
LE: loop exit
PB: predicated region body
PF: predicated region fallthrough
CT: control target
= control target key end

     0   :  { %s10405_s0 = inlined_call_operand.vmem [shape: f32[2,24,48], index: 0, kind: input, shape index: {}]   ;;  %s10406_s1 = inlined_call_operand.vmem [shape: f32[1,24,32], index: 1, kind: input, shape index: {}]   ;;  %s10407_s2 = inlined_call_operand.vmem [shape: bf16[48,32], index: 2, kind: input, shape index: {}]   ;;  %s10408_s3 = inlined_call_operand.vmem [shape: bf16[2,4,32,8], index: 3, kind: input, shape index: {}]   ;;  %s10409_s4 = inlined_call_operand.vmem [shape: f32[2,4,1,8], index: 4, kind: input, shape index: {}]   ;;  %s10410_s5 = inlined_call_operand.vmem [shape: bf16[2,4,32,8], index: 5, kind: input, shape index: {}]   ;;  %s10411_s6 = inlined_call_operand.vmem [shape: f32[2,4,1,8], index: 6, kind: input, shape index: {}]   ;;  %s10412_s7 = inlined_call_operand.vmem [shape: bf16[2,4,32,8], index: 7, kind: input, shape index: {}]   ;;  %s10413_s8 = inlined_call_operand.vmem [shape: f32[2,4,1,8], index: 8, kind: input, shape index: {}]   ;;  %s10414_s9 = inlined_call_operand.vmem [shape: bf16[2,4,8,32], index: 9, kind: input, shape index: {}]   ;;  %s10415_s10 = inlined_call_operand.vmem [shape: f32[2,1,32], index: 10, kind: input, shape index: {}]   ;;  %s10416_s11 = inlined_call_operand.vmem [shape: f32[2,1,32], index: 11, kind: input, shape index: {}]   ;;  %s10417_s12 = inlined_call_operand.vmem [shape: f32[2,1,32], index: 12, kind: input, shape index: {}]   ;;  %s10418_s13 = inlined_call_operand.vmem [shape: bf16[2,32,64], index: 13, kind: input, shape index: {}]   ;;  %s10419_s14 = inlined_call_operand.vmem [shape: f32[2,1,64], index: 14, kind: input, shape index: {}]   ;;  %s10420_s15 = inlined_call_operand.vmem [shape: bf16[2,64,32], index: 15, kind: input, shape index: {}]   ;;  %s10421_s16 = inlined_call_operand.vmem [shape: f32[2,1,32], index: 16, kind: input, shape index: {}]   ;;  %s10422_s17 = inlined_call_operand.vmem [shape: f32[2,1,32], index: 17, kind: input, shape index: {}]   ;;  %s10423_s18 = inlined_call_operand.vmem [shape: f32[2,1,32], index: 18, kind: input, shape index: {}]   ;;  %s10424_s19 = inlined_call_operand.vmem [shape: f32[1,32], index: 19, kind: input, shape index: {}]   ;;  %s10425_s20 = inlined_call_operand.vmem [shape: f32[1,32], index: 20, kind: input, shape index: {}]   ;;  %s10426_s21 = inlined_call_operand.vmem [shape: bf16[32,16], index: 21, kind: input, shape index: {}]   ;;  %s10427_s22 = inlined_call_operand.vmem [shape: f32[1,16], index: 22, kind: input, shape index: {}]   ;;  %s10428_s23 = inlined_call_operand.hbm [shape: f32[2,24,32], index: 23, kind: output, shape index: {0}]   ;;  %s10429_s24 = inlined_call_operand.hbm [shape: f32[2,16], index: 24, kind: output, shape index: {1}]  }
   0x1   :  { %10439 = sst [smem:[#allocation8_spill]] %s10405_s0 }
   0x2   :  { %10440 = sst [smem:[#allocation9_spill]] %s10406_s1 }
   0x3   :  { %10441 = sst [smem:[#allocation10_spill]] %s10407_s2 }
   0x4   :  { %10442 = sst [smem:[#allocation11_spill]] %s10408_s3 }
   0x5   :  { %10443 = sst [smem:[#allocation12_spill]] %s10409_s4 }
   0x6   :  { %10444 = sst [smem:[#allocation13_spill]] %s10410_s5 }
   0x7   :  { %10445 = sst [smem:[#allocation14_spill]] %s10411_s6 }
   0x8   :  { %10446 = sst [smem:[#allocation15_spill]] %s10412_s7 }
   0x9   :  { %10447 = sst [smem:[#allocation16_spill]] %s10413_s8 }
   0xa   :  { %30 = vsyncpa [#allocation3], 0  ;;  %s10448_s27 = sld [smem:[#allocation10_spill]]  ;;  %v8576_v1 = vmov 0.0   ;;  %vm8577_vm0 = vmmov 0   ;;  %s10449_s30 = sld [smem:[#allocation8_spill]] }
   0xb   :  { %7274 = vmatprep.subr.bf16.mxu0 %v8576_v1  ;;  %7292 = vmatprep.subr.bf16.mxu1 %v8576_v1  ;;  %vm112_vm1 = vcmask 392192  }
   0xc   :  { %7280 = vmatprep.mubr.msk.bf16.mxu0 %vm8577_vm0, %v8576_v1  ;;  %7296 = vmatprep.mubr.msk.bf16.mxu1 %vm8577_vm0, %v8576_v1 }
  0x10   :  { %v8183_v0 = vld [vmem:[%s10448_s27] sm:$0xff]   ;;  %v8184_v2 = vld [vmem:[%s10448_s27 + $0x8] sm:$0xff]   ;;  %v8185_v3 = vld [vmem:[%s10448_s27 + $0x10] sm:$0xff]  }
  0x11   :  { %7275 = vmatpush3.bf16.msra.mxu0 %v8183_v0  ;;  %v79_v4 = vld [vmem:[%s10449_s30] sm:$0xff]  ;;  %v80_v5 = vld [vmem:[%s10449_s30 + $0x8] sm:$0xff]  ;;  %v81_v7 = vld [vmem:[%s10449_s30 + $0x10] sm:$0xff] }
  0x12   :  { %7276 = vmatprep.subr.bf16.mxu0 %v8576_v1  ;;  %v91_v6 = vpack.c.bf16 %v80_v5, %v79_v4  ;;  %v82_v8 = vld [vmem:[%s10449_s30 + $0x18] sm:$0xff]  ;;  %v83_v10 = vld [vmem:[%s10449_s30 + $0x20] sm:$0xff]  ;;  %v84_v11 = vld [vmem:[%s10449_s30 + $0x28] sm:$0xff] }
  0x13   :  { %v92_v9 = vpack.c.bf16 %v82_v8, %v81_v7  ;;  %v93_v12 = vpack.c.bf16 %v84_v11, %v83_v10 }
  0x15   :  { %7277 = vmatpush3.bf16.msra.mxu0 %v8184_v2 }
  0x16   :  { %7278 = vmatprep.subr.bf16.mxu0 %v8576_v1 }
  0x19   :  { %7279 = vmatpush3.bf16.msra.mxu0 %v8185_v3 }
  0x1a   :  { %7308 = vmatprep.subr.bf16.mxu0 %v8576_v1 }
  0x1c   :  { %7281 = vmatmul.mubr.msk.bf16.vlgmr.msra.gmra.mrb[0].mxu0 %vm112_vm1, %v91_v6 }
  0x1d   :  { %7284 = vmatprep.mubr.msk.bf16.mxu0 %vm8577_vm0, %v8576_v1 }
  0x24   :  { %7285 = vmatmul.mubr.msk.bf16.gmra.mrb[4].mxu0 %vm112_vm1, %v92_v9 }
  0x25   :  { %7288 = vmatprep.mubr.msk.bf16.mxu0 %vm8577_vm0, %v8576_v1 }
  0x2c   :  { %7289 = vmatmul.mubr.msk.bf16.gmra.mrb[8].mxu0 %vm112_vm1, %v93_v12 }
  0x2d   :  { %7312 = vmatprep.mubr.msk.bf16.mxu0 %vm8577_vm0, %v8576_v1 }
  0x2e   :  { %31 = vsyncpa [#allocation5], 0  ;;  %s10450_s0 = sld [smem:[#allocation11_spill]]  ;;  %s10451_s25 = sld [smem:[#allocation13_spill]]  ;;  %vm296_vm2 = vcmask 261120   ;;  %vm521_vm3 = vcmask 64512  }
  0x2f   :  { %s10452_s27 = sld [smem:[#allocation9_spill]]  ;;  %s10453_s7 = sld [smem:[#allocation15_spill]]  ;;  %vm735_vm4 = vcmask 1043456   ;;  %vm654_vm6 = vcmask 195584   ;;  %vm3098_vm7 = vcmask 523264   ;;  %vm6492_vm8 = vcmask 1041409  }
  0x30   :  { %s10454_s26 = sld [smem:[#allocation12_spill]]  ;;  %s10455_s6 = sld [smem:[#allocation14_spill]]  ;;  %vm6551_vm9 = vcmask 123904  }
  0x31   :  { %s10456_s3 = sld [smem:[#allocation16_spill]] }
  0x34   :  { %v8186_v13 = vld [vmem:[%s10450_s0] sm:$0xff]   ;;  %v8188_v15 = vld [vmem:[%s10450_s0 + $0x8] sm:$0xff]  }
  0x35   :  { %v8187_v14 = vld [vmem:[%s10451_s25] sm:$0xff]   ;;  %7293 = vmatpush3.bf16.msra.mxu1 %v8186_v13  ;;  %v8189_v16 = vld [vmem:[%s10451_s25 + $0x8] sm:$0xff]   ;;  %v181_v28 = vld [vmem:[%s10452_s27 + $0x10] sm:$0xff] }
  0x36   :  { %7309 = vmatpush3.bf16.msra.mxu0 %v8187_v14  ;;  %7294 = vmatprep.subr.bf16.mxu1 %v8576_v1  ;;  %v179_v18 = vld [vmem:[%s10452_s27] sm:$0xff]  ;;  %v180_v19 = vld [vmem:[%s10452_s27 + $0x8] sm:$0xff] }
  0x37   :  { %7310 = vmatprep.subr.bf16.mxu0 %v8576_v1  ;;  %v8190_v25 = vld [vmem:[%s10453_s7] sm:$0xff]   ;;  %v8191_v29 = vld [vmem:[%s10453_s7 + $0x8] sm:$0xff]  }
  0x38   :  { %v8845_v43 = vld [vmem:[%s10454_s26] ss:$0 sm:$0xff] }
  0x39   :  { %7295 = vmatpush3.bf16.msra.mxu1 %v8188_v15  ;;  %v8850_v45 = vld [vmem:[%s10455_s6] ss:$0 sm:$0xff] }
  0x3a   :  { %7311 = vmatpush3.bf16.msra.mxu0 %v8189_v16  ;;  %8124 = vmatprep.subr.bf16.mxu1 %v8576_v1  ;;  %v8862_v61 = vld [vmem:[%s10456_s3] ss:$0 sm:$0xff] }
  0x3b   :  { %7324 = vmatprep.subr.bf16.mxu0 %v8576_v1 }
  0xef   :  { %v156_v17 = vpop.f32.mrb[0].mxu0 }
  0xf0   :  { %v7282_v20 = vpop.f32.mrb[1].mxu0  ;;  %v8775_v22 = vadd.f32 %v179_v18, %v156_v17 }
  0xf1   :  { %v159_v21 = vpop.f32.mrb[2].mxu0 }
  0xf2   :  { %v8777_v23 = vadd.f32 %v180_v19, %v159_v21  ;;  %v7283_v24 = vpop.f32.mrb[3].mxu0 }
  0xf4   :  { %v8784_v26 = vpack.c.bf16 %v8777_v23, %v8775_v22 }
  0xf6   :  { %7297 = vmatmul.mubr.msk.bf16.vlgmr.msra.gmra.mrb[0].mxu1 %vm296_vm2, %v8784_v26  ;;  %7313 = vmatmul.mubr.msk.bf16.vlgmr.msra.gmra.mrb[12].mxu0 %vm296_vm2, %v8784_v26 }
  0xf7   :  { %v164_v27 = vpop.f32.mrb[4].mxu0  ;;  %7325 = vmatpush3.bf16.msra.mxu0 %v8190_v25  ;;  %7300 = vmatprep.mubr.msk.bf16.mxu1 %vm8577_vm0, %v8576_v1 }
  0xf8   :  { %v7286_v30 = vpop.f32.mrb[5].mxu0  ;;  %7326 = vmatprep.subr.bf16.mxu0 %v8576_v1  ;;  %7328 = vmatprep.mubr.msk.bf16.mxu0 %vm8577_vm0, %v8576_v1  ;;  %v8801_v32 = vadd.f32 %v181_v28, %v164_v27 }
  0xf9   :  { %v167_v31 = vpop.f32.mrb[6].mxu0  ;;  %8126 = vmatpush3.bf16.msra.mxu1 %v8187_v14 }
  0xfa   :  { %v8803_v33 = vadd.f32 %v179_v18, %v167_v31  ;;  %v7287_v34 = vpop.f32.mrb[7].mxu0  ;;  %8125 = vmatprep.subr.bf16.mxu1 %v8576_v1 }
  0xfb   :  { %7327 = vmatpush3.bf16.msra.mxu0 %v8191_v29 }
  0xfc   :  { %v8808_v35 = vpack.c.bf16 %v8803_v33, %v8801_v32 }
  0xfd   :  { %8127 = vmatpush3.bf16.msra.mxu1 %v8189_v16 }
  0xfe   :  { %7301 = vmatmul.mubr.msk.bf16.gmra.mrb[4].mxu1 %vm296_vm2, %v8808_v35  ;;  %7329 = vmatmul.mubr.msk.bf16.vlgmr.msra.gmra.mrb[16].mxu0 %vm296_vm2, %v8784_v26 }
  0xff   :  { %v172_v36 = vpop.f32.mrb[8].mxu0  ;;  %7304 = vmatprep.mubr.msk.bf16.mxu1 %vm8577_vm0, %v8576_v1  ;;  %7332 = vmatprep.mubr.msk.bf16.mxu0 %vm8577_vm0, %v8576_v1 }
 0x100   :  { %v7290_v37 = vpop.f32.mrb[9].mxu0  ;;  %v8818_v39 = vadd.f32 %v180_v19, %v172_v36 }
 0x101   :  { %v175_v38 = vpop.f32.mrb[10].mxu0 }
 0x102   :  { %v8820_v40 = vadd.f32 %v181_v28, %v175_v38  ;;  %v7291_v41 = vpop.f32.mrb[11].mxu0 }
 0x104   :  { %v8824_v42 = vpack.c.bf16 %v8820_v40, %v8818_v39 }
 0x106   :  { %7305 = vmatmul.mubr.msk.bf16.gmra.mrb[8].mxu1 %vm296_vm2, %v8824_v42  ;;  %7333 = vmatmul.mubr.msk.bf16.gmra.mrb[20].mxu0 %vm296_vm2, %v8808_v35 }
 0x107   :  { %7316 = vmatprep.mubr.msk.bf16.mxu1 %vm8577_vm0, %v8576_v1  ;;  %7336 = vmatprep.mubr.msk.bf16.mxu0 %vm8577_vm0, %v8576_v1 }
 0x10e   :  { %7317 = vmatmul.mubr.msk.bf16.vlgmr.msra.gmra.mrb[12].mxu1 %vm296_vm2, %v8808_v35  ;;  %7337 = vmatmul.mubr.msk.bf16.gmra.mrb[24].mxu0 %vm296_vm2, %v8824_v42 }
 0x10f   :  { %7320 = vmatprep.mubr.msk.bf16.mxu1 %vm8577_vm0, %v8576_v1 }
 0x116   :  { %7321 = vmatmul.mubr.msk.bf16.gmra.mrb[16].mxu1 %vm296_vm2, %v8824_v42 }
 0x1c9   :  { %v340_v44 = vpop.f32.mrb[0].mxu1  ;;  %v415_v46 = vpop.f32.mrb[12].mxu0 }
 0x1ca   :  { %v7298_v47 = vpop.f32.mrb[1].mxu1  ;;  %v7314_v48 = vpop.f32.mrb[13].mxu0  ;;  %v341_v51 = vadd.f32 %v8845_v43, %v340_v44  ;;  %v416_v52 = vadd.f32 %v8850_v45, %v415_v46 }
 0x1cb   :  { %v343_v49 = vpop.f32.mrb[2].mxu1  ;;  %v418_v50 = vpop.f32.mrb[14].mxu0 }
 0x1cc   :  { %v344_v53 = vadd.f32 %v8845_v43, %v343_v49  ;;  %v419_v54 = vadd.f32 %v8850_v45, %v418_v50  ;;  %v7299_v55 = vpop.f32.mrb[3].mxu1  ;;  %v7315_v56 = vpop.f32.mrb[15].mxu0 }
 0x1ce   :  { %v513_v57 = vpack.c.bf16 %v344_v53, %v341_v51  ;;  %v517_v58 = vpack.c.bf16 %v419_v54, %v416_v52 }
 0x1d0   :  { %8128 = vmatprep.subr.msk.bf16.mxu1 %vm521_vm3, %v517_v58  ;;  %7344 = vmatprep.mubr.msk.bf16.mxu1 %vm521_vm3, %v513_v57  ;;  %v529_v59 = vsel %vm521_vm3, %v517_v58, 0 }
 0x1d1   :  { %v348_v60 = vpop.f32.mrb[4].mxu1  ;;  %v490_v62 = vpop.f32.mrb[16].mxu0  ;;  %7341 = vmatpush3.bf16.xpose.msra.mxu1 %v529_v59 }
 0x1d2   :  { %v7302_v63 = vpop.f32.mrb[5].mxu1  ;;  %v7330_v0 = vpop.f32.mrb[17].mxu0  ;;  %v491_v4 = vadd.f32 %v8862_v61, %v490_v62  ;;  %v349_v44 = vadd.f32 %v8845_v43, %v348_v60 }
 0x1d3   :  { %v351_v2 = vpop.f32.mrb[6].mxu1  ;;  %v493_v3 = vpop.f32.mrb[18].mxu0 }
 0x1d4   :  { %v494_v5 = vadd.f32 %v8862_v61, %v493_v3  ;;  %v7303_v6 = vpop.f32.mrb[7].mxu1  ;;  %v7331_v7 = vpop.f32.mrb[19].mxu0  ;;  %v352_v11 = vadd.f32 %v8845_v43, %v351_v2  ;;  %v514_v52 = vpack.c.bf16 %v349_v44, %v349_v44 }
 0x1d6   :  { %v725_v8 = vpack.c.bf16 %v494_v5, %v491_v4 }
 0x1d9   :  { %v356_v9 = vpop.f32.mrb[8].mxu1  ;;  %v498_v10 = vpop.f32.mrb[20].mxu0 }
 0x1da   :  { %v357_v12 = vadd.f32 %v8845_v43, %v356_v9  ;;  %v7306_v13 = vpop.f32.mrb[9].mxu1  ;;  %v7334_v14 = vpop.f32.mrb[21].mxu0  ;;  %v499_v47 = vadd.f32 %v8862_v61, %v498_v10 }
 0x1db   :  { %v359_v15 = vpop.f32.mrb[10].mxu1  ;;  %v501_v16 = vpop.f32.mrb[22].mxu0  ;;  %v8578_v13 = vmov -1e+09  }
 0x1dc   :  { %v515_v17 = vpack.c.bf16 %v357_v12, %v352_v11  ;;  %v7307_v18 = vpop.f32.mrb[11].mxu1  ;;  %v7335_v19 = vpop.f32.mrb[23].mxu0  ;;  %v502_v24 = vadd.f32 %v8862_v61, %v501_v16  ;;  %v726_v56 = vpack.c.bf16 %v499_v47, %v499_v47  ;;  %v360_v60 = vadd.f32 %v8845_v43, %v359_v15 }
 0x1dd   :  { %v188_v43 = vlaneseq }
 0x1de   :  { %7352 = vmatprep.mubr.msk.bf16.mxu0 %vm521_vm3, %v515_v17  ;;  %v737_v59 = vsel %vm735_vm4, %v726_v56, 0  ;;  %v516_v63 = vpack.c.bf16 %v360_v60, %v360_v60 }
 0x1df   :  { %v189_v7 = vand.u32 127, %v188_v43 }
 0x1e1   :  { %v423_v20 = vpop.f32.mrb[12].mxu1  ;;  %v506_v21 = vpop.f32.mrb[24].mxu0  ;;  %vm190_vm5 = vcmp.lt.s32.totalorder %v189_v7, 17 }
 0x1e2   :  { %v424_v25 = vadd.f32 %v8850_v45, %v423_v20  ;;  %v507_v27 = vadd.f32 %v8862_v61, %v506_v21  ;;  %v7318_v28 = vpop.f32.mrb[13].mxu1  ;;  %v7338_v29 = vpop.f32.mrb[25].mxu0  ;;  %v8893_v14 = vsel %vm190_vm5, 0.0, %v8578_v13 }
 0x1e3   :  { %v426_v30 = vpop.f32.mrb[14].mxu1  ;;  %v509_v31 = vpop.f32.mrb[26].mxu0 }
 0x1e4   :  { %v518_v34 = vpack.c.bf16 %v424_v25, %v424_v25  ;;  %v727_v36 = vpack.c.bf16 %v507_v27, %v502_v24  ;;  %v7319_v37 = vpop.f32.mrb[15].mxu1  ;;  %v7339_v38 = vpop.f32.mrb[27].mxu0  ;;  %v427_v48 = vadd.f32 %v8850_v45, %v426_v30  ;;  %v510_v62 = vadd.f32 %v8862_v61, %v509_v31 }
 0x1e6   :  { %8129 = vmatprep.subr.msk.bf16.mxu1 %vm521_vm3, %v518_v34  ;;  %v532_v41 = vsel %vm521_vm3, %v518_v34, 0  ;;  %v728_v0 = vpack.c.bf16 %v510_v62, %v510_v62 }
 0x1e7   :  { %7343 = vmatpush3.bf16.xpose.msra.mxu1 %v532_v41 }
 0x1e8   :  { %7356 = vmatprep.subr.bf16.mxu1 %v725_v8  ;;  %v794_v2 = vsel %vm735_vm4, %v728_v0, 0 }
 0x1e9   :  { %v431_v46 = vpop.f32.mrb[16].mxu1 }
 0x1ea   :  { %v432_v49 = vadd.f32 %v8850_v45, %v431_v46  ;;  %v7322_v50 = vpop.f32.mrb[17].mxu1 }
 0x1eb   :  { %v434_v51 = vpop.f32.mrb[18].mxu1 }
 0x1ec   :  { %v519_v53 = vpack.c.bf16 %v432_v49, %v427_v48  ;;  %v435_v54 = vadd.f32 %v8850_v45, %v434_v51  ;;  %v7323_v55 = vpop.f32.mrb[19].mxu1 }
 0x1ee   :  { %v520_v57 = vpack.c.bf16 %v435_v54, %v435_v54  ;;  %7345 = vmatmul.mubr.msk.bf16.vlgmr.msra.gmra.mrb[20].mxu1 %vm521_vm3, %v514_v52  ;;  %8130 = vmatprep.subr.msk.bf16.mxu0 %vm521_vm3, %v519_v53  ;;  %v589_v58 = vsel %vm521_vm3, %v519_v53, 0 }
 0x1ef   :  { %7349 = vmatpush3.bf16.xpose.msra.mxu0 %v589_v58  ;;  %7357 = vmatpush3.bf16.msra.mxu1 %v725_v8 }
 0x1f0   :  { %8131 = vmatprep.subr.msk.bf16.mxu0 %vm521_vm3, %v520_v57  ;;  %8132 = vmatprep.subr.msk.bf16.mxu1 %vm735_vm4, %v726_v56  ;;  %v592_v45 = vsel %vm521_vm3, %v520_v57, 0 }
 0x1f3   :  { %7359 = vmatpush3.bf16.msra.mxu1 %v737_v59 }
 0x1f4   :  { %7372 = vmatprep.subr.bf16.mxu1 %v8576_v1 }
 0x1f7   :  { %7351 = vmatpush3.bf16.xpose.msra.mxu0 %v592_v45 }
 0x1f8   :  { %7364 = vmatprep.subr.bf16.mxu0 %v727_v36 }
 0x1fe   :  { %7353 = vmatmul.mubr.msk.bf16.vlgmr.msra.gmra.mrb[28].mxu0 %vm521_vm3, %v516_v63 }
 0x1ff   :  { %7365 = vmatpush3.bf16.msra.mxu0 %v727_v36 }
 0x200   :  { %8133 = vmatprep.subr.msk.bf16.mxu0 %vm735_vm4, %v728_v0 }
 0x203   :  { %7367 = vmatpush3.bf16.msra.mxu0 %v794_v2 }
 0x204   :  { %7388 = vmatprep.subr.bf16.mxu0 %v8576_v1 }
 0x2c1   :  { %v7346_v3 = vpop.f32.mrb[20].mxu1 }
 0x2c2   :  { %v568_v4 = vpop.f32.mrb[21].mxu1  ;;  %v644_v19 = vmul.f32 0.35355338, %v7346_v3 }
 0x2c3   :  { %v7347_v5 = vpop.f32.mrb[22].mxu1  ;;  %v642_v8 = vmul.f32 0.35355338, %v568_v4 }
 0x2c4   :  { %v571_v6 = vpop.f32.mrb[23].mxu1  ;;  %v650_v29 = vadd.f32 %v644_v19, %v8893_v14 }
 0x2c5   :  { %v648_v21 = vadd.f32 %v642_v8, %v8893_v14  ;;  %v643_v24 = vmul.f32 0.35355338, %v571_v6 }
 0x2c6   :  { %v661_v34 = vsel %vm654_vm6, %v650_v29, -inf }
 0x2c7   :  { %v655_v28 = vsel %vm654_vm6, %v648_v21, -inf  ;;  %v649_v31 = vadd.f32 %v643_v24, %v8893_v14 }
 0x2c9   :  { %v658_v36 = vsel %vm654_vm6, %v649_v31, -inf }
 0x2d1   :  { %v7354_v61 = vpop.f32.mrb[28].mxu0 }
 0x2d2   :  { %v647_v9 = vmul.f32 0.35355338, %v7354_v61  ;;  %v628_v10 = vpop.f32.mrb[29].mxu0 }
 0x2d3   :  { %v645_v11 = vmul.f32 0.35355338, %v628_v10  ;;  %v7355_v12 = vpop.f32.mrb[30].mxu0 }
 0x2d4   :  { %v631_v15 = vpop.f32.mrb[31].mxu0  ;;  %v653_v16 = vadd.f32 %v647_v9, %v8893_v14 }
 0x2d5   :  { %v646_v17 = vmul.f32 0.35355338, %v631_v15  ;;  %v651_v18 = vadd.f32 %v645_v11, %v8893_v14 }
 0x2d6   :  { %v670_v20 = vsel %vm654_vm6, %v653_v16, -inf }
 0x2d7   :  { %671 = vmax.xlane.f32.xlu1 %v670_v20  ;;  %v664_v25 = vsel %vm654_vm6, %v651_v18, -inf  ;;  %v652_v27 = vadd.f32 %v646_v17, %v8893_v14 }
 0x2d8   :  { %665 = vmax.xlane.f32.xlu0 %v664_v25 }
 0x2d9   :  { %v667_v30 = vsel %vm654_vm6, %v652_v27, -inf }
 0x2db   :  { %656 = vmax.xlane.f32.xlu1 %v655_v28 }
 0x2dc   :  { %668 = vmax.xlane.f32.xlu0 %v667_v30  ;;  %v8193_v30 = vld [vmem:[%s10451_s25 + $0x18] sm:$0xff]  }
 0x2df   :  { %662 = vmax.xlane.f32.xlu1 %v661_v34 }
 0x2e0   :  { %659 = vmax.xlane.f32.xlu0 %v658_v36 }
 0x364   :  { %v672_v37 = vpop.xlane.xlu1 %671 }
 0x365   :  { %v678_v38 = vsub.f32 %v653_v16, %v672_v37  ;;  %v666_v41 = vpop.xlane.xlu0 %665  ;;  %v8194_v37 = vld [vmem:[%s10450_s0 + $0x10] sm:$0xff]  }
 0x366   :  { %v676_v44 = vsub.f32 %v651_v18, %v666_v41  ;;  %v8195_v41 = vld [vmem:[%s10450_s0 + $0x18] sm:$0xff]  }
 0x367   :  { %v689_v46 = vmul.f32 1.442695, %v678_v38 }
 0x368   :  { %v685_v47 = vmul.f32 1.442695, %v676_v44  ;;  %v657_v48 = vpop.xlane.xlu1 %656  ;;  %v8196_v44 = vld [vmem:[%s10453_s7 + $0x10] sm:$0xff]  }
 0x369   :  { %v673_v49 = vsub.f32 %v648_v21, %v657_v48  ;;  %v669_v50 = vpop.xlane.xlu0 %668  ;;  %v8192_v21 = vld [vmem:[%s10451_s25 + $0x10] sm:$0xff]  }
 0x36a   :  { %8248 = vpow2.f32 %v685_v47  ;;  %v677_v51 = vsub.f32 %v652_v27, %v669_v50 }
 0x36b   :  { %8250 = vpow2.f32 %v689_v46  ;;  %v679_v52 = vmul.f32 1.442695, %v673_v49  ;;  %v8197_v46 = vld [vmem:[%s10453_s7 + $0x18] sm:$0xff]  }
 0x36c   :  { %v687_v53 = vmul.f32 1.442695, %v677_v51  ;;  %v663_v54 = vpop.xlane.xlu1 %662 }
 0x36d   :  { %v675_v55 = vsub.f32 %v650_v29, %v663_v54  ;;  %v660_v56 = vpop.xlane.xlu0 %659 }
 0x36e   :  { %8252 = vpow2.f32 %v687_v53  ;;  %v674_v57 = vsub.f32 %v649_v31, %v660_v56 }
 0x36f   :  { %8254 = vpow2.f32 %v679_v52  ;;  %v683_v58 = vmul.f32 1.442695, %v675_v55  ;;  %v6634_v55 = vld [vmem:[%s10455_s6 + $0x1] ss:$0 sm:$0xff] }
 0x370   :  { %v681_v59 = vmul.f32 1.442695, %v674_v57 }
 0x372   :  { %8256 = vpow2.f32 %v681_v59 }
 0x373   :  { %8258 = vpow2.f32 %v683_v58 }
 0x374   :  { %v8249_v45 = vpop.eup %8248 }
 0x375   :  { %v700_v60 = vsel %vm654_vm6, %v8249_v45, 0.0  ;;  %v8251_v62 = vpop.eup %8250 }
 0x376   :  { %701 = vadd.xlane.f32.xlu0 %v700_v60  ;;  %v706_v0 = vsel %vm654_vm6, %v8251_v62, 0.0 }
 0x378   :  { %v8253_v63 = vpop.eup %8252 }
 0x379   :  { %v703_v2 = vsel %vm654_vm6, %v8253_v63, 0.0  ;;  %v8255_v3 = vpop.eup %8254 }
 0x37a   :  { %707 = vadd.xlane.f32.xlu0 %v706_v0  ;;  %704 = vadd.xlane.f32.xlu1 %v703_v2  ;;  %v691_v5 = vsel %vm654_vm6, %v8255_v3, 0.0 }
 0x37c   :  { %v8257_v4 = vpop.eup %8256 }
 0x37d   :  { %v694_v6 = vsel %vm654_vm6, %v8257_v4, 0.0  ;;  %v8259_v43 = vpop.eup %8258 }
 0x37e   :  { %692 = vadd.xlane.f32.xlu1 %v691_v5  ;;  %695 = vadd.xlane.f32.xlu0 %v694_v6  ;;  %v697_v7 = vsel %vm654_vm6, %v8259_v43, 0.0 }
 0x382   :  { %698 = vadd.xlane.f32.xlu1 %v697_v7 }
 0x403   :  { %v702_v61 = vpop.xlane.xlu0 %701 }
 0x404   :  { %8260 = vrcp.f32 %v702_v61 }
 0x407   :  { %v705_v8 = vpop.xlane.xlu1 %704  ;;  %v708_v9 = vpop.xlane.xlu0 %707 }
 0x408   :  { %8262 = vrcp.f32 %v705_v8 }
 0x409   :  { %8264 = vrcp.f32 %v708_v9 }
 0x40b   :  { %v693_v10 = vpop.xlane.xlu1 %692  ;;  %v696_v11 = vpop.xlane.xlu0 %695 }
 0x40c   :  { %8266 = vrcp.f32 %v693_v10 }
 0x40d   :  { %8268 = vrcp.f32 %v696_v11 }
 0x40e   :  { %v8261_v13 = vpop.eup %8260 }
 0x40f   :  { %v699_v12 = vpop.xlane.xlu1 %698  ;;  %v716_v17 = vmul.f32 %v8261_v13, %v8249_v45 }
 0x410   :  { %8270 = vrcp.f32 %v699_v12 }
 0x412   :  { %v8263_v15 = vpop.eup %8262 }
 0x413   :  { %v8265_v16 = vpop.eup %8264  ;;  %v718_v18 = vmul.f32 %v8263_v15, %v8253_v63 }
 0x414   :  { %v720_v19 = vmul.f32 %v8265_v16, %v8251_v62 }
 0x415   :  { %v723_v20 = vpack.c.bf16 %v718_v18, %v716_v17 }
 0x416   :  { %v8267_v24 = vpop.eup %8266  ;;  %v724_v25 = vpack.c.bf16 %v720_v19, %v720_v19 }
 0x417   :  { %v8269_v27 = vpop.eup %8268  ;;  %7368 = vmatprep.mubr.msk.bf16.mxu0 %vm654_vm6, %v723_v20  ;;  %v710_v28 = vmul.f32 %v8267_v24, %v8255_v3  ;;  %v6628_v3 = vld [vmem:[%s10454_s26 + $0x1] ss:$0 sm:$0xff] }
 0x418   :  { %7369 = vmatmul.mubr.msk.bf16.vlgmr.msra.gmra.mrb[32].mxu0 %vm654_vm6, %v724_v25  ;;  %v712_v29 = vmul.f32 %v8269_v27, %v8257_v4 }
 0x419   :  { %7389 = vmatpush3.bf16.msra.mxu0 %v8192_v21  ;;  %7392 = vmatprep.mubr.msk.bf16.mxu0 %vm8577_vm0, %v8576_v1 }
 0x41a   :  { %v8271_v31 = vpop.eup %8270  ;;  %v721_v34 = vpack.c.bf16 %v712_v29, %v710_v28  ;;  %7390 = vmatprep.subr.bf16.mxu0 %v8576_v1 }
 0x41b   :  { %v714_v36 = vmul.f32 %v8271_v31, %v8259_v43 }
 0x41c   :  { %7360 = vmatprep.mubr.msk.bf16.mxu1 %vm654_vm6, %v721_v34 }
 0x41d   :  { %7391 = vmatpush3.bf16.msra.mxu0 %v8193_v30  ;;  %v722_v38 = vpack.c.bf16 %v714_v36, %v714_v36 }
 0x41f   :  { %7361 = vmatmul.mubr.msk.bf16.vlgmr.msra.gmra.mrb[24].mxu1 %vm654_vm6, %v722_v38 }
 0x420   :  { %7373 = vmatpush3.bf16.msra.mxu1 %v8194_v37  ;;  %7393 = vmatmul.mubr.msk.bf16.vlgmr.msra.gmra.mrb[36].mxu0 %vm296_vm2, %v8784_v26 }
 0x421   :  { %7374 = vmatprep.subr.bf16.mxu1 %v8576_v1  ;;  %7376 = vmatprep.mubr.msk.bf16.mxu1 %vm8577_vm0, %v8576_v1 }
 0x422   :  { %7396 = vmatprep.mubr.msk.bf16.mxu0 %vm8577_vm0, %v8576_v1 }
 0x424   :  { %7375 = vmatpush3.bf16.msra.mxu1 %v8195_v41 }
 0x425   :  { %7404 = vmatprep.subr.bf16.mxu1 %v8576_v1 }
 0x427   :  { %7377 = vmatmul.mubr.msk.bf16.vlgmr.msra.gmra.mrb[28].mxu1 %vm296_vm2, %v8784_v26 }
 0x428   :  { %7397 = vmatmul.mubr.msk.bf16.gmra.mrb[40].mxu0 %vm296_vm2, %v8808_v35  ;;  %7380 = vmatprep.mubr.msk.bf16.mxu1 %vm8577_vm0, %v8576_v1 }
 0x429   :  { %7400 = vmatprep.mubr.msk.bf16.mxu0 %vm8577_vm0, %v8576_v1  ;;  %7405 = vmatpush3.bf16.msra.mxu1 %v8196_v44 }
 0x42a   :  { %7406 = vmatprep.subr.bf16.mxu1 %v8576_v1 }
 0x42d   :  { %7407 = vmatpush3.bf16.msra.mxu1 %v8197_v46 }
 0x42f   :  { %7381 = vmatmul.mubr.msk.bf16.gmra.mrb[32].mxu1 %vm296_vm2, %v8808_v35 }
 0x430   :  { %7401 = vmatmul.mubr.msk.bf16.gmra.mrb[44].mxu0 %vm296_vm2, %v8824_v42  ;;  %7384 = vmatprep.mubr.msk.bf16.mxu1 %vm8577_vm0, %v8576_v1 }
 0x437   :  { %7385 = vmatmul.mubr.msk.bf16.gmra.mrb[36].mxu1 %vm296_vm2, %v8824_v42 }
 0x438   :  { %7408 = vmatprep.mubr.msk.bf16.mxu1 %vm8577_vm0, %v8576_v1 }
 0x43f   :  { %7409 = vmatmul.mubr.msk.bf16.vlgmr.msra.gmra.mrb[40].mxu1 %vm296_vm2, %v8784_v26 }
 0x440   :  { %7412 = vmatprep.mubr.msk.bf16.mxu1 %vm8577_vm0, %v8576_v1 }
 0x447   :  { %7413 = vmatmul.mubr.msk.bf16.gmra.mrb[44].mxu1 %vm296_vm2, %v8808_v35 }
 0x448   :  { %7416 = vmatprep.mubr.msk.bf16.mxu1 %vm8577_vm0, %v8576_v1 }
 0x44f   :  { %7417 = vmatmul.mubr.msk.bf16.gmra.mrb[48].mxu1 %vm296_vm2, %v8824_v42 }
 0x4eb   :  { %v8975_v47 = vpop.f32.mrb[32].mxu0 }
 0x4ec   :  { %v8977_v48 = vpop.f32.mrb[33].mxu0 }
 0x4ed   :  { %v7371_v49 = vpop.f32.mrb[34].mxu0 }
 0x4ee   :  { %v8979_v50 = vpop.f32.mrb[35].mxu0 }
 0x4ef   :  { %v846_v51 = vpack.c.bf16 %v8975_v47, %v8979_v50  ;;  %v253_v47 = vld [vmem:[%s10414_s9 + $0x4] sm:$0xf] }
 0x4f2   :  { %v8983_v52 = vpop.f32.mrb[24].mxu1 }
 0x4f3   :  { %v845_v53 = vpack.c.bf16 %v8977_v48, %v8983_v52  ;;  %v8987_v54 = vpop.f32.mrb[25].mxu1  ;;  %v974_v56 = vpop.f32.mrb[36].mxu0  ;;  %v1413_v48 = vsel %vm735_vm4, %v253_v47, 0 }
 0x4f4   :  { %v7363_v57 = vpop.f32.mrb[26].mxu1  ;;  %v7394_v58 = vpop.f32.mrb[37].mxu0  ;;  %v975_v60 = vadd.f32 %v6634_v55, %v974_v56 }
 0x4f5   :  { %v8992_v59 = vpop.f32.mrb[27].mxu1  ;;  %v977_v45 = vpop.f32.mrb[38].mxu0 }
 0x4f6   :  { %v844_v62 = vpack.c.bf16 %v8992_v59, %v8987_v54  ;;  %v978_v63 = vadd.f32 %v6634_v55, %v977_v45  ;;  %v7395_v0 = vpop.f32.mrb[39].mxu0  ;;  %v8200_v54 = vld [vmem:[%s10450_s0 + $0x20] sm:$0xff]  }
 0x4f8   :  { %v1076_v2 = vpack.c.bf16 %v978_v63, %v975_v60  ;;  %v6640_v60 = vld [vmem:[%s10456_s3 + $0x1] ss:$0 sm:$0xff] }
 0x4fa   :  { %v899_v4 = vpop.f32.mrb[28].mxu1  ;;  %8134 = vmatprep.subr.msk.bf16.mxu0 %vm521_vm3, %v1076_v2  ;;  %v1087_v5 = vsel %vm521_vm3, %v1076_v2, 0 }
 0x4fb   :  { %v7378_v6 = vpop.f32.mrb[29].mxu1  ;;  %v982_v43 = vpop.f32.mrb[40].mxu0  ;;  %7421 = vmatpush3.bf16.xpose.msra.mxu0 %v1087_v5  ;;  %v900_v9 = vadd.f32 %v6628_v3, %v899_v4 }
 0x4fc   :  { %v983_v7 = vadd.f32 %v6634_v55, %v982_v43  ;;  %v902_v61 = vpop.f32.mrb[30].mxu1  ;;  %v7398_v8 = vpop.f32.mrb[41].mxu0 }
 0x4fd   :  { %v903_v10 = vadd.f32 %v6628_v3, %v902_v61  ;;  %v7379_v11 = vpop.f32.mrb[31].mxu1  ;;  %v985_v12 = vpop.f32.mrb[42].mxu0 }
 0x4fe   :  { %v1077_v13 = vpack.c.bf16 %v983_v7, %v983_v7  ;;  %v7399_v15 = vpop.f32.mrb[43].mxu0  ;;  %v986_v21 = vadd.f32 %v6634_v55, %v985_v12 }
 0x4ff   :  { %v1072_v16 = vpack.c.bf16 %v903_v10, %v900_v9 }
 0x500   :  { %8135 = vmatprep.subr.msk.bf16.mxu0 %vm521_vm3, %v1077_v13  ;;  %v1090_v17 = vsel %vm521_vm3, %v1077_v13, 0 }
 0x501   :  { %7424 = vmatprep.mubr.msk.bf16.mxu0 %vm521_vm3, %v1072_v16 }
 0x502   :  { %v907_v18 = vpop.f32.mrb[32].mxu1 }
 0x503   :  { %v7382_v19 = vpop.f32.mrb[33].mxu1  ;;  %v990_v20 = vpop.f32.mrb[44].mxu0  ;;  %7423 = vmatpush3.bf16.xpose.msra.mxu0 %v1090_v17  ;;  %v908_v24 = vadd.f32 %v6628_v3, %v907_v18 }
 0x504   :  { %v991_v25 = vadd.f32 %v6634_v55, %v990_v20  ;;  %v910_v27 = vpop.f32.mrb[34].mxu1  ;;  %v7402_v28 = vpop.f32.mrb[45].mxu0 }
 0x505   :  { %v7383_v29 = vpop.f32.mrb[35].mxu1  ;;  %v993_v30 = vpop.f32.mrb[46].mxu0  ;;  %v1073_v37 = vpack.c.bf16 %v908_v24, %v908_v24  ;;  %v911_v46 = vadd.f32 %v6628_v3, %v910_v27 }
 0x506   :  { %v1078_v31 = vpack.c.bf16 %v991_v25, %v986_v21  ;;  %v994_v34 = vadd.f32 %v6634_v55, %v993_v30  ;;  %v7403_v36 = vpop.f32.mrb[47].mxu0 }
 0x508   :  { %8136 = vmatprep.subr.msk.bf16.mxu0 %vm521_vm3, %v1078_v31  ;;  %v1079_v38 = vpack.c.bf16 %v994_v34, %v994_v34  ;;  %v1147_v44 = vsel %vm521_vm3, %v1078_v31, 0 }
 0x50a   :  { %v915_v41 = vpop.f32.mrb[36].mxu1  ;;  %7425 = vmatmul.mubr.msk.bf16.vlgmr.msra.gmra.mrb[48].mxu0 %vm521_vm3, %v1073_v37  ;;  %v1150_v55 = vsel %vm521_vm3, %v1079_v38, 0 }
 0x50b   :  { %v916_v49 = vadd.f32 %v6628_v3, %v915_v41  ;;  %v7386_v56 = vpop.f32.mrb[37].mxu1  ;;  %7429 = vmatpush3.bf16.xpose.msra.mxu0 %v1147_v44 }
 0x50c   :  { %v918_v57 = vpop.f32.mrb[38].mxu1  ;;  %8137 = vmatprep.subr.msk.bf16.mxu0 %vm521_vm3, %v1079_v38 }
 0x50d   :  { %v1074_v58 = vpack.c.bf16 %v916_v49, %v911_v46  ;;  %v7387_v45 = vpop.f32.mrb[39].mxu1  ;;  %v919_v2 = vadd.f32 %v6628_v3, %v918_v57 }
 0x50f   :  { %7432 = vmatprep.mubr.msk.bf16.mxu0 %vm521_vm3, %v1074_v58  ;;  %v1075_v61 = vpack.c.bf16 %v919_v2, %v919_v2 }
 0x512   :  { %v1049_v63 = vpop.f32.mrb[40].mxu1 }
 0x513   :  { %v7410_v0 = vpop.f32.mrb[41].mxu1  ;;  %7431 = vmatpush3.bf16.xpose.msra.mxu0 %v1150_v55  ;;  %v1050_v5 = vadd.f32 %v6640_v60, %v1049_v63 }
 0x514   :  { %v1052_v4 = vpop.f32.mrb[42].mxu1 }
 0x515   :  { %v1053_v6 = vadd.f32 %v6640_v60, %v1052_v4  ;;  %v7411_v43 = vpop.f32.mrb[43].mxu1 }
 0x517   :  { %v1282_v7 = vpack.c.bf16 %v1053_v6, %v1050_v5 }
 0x519   :  { %7436 = vmatprep.subr.bf16.mxu1 %v1282_v7 }
 0x51a   :  { %v1057_v8 = vpop.f32.mrb[44].mxu1  ;;  %7433 = vmatmul.mubr.msk.bf16.vlgmr.msra.gmra.mrb[52].mxu0 %vm521_vm3, %v1075_v61  ;;  %7437 = vmatpush3.bf16.msra.mxu1 %v1282_v7 }
 0x51b   :  { %v1058_v9 = vadd.f32 %v6640_v60, %v1057_v8  ;;  %v7414_v10 = vpop.f32.mrb[45].mxu1 }
 0x51c   :  { %v1060_v11 = vpop.f32.mrb[46].mxu1 }
 0x51d   :  { %v1283_v12 = vpack.c.bf16 %v1058_v9, %v1058_v9  ;;  %v7415_v13 = vpop.f32.mrb[47].mxu1  ;;  %v1061_v16 = vadd.f32 %v6640_v60, %v1060_v11 }
 0x51f   :  { %v1293_v15 = vsel %vm735_vm4, %v1283_v12, 0  ;;  %8138 = vmatprep.subr.msk.bf16.mxu1 %vm735_vm4, %v1283_v12 }
 0x520   :  { %7439 = vmatpush3.bf16.msra.mxu1 %v1293_v15 }
 0x521   :  { %7452 = vmatprep.subr.bf16.mxu1 %v8576_v1 }
 0x522   :  { %v1065_v3 = vpop.f32.mrb[48].mxu1 }
 0x523   :  { %v1066_v17 = vadd.f32 %v6640_v60, %v1065_v3  ;;  %v7418_v18 = vpop.f32.mrb[49].mxu1 }
 0x524   :  { %v1068_v19 = vpop.f32.mrb[50].mxu1 }
 0x525   :  { %v1284_v20 = vpack.c.bf16 %v1066_v17, %v1061_v16  ;;  %v1069_v21 = vadd.f32 %v6640_v60, %v1068_v19  ;;  %v7419_v24 = vpop.f32.mrb[51].mxu1 }
 0x527   :  { %v1285_v25 = vpack.c.bf16 %v1069_v21, %v1069_v21  ;;  %7444 = vmatprep.subr.bf16.mxu0 %v1284_v20 }
 0x528   :  { %7445 = vmatpush3.bf16.msra.mxu0 %v1284_v20 }
 0x529   :  { %8139 = vmatprep.subr.msk.bf16.mxu0 %vm735_vm4, %v1285_v25  ;;  %v1350_v27 = vsel %vm735_vm4, %v1285_v25, 0 }
 0x52c   :  { %7447 = vmatpush3.bf16.msra.mxu0 %v1350_v27 }
 0x52d   :  { %7466 = vmatprep.subr.bf16.mxu0 %v8576_v1 }
 0x5dd   :  { %v7426_v28 = vpop.f32.mrb[48].mxu0 }
 0x5de   :  { %v1126_v29 = vpop.f32.mrb[49].mxu0  ;;  %v1202_v30 = vmul.f32 0.35355338, %v7426_v28 }
 0x5df   :  { %v1200_v31 = vmul.f32 0.35355338, %v1126_v29  ;;  %v7427_v34 = vpop.f32.mrb[50].mxu0 }
 0x5e0   :  { %v1129_v36 = vpop.f32.mrb[51].mxu0  ;;  %v1208_v46 = vadd.f32 %v1202_v30, %v8893_v14 }
 0x5e1   :  { %v1201_v37 = vmul.f32 0.35355338, %v1129_v36  ;;  %v1206_v38 = vadd.f32 %v1200_v31, %v8893_v14 }
 0x5e2   :  { %v1218_v56 = vsel %vm654_vm6, %v1208_v46, -inf }
 0x5e3   :  { %v1212_v41 = vsel %vm654_vm6, %v1206_v38, -inf  ;;  %v1207_v44 = vadd.f32 %v1201_v37, %v8893_v14 }
 0x5e4   :  { %1213 = vmax.xlane.f32.xlu0 %v1212_v41 }
 0x5e5   :  { %v1215_v49 = vsel %vm654_vm6, %v1207_v44, -inf }
 0x5e6   :  { %1216 = vmax.xlane.f32.xlu1 %v1215_v49 }
 0x5e8   :  { %1219 = vmax.xlane.f32.xlu0 %v1218_v56 }
 0x5ed   :  { %v7434_v57 = vpop.f32.mrb[52].mxu0 }
 0x5ee   :  { %v1186_v58 = vpop.f32.mrb[53].mxu0  ;;  %v1205_v45 = vmul.f32 0.35355338, %v7434_v57 }
 0x5ef   :  { %v1203_v55 = vmul.f32 0.35355338, %v1186_v58  ;;  %v7435_v60 = vpop.f32.mrb[54].mxu0 }
 0x5f0   :  { %v1189_v63 = vpop.f32.mrb[55].mxu0  ;;  %v1211_v6 = vadd.f32 %v1205_v45, %v8893_v14 }
 0x5f1   :  { %v1204_v0 = vmul.f32 0.35355338, %v1189_v63  ;;  %v1209_v2 = vadd.f32 %v1203_v55, %v8893_v14 }
 0x5f2   :  { %v1227_v7 = vsel %vm654_vm6, %v1211_v6, -inf }
 0x5f3   :  { %v1221_v4 = vsel %vm654_vm6, %v1209_v2, -inf  ;;  %v1210_v5 = vadd.f32 %v1204_v0, %v8893_v14 }
 0x5f4   :  { %1222 = vmax.xlane.f32.xlu1 %v1221_v4 }
 0x5f5   :  { %v1224_v43 = vsel %vm654_vm6, %v1210_v5, -inf }
 0x5f6   :  { %1225 = vmax.xlane.f32.xlu0 %v1224_v43 }
 0x5f8   :  { %1228 = vmax.xlane.f32.xlu1 %v1227_v7 }
 0x671   :  { %v1214_v61 = vpop.xlane.xlu0 %1213 }
 0x672   :  { %v1230_v8 = vsub.f32 %v1206_v38, %v1214_v61 }
 0x673   :  { %v1217_v9 = vpop.xlane.xlu1 %1216 }
 0x674   :  { %v1236_v10 = vmul.f32 1.442695, %v1230_v8  ;;  %v1231_v11 = vsub.f32 %v1207_v44, %v1217_v9 }
 0x675   :  { %v1220_v12 = vpop.xlane.xlu0 %1219 }
 0x676   :  { %8272 = vpow2.f32 %v1236_v10  ;;  %v1238_v13 = vmul.f32 1.442695, %v1231_v11  ;;  %v1232_v15 = vsub.f32 %v1208_v46, %v1220_v12  ;;  %v252_v12 = vld [vmem:[%s10414_s9] sm:$0xf] }
 0x678   :  { %8274 = vpow2.f32 %v1238_v13  ;;  %v1240_v3 = vmul.f32 1.442695, %v1232_v15 }
 0x67a   :  { %8276 = vpow2.f32 %v1240_v3 }
 0x680   :  { %v8273_v16 = vpop.eup %8272 }
 0x681   :  { %v1223_v17 = vpop.xlane.xlu1 %1222  ;;  %v1248_v18 = vsel %vm654_vm6, %v8273_v16, 0.0 }
 0x682   :  { %v8275_v19 = vpop.eup %8274  ;;  %v1233_v20 = vsub.f32 %v1209_v2, %v1223_v17  ;;  %1249 = vadd.xlane.f32.xlu0 %v1248_v18  ;;  %v8198_v17 = vld [vmem:[%s10451_s25 + $0x20] sm:$0xff]   ;;  %v8199_v18 = vld [vmem:[%s10451_s25 + $0x28] sm:$0xff]  }
 0x683   :  { %v1226_v21 = vpop.xlane.xlu0 %1225  ;;  %v1251_v24 = vsel %vm654_vm6, %v8275_v19, 0.0 }
 0x684   :  { %v8277_v25 = vpop.eup %8276  ;;  %v1242_v27 = vmul.f32 1.442695, %v1233_v20  ;;  %v1234_v28 = vsub.f32 %v1210_v5, %v1226_v21  ;;  %1252 = vadd.xlane.f32.xlu1 %v1251_v24 }
 0x685   :  { %v1229_v29 = vpop.xlane.xlu1 %1228  ;;  %v1254_v30 = vsel %vm654_vm6, %v8277_v25, 0.0 }
 0x686   :  { %8278 = vpow2.f32 %v1242_v27  ;;  %v1244_v31 = vmul.f32 1.442695, %v1234_v28  ;;  %v1235_v34 = vsub.f32 %v1211_v6, %v1229_v29  ;;  %1255 = vadd.xlane.f32.xlu0 %v1254_v30 }
 0x688   :  { %8280 = vpow2.f32 %v1244_v31  ;;  %v1246_v36 = vmul.f32 1.442695, %v1235_v34 }
 0x68a   :  { %8282 = vpow2.f32 %v1246_v36 }
 0x690   :  { %v8279_v37 = vpop.eup %8278 }
 0x691   :  { %v1257_v38 = vsel %vm654_vm6, %v8279_v37, 0.0 }
 0x692   :  { %v8281_v41 = vpop.eup %8280  ;;  %1258 = vadd.xlane.f32.xlu1 %v1257_v38 }
 0x693   :  { %v1260_v44 = vsel %vm654_vm6, %v8281_v41, 0.0 }
 0x694   :  { %v8283_v46 = vpop.eup %8282  ;;  %1261 = vadd.xlane.f32.xlu0 %v1260_v44  ;;  %v8203_v44 = vld [vmem:[%s10453_s7 + $0x28] sm:$0xff]  }
 0x695   :  { %v1263_v49 = vsel %vm654_vm6, %v8283_v46, 0.0 }
 0x696   :  { %1264 = vadd.xlane.f32.xlu1 %v1263_v49 }
 0x70f   :  { %v1250_v56 = vpop.xlane.xlu0 %1249 }
 0x710   :  { %8284 = vrcp.f32 %v1250_v56 }
 0x711   :  { %v1253_v57 = vpop.xlane.xlu1 %1252 }
 0x712   :  { %8286 = vrcp.f32 %v1253_v57 }
 0x713   :  { %v1256_v58 = vpop.xlane.xlu0 %1255 }
 0x714   :  { %8288 = vrcp.f32 %v1256_v58  ;;  %v6666_v58 = vld [vmem:[%s10455_s6 + $0x2] ss:$0 sm:$0xff] }
 0x71a   :  { %v8285_v45 = vpop.eup %8284 }
 0x71b   :  { %v1267_v60 = vmul.f32 %v8285_v45, %v8273_v16  ;;  %v1482_v16 = vsel %vm735_vm4, %v252_v12, 0 }
 0x71c   :  { %v8287_v55 = vpop.eup %8286 }
 0x71d   :  { %v1269_v63 = vmul.f32 %v8287_v55, %v8275_v19 }
 0x71e   :  { %v8289_v0 = vpop.eup %8288 }
 0x71f   :  { %v1271_v2 = vmul.f32 %v8289_v0, %v8277_v25  ;;  %v1259_v4 = vpop.xlane.xlu1 %1258  ;;  %v1278_v5 = vpack.c.bf16 %v1269_v63, %v1267_v60 }
 0x720   :  { %8290 = vrcp.f32 %v1259_v4 }
 0x721   :  { %v1279_v6 = vpack.c.bf16 %v1271_v2, %v1271_v2  ;;  %7440 = vmatprep.mubr.msk.bf16.mxu1 %vm654_vm6, %v1278_v5  ;;  %v1262_v43 = vpop.xlane.xlu0 %1261 }
 0x722   :  { %8292 = vrcp.f32 %v1262_v43 }
 0x723   :  { %v1265_v7 = vpop.xlane.xlu1 %1264  ;;  %7441 = vmatmul.mubr.msk.bf16.vlgmr.msra.gmra.mrb[52].mxu1 %vm654_vm6, %v1279_v6 }
 0x724   :  { %8294 = vrcp.f32 %v1265_v7  ;;  %7454 = vmatprep.mubr.msk.bf16.mxu1 %vm8577_vm0, %v8576_v1  ;;  %7453 = vmatpush3.bf16.msra.mxu1 %v1413_v48 }
 0x725   :  { %7480 = vmatprep.subr.bf16.mxu1 %v8576_v1 }
 0x72a   :  { %v8291_v61 = vpop.eup %8290 }
 0x72b   :  { %v1273_v9 = vmul.f32 %v8291_v61, %v8279_v37  ;;  %v8202_v37 = vld [vmem:[%s10453_s7 + $0x20] sm:$0xff]  }
 0x72c   :  { %v8293_v8 = vpop.eup %8292 }
 0x72d   :  { %v1275_v10 = vmul.f32 %v8293_v8, %v8281_v41 }
 0x72e   :  { %v8295_v11 = vpop.eup %8294 }
 0x72f   :  { %v1280_v13 = vpack.c.bf16 %v1275_v10, %v1273_v9  ;;  %v1277_v15 = vmul.f32 %v8295_v11, %v8283_v46 }
 0x731   :  { %7448 = vmatprep.mubr.msk.bf16.mxu0 %vm654_vm6, %v1280_v13  ;;  %v1281_v3 = vpack.c.bf16 %v1277_v15, %v1277_v15 }
 0x733   :  { %7449 = vmatmul.mubr.msk.bf16.vlgmr.msra.gmra.mrb[56].mxu0 %vm654_vm6, %v1281_v3 }
 0x734   :  { %7467 = vmatpush3.bf16.msra.mxu0 %v1482_v16  ;;  %7468 = vmatprep.mubr.msk.bf16.mxu0 %vm8577_vm0, %v8576_v1 }
 0x735   :  { %7496 = vmatprep.subr.bf16.mxu0 %v8576_v1 }
 0x73b   :  { %7469 = vmatmul.mubr.msk.bf16.vlgmr.msra.gmra.mrb[60].mxu0 %vm521_vm3, %v844_v62  ;;  %v8201_v62 = vld [vmem:[%s10450_s0 + $0x28] sm:$0xff]  }
 0x73c   :  { %7472 = vmatprep.mubr.msk.bf16.mxu0 %vm8577_vm0, %v8576_v1  ;;  %7497 = vmatpush3.bf16.msra.mxu0 %v8198_v17 }
 0x73d   :  { %7498 = vmatprep.subr.bf16.mxu0 %v8576_v1 }
 0x740   :  { %7499 = vmatpush3.bf16.msra.mxu0 %v8199_v18 }
 0x743   :  { %7473 = vmatmul.mubr.msk.bf16.gmra.mrb[64].mxu0 %vm521_vm3, %v845_v53 }
 0x744   :  { %7476 = vmatprep.mubr.msk.bf16.mxu0 %vm8577_vm0, %v8576_v1 }
 0x74b   :  { %7477 = vmatmul.mubr.msk.bf16.gmra.mrb[68].mxu0 %vm521_vm3, %v846_v51 }
 0x74c   :  { %7500 = vmatprep.mubr.msk.bf16.mxu0 %vm8577_vm0, %v8576_v1 }
 0x753   :  { %7501 = vmatmul.mubr.msk.bf16.vlgmr.msra.gmra.mrb[72].mxu0 %vm296_vm2, %v8784_v26 }
 0x754   :  { %7504 = vmatprep.mubr.msk.bf16.mxu0 %vm8577_vm0, %v8576_v1 }
 0x75b   :  { %7505 = vmatmul.mubr.msk.bf16.gmra.mrb[76].mxu0 %vm296_vm2, %v8808_v35 }
 0x75c   :  { %7508 = vmatprep.mubr.msk.bf16.mxu0 %vm8577_vm0, %v8576_v1 }
 0x763   :  { %7509 = vmatmul.mubr.msk.bf16.gmra.mrb[80].mxu0 %vm296_vm2, %v8824_v42 }
 0x7f6   :  { %v7442_v50 = vpop.f32.mrb[52].mxu1 }
 0x7f7   :  { %v1329_v51 = vpop.f32.mrb[53].mxu1 }
 0x7f8   :  { %v7443_v52 = vpop.f32.mrb[54].mxu1 }
 0x7f9   :  { %v1332_v53 = vpop.f32.mrb[55].mxu1 }
 0x7fa   :  { %v1400_v59 = vpack.c.bf16 %v1332_v53, %v1329_v51 }
 0x7fc   :  { %7455 = vmatmul.mubr.msk.bf16.vlgmr.msra.gmra.mrb[56].mxu1 %vm521_vm3, %v1400_v59 }
 0x7fd   :  { %7458 = vmatprep.mubr.msk.bf16.mxu1 %vm8577_vm0, %v8576_v1  ;;  %7481 = vmatpush3.bf16.msra.mxu1 %v8200_v54 }
 0x7fe   :  { %7482 = vmatprep.subr.bf16.mxu1 %v8576_v1 }
 0x801   :  { %7483 = vmatpush3.bf16.msra.mxu1 %v8201_v62 }
 0x802   :  { %7512 = vmatprep.subr.bf16.mxu1 %v8576_v1 }
 0x806   :  { %v7450_v19 = vpop.f32.mrb[56].mxu0 }
 0x807   :  { %v1386_v20 = vpop.f32.mrb[57].mxu0 }
 0x808   :  { %v1401_v21 = vpack.c.bf16 %v1386_v20, %v7442_v50  ;;  %v7451_v24 = vpop.f32.mrb[58].mxu0 }
 0x809   :  { %v1389_v25 = vpop.f32.mrb[59].mxu0 }
 0x80a   :  { %v1402_v27 = vpack.c.bf16 %v7450_v19, %v1389_v25  ;;  %7459 = vmatmul.mubr.msk.bf16.gmra.mrb[60].mxu1 %vm521_vm3, %v1401_v21 }
 0x80b   :  { %7462 = vmatprep.mubr.msk.bf16.mxu1 %vm8577_vm0, %v8576_v1 }
 0x80e   :  { %v1518_v28 = vpop.f32.mrb[60].mxu0 }
 0x80f   :  { %v7470_v29 = vpop.f32.mrb[61].mxu0 }
 0x810   :  { %v1521_v30 = vpop.f32.mrb[62].mxu0 }
 0x811   :  { %v7471_v31 = vpop.f32.mrb[63].mxu0 }
 0x812   :  { %7463 = vmatmul.mubr.msk.bf16.gmra.mrb[64].mxu1 %vm521_vm3, %v1402_v27 }
 0x813   :  { %7484 = vmatprep.mubr.msk.bf16.mxu1 %vm8577_vm0, %v8576_v1 }
 0x816   :  { %v1526_v34 = vpop.f32.mrb[64].mxu0 }
 0x817   :  { %v7474_v36 = vpop.f32.mrb[65].mxu0 }
 0x818   :  { %v1529_v38 = vpop.f32.mrb[66].mxu0 }
 0x819   :  { %v7475_v41 = vpop.f32.mrb[67].mxu0 }
 0x81a   :  { %7485 = vmatmul.mubr.msk.bf16.vlgmr.msra.gmra.mrb[68].mxu1 %vm296_vm2, %v8784_v26 }
 0x81b   :  { %7488 = vmatprep.mubr.msk.bf16.mxu1 %vm8577_vm0, %v8576_v1  ;;  %7513 = vmatpush3.bf16.msra.mxu1 %v8202_v37 }
 0x81c   :  { %7514 = vmatprep.subr.bf16.mxu1 %v8576_v1 }
 0x81e   :  { %v1534_v46 = vpop.f32.mrb[68].mxu0 }
 0x81f   :  { %v7478_v49 = vpop.f32.mrb[69].mxu0  ;;  %7515 = vmatpush3.bf16.msra.mxu1 %v8203_v44 }
 0x820   :  { %v1537_v56 = vpop.f32.mrb[70].mxu0 }
 0x821   :  { %v7479_v57 = vpop.f32.mrb[71].mxu0 }
 0x822   :  { %7489 = vmatmul.mubr.msk.bf16.gmra.mrb[72].mxu1 %vm296_vm2, %v8808_v35 }
 0x823   :  { %7492 = vmatprep.mubr.msk.bf16.mxu1 %vm8577_vm0, %v8576_v1 }
 0x826   :  { %v1668_v45 = vpop.f32.mrb[72].mxu0 }
 0x827   :  { %v7502_v55 = vpop.f32.mrb[73].mxu0  ;;  %v1669_v63 = vadd.f32 %v6666_v58, %v1668_v45 }
 0x828   :  { %v1671_v60 = vpop.f32.mrb[74].mxu0 }
 0x829   :  { %v1672_v0 = vadd.f32 %v6666_v58, %v1671_v60  ;;  %v7503_v2 = vpop.f32.mrb[75].mxu0 }
 0x82a   :  { %7493 = vmatmul.mubr.msk.bf16.gmra.mrb[76].mxu1 %vm296_vm2, %v8824_v42 }
 0x82b   :  { %v1770_v4 = vpack.c.bf16 %v1672_v0, %v1669_v63  ;;  %7516 = vmatprep.mubr.msk.bf16.mxu1 %vm8577_vm0, %v8576_v1 }
 0x82d   :  { %8140 = vmatprep.subr.msk.bf16.mxu0 %vm521_vm3, %v1770_v4  ;;  %v1781_v5 = vsel %vm521_vm3, %v1770_v4, 0 }
 0x82e   :  { %v1676_v6 = vpop.f32.mrb[76].mxu0  ;;  %7529 = vmatpush3.bf16.xpose.msra.mxu0 %v1781_v5 }
 0x82f   :  { %v1677_v43 = vadd.f32 %v6666_v58, %v1676_v6  ;;  %v7506_v7 = vpop.f32.mrb[77].mxu0 }
 0x830   :  { %v1679_v61 = vpop.f32.mrb[78].mxu0 }
 0x831   :  { %v1771_v8 = vpack.c.bf16 %v1677_v43, %v1677_v43  ;;  %v7507_v9 = vpop.f32.mrb[79].mxu0  ;;  %v1680_v12 = vadd.f32 %v6666_v58, %v1679_v61 }
 0x832   :  { %7517 = vmatmul.mubr.msk.bf16.vlgmr.msra.gmra.mrb[80].mxu1 %vm296_vm2, %v8784_v26  ;;  %v6672_v9 = vld [vmem:[%s10456_s3 + $0x2] ss:$0 sm:$0xff] }
 0x833   :  { %8141 = vmatprep.subr.msk.bf16.mxu0 %vm521_vm3, %v1771_v8  ;;  %7520 = vmatprep.mubr.msk.bf16.mxu1 %vm8577_vm0, %v8576_v1  ;;  %v1784_v10 = vsel %vm521_vm3, %v1771_v8, 0 }
 0x836   :  { %v1684_v11 = vpop.f32.mrb[80].mxu0  ;;  %7531 = vmatpush3.bf16.xpose.msra.mxu0 %v1784_v10 }
 0x837   :  { %v1685_v13 = vadd.f32 %v6666_v58, %v1684_v11  ;;  %v7510_v15 = vpop.f32.mrb[81].mxu0 }
 0x838   :  { %v1687_v3 = vpop.f32.mrb[82].mxu0 }
 0x839   :  { %v1772_v16 = vpack.c.bf16 %v1685_v13, %v1680_v12  ;;  %v1688_v17 = vadd.f32 %v6666_v58, %v1687_v3  ;;  %v7511_v18 = vpop.f32.mrb[83].mxu0 }
 0x83a   :  { %7521 = vmatmul.mubr.msk.bf16.gmra.mrb[84].mxu1 %vm296_vm2, %v8808_v35 }
 0x83b   :  { %8142 = vmatprep.subr.msk.bf16.mxu0 %vm521_vm3, %v1772_v16  ;;  %7524 = vmatprep.mubr.msk.bf16.mxu1 %vm8577_vm0, %v8576_v1  ;;  %v1773_v60 = vpack.c.bf16 %v1688_v17, %v1688_v17  ;;  %v1841_v63 = vsel %vm521_vm3, %v1772_v16, 0 }
 0x83d   :  { %v1844_v61 = vsel %vm521_vm3, %v1773_v60, 0 }
 0x842   :  { %7525 = vmatmul.mubr.msk.bf16.gmra.mrb[88].mxu1 %vm296_vm2, %v8824_v42 }
 0x8cf   :  { %v1449_v47 = vpop.f32.mrb[56].mxu1 }
 0x8d0   :  { %v9145_v48 = vadd.f32 %v1518_v28, %v1449_v47  ;;  %v7456_v50 = vpop.f32.mrb[57].mxu1 }
 0x8d1   :  { %v1452_v51 = vpop.f32.mrb[58].mxu1 }
 0x8d2   :  { %v9147_v52 = vadd.f32 %v1521_v30, %v1452_v51  ;;  %v7457_v53 = vpop.f32.mrb[59].mxu1  ;;  %v6660_v30 = vld [vmem:[%s10454_s26 + $0x2] ss:$0 sm:$0xff] }
 0x8dd   :  { %v1457_v54 = vpop.f32.mrb[60].mxu1 }
 0x8de   :  { %v9149_v59 = vadd.f32 %v1526_v34, %v1457_v54  ;;  %v7460_v62 = vpop.f32.mrb[61].mxu1 }
 0x8df   :  { %v1460_v19 = vpop.f32.mrb[62].mxu1 }
 0x8e0   :  { %v9151_v20 = vadd.f32 %v1529_v38, %v1460_v19  ;;  %v7461_v21 = vpop.f32.mrb[63].mxu1 }
 0x8e5   :  { %v1465_v24 = vpop.f32.mrb[64].mxu1 }
 0x8e6   :  { %v9153_v25 = vadd.f32 %v1534_v46, %v1465_v24  ;;  %v7464_v27 = vpop.f32.mrb[65].mxu1 }
 0x8e7   :  { %v1468_v29 = vpop.f32.mrb[66].mxu1 }
 0x8e8   :  { %v9155_v28 = vadd.f32 %v1537_v56, %v1468_v29  ;;  %v7465_v31 = vpop.f32.mrb[67].mxu1 }
 0x8ed   :  { %v1593_v36 = vpop.f32.mrb[68].mxu1 }
 0x8ee   :  { %v7486_v34 = vpop.f32.mrb[69].mxu1  ;;  %v1594_v41 = vadd.f32 %v6660_v30, %v1593_v36 }
 0x8ef   :  { %v1596_v37 = vpop.f32.mrb[70].mxu1 }
 0x8f0   :  { %v1597_v44 = vadd.f32 %v6660_v30, %v1596_v37  ;;  %v7487_v38 = vpop.f32.mrb[71].mxu1 }
 0x8f2   :  { %v1766_v49 = vpack.c.bf16 %v1597_v44, %v1594_v41 }
 0x8f4   :  { %7532 = vmatprep.mubr.msk.bf16.mxu0 %vm521_vm3, %v1766_v49 }
 0x8f5   :  { %v1601_v46 = vpop.f32.mrb[72].mxu1 }
 0x8f6   :  { %v1602_v57 = vadd.f32 %v6660_v30, %v1601_v46  ;;  %v7490_v58 = vpop.f32.mrb[73].mxu1 }
 0x8f7   :  { %v1604_v45 = vpop.f32.mrb[74].mxu1 }
 0x8f8   :  { %v1767_v56 = vpack.c.bf16 %v1602_v57, %v1602_v57  ;;  %v7491_v55 = vpop.f32.mrb[75].mxu1  ;;  %v1605_v2 = vadd.f32 %v6660_v30, %v1604_v45 }
 0x8fa   :  { %7533 = vmatmul.mubr.msk.bf16.vlgmr.msra.gmra.mrb[84].mxu0 %vm521_vm3, %v1767_v56 }
 0x8fb   :  { %7537 = vmatpush3.bf16.xpose.msra.mxu0 %v1841_v63 }
 0x8fc   :  { %8143 = vmatprep.subr.msk.bf16.mxu0 %vm521_vm3, %v1773_v60 }
 0x8fd   :  { %v1609_v0 = vpop.f32.mrb[76].mxu1 }
 0x8fe   :  { %v1610_v4 = vadd.f32 %v6660_v30, %v1609_v0  ;;  %v7494_v5 = vpop.f32.mrb[77].mxu1 }
 0x8ff   :  { %v1612_v6 = vpop.f32.mrb[78].mxu1 }
 0x900   :  { %v1768_v43 = vpack.c.bf16 %v1610_v4, %v1605_v2  ;;  %v7495_v7 = vpop.f32.mrb[79].mxu1  ;;  %v1613_v8 = vadd.f32 %v6660_v30, %v1612_v6 }
 0x902   :  { %7540 = vmatprep.mubr.msk.bf16.mxu0 %vm521_vm3, %v1768_v43  ;;  %v1769_v13 = vpack.c.bf16 %v1613_v8, %v1613_v8 }
 0x903   :  { %7539 = vmatpush3.bf16.xpose.msra.mxu0 %v1844_v61 }
 0x905   :  { %v1743_v10 = vpop.f32.mrb[80].mxu1 }
 0x906   :  { %v7518_v11 = vpop.f32.mrb[81].mxu1  ;;  %v1744_v15 = vadd.f32 %v6672_v9, %v1743_v10 }
 0x907   :  { %v1746_v12 = vpop.f32.mrb[82].mxu1 }
 0x908   :  { %v1747_v3 = vadd.f32 %v6672_v9, %v1746_v12  ;;  %v7519_v16 = vpop.f32.mrb[83].mxu1 }
 0x90a   :  { %v1976_v17 = vpack.c.bf16 %v1747_v3, %v1744_v15  ;;  %7541 = vmatmul.mubr.msk.bf16.vlgmr.msra.gmra.mrb[88].mxu0 %vm521_vm3, %v1769_v13 }
 0x90c   :  { %7544 = vmatprep.subr.bf16.mxu1 %v1976_v17 }
 0x90d   :  { %v1751_v18 = vpop.f32.mrb[84].mxu1  ;;  %7545 = vmatpush3.bf16.msra.mxu1 %v1976_v17 }
 0x90e   :  { %v1752_v47 = vadd.f32 %v6672_v9, %v1751_v18  ;;  %v7522_v50 = vpop.f32.mrb[85].mxu1 }
 0x90f   :  { %v1754_v51 = vpop.f32.mrb[86].mxu1 }
 0x910   :  { %v1977_v53 = vpack.c.bf16 %v1752_v47, %v1752_v47  ;;  %v7523_v54 = vpop.f32.mrb[87].mxu1  ;;  %v1755_v21 = vadd.f32 %v6672_v9, %v1754_v51 }
 0x912   :  { %v1987_v62 = vsel %vm735_vm4, %v1977_v53, 0  ;;  %8144 = vmatprep.subr.msk.bf16.mxu1 %vm735_vm4, %v1977_v53 }
 0x913   :  { %7547 = vmatpush3.bf16.msra.mxu1 %v1987_v62 }
 0x914   :  { %7560 = vmatprep.subr.bf16.mxu1 %v8576_v1 }
 0x915   :  { %v1759_v19 = vpop.f32.mrb[88].mxu1 }
 0x916   :  { %v1760_v24 = vadd.f32 %v6672_v9, %v1759_v19  ;;  %v7526_v27 = vpop.f32.mrb[89].mxu1 }
 0x917   :  { %v1762_v29 = vpop.f32.mrb[90].mxu1 }
 0x918   :  { %v1978_v31 = vpack.c.bf16 %v1760_v24, %v1755_v21  ;;  %v1763_v30 = vadd.f32 %v6672_v9, %v1762_v29  ;;  %v7527_v36 = vpop.f32.mrb[91].mxu1 }
 0x91a   :  { %v1979_v34 = vpack.c.bf16 %v1763_v30, %v1763_v30  ;;  %7552 = vmatprep.subr.bf16.mxu0 %v1978_v31 }
 0x91b   :  { %7553 = vmatpush3.bf16.msra.mxu0 %v1978_v31 }
 0x91c   :  { %8145 = vmatprep.subr.msk.bf16.mxu0 %vm735_vm4, %v1979_v34  ;;  %v2044_v37 = vsel %vm735_vm4, %v1979_v34, 0 }
 0x91f   :  { %7555 = vmatpush3.bf16.msra.mxu0 %v2044_v37 }
 0x920   :  { %7574 = vmatprep.subr.bf16.mxu0 %v8576_v1 }
 0x9cd   :  { %v7534_v41 = vpop.f32.mrb[84].mxu0 }
 0x9ce   :  { %v1820_v44 = vpop.f32.mrb[85].mxu0  ;;  %v1896_v38 = vmul.f32 0.35355338, %v7534_v41 }
 0x9cf   :  { %v1894_v49 = vmul.f32 0.35355338, %v1820_v44  ;;  %v7535_v46 = vpop.f32.mrb[86].mxu0 }
 0x9d0   :  { %v1823_v57 = vpop.f32.mrb[87].mxu0  ;;  %v1902_v60 = vadd.f32 %v1896_v38, %v8893_v14 }
 0x9d1   :  { %v1895_v58 = vmul.f32 0.35355338, %v1823_v57  ;;  %v1900_v45 = vadd.f32 %v1894_v49, %v8893_v14 }
 0x9d2   :  { %v1912_v0 = vsel %vm654_vm6, %v1902_v60, -inf }
 0x9d3   :  { %v1906_v56 = vsel %vm654_vm6, %v1900_v45, -inf  ;;  %v1901_v55 = vadd.f32 %v1895_v58, %v8893_v14 }
 0x9d4   :  { %1907 = vmax.xlane.f32.xlu0 %v1906_v56 }
 0x9d5   :  { %v1909_v63 = vsel %vm654_vm6, %v1901_v55, -inf }
 0x9d6   :  { %1910 = vmax.xlane.f32.xlu1 %v1909_v63 }
 0x9d8   :  { %1913 = vmax.xlane.f32.xlu0 %v1912_v0 }
 0x9dd   :  { %v7542_v2 = vpop.f32.mrb[88].mxu0 }
 0x9de   :  { %v1880_v4 = vpop.f32.mrb[89].mxu0  ;;  %v1899_v5 = vmul.f32 0.35355338, %v7542_v2 }
 0x9df   :  { %v1897_v6 = vmul.f32 0.35355338, %v1880_v4  ;;  %v7543_v43 = vpop.f32.mrb[90].mxu0 }
 0x9e0   :  { %v1883_v7 = vpop.f32.mrb[91].mxu0  ;;  %v1905_v11 = vadd.f32 %v1899_v5, %v8893_v14 }
 0x9e1   :  { %v1898_v61 = vmul.f32 0.35355338, %v1883_v7  ;;  %v1903_v8 = vadd.f32 %v1897_v6, %v8893_v14 }
 0x9e2   :  { %v1921_v13 = vsel %vm654_vm6, %v1905_v11, -inf }
 0x9e3   :  { %v1915_v9 = vsel %vm654_vm6, %v1903_v8, -inf  ;;  %v1904_v10 = vadd.f32 %v1898_v61, %v8893_v14 }
 0x9e4   :  { %1916 = vmax.xlane.f32.xlu1 %v1915_v9 }
 0x9e5   :  { %v1918_v12 = vsel %vm654_vm6, %v1904_v10, -inf }
 0x9e6   :  { %1919 = vmax.xlane.f32.xlu0 %v1918_v12 }
 0x9e8   :  { %1922 = vmax.xlane.f32.xlu1 %v1921_v13 }
 0xa61   :  { %v1908_v15 = vpop.xlane.xlu0 %1907 }
 0xa62   :  { %v1924_v3 = vsub.f32 %v1900_v45, %v1908_v15 }
 0xa63   :  { %v1911_v16 = vpop.xlane.xlu1 %1910 }
 0xa64   :  { %v1930_v17 = vmul.f32 1.442695, %v1924_v3  ;;  %v1925_v18 = vsub.f32 %v1901_v55, %v1911_v16 }
 0xa65   :  { %v1914_v47 = vpop.xlane.xlu0 %1913 }
 0xa66   :  { %8296 = vpow2.f32 %v1930_v17  ;;  %v1932_v50 = vmul.f32 1.442695, %v1925_v18  ;;  %v1926_v51 = vsub.f32 %v1902_v60, %v1914_v47  ;;  %v8204_v18 = vld [vmem:[%s10450_s0 + $0x30] sm:$0xff]  }
 0xa68   :  { %8298 = vpow2.f32 %v1932_v50  ;;  %v1934_v53 = vmul.f32 1.442695, %v1926_v51  ;;  %v8205_v50 = vld [vmem:[%s10450_s0 + $0x38] sm:$0xff]   ;;  %v8206_v51 = vld [vmem:[%s10453_s7 + $0x30] sm:$0xff]  }
 0xa6a   :  { %8300 = vpow2.f32 %v1934_v53  ;;  %v8207_v53 = vld [vmem:[%s10453_s7 + $0x38] sm:$0xff]  }
 0xa70   :  { %v8297_v54 = vpop.eup %8296 }
 0xa71   :  { %v1917_v62 = vpop.xlane.xlu1 %1916  ;;  %v1942_v19 = vsel %vm654_vm6, %v8297_v54, 0.0 }
 0xa72   :  { %v8299_v21 = vpop.eup %8298  ;;  %v1927_v24 = vsub.f32 %v1903_v8, %v1917_v62  ;;  %1943 = vadd.xlane.f32.xlu0 %v1942_v19 }
 0xa73   :  { %v1920_v27 = vpop.xlane.xlu0 %1919  ;;  %v1945_v29 = vsel %vm654_vm6, %v8299_v21, 0.0 }
 0xa74   :  { %v8301_v31 = vpop.eup %8300  ;;  %v1936_v30 = vmul.f32 1.442695, %v1927_v24  ;;  %v1928_v36 = vsub.f32 %v1904_v10, %v1920_v27  ;;  %1946 = vadd.xlane.f32.xlu1 %v1945_v29  ;;  %v8208_v29 = vld [vmem:[%s10451_s25 + $0x30] sm:$0xff]  }
 0xa75   :  { %v1923_v34 = vpop.xlane.xlu1 %1922  ;;  %v1948_v37 = vsel %vm654_vm6, %v8301_v31, 0.0 }
 0xa76   :  { %8302 = vpow2.f32 %v1936_v30  ;;  %v1938_v41 = vmul.f32 1.442695, %v1928_v36  ;;  %v1929_v44 = vsub.f32 %v1905_v11, %v1923_v34  ;;  %1949 = vadd.xlane.f32.xlu0 %v1948_v37  ;;  %v8209_v30 = vld [vmem:[%s10451_s25 + $0x38] sm:$0xff]  }
 0xa78   :  { %8304 = vpow2.f32 %v1938_v41  ;;  %v1940_v38 = vmul.f32 1.442695, %v1929_v44 }
 0xa7a   :  { %8306 = vpow2.f32 %v1940_v38 }
 0xa80   :  { %v8303_v49 = vpop.eup %8302 }
 0xa81   :  { %v1951_v46 = vsel %vm654_vm6, %v8303_v49, 0.0 }
 0xa82   :  { %v8305_v57 = vpop.eup %8304  ;;  %1952 = vadd.xlane.f32.xlu1 %v1951_v46 }
 0xa83   :  { %v1954_v58 = vsel %vm654_vm6, %v8305_v57, 0.0 }
 0xa84   :  { %v8307_v45 = vpop.eup %8306  ;;  %1955 = vadd.xlane.f32.xlu0 %v1954_v58 }
 0xa85   :  { %v1957_v56 = vsel %vm654_vm6, %v8307_v45, 0.0 }
 0xa86   :  { %1958 = vadd.xlane.f32.xlu1 %v1957_v56 }
 0xaff   :  { %v1944_v55 = vpop.xlane.xlu0 %1943 }
 0xb00   :  { %8308 = vrcp.f32 %v1944_v55 }
 0xb01   :  { %v1947_v60 = vpop.xlane.xlu1 %1946 }
 0xb02   :  { %8310 = vrcp.f32 %v1947_v60 }
 0xb03   :  { %v1950_v63 = vpop.xlane.xlu0 %1949 }
 0xb04   :  { %8312 = vrcp.f32 %v1950_v63 }
 0xb0a   :  { %v8309_v0 = vpop.eup %8308 }
 0xb0b   :  { %v1961_v4 = vmul.f32 %v8309_v0, %v8297_v54  ;;  %v254_v54 = vld [vmem:[%s10414_s9 + $0x8] sm:$0xf] }
 0xb0c   :  { %v8311_v2 = vpop.eup %8310  ;;  %v2107_v62 = vsel %vm735_vm4, %v254_v54, 0 }
 0xb0d   :  { %v1963_v5 = vmul.f32 %v8311_v2, %v8299_v21 }
 0xb0e   :  { %v8313_v6 = vpop.eup %8312 }
 0xb0f   :  { %v1965_v43 = vmul.f32 %v8313_v6, %v8301_v31  ;;  %v1953_v7 = vpop.xlane.xlu1 %1952  ;;  %v1972_v61 = vpack.c.bf16 %v1963_v5, %v1961_v4 }
 0xb10   :  { %8314 = vrcp.f32 %v1953_v7 }
 0xb11   :  { %v1973_v8 = vpack.c.bf16 %v1965_v43, %v1965_v43  ;;  %v1956_v9 = vpop.xlane.xlu0 %1955  ;;  %7548 = vmatprep.mubr.msk.bf16.mxu1 %vm654_vm6, %v1972_v61 }
 0xb12   :  { %8316 = vrcp.f32 %v1956_v9 }
 0xb13   :  { %v1959_v10 = vpop.xlane.xlu1 %1958  ;;  %7549 = vmatmul.mubr.msk.bf16.vlgmr.msra.gmra.mrb[92].mxu1 %vm654_vm6, %v1973_v8 }
 0xb14   :  { %8318 = vrcp.f32 %v1959_v10  ;;  %7562 = vmatprep.mubr.msk.bf16.mxu1 %vm8577_vm0, %v8576_v1  ;;  %7561 = vmatpush3.bf16.msra.mxu1 %v2107_v62 }
 0xb15   :  { %7590 = vmatprep.subr.bf16.mxu1 %v8576_v1 }
 0xb1a   :  { %v8315_v11 = vpop.eup %8314 }
 0xb1b   :  { %v1967_v13 = vmul.f32 %v8315_v11, %v8303_v49  ;;  %v6689_v49 = vld [vmem:[%s10454_s26 + $0x3] ss:$0 sm:$0xff] }
 0xb1c   :  { %v8317_v12 = vpop.eup %8316 }
 0xb1d   :  { %v1969_v15 = vmul.f32 %v8317_v12, %v8305_v57 }
 0xb1e   :  { %v8319_v3 = vpop.eup %8318 }
 0xb1f   :  { %v1974_v16 = vpack.c.bf16 %v1969_v15, %v1967_v13  ;;  %v1971_v17 = vmul.f32 %v8319_v3, %v8307_v45 }
 0xb21   :  { %7556 = vmatprep.mubr.msk.bf16.mxu0 %vm654_vm6, %v1974_v16  ;;  %v1975_v47 = vpack.c.bf16 %v1971_v17, %v1971_v17 }
 0xb23   :  { %7557 = vmatmul.mubr.msk.bf16.vlgmr.msra.gmra.mrb[92].mxu0 %vm654_vm6, %v1975_v47 }
 0xb24   :  { %7575 = vmatpush3.bf16.msra.mxu0 %v8204_v18  ;;  %7578 = vmatprep.mubr.msk.bf16.mxu0 %vm8577_vm0, %v8576_v1 }
 0xb25   :  { %7576 = vmatprep.subr.bf16.mxu0 %v8576_v1 }
 0xb28   :  { %7577 = vmatpush3.bf16.msra.mxu0 %v8205_v50 }
 0xb29   :  { %7606 = vmatprep.subr.bf16.mxu0 %v8576_v1 }
 0xb2b   :  { %7579 = vmatmul.mubr.msk.bf16.vlgmr.msra.gmra.mrb[96].mxu0 %vm296_vm2, %v8784_v26 }
 0xb2c   :  { %7582 = vmatprep.mubr.msk.bf16.mxu0 %vm8577_vm0, %v8576_v1  ;;  %7607 = vmatpush3.bf16.msra.mxu0 %v8206_v51 }
 0xb2d   :  { %7608 = vmatprep.subr.bf16.mxu0 %v8576_v1 }
 0xb30   :  { %7609 = vmatpush3.bf16.msra.mxu0 %v8207_v53 }
 0xb33   :  { %7583 = vmatmul.mubr.msk.bf16.gmra.mrb[100].mxu0 %vm296_vm2, %v8808_v35 }
 0xb34   :  { %7586 = vmatprep.mubr.msk.bf16.mxu0 %vm8577_vm0, %v8576_v1 }
 0xb3b   :  { %7587 = vmatmul.mubr.msk.bf16.gmra.mrb[104].mxu0 %vm296_vm2, %v8824_v42 }
 0xb3c   :  { %7610 = vmatprep.mubr.msk.bf16.mxu0 %vm8577_vm0, %v8576_v1 }
 0xb43   :  { %7611 = vmatmul.mubr.msk.bf16.vlgmr.msra.gmra.mrb[108].mxu0 %vm296_vm2, %v8784_v26 }
 0xb44   :  { %7614 = vmatprep.mubr.msk.bf16.mxu0 %vm8577_vm0, %v8576_v1 }
 0xb4b   :  { %7615 = vmatmul.mubr.msk.bf16.gmra.mrb[112].mxu0 %vm296_vm2, %v8808_v35 }
 0xb4c   :  { %7618 = vmatprep.mubr.msk.bf16.mxu0 %vm8577_vm0, %v8576_v1 }
 0xb53   :  { %7619 = vmatmul.mubr.msk.bf16.gmra.mrb[116].mxu0 %vm296_vm2, %v8824_v42 }
 0xbe6   :  { %v7550_v19 = vpop.f32.mrb[92].mxu1 }
 0xbe7   :  { %v2023_v21 = vpop.f32.mrb[93].mxu1 }
 0xbe8   :  { %v7551_v24 = vpop.f32.mrb[94].mxu1 }
 0xbe9   :  { %v2026_v27 = vpop.f32.mrb[95].mxu1 }
 0xbea   :  { %v2094_v31 = vpack.c.bf16 %v2026_v27, %v2023_v21 }
 0xbec   :  { %7563 = vmatmul.mubr.msk.bf16.vlgmr.msra.gmra.mrb[96].mxu1 %vm521_vm3, %v2094_v31 }
 0xbed   :  { %7566 = vmatprep.mubr.msk.bf16.mxu1 %vm8577_vm0, %v8576_v1  ;;  %7591 = vmatpush3.bf16.msra.mxu1 %v8208_v29 }
 0xbee   :  { %7592 = vmatprep.subr.bf16.mxu1 %v8576_v1 }
 0xbf1   :  { %7593 = vmatpush3.bf16.msra.mxu1 %v8209_v30 }
 0xbf6   :  { %v7558_v36 = vpop.f32.mrb[92].mxu0 }
 0xbf7   :  { %v2080_v34 = vpop.f32.mrb[93].mxu0 }
 0xbf8   :  { %v2095_v37 = vpack.c.bf16 %v2080_v34, %v7550_v19  ;;  %v7559_v41 = vpop.f32.mrb[94].mxu0 }
 0xbf9   :  { %v2083_v44 = vpop.f32.mrb[95].mxu0 }
 0xbfa   :  { %v2096_v38 = vpack.c.bf16 %v7558_v36, %v2083_v44  ;;  %7567 = vmatmul.mubr.msk.bf16.gmra.mrb[100].mxu1 %vm521_vm3, %v2095_v37 }
 0xbfb   :  { %7570 = vmatprep.mubr.msk.bf16.mxu1 %vm8577_vm0, %v8576_v1 }
 0xbfe   :  { %v2224_v46 = vpop.f32.mrb[96].mxu0 }
 0xbff   :  { %v7580_v57 = vpop.f32.mrb[97].mxu0  ;;  %v2225_v45 = vadd.f32 %v6689_v49, %v2224_v46 }
 0xc00   :  { %v2227_v58 = vpop.f32.mrb[98].mxu0 }
 0xc01   :  { %v2228_v56 = vadd.f32 %v6689_v49, %v2227_v58  ;;  %v7581_v55 = vpop.f32.mrb[99].mxu0 }
 0xc02   :  { %7571 = vmatmul.mubr.msk.bf16.gmra.mrb[104].mxu1 %vm521_vm3, %v2096_v38 }
 0xc03   :  { %v2397_v60 = vpack.c.bf16 %v2228_v56, %v2225_v45  ;;  %7594 = vmatprep.mubr.msk.bf16.mxu1 %vm8577_vm0, %v8576_v1 }
 0xc06   :  { %v2232_v63 = vpop.f32.mrb[100].mxu0 }
 0xc07   :  { %v9263_v0 = vadd.f32 %v6689_v49, %v2232_v63  ;;  %v7584_v2 = vpop.f32.mrb[101].mxu0 }
 0xc08   :  { %v2235_v4 = vpop.f32.mrb[102].mxu0 }
 0xc09   :  { %v7585_v5 = vpop.f32.mrb[103].mxu0  ;;  %v2236_v43 = vadd.f32 %v6689_v49, %v2235_v4 }
 0xc0a   :  { %7595 = vmatmul.mubr.msk.bf16.vlgmr.msra.gmra.mrb[108].mxu1 %vm296_vm2, %v8784_v26  ;;  %v9279_v26 = vld [vmem:[%s10456_s3 + $0x3] ss:$0 sm:$0xff] }
 0xc0b   :  { %7598 = vmatprep.mubr.msk.bf16.mxu1 %vm8577_vm0, %v8576_v1 }
 0xc0e   :  { %v2240_v6 = vpop.f32.mrb[104].mxu0 }
 0xc0f   :  { %v2241_v7 = vadd.f32 %v6689_v49, %v2240_v6  ;;  %v7588_v61 = vpop.f32.mrb[105].mxu0 }
 0xc10   :  { %v2243_v8 = vpop.f32.mrb[106].mxu0 }
 0xc11   :  { %v2399_v9 = vpack.c.bf16 %v2241_v7, %v2236_v43  ;;  %v9269_v10 = vadd.f32 %v6689_v49, %v2243_v8  ;;  %v7589_v11 = vpop.f32.mrb[107].mxu0 }
 0xc12   :  { %7599 = vmatmul.mubr.msk.bf16.gmra.mrb[112].mxu1 %vm296_vm2, %v8808_v35 }
 0xc13   :  { %7634 = vmatprep.mubr.msk.bf16.mxu0 %vm521_vm3, %v2399_v9  ;;  %7602 = vmatprep.mubr.msk.bf16.mxu1 %vm8577_vm0, %v8576_v1 }
 0xc16   :  { %v2374_v12 = vpop.f32.mrb[108].mxu0 }
 0xc17   :  { %v7612_v13 = vpop.f32.mrb[109].mxu0  ;;  %v2375_v3 = vadd.f32 %v9279_v26, %v2374_v12 }
 0xc18   :  { %v2377_v15 = vpop.f32.mrb[110].mxu0 }
 0xc19   :  { %v2378_v16 = vadd.f32 %v9279_v26, %v2377_v15  ;;  %v7613_v17 = vpop.f32.mrb[111].mxu0 }
 0xc1a   :  { %7603 = vmatmul.mubr.msk.bf16.gmra.mrb[116].mxu1 %vm296_vm2, %v8824_v42 }
 0xc1b   :  { %v9285_v35 = vpack.c.bf16 %v2378_v16, %v2375_v3  ;;  %7626 = vmatprep.mubr.msk.bf16.mxu1 %vm521_vm3, %v2397_v60 }
 0xc1e   :  { %v2382_v18 = vpop.f32.mrb[112].mxu0 }
 0xc1f   :  { %v7616_v47 = vpop.f32.mrb[113].mxu0  ;;  %v2383_v16 = vadd.f32 %v9279_v26, %v2382_v18 }
 0xc20   :  { %v2385_v50 = vpop.f32.mrb[114].mxu0 }
 0xc21   :  { %v7617_v51 = vpop.f32.mrb[115].mxu0  ;;  %v2386_v54 = vadd.f32 %v9279_v26, %v2385_v50 }
 0xc22   :  { %v2398_v51 = vpack.c.bf16 %v9263_v0, %v9263_v0 }
 0xc26   :  { %v2390_v53 = vpop.f32.mrb[116].mxu0 }
 0xc27   :  { %v2391_v62 = vadd.f32 %v9279_v26, %v2390_v53  ;;  %v7620_v19 = vpop.f32.mrb[117].mxu0 }
 0xc28   :  { %v9290_v21 = vpop.f32.mrb[118].mxu0 }
 0xc29   :  { %v9292_v24 = vpack.c.bf16 %v2391_v62, %v2386_v54  ;;  %v7621_v27 = vpop.f32.mrb[119].mxu0  ;;  %v2608_v62 = vpack.c.bf16 %v2383_v16, %v2383_v16  ;;  %v2394_v19 = vadd.f32 %v9279_v26, %v9290_v21 }
 0xc2a   :  { %v2400_v27 = vpack.c.bf16 %v9269_v10, %v9269_v10 }
 0xc2b   :  { %v2618_v18 = vsel %vm735_vm4, %v2608_v62, 0 }
 0xcbf   :  { %v2143_v42 = vpop.f32.mrb[96].mxu1 }
 0xcc0   :  { %v9295_v29 = vadd.f32 %v2143_v42, %v9145_v48  ;;  %v7564_v31 = vpop.f32.mrb[97].mxu1  ;;  %v2610_v42 = vpack.c.bf16 %v2394_v19, %v2394_v19 }
 0xcc1   :  { %v2146_v30 = vpop.f32.mrb[98].mxu1 }
 0xcc2   :  { %v9298_v36 = vadd.f32 %v2146_v30, %v9147_v52  ;;  %v7565_v34 = vpop.f32.mrb[99].mxu1 }
 0xccd   :  { %v2151_v37 = vpop.f32.mrb[100].mxu1 }
 0xcce   :  { %v9301_v41 = vadd.f32 %v2151_v37, %v9149_v59  ;;  %v7568_v44 = vpop.f32.mrb[101].mxu1  ;;  %v6695_v59 = vld [vmem:[%s10455_s6 + $0x3] ss:$0 sm:$0xff] }
 0xccf   :  { %v2154_v38 = vpop.f32.mrb[102].mxu1 }
 0xcd0   :  { %v9304_v49 = vadd.f32 %v2154_v38, %v9151_v20  ;;  %v7569_v46 = vpop.f32.mrb[103].mxu1 }
 0xcd5   :  { %v2159_v57 = vpop.f32.mrb[104].mxu1 }
 0xcd6   :  { %v9307_v48 = vadd.f32 %v2159_v57, %v9153_v25  ;;  %v7572_v58 = vpop.f32.mrb[105].mxu1 }
 0xcd7   :  { %v2162_v45 = vpop.f32.mrb[106].mxu1 }
 0xcd8   :  { %v9310_v52 = vadd.f32 %v2162_v45, %v9155_v28  ;;  %v7573_v56 = vpop.f32.mrb[107].mxu1 }
 0xcdd   :  { %v2299_v55 = vpop.f32.mrb[108].mxu1 }
 0xcde   :  { %v7596_v60 = vpop.f32.mrb[109].mxu1  ;;  %v2300_v20 = vadd.f32 %v6695_v59, %v2299_v55 }
 0xcdf   :  { %v2302_v63 = vpop.f32.mrb[110].mxu1 }
 0xce0   :  { %v2303_v2 = vadd.f32 %v6695_v59, %v2302_v63  ;;  %v7597_v4 = vpop.f32.mrb[111].mxu1 }
 0xce2   :  { %v2401_v5 = vpack.c.bf16 %v2303_v2, %v2300_v20 }
 0xce4   :  { %8146 = vmatprep.subr.msk.bf16.mxu1 %vm521_vm3, %v2401_v5  ;;  %v2412_v25 = vsel %vm521_vm3, %v2401_v5, 0 }
 0xce5   :  { %v2307_v6 = vpop.f32.mrb[112].mxu1  ;;  %7623 = vmatpush3.bf16.xpose.msra.mxu1 %v2412_v25 }
 0xce6   :  { %v2308_v28 = vadd.f32 %v6695_v59, %v2307_v6  ;;  %v7600_v43 = vpop.f32.mrb[113].mxu1 }
 0xce7   :  { %v2310_v7 = vpop.f32.mrb[114].mxu1 }
 0xce8   :  { %v2402_v61 = vpack.c.bf16 %v2308_v28, %v2308_v28  ;;  %v7601_v8 = vpop.f32.mrb[115].mxu1  ;;  %v2311_v12 = vadd.f32 %v6695_v59, %v2310_v7 }
 0xcea   :  { %8147 = vmatprep.subr.msk.bf16.mxu1 %vm521_vm3, %v2402_v61  ;;  %v2415_v9 = vsel %vm521_vm3, %v2402_v61, 0 }
 0xced   :  { %v2315_v11 = vpop.f32.mrb[116].mxu1  ;;  %7625 = vmatpush3.bf16.xpose.msra.mxu1 %v2415_v9 }
 0xcee   :  { %v2316_v13 = vadd.f32 %v6695_v59, %v2315_v11  ;;  %v7604_v15 = vpop.f32.mrb[117].mxu1  ;;  %7638 = vmatprep.subr.bf16.mxu1 %v9285_v35 }
 0xcef   :  { %v2318_v3 = vpop.f32.mrb[118].mxu1 }
 0xcf0   :  { %v2403_v17 = vpack.c.bf16 %v2316_v13, %v2311_v12  ;;  %v2319_v47 = vadd.f32 %v6695_v59, %v2318_v3  ;;  %v7605_v50 = vpop.f32.mrb[119].mxu1 }
 0xcf2   :  { %v2404_v53 = vpack.c.bf16 %v2319_v47, %v2319_v47  ;;  %8148 = vmatprep.subr.msk.bf16.mxu0 %vm521_vm3, %v2403_v17  ;;  %v2472_v54 = vsel %vm521_vm3, %v2403_v17, 0 }
 0xcf3   :  { %7631 = vmatpush3.bf16.xpose.msra.mxu0 %v2472_v54 }
 0xcf4   :  { %7627 = vmatmul.mubr.msk.bf16.vlgmr.msra.gmra.mrb[120].mxu1 %vm521_vm3, %v2398_v51  ;;  %8149 = vmatprep.subr.msk.bf16.mxu0 %vm521_vm3, %v2404_v53  ;;  %v2475_v0 = vsel %vm521_vm3, %v2404_v53, 0 }
 0xcf5   :  { %7639 = vmatpush3.bf16.msra.mxu1 %v9285_v35  ;;  %v2675_v35 = vsel %vm735_vm4, %v2610_v42, 0 }
 0xcf6   :  { %8150 = vmatprep.subr.msk.bf16.mxu1 %vm735_vm4, %v2608_v62 }
 0xcf9   :  { %7641 = vmatpush3.bf16.msra.mxu1 %v2618_v18 }
 0xcfa   :  { %7654 = vmatprep.subr.bf16.mxu1 %v8576_v1 }
 0xcfb   :  { %7633 = vmatpush3.bf16.xpose.msra.mxu0 %v2475_v0 }
 0xcfc   :  { %7646 = vmatprep.subr.bf16.mxu0 %v9292_v24 }
 0xd02   :  { %7635 = vmatmul.mubr.msk.bf16.vlgmr.msra.gmra.mrb[120].mxu0 %vm521_vm3, %v2400_v27 }
 0xd03   :  { %7647 = vmatpush3.bf16.msra.mxu0 %v9292_v24 }
 0xd04   :  { %8151 = vmatprep.subr.msk.bf16.mxu0 %vm735_vm4, %v2610_v42 }
 0xd07   :  { %7649 = vmatpush3.bf16.msra.mxu0 %v2675_v35 }
 0xd08   :  { %7668 = vmatprep.subr.bf16.mxu0 %v8576_v1 }
 0xdc7   :  { %v7628_v31 = vpop.f32.mrb[120].mxu1 }
 0xdc8   :  { %v2451_v30 = vpop.f32.mrb[121].mxu1  ;;  %v2527_v34 = vmul.f32 0.35355338, %v7628_v31 }
 0xdc9   :  { %v2525_v37 = vmul.f32 0.35355338, %v2451_v30  ;;  %v7629_v26 = vpop.f32.mrb[122].mxu1 }
 0xdca   :  { %v2454_v21 = vpop.f32.mrb[123].mxu1  ;;  %v2533_v46 = vadd.f32 %v2527_v34, %v8893_v14 }
 0xdcb   :  { %v2526_v44 = vmul.f32 0.35355338, %v2454_v21  ;;  %v2531_v10 = vadd.f32 %v2525_v37, %v8893_v14 }
 0xdcc   :  { %v2543_v58 = vsel %vm654_vm6, %v2533_v46, -inf }
 0xdcd   :  { %v2537_v38 = vsel %vm654_vm6, %v2531_v10, -inf  ;;  %v2532_v24 = vadd.f32 %v2526_v44, %v8893_v14 }
 0xdce   :  { %2538 = vmax.xlane.f32.xlu0 %v2537_v38 }
 0xdcf   :  { %v2540_v57 = vsel %vm654_vm6, %v2532_v24, -inf }
 0xdd0   :  { %2541 = vmax.xlane.f32.xlu1 %v2540_v57 }
 0xdd2   :  { %2544 = vmax.xlane.f32.xlu0 %v2543_v58 }
 0xdd5   :  { %v7636_v45 = vpop.f32.mrb[120].mxu0 }
 0xdd6   :  { %v2511_v56 = vpop.f32.mrb[121].mxu0  ;;  %v2530_v59 = vmul.f32 0.35355338, %v7636_v45 }
 0xdd7   :  { %v2528_v55 = vmul.f32 0.35355338, %v2511_v56  ;;  %v7637_v60 = vpop.f32.mrb[122].mxu0 }
 0xdd8   :  { %v2514_v63 = vpop.f32.mrb[123].mxu0  ;;  %v2536_v25 = vadd.f32 %v2530_v59, %v8893_v14 }
 0xdd9   :  { %v2529_v20 = vmul.f32 0.35355338, %v2514_v63  ;;  %v2534_v2 = vadd.f32 %v2528_v55, %v8893_v14 }
 0xdda   :  { %v2552_v28 = vsel %vm654_vm6, %v2536_v25, -inf }
 0xddb   :  { %v2546_v4 = vsel %vm654_vm6, %v2534_v2, -inf  ;;  %v2535_v5 = vadd.f32 %v2529_v20, %v8893_v14 }
 0xddc   :  { %2547 = vmax.xlane.f32.xlu1 %v2546_v4 }
 0xddd   :  { %v2549_v6 = vsel %vm654_vm6, %v2535_v5, -inf }
 0xdde   :  { %2550 = vmax.xlane.f32.xlu0 %v2549_v6 }
 0xde0   :  { %2553 = vmax.xlane.f32.xlu1 %v2552_v28 }
 0xe5b   :  { %v2539_v43 = vpop.xlane.xlu0 %2538 }
 0xe5c   :  { %v2555_v7 = vsub.f32 %v2531_v10, %v2539_v43 }
 0xe5d   :  { %v2542_v61 = vpop.xlane.xlu1 %2541 }
 0xe5e   :  { %v2561_v8 = vmul.f32 1.442695, %v2555_v7  ;;  %v2556_v9 = vsub.f32 %v2532_v24, %v2542_v61  ;;  %v255_v61 = vld [vmem:[%s10414_s9 + $0xc] sm:$0xf] }
 0xe5f   :  { %v2545_v11 = vpop.xlane.xlu0 %2544 }
 0xe60   :  { %8320 = vpow2.f32 %v2561_v8  ;;  %v2563_v12 = vmul.f32 1.442695, %v2556_v9  ;;  %v2557_v13 = vsub.f32 %v2533_v46, %v2545_v11  ;;  %v2738_v8 = vsel %vm735_vm4, %v255_v61, 0 }
 0xe62   :  { %8322 = vpow2.f32 %v2563_v12  ;;  %v2565_v15 = vmul.f32 1.442695, %v2557_v13 }
 0xe64   :  { %8324 = vpow2.f32 %v2565_v15 }
 0xe69   :  { %v2548_v3 = vpop.xlane.xlu1 %2547 }
 0xe6a   :  { %v8321_v16 = vpop.eup %8320  ;;  %v2558_v17 = vsub.f32 %v2534_v2, %v2548_v3 }
 0xe6b   :  { %v2551_v47 = vpop.xlane.xlu0 %2550  ;;  %v2573_v50 = vsel %vm654_vm6, %v8321_v16, 0.0 }
 0xe6c   :  { %v8323_v51 = vpop.eup %8322  ;;  %v2567_v53 = vmul.f32 1.442695, %v2558_v17  ;;  %v2559_v54 = vsub.f32 %v2535_v5, %v2551_v47  ;;  %2574 = vadd.xlane.f32.xlu0 %v2573_v50 }
 0xe6d   :  { %v2554_v62 = vpop.xlane.xlu1 %2553  ;;  %v2576_v18 = vsel %vm654_vm6, %v8323_v51, 0.0 }
 0xe6e   :  { %v8325_v0 = vpop.eup %8324  ;;  %8326 = vpow2.f32 %v2567_v53  ;;  %v2569_v19 = vmul.f32 1.442695, %v2559_v54  ;;  %v2560_v27 = vsub.f32 %v2536_v25, %v2554_v62  ;;  %2577 = vadd.xlane.f32.xlu1 %v2576_v18  ;;  %v6718_v53 = vld [vmem:[%s10415_s10] ss:$0 sm:$0xff] }
 0xe6f   :  { %v2579_v42 = vsel %vm654_vm6, %v8325_v0, 0.0 }
 0xe70   :  { %8328 = vpow2.f32 %v2569_v19  ;;  %v2571_v35 = vmul.f32 1.442695, %v2560_v27  ;;  %2580 = vadd.xlane.f32.xlu0 %v2579_v42 }
 0xe72   :  { %8330 = vpow2.f32 %v2571_v35 }
 0xe78   :  { %v8327_v31 = vpop.eup %8326 }
 0xe79   :  { %v2582_v30 = vsel %vm654_vm6, %v8327_v31, 0.0 }
 0xe7a   :  { %v8329_v34 = vpop.eup %8328  ;;  %2583 = vadd.xlane.f32.xlu1 %v2582_v30 }
 0xe7b   :  { %v2585_v37 = vsel %vm654_vm6, %v8329_v34, 0.0 }
 0xe7c   :  { %v8331_v26 = vpop.eup %8330  ;;  %2586 = vadd.xlane.f32.xlu0 %v2585_v37 }
 0xe7d   :  { %v2588_v21 = vsel %vm654_vm6, %v8331_v26, 0.0 }
 0xe7e   :  { %2589 = vadd.xlane.f32.xlu1 %v2588_v21 }
 0xef9   :  { %v2575_v44 = vpop.xlane.xlu0 %2574 }
 0xefa   :  { %8332 = vrcp.f32 %v2575_v44 }
 0xefb   :  { %v2578_v10 = vpop.xlane.xlu1 %2577 }
 0xefc   :  { %8334 = vrcp.f32 %v2578_v10 }
 0xefd   :  { %v2581_v38 = vpop.xlane.xlu0 %2580 }
 0xefe   :  { %8336 = vrcp.f32 %v2581_v38 }
 0xf04   :  { %v8333_v24 = vpop.eup %8332 }
 0xf05   :  { %v2592_v58 = vmul.f32 %v8333_v24, %v8321_v16 }
 0xf06   :  { %v8335_v46 = vpop.eup %8334 }
 0xf07   :  { %v2584_v57 = vpop.xlane.xlu1 %2583  ;;  %v2594_v45 = vmul.f32 %v8335_v46, %v8323_v51 }
 0xf08   :  { %v8337_v56 = vpop.eup %8336  ;;  %8338 = vrcp.f32 %v2584_v57 }
 0xf09   :  { %v2587_v59 = vpop.xlane.xlu0 %2586  ;;  %v2603_v55 = vpack.c.bf16 %v2594_v45, %v2592_v58  ;;  %v2596_v60 = vmul.f32 %v8337_v56, %v8325_v0 }
 0xf0a   :  { %8340 = vrcp.f32 %v2587_v59 }
 0xf0b   :  { %7642 = vmatprep.mubr.msk.bf16.mxu1 %vm654_vm6, %v2603_v55  ;;  %v2590_v63 = vpop.xlane.xlu1 %2589  ;;  %v2604_v20 = vpack.c.bf16 %v2596_v60, %v2596_v60 }
 0xf0c   :  { %8342 = vrcp.f32 %v2590_v63 }
 0xf0d   :  { %7643 = vmatmul.mubr.msk.bf16.vlgmr.msra.gmra.mrb[124].mxu1 %vm654_vm6, %v2604_v20 }
 0xf0e   :  { %7656 = vmatprep.mubr.msk.bf16.mxu1 %vm8577_vm0, %v8576_v1  ;;  %7655 = vmatpush3.bf16.msra.mxu1 %v2738_v8 }
 0xf0f   :  { %7684 = vmatprep.subr.bf16.mxu1 %v8576_v1 }
 0xf12   :  { %v8339_v2 = vpop.eup %8338 }
 0xf13   :  { %v2598_v5 = vmul.f32 %v8339_v2, %v8327_v31 }
 0xf14   :  { %v8341_v4 = vpop.eup %8340 }
 0xf15   :  { %v2600_v25 = vmul.f32 %v8341_v4, %v8329_v34 }
 0xf16   :  { %v8343_v6 = vpop.eup %8342 }
 0xf17   :  { %v2605_v28 = vpack.c.bf16 %v2600_v25, %v2598_v5  ;;  %v2602_v43 = vmul.f32 %v8343_v6, %v8331_v26 }
 0xf19   :  { %7650 = vmatprep.mubr.msk.bf16.mxu0 %vm654_vm6, %v2605_v28  ;;  %v2606_v7 = vpack.c.bf16 %v2602_v43, %v2602_v43 }
 0xf1b   :  { %7651 = vmatmul.mubr.msk.bf16.vlgmr.msra.gmra.mrb[124].mxu0 %vm654_vm6, %v2606_v7 }
 0xf1c   :  { %7672 = vmatprep.mubr.msk.bf16.mxu0 %vm8577_vm0, %v8576_v1 }
 0xfe0   :  { %v7644_v9 = vpop.f32.mrb[124].mxu1 }
 0xfe1   :  { %v2654_v11 = vpop.f32.mrb[125].mxu1 }
 0xfe2   :  { %v7645_v12 = vpop.f32.mrb[126].mxu1 }
 0xfe3   :  { %v2657_v13 = vpop.f32.mrb[127].mxu1 }
 0xfe4   :  { %v2725_v15 = vpack.c.bf16 %v2657_v13, %v2654_v11 }
 0xfe6   :  { %7657 = vmatmul.mubr.msk.bf16.vlgmr.msra.gmra.mrb[128].mxu1 %vm521_vm3, %v2725_v15 }
 0xfe7   :  { %7660 = vmatprep.mubr.msk.bf16.mxu1 %vm8577_vm0, %v8576_v1 }
 0xfee   :  { %v7652_v3 = vpop.f32.mrb[124].mxu0 }
 0xfef   :  { %v2711_v16 = vpop.f32.mrb[125].mxu0 }
 0xff0   :  { %v2726_v17 = vpack.c.bf16 %v2711_v16, %v7644_v9  ;;  %v7653_v47 = vpop.f32.mrb[126].mxu0 }
 0xff1   :  { %v2714_v50 = vpop.f32.mrb[127].mxu0 }
 0xff2   :  { %v2727_v51 = vpack.c.bf16 %v7652_v3, %v2714_v50  ;;  %7661 = vmatmul.mubr.msk.bf16.gmra.mrb[132].mxu1 %vm521_vm3, %v2726_v17 }
 0xff3   :  { %7664 = vmatprep.mubr.msk.bf16.mxu1 %vm8577_vm0, %v8576_v1 }
 0xffa   :  { %7665 = vmatmul.mubr.msk.bf16.gmra.mrb[136].mxu1 %vm521_vm3, %v2727_v51 }
 0xffb   :  { %7692 = vmatprep.mubr.msk.bf16.mxu1 %vm8577_vm0, %v8576_v1 }
0x10b9   :  { %v2774_v54 = vpop.f32.mrb[128].mxu1 }
0x10ba   :  { %v2797_v62 = vadd.f32 %v2774_v54, %v9295_v29  ;;  %v7658_v18 = vpop.f32.mrb[129].mxu1 }
0x10bb   :  { %v2777_v0 = vpop.f32.mrb[130].mxu1 }
0x10bc   :  { %v2809_v19 = vadd.f32 %v6718_v53, %v2797_v62  ;;  %v2798_v27 = vadd.f32 %v2777_v0, %v9298_v36  ;;  %v7659_v42 = vpop.f32.mrb[131].mxu1 }
0x10be   :  { %v2810_v35 = vadd.f32 %v6718_v53, %v2798_v27  ;;  %v2815_v31 = vadd.f32 %v2809_v19, %v8775_v22  ;;  %v8210_v19 = vld [vmem:[%s10418_s13] sm:$0xff]   ;;  %v8211_v27 = vld [vmem:[%s10418_s13 + $0x8] sm:$0xff]  }
0x10bf   :  { %7669 = vmatpush3.bf16.msra.mxu0 %v8210_v19 }
0x10c0   :  { %v2821_v30 = vsel %vm296_vm2, %v2815_v31, 0.0  ;;  %v2816_v34 = vadd.f32 %v2810_v35, %v8777_v23  ;;  %7670 = vmatprep.subr.bf16.mxu0 %v8576_v1 }
0x10c1   :  { %2822 = vadd.xlane.f32.xlu0 %v2821_v30 }
0x10c2   :  { %v2824_v37 = vsel %vm296_vm2, %v2816_v34, 0.0 }
0x10c3   :  { %2825 = vadd.xlane.f32.xlu1 %v2824_v37  ;;  %7671 = vmatpush3.bf16.msra.mxu0 %v8211_v27 }
0x10c4   :  { %7704 = vmatprep.subr.bf16.mxu0 %v8576_v1 }
0x10c5   :  { %v2782_v26 = vpop.f32.mrb[132].mxu1 }
0x10c6   :  { %v2799_v29 = vadd.f32 %v2782_v26, %v9301_v41  ;;  %v7662_v21 = vpop.f32.mrb[133].mxu1 }
0x10c7   :  { %v2785_v44 = vpop.f32.mrb[134].mxu1 }
0x10c8   :  { %v2811_v10 = vadd.f32 %v6718_v53, %v2799_v29  ;;  %v2800_v36 = vadd.f32 %v2785_v44, %v9304_v49  ;;  %v7663_v38 = vpop.f32.mrb[135].mxu1 }
0x10ca   :  { %v2812_v24 = vadd.f32 %v6718_v53, %v2800_v36  ;;  %v2817_v22 = vadd.f32 %v2811_v10, %v8801_v32  ;;  %v6719_v10 = vld [vmem:[%s10416_s11] ss:$0 sm:$0xff] }
0x10cc   :  { %v2827_v46 = vsel %vm296_vm2, %v2817_v22, 0.0  ;;  %v2818_v23 = vadd.f32 %v2812_v24, %v8803_v33 }
0x10cd   :  { %2828 = vadd.xlane.f32.xlu0 %v2827_v46  ;;  %v2790_v57 = vpop.f32.mrb[136].mxu1 }
0x10ce   :  { %v2801_v58 = vadd.f32 %v2790_v57, %v9307_v48  ;;  %v7666_v45 = vpop.f32.mrb[137].mxu1  ;;  %v2830_v41 = vsel %vm296_vm2, %v2818_v23, 0.0 }
0x10cf   :  { %2831 = vadd.xlane.f32.xlu1 %v2830_v41  ;;  %v2793_v56 = vpop.f32.mrb[138].mxu1 }
0x10d0   :  { %v2813_v59 = vadd.f32 %v6718_v53, %v2801_v58  ;;  %v2802_v49 = vadd.f32 %v2793_v56, %v9310_v52  ;;  %v7667_v55 = vpop.f32.mrb[139].mxu1  ;;  %v6720_v58 = vld [vmem:[%s10417_s12] ss:$0 sm:$0xff] }
0x10d2   :  { %v2814_v60 = vadd.f32 %v6718_v53, %v2802_v49  ;;  %v2819_v32 = vadd.f32 %v2813_v59, %v8818_v39 }
0x10d4   :  { %v2833_v63 = vsel %vm296_vm2, %v2819_v32, 0.0  ;;  %v2820_v33 = vadd.f32 %v2814_v60, %v8820_v40 }
0x10d5   :  { %2834 = vadd.xlane.f32.xlu0 %v2833_v63 }
0x10d6   :  { %v2836_v20 = vsel %vm296_vm2, %v2820_v33, 0.0 }
0x10d7   :  { %2837 = vadd.xlane.f32.xlu1 %v2836_v20 }
0x114e   :  { %v2823_v48 = vpop.xlane.xlu0 %2822 }
0x114f   :  { %v2840_v2 = vmul.f32 0.03125, %v2823_v48 }
0x1150   :  { %v2826_v4 = vpop.xlane.xlu1 %2825 }
0x1151   :  { %v2846_v5 = vsub.f32 %v2815_v31, %v2840_v2  ;;  %v2841_v25 = vmul.f32 0.03125, %v2826_v4 }
0x1153   :  { %v2847_v6 = vsub.f32 %v2816_v34, %v2841_v25  ;;  %v2852_v28 = vmul.f32 %v2846_v5, %v2846_v5 }
0x1155   :  { %v2858_v52 = vsel %vm296_vm2, %v2852_v28, 0.0  ;;  %v2853_v43 = vmul.f32 %v2847_v6, %v2847_v6 }
0x1156   :  { %2859 = vadd.xlane.f32.xlu0 %v2858_v52 }
0x1157   :  { %v2861_v39 = vsel %vm296_vm2, %v2853_v43, 0.0 }
0x1158   :  { %2862 = vadd.xlane.f32.xlu1 %v2861_v39 }
0x115a   :  { %v2829_v7 = vpop.xlane.xlu0 %2828 }
0x115b   :  { %v2842_v40 = vmul.f32 0.03125, %v2829_v7 }
0x115c   :  { %v2832_v61 = vpop.xlane.xlu1 %2831 }
0x115d   :  { %v9405_v8 = vsub.f32 %v2817_v22, %v2842_v40  ;;  %v2843_v9 = vmul.f32 0.03125, %v2832_v61 }
0x115f   :  { %v9407_v11 = vsub.f32 %v2818_v23, %v2843_v9  ;;  %v2854_v12 = vmul.f32 %v9405_v8, %v9405_v8 }
0x1161   :  { %v2864_v13 = vsel %vm296_vm2, %v2854_v12, 0.0  ;;  %v2855_v15 = vmul.f32 %v9407_v11, %v9407_v11 }
0x1162   :  { %2865 = vadd.xlane.f32.xlu0 %v2864_v13  ;;  %v2835_v3 = vpop.xlane.xlu0 %2834  ;;  %v8212_v13 = vld [vmem:[%s10420_s15] sm:$0xff]  }
0x1163   :  { %v2844_v16 = vmul.f32 0.03125, %v2835_v3  ;;  %v2867_v17 = vsel %vm296_vm2, %v2855_v15, 0.0  ;;  %7685 = vmatpush3.bf16.msra.mxu1 %v8212_v13  ;;  %v8213_v15 = vld [vmem:[%s10420_s15 + $0x8] sm:$0xff]   ;;  %v8214_v3 = vld [vmem:[%s10420_s15 + $0x10] sm:$0xff]  }
0x1164   :  { %2868 = vadd.xlane.f32.xlu1 %v2867_v17  ;;  %v2838_v47 = vpop.xlane.xlu1 %2837  ;;  %7686 = vmatprep.subr.bf16.mxu1 %v8576_v1  ;;  %v6721_v17 = vld [vmem:[%s10419_s14] ss:$0 sm:$0xff] }
0x1165   :  { %v2850_v50 = vsub.f32 %v2819_v32, %v2844_v16  ;;  %v2845_v51 = vmul.f32 0.03125, %v2838_v47  ;;  %v8215_v16 = vld [vmem:[%s10420_s15 + $0x18] sm:$0xff]  }
0x1167   :  { %v2851_v53 = vsub.f32 %v2820_v33, %v2845_v51  ;;  %v2856_v54 = vmul.f32 %v2850_v50, %v2850_v50  ;;  %7687 = vmatpush3.bf16.msra.mxu1 %v8213_v15 }
0x1168   :  { %7688 = vmatprep.subr.bf16.mxu1 %v8576_v1 }
0x1169   :  { %v2870_v62 = vsel %vm296_vm2, %v2856_v54, 0.0  ;;  %v2857_v18 = vmul.f32 %v2851_v53, %v2851_v53 }
0x116a   :  { %2871 = vadd.xlane.f32.xlu0 %v2870_v62 }
0x116b   :  { %v2873_v0 = vsel %vm296_vm2, %v2857_v18, 0.0  ;;  %7689 = vmatpush3.bf16.msra.mxu1 %v8214_v3 }
0x116c   :  { %2874 = vadd.xlane.f32.xlu1 %v2873_v0  ;;  %7690 = vmatprep.subr.bf16.mxu1 %v8576_v1 }
0x116f   :  { %7691 = vmatpush3.bf16.msra.mxu1 %v8215_v16 }
0x1170   :  { %7720 = vmatprep.subr.bf16.mxu1 %v8576_v1 }
0x11e3   :  { %v2860_v42 = vpop.xlane.xlu0 %2859 }
0x11e4   :  { %v2876_v35 = vmul.f32 0.03125, %v2860_v42 }
0x11e5   :  { %v2863_v31 = vpop.xlane.xlu1 %2862 }
0x11e6   :  { %v2882_v30 = vadd.f32 1e-12, %v2876_v35  ;;  %v2877_v34 = vmul.f32 0.03125, %v2863_v31 }
0x11e8   :  { %8344 = vrsqrt.f32 %v2882_v30  ;;  %v2883_v37 = vadd.f32 1e-12, %v2877_v34 }
0x11ea   :  { %8346 = vrsqrt.f32 %v2883_v37 }
0x11ef   :  { %v2866_v26 = vpop.xlane.xlu0 %2865 }
0x11f0   :  { %v2878_v29 = vmul.f32 0.03125, %v2866_v26 }
0x11f1   :  { %v2869_v21 = vpop.xlane.xlu1 %2868 }
0x11f2   :  { %v8345_v44 = vpop.eup %8344  ;;  %v2884_v36 = vadd.f32 1e-12, %v2878_v29  ;;  %v2879_v38 = vmul.f32 0.03125, %v2869_v21 }
0x11f3   :  { %v2894_v24 = vmul.f32 %v8345_v44, %v2846_v5 }
0x11f4   :  { %v8347_v22 = vpop.eup %8346  ;;  %8348 = vrsqrt.f32 %v2884_v36  ;;  %v2885_v46 = vadd.f32 1e-12, %v2879_v38 }
0x11f5   :  { %v2906_v23 = vmul.f32 %v6719_v10, %v2894_v24  ;;  %v2895_v57 = vmul.f32 %v8347_v22, %v2847_v6 }
0x11f6   :  { %8350 = vrsqrt.f32 %v2885_v46 }
0x11f7   :  { %v2907_v45 = vmul.f32 %v6719_v10, %v2895_v57  ;;  %v2872_v41 = vpop.xlane.xlu0 %2871  ;;  %v9431_v49 = vadd.f32 %v6720_v58, %v2906_v23 }
0x11f8   :  { %v2880_v56 = vmul.f32 0.03125, %v2872_v41 }
0x11f9   :  { %v2875_v59 = vpop.xlane.xlu1 %2874  ;;  %v9433_v55 = vadd.f32 %v6720_v58, %v2907_v45 }
0x11fa   :  { %v2886_v60 = vadd.f32 1e-12, %v2880_v56  ;;  %v2881_v32 = vmul.f32 0.03125, %v2875_v59 }
0x11fb   :  { %v2924_v63 = vpack.c.bf16 %v9433_v55, %v9431_v49 }
0x11fc   :  { %8352 = vrsqrt.f32 %v2886_v60  ;;  %v2887_v33 = vadd.f32 1e-12, %v2881_v32 }
0x11fd   :  { %7673 = vmatmul.mubr.msk.bf16.vlgmr.msra.gmra.mrb[128].mxu0 %vm296_vm2, %v2924_v63 }
0x11fe   :  { %v8349_v20 = vpop.eup %8348  ;;  %8354 = vrsqrt.f32 %v2887_v33  ;;  %7676 = vmatprep.mubr.msk.bf16.mxu0 %vm8577_vm0, %v8576_v1 }
0x11ff   :  { %v2896_v48 = vmul.f32 %v8349_v20, %v9405_v8 }
0x1200   :  { %v8351_v2 = vpop.eup %8350 }
0x1201   :  { %v2897_v4 = vmul.f32 %v8351_v2, %v9407_v11  ;;  %v2908_v5 = vmul.f32 %v6719_v10, %v2896_v48 }
0x1203   :  { %v2909_v25 = vmul.f32 %v6719_v10, %v2897_v4  ;;  %v9442_v6 = vadd.f32 %v6720_v58, %v2908_v5 }
0x1205   :  { %v9444_v28 = vadd.f32 %v6720_v58, %v2909_v25 }
0x1206   :  { %v8353_v52 = vpop.eup %8352 }
0x1207   :  { %v2925_v43 = vpack.c.bf16 %v9444_v28, %v9442_v6  ;;  %v2898_v39 = vmul.f32 %v8353_v52, %v2850_v50 }
0x1208   :  { %v8355_v7 = vpop.eup %8354 }
0x1209   :  { %v2899_v40 = vmul.f32 %v8355_v7, %v2851_v53  ;;  %7677 = vmatmul.mubr.msk.bf16.gmra.mrb[132].mxu0 %vm296_vm2, %v2925_v43  ;;  %v2910_v61 = vmul.f32 %v6719_v10, %v2898_v39 }
0x120a   :  { %7680 = vmatprep.mubr.msk.bf16.mxu0 %vm8577_vm0, %v8576_v1 }
0x120b   :  { %v2911_v8 = vmul.f32 %v6719_v10, %v2899_v40  ;;  %v9451_v9 = vadd.f32 %v6720_v58, %v2910_v61 }
0x120d   :  { %v9453_v11 = vadd.f32 %v6720_v58, %v2911_v8 }
0x120f   :  { %v2926_v12 = vpack.c.bf16 %v9453_v11, %v9451_v9 }
0x1211   :  { %7681 = vmatmul.mubr.msk.bf16.gmra.mrb[136].mxu0 %vm296_vm2, %v2926_v12 }
0x1212   :  { %7708 = vmatprep.mubr.msk.bf16.mxu0 %vm8577_vm0, %v8576_v1 }
0x12d0   :  { %v2988_v47 = vpop.f32.mrb[128].mxu0 }
0x12d1   :  { %v2989_v50 = vadd.f32 %v6721_v17, %v2988_v47  ;;  %v7674_v51 = vpop.f32.mrb[129].mxu0 }
0x12d2   :  { %v2991_v53 = vpop.f32.mrb[130].mxu0 }
0x12d3   :  { %v3011_v54 = vmul.f32 %v2989_v50, %v2989_v50  ;;  %v2992_v62 = vadd.f32 %v6721_v17, %v2991_v53  ;;  %v7675_v18 = vpop.f32.mrb[131].mxu0 }
0x12d5   :  { %v3017_v0 = vmul.f32 %v3011_v54, %v2989_v50  ;;  %v3012_v19 = vmul.f32 %v2992_v62, %v2992_v62 }
0x12d7   :  { %v3023_v27 = vmul.f32 0.044715, %v3017_v0  ;;  %v3018_v42 = vmul.f32 %v3012_v19, %v2992_v62 }
0x12d9   :  { %v3029_v35 = vadd.f32 %v3023_v27, %v2989_v50  ;;  %v3024_v31 = vmul.f32 0.044715, %v3018_v42 }
0x12db   :  { %v3035_v30 = vmul.f32 0.7978846, %v3029_v35  ;;  %v3030_v34 = vadd.f32 %v3024_v31, %v2992_v62 }
0x12dc   :  { %v2996_v37 = vpop.f32.mrb[132].mxu0 }
0x12dd   :  { %8356 = vtanh.f32 %v3035_v30  ;;  %v3036_v26 = vmul.f32 0.7978846, %v3030_v34  ;;  %v2997_v29 = vadd.f32 %v6721_v17, %v2996_v37  ;;  %v7678_v21 = vpop.f32.mrb[133].mxu0 }
0x12de   :  { %v2999_v44 = vpop.f32.mrb[134].mxu0 }
0x12df   :  { %8358 = vtanh.f32 %v3036_v26  ;;  %v3013_v10 = vmul.f32 %v2997_v29, %v2997_v29  ;;  %v3000_v36 = vadd.f32 %v6721_v17, %v2999_v44  ;;  %v7679_v38 = vpop.f32.mrb[135].mxu0 }
0x12e1   :  { %v3019_v24 = vmul.f32 %v3013_v10, %v2997_v29  ;;  %v3014_v22 = vmul.f32 %v3000_v36, %v3000_v36 }
0x12e3   :  { %v3025_v46 = vmul.f32 0.044715, %v3019_v24  ;;  %v3020_v23 = vmul.f32 %v3014_v22, %v3000_v36 }
0x12e4   :  { %v3004_v57 = vpop.f32.mrb[136].mxu0 }
0x12e5   :  { %v3031_v58 = vadd.f32 %v3025_v46, %v2997_v29  ;;  %v3026_v45 = vmul.f32 0.044715, %v3020_v23  ;;  %v3005_v41 = vadd.f32 %v6721_v17, %v3004_v57  ;;  %v7682_v56 = vpop.f32.mrb[137].mxu0 }
0x12e6   :  { %v3007_v59 = vpop.f32.mrb[138].mxu0 }
0x12e7   :  { %v8357_v60 = vpop.eup %8356  ;;  %v3037_v32 = vmul.f32 0.7978846, %v3031_v58  ;;  %v3032_v63 = vadd.f32 %v3026_v45, %v3000_v36  ;;  %v3015_v33 = vmul.f32 %v3005_v41, %v3005_v41  ;;  %v3008_v20 = vadd.f32 %v6721_v17, %v3007_v59  ;;  %v7683_v48 = vpop.f32.mrb[139].mxu0 }
0x12e8   :  { %v3047_v2 = vadd.f32 1.0, %v8357_v60 }
0x12e9   :  { %v8359_v4 = vpop.eup %8358  ;;  %8360 = vtanh.f32 %v3037_v32  ;;  %v3038_v5 = vmul.f32 0.7978846, %v3032_v63  ;;  %v3021_v25 = vmul.f32 %v3015_v33, %v3005_v41  ;;  %v3016_v52 = vmul.f32 %v3008_v20, %v3008_v20 }
0x12ea   :  { %v3053_v43 = vmul.f32 0.5, %v3047_v2  ;;  %v3048_v39 = vadd.f32 1.0, %v8359_v4 }
0x12eb   :  { %8362 = vtanh.f32 %v3038_v5  ;;  %v3027_v7 = vmul.f32 0.044715, %v3021_v25  ;;  %v3022_v40 = vmul.f32 %v3016_v52, %v3008_v20 }
0x12ec   :  { %v3054_v61 = vmul.f32 0.5, %v3048_v39  ;;  %v3059_v13 = vmul.f32 %v3053_v43, %v2989_v50 }
0x12ed   :  { %v3033_v8 = vadd.f32 %v3027_v7, %v3005_v41  ;;  %v3028_v12 = vmul.f32 0.044715, %v3022_v40 }
0x12ee   :  { %v3060_v15 = vmul.f32 %v3054_v61, %v2992_v62 }
0x12ef   :  { %v3039_v3 = vmul.f32 0.7978846, %v3033_v8  ;;  %v3034_v16 = vadd.f32 %v3028_v12, %v3008_v20 }
0x12f0   :  { %v3065_v17 = vpack.c.bf16 %v3060_v15, %v3059_v13 }
0x12f1   :  { %8364 = vtanh.f32 %v3039_v3  ;;  %v3040_v47 = vmul.f32 0.7978846, %v3034_v16 }
0x12f2   :  { %7693 = vmatmul.mubr.msk.bf16.vlgmr.msra.gmra.mrb[140].mxu1 %vm3098_vm7, %v3065_v17 }
0x12f3   :  { %v8361_v51 = vpop.eup %8360  ;;  %8366 = vtanh.f32 %v3040_v47  ;;  %7696 = vmatprep.mubr.msk.bf16.mxu1 %vm8577_vm0, %v8576_v1 }
0x12f4   :  { %v3049_v53 = vadd.f32 1.0, %v8361_v51 }
0x12f5   :  { %v8363_v54 = vpop.eup %8362 }
0x12f6   :  { %v3055_v18 = vmul.f32 0.5, %v3049_v53  ;;  %v3050_v0 = vadd.f32 1.0, %v8363_v54 }
0x12f8   :  { %v3056_v19 = vmul.f32 0.5, %v3050_v0  ;;  %v3061_v50 = vmul.f32 %v3055_v18, %v2997_v29  ;;  %v6727_v29 = vld [vmem:[%s10421_s16] ss:$0 sm:$0xff] }
0x12fa   :  { %v3062_v62 = vmul.f32 %v3056_v19, %v3000_v36 }
0x12fb   :  { %v8365_v27 = vpop.eup %8364 }
0x12fc   :  { %v3051_v42 = vadd.f32 1.0, %v8365_v27  ;;  %v3066_v35 = vpack.c.bf16 %v3062_v62, %v3061_v50 }
0x12fd   :  { %v8367_v31 = vpop.eup %8366 }
0x12fe   :  { %v3057_v30 = vmul.f32 0.5, %v3051_v42  ;;  %v3052_v34 = vadd.f32 1.0, %v8367_v31  ;;  %7697 = vmatmul.mubr.msk.bf16.gmra.mrb[144].mxu1 %vm3098_vm7, %v3066_v35 }
0x12ff   :  { %7700 = vmatprep.mubr.msk.bf16.mxu1 %vm8577_vm0, %v8576_v1 }
0x1300   :  { %v3058_v37 = vmul.f32 0.5, %v3052_v34  ;;  %v3063_v26 = vmul.f32 %v3057_v30, %v3005_v41 }
0x1302   :  { %v3064_v21 = vmul.f32 %v3058_v37, %v3008_v20 }
0x1304   :  { %v3067_v44 = vpack.c.bf16 %v3064_v21, %v3063_v26 }
0x1306   :  { %7701 = vmatmul.mubr.msk.bf16.gmra.mrb[148].mxu1 %vm3098_vm7, %v3067_v44  ;;  %v8216_v44 = vld [vmem:[%s10451_s25 + $0x40] sm:$0xff]  }
0x1307   :  { %7724 = vmatprep.mubr.msk.bf16.mxu1 %vm8577_vm0, %v8576_v1  ;;  %7721 = vmatpush3.bf16.msra.mxu1 %v8216_v44 }
0x1308   :  { %7722 = vmatprep.subr.bf16.mxu1 %v8576_v1 }
0x13c5   :  { %v3142_v10 = vpop.f32.mrb[140].mxu1 }
0x13c6   :  { %v3143_v36 = vadd.f32 %v6727_v29, %v3142_v10  ;;  %v7694_v38 = vpop.f32.mrb[141].mxu1  ;;  %v8218_v10 = vld [vmem:[%s10450_s0 + $0x48] sm:$0xff]  }
0x13c7   :  { %v3145_v24 = vpop.f32.mrb[142].mxu1 }
0x13c8   :  { %v3146_v22 = vadd.f32 %v6727_v29, %v3145_v24  ;;  %v7695_v46 = vpop.f32.mrb[143].mxu1  ;;  %v3165_v23 = vadd.f32 %v3143_v36, %v9431_v49  ;;  %v8219_v36 = vld [vmem:[%s10451_s25 + $0x48] sm:$0xff]  }
0x13c9   :  { %7723 = vmatpush3.bf16.msra.mxu1 %v8219_v36 }
0x13ca   :  { %v3171_v57 = vsel %vm296_vm2, %v3165_v23, 0.0  ;;  %v3166_v58 = vadd.f32 %v3146_v22, %v9433_v55 }
0x13cb   :  { %3172 = vadd.xlane.f32.xlu0 %v3171_v57 }
0x13cc   :  { %v3174_v45 = vsel %vm296_vm2, %v3166_v58, 0.0 }
0x13cd   :  { %3175 = vadd.xlane.f32.xlu1 %v3174_v45 }
0x13d1   :  { %v3150_v41 = vpop.f32.mrb[144].mxu1 }
0x13d2   :  { %v3151_v56 = vadd.f32 %v6727_v29, %v3150_v41  ;;  %v7698_v59 = vpop.f32.mrb[145].mxu1 }
0x13d3   :  { %v3153_v60 = vpop.f32.mrb[146].mxu1  ;;  %v6735_v59 = vld [vmem:[%s10422_s17] ss:$0 sm:$0xff] }
0x13d4   :  { %v3154_v32 = vadd.f32 %v6727_v29, %v3153_v60  ;;  %v7699_v63 = vpop.f32.mrb[147].mxu1  ;;  %v3167_v33 = vadd.f32 %v3151_v56, %v9442_v6 }
0x13d6   :  { %v3177_v20 = vsel %vm296_vm2, %v3167_v33, 0.0  ;;  %v3168_v49 = vadd.f32 %v3154_v32, %v9444_v28 }
0x13d7   :  { %3178 = vadd.xlane.f32.xlu0 %v3177_v20 }
0x13d8   :  { %v3180_v48 = vsel %vm296_vm2, %v3168_v49, 0.0 }
0x13d9   :  { %3181 = vadd.xlane.f32.xlu1 %v3180_v48  ;;  %v3158_v55 = vpop.f32.mrb[148].mxu1 }
0x13da   :  { %v3159_v2 = vadd.f32 %v6727_v29, %v3158_v55  ;;  %v7702_v4 = vpop.f32.mrb[149].mxu1  ;;  %v6736_v55 = vld [vmem:[%s10423_s18] ss:$0 sm:$0xff] }
0x13db   :  { %v3161_v5 = vpop.f32.mrb[150].mxu1 }
0x13dc   :  { %v3162_v25 = vadd.f32 %v6727_v29, %v3161_v5  ;;  %v7703_v52 = vpop.f32.mrb[151].mxu1  ;;  %v3169_v43 = vadd.f32 %v3159_v2, %v9451_v9  ;;  %v8217_v29 = vld [vmem:[%s10450_s0 + $0x40] sm:$0xff]  }
0x13dd   :  { %7705 = vmatpush3.bf16.msra.mxu0 %v8217_v29 }
0x13de   :  { %v3183_v39 = vsel %vm296_vm2, %v3169_v43, 0.0  ;;  %v3170_v6 = vadd.f32 %v3162_v25, %v9453_v11  ;;  %7706 = vmatprep.subr.bf16.mxu0 %v8576_v1 }
0x13df   :  { %3184 = vadd.xlane.f32.xlu0 %v3183_v39 }
0x13e0   :  { %v3186_v7 = vsel %vm296_vm2, %v3170_v6, 0.0 }
0x13e1   :  { %3187 = vadd.xlane.f32.xlu1 %v3186_v7  ;;  %7707 = vmatpush3.bf16.msra.mxu0 %v8218_v10 }
0x13e2   :  { %7736 = vmatprep.subr.bf16.mxu0 %v8576_v1 }
0x1458   :  { %v3173_v28 = vpop.xlane.xlu0 %3172 }
0x1459   :  { %v3189_v40 = vmul.f32 0.03125, %v3173_v28  ;;  %v8220_v28 = vld [vmem:[%s10453_s7 + $0x40] sm:$0xff]  }
0x145a   :  { %v3176_v61 = vpop.xlane.xlu1 %3175 }
0x145b   :  { %v3195_v8 = vsub.f32 %v3165_v23, %v3189_v40  ;;  %v3190_v12 = vmul.f32 0.03125, %v3176_v61 }
0x145d   :  { %v3196_v13 = vsub.f32 %v3166_v58, %v3190_v12  ;;  %v3201_v15 = vmul.f32 %v3195_v8, %v3195_v8  ;;  %v8221_v12 = vld [vmem:[%s10453_s7 + $0x48] sm:$0xff]  }
0x145f   :  { %v3207_v3 = vsel %vm296_vm2, %v3201_v15, 0.0  ;;  %v3202_v16 = vmul.f32 %v3196_v13, %v3196_v13 }
0x1460   :  { %3208 = vadd.xlane.f32.xlu0 %v3207_v3 }
0x1461   :  { %v3210_v9 = vsel %vm296_vm2, %v3202_v16, 0.0 }
0x1462   :  { %3211 = vadd.xlane.f32.xlu1 %v3210_v9 }
0x1464   :  { %v3179_v17 = vpop.xlane.xlu0 %3178 }
0x1465   :  { %v3191_v11 = vmul.f32 0.03125, %v3179_v17 }
0x1466   :  { %v3182_v47 = vpop.xlane.xlu1 %3181 }
0x1467   :  { %v9505_v51 = vsub.f32 %v3167_v33, %v3191_v11  ;;  %v3192_v53 = vmul.f32 0.03125, %v3182_v47 }
0x1469   :  { %v9507_v54 = vsub.f32 %v3168_v49, %v3192_v53  ;;  %v3203_v18 = vmul.f32 %v9505_v51, %v9505_v51 }
0x146b   :  { %v3213_v0 = vsel %vm296_vm2, %v3203_v18, 0.0  ;;  %v3204_v19 = vmul.f32 %v9507_v54, %v9507_v54 }
0x146c   :  { %3214 = vadd.xlane.f32.xlu0 %v3213_v0  ;;  %v3185_v50 = vpop.xlane.xlu0 %3184 }
0x146d   :  { %v3193_v62 = vmul.f32 0.03125, %v3185_v50  ;;  %v3216_v27 = vsel %vm296_vm2, %v3204_v19, 0.0 }
0x146e   :  { %3217 = vadd.xlane.f32.xlu1 %v3216_v27  ;;  %v3188_v42 = vpop.xlane.xlu1 %3187  ;;  %v9616_v27 = vld [vmem:[%s10454_s26 + $0x4] ss:$0 sm:$0xff] }
0x146f   :  { %v9515_v35 = vsub.f32 %v3169_v43, %v3193_v62  ;;  %v3194_v31 = vmul.f32 0.03125, %v3188_v42 }
0x1471   :  { %v9517_v30 = vsub.f32 %v3170_v6, %v3194_v31  ;;  %v3205_v34 = vmul.f32 %v9515_v35, %v9515_v35 }
0x1473   :  { %v3219_v37 = vsel %vm296_vm2, %v3205_v34, 0.0  ;;  %v3206_v26 = vmul.f32 %v9517_v30, %v9517_v30 }
0x1474   :  { %3220 = vadd.xlane.f32.xlu0 %v3219_v37 }
0x1475   :  { %v3222_v21 = vsel %vm296_vm2, %v3206_v26, 0.0 }
0x1476   :  { %3223 = vadd.xlane.f32.xlu1 %v3222_v21 }
0x14ed   :  { %v3209_v38 = vpop.xlane.xlu0 %3208 }
0x14ee   :  { %v3225_v24 = vmul.f32 0.03125, %v3209_v38 }
0x14ef   :  { %v3212_v22 = vpop.xlane.xlu1 %3211 }
0x14f0   :  { %v3231_v46 = vadd.f32 1e-12, %v3225_v24  ;;  %v3226_v23 = vmul.f32 0.03125, %v3212_v22 }
0x14f2   :  { %8368 = vrsqrt.f32 %v3231_v46  ;;  %v3232_v57 = vadd.f32 1e-12, %v3226_v23 }
0x14f4   :  { %8370 = vrsqrt.f32 %v3232_v57 }
0x14f9   :  { %v3215_v58 = vpop.xlane.xlu0 %3214 }
0x14fa   :  { %v3227_v45 = vmul.f32 0.03125, %v3215_v58 }
0x14fb   :  { %v3218_v41 = vpop.xlane.xlu1 %3217 }
0x14fc   :  { %v8369_v56 = vpop.eup %8368  ;;  %v3233_v60 = vadd.f32 1e-12, %v3227_v45  ;;  %v3228_v32 = vmul.f32 0.03125, %v3218_v41 }
0x14fd   :  { %v3243_v63 = vmul.f32 %v8369_v56, %v3195_v8 }
0x14fe   :  { %v8371_v33 = vpop.eup %8370  ;;  %8372 = vrsqrt.f32 %v3233_v60  ;;  %v3234_v20 = vadd.f32 1e-12, %v3228_v32 }
0x14ff   :  { %v3255_v49 = vmul.f32 %v6735_v59, %v3243_v63  ;;  %v3244_v48 = vmul.f32 %v8371_v33, %v3196_v13 }
0x1500   :  { %8374 = vrsqrt.f32 %v3234_v20 }
0x1501   :  { %v3256_v2 = vmul.f32 %v6735_v59, %v3244_v48  ;;  %v3221_v4 = vpop.xlane.xlu0 %3220  ;;  %v9546_v25 = vadd.f32 %v6736_v55, %v3255_v49 }
0x1502   :  { %v3229_v5 = vmul.f32 0.03125, %v3221_v4 }
0x1503   :  { %v9548_v52 = vadd.f32 %v6736_v55, %v3256_v2  ;;  %v3224_v43 = vpop.xlane.xlu1 %3223 }
0x1504   :  { %v3235_v39 = vadd.f32 1e-12, %v3229_v5  ;;  %v3230_v6 = vmul.f32 0.03125, %v3224_v43 }
0x1505   :  { %v9552_v7 = vpack.c.bf16 %v9548_v52, %v9546_v25 }
0x1506   :  { %8376 = vrsqrt.f32 %v3235_v39  ;;  %v3236_v40 = vadd.f32 1e-12, %v3230_v6 }
0x1507   :  { %7709 = vmatmul.mubr.msk.bf16.vlgmr.msra.gmra.mrb[140].mxu0 %vm296_vm2, %v9552_v7  ;;  %7725 = vmatmul.mubr.msk.bf16.vlgmr.msra.gmra.mrb[152].mxu1 %vm296_vm2, %v9552_v7 }
0x1508   :  { %v8373_v61 = vpop.eup %8372  ;;  %8378 = vrsqrt.f32 %v3236_v40  ;;  %7712 = vmatprep.mubr.msk.bf16.mxu0 %vm8577_vm0, %v8576_v1  ;;  %7728 = vmatprep.mubr.msk.bf16.mxu1 %vm8577_vm0, %v8576_v1 }
0x1509   :  { %v3245_v8 = vmul.f32 %v8373_v61, %v9505_v51  ;;  %7737 = vmatpush3.bf16.msra.mxu0 %v8220_v28 }
0x150a   :  { %v8375_v13 = vpop.eup %8374  ;;  %7738 = vmatprep.subr.bf16.mxu0 %v8576_v1 }
0x150b   :  { %v3257_v15 = vmul.f32 %v6735_v59, %v3245_v8  ;;  %v3246_v3 = vmul.f32 %v8375_v13, %v9507_v54 }
0x150d   :  { %v3258_v16 = vmul.f32 %v6735_v59, %v3246_v3  ;;  %7739 = vmatpush3.bf16.msra.mxu0 %v8221_v12  ;;  %v9571_v9 = vadd.f32 %v6736_v55, %v3257_v15 }
0x150f   :  { %v9573_v17 = vadd.f32 %v6736_v55, %v3258_v16 }
0x1510   :  { %v8377_v11 = vpop.eup %8376 }
0x1511   :  { %v9577_v47 = vpack.c.bf16 %v9573_v17, %v9571_v9  ;;  %v3247_v51 = vmul.f32 %v8377_v11, %v9515_v35  ;;  %v6826_v35 = vld [vmem:[%s10455_s6 + $0x4] ss:$0 sm:$0xff] }
0x1512   :  { %v8379_v53 = vpop.eup %8378  ;;  %v6832_v11 = vld [vmem:[%s10456_s3 + $0x4] ss:$0 sm:$0xff] }
0x1513   :  { %v3259_v18 = vmul.f32 %v6735_v59, %v3247_v51  ;;  %v3248_v0 = vmul.f32 %v8379_v53, %v9517_v30  ;;  %7713 = vmatmul.mubr.msk.bf16.gmra.mrb[144].mxu0 %vm296_vm2, %v9577_v47  ;;  %7729 = vmatmul.mubr.msk.bf16.gmra.mrb[156].mxu1 %vm296_vm2, %v9577_v47 }
0x1514   :  { %7716 = vmatprep.mubr.msk.bf16.mxu0 %vm8577_vm0, %v8576_v1  ;;  %7732 = vmatprep.mubr.msk.bf16.mxu1 %vm8577_vm0, %v8576_v1 }
0x1515   :  { %v3260_v54 = vmul.f32 %v6735_v59, %v3248_v0  ;;  %v9589_v19 = vadd.f32 %v6736_v55, %v3259_v18 }
0x1517   :  { %v9591_v50 = vadd.f32 %v6736_v55, %v3260_v54 }
0x1519   :  { %v9595_v62 = vpack.c.bf16 %v9591_v50, %v9589_v19 }
0x151b   :  { %7717 = vmatmul.mubr.msk.bf16.gmra.mrb[148].mxu0 %vm296_vm2, %v9595_v62  ;;  %7733 = vmatmul.mubr.msk.bf16.gmra.mrb[160].mxu1 %vm296_vm2, %v9595_v62 }
0x151c   :  { %7740 = vmatprep.mubr.msk.bf16.mxu0 %vm8577_vm0, %v8576_v1 }
0x1523   :  { %7741 = vmatmul.mubr.msk.bf16.vlgmr.msra.gmra.mrb[152].mxu0 %vm296_vm2, %v9552_v7 }
0x1524   :  { %7744 = vmatprep.mubr.msk.bf16.mxu0 %vm8577_vm0, %v8576_v1 }
0x152b   :  { %7745 = vmatmul.mubr.msk.bf16.gmra.mrb[156].mxu0 %vm296_vm2, %v9577_v47 }
0x152c   :  { %7748 = vmatprep.mubr.msk.bf16.mxu0 %vm8577_vm0, %v8576_v1 }
0x1533   :  { %7749 = vmatmul.mubr.msk.bf16.gmra.mrb[160].mxu0 %vm296_vm2, %v9595_v62 }
0x15da   :  { %v3436_v42 = vpop.f32.mrb[140].mxu0  ;;  %v3511_v31 = vpop.f32.mrb[152].mxu1 }
0x15db   :  { %v7710_v30 = vpop.f32.mrb[141].mxu0  ;;  %v7726_v34 = vpop.f32.mrb[153].mxu1  ;;  %v3437_v21 = vadd.f32 %v9616_v27, %v3436_v42  ;;  %v3512_v44 = vadd.f32 %v6826_v35, %v3511_v31 }
0x15dc   :  { %v3439_v37 = vpop.f32.mrb[142].mxu0  ;;  %v3514_v26 = vpop.f32.mrb[154].mxu1 }
0x15dd   :  { %v3440_v29 = vadd.f32 %v9616_v27, %v3439_v37  ;;  %v3515_v10 = vadd.f32 %v6826_v35, %v3514_v26  ;;  %v7711_v36 = vpop.f32.mrb[143].mxu0  ;;  %v7727_v38 = vpop.f32.mrb[155].mxu1 }
0x15df   :  { %v3609_v24 = vpack.c.bf16 %v3440_v29, %v3437_v21  ;;  %v3613_v22 = vpack.c.bf16 %v3515_v10, %v3512_v44 }
0x15e1   :  { %8152 = vmatprep.subr.msk.bf16.mxu1 %vm521_vm3, %v3613_v22  ;;  %7756 = vmatprep.mubr.msk.bf16.mxu1 %vm521_vm3, %v3609_v24  ;;  %v3624_v46 = vsel %vm521_vm3, %v3613_v22, 0 }
0x15e2   :  { %7753 = vmatpush3.bf16.xpose.msra.mxu1 %v3624_v46 }
0x15e6   :  { %v3444_v23 = vpop.f32.mrb[144].mxu0  ;;  %v3519_v57 = vpop.f32.mrb[156].mxu1 }
0x15e7   :  { %v3520_v58 = vadd.f32 %v6826_v35, %v3519_v57  ;;  %v7714_v45 = vpop.f32.mrb[145].mxu0  ;;  %v7730_v41 = vpop.f32.mrb[157].mxu1  ;;  %v3445_v20 = vadd.f32 %v9616_v27, %v3444_v23 }
0x15e8   :  { %v3447_v56 = vpop.f32.mrb[146].mxu0  ;;  %v3522_v59 = vpop.f32.mrb[158].mxu1 }
0x15e9   :  { %v3614_v60 = vpack.c.bf16 %v3520_v58, %v3520_v58  ;;  %v7715_v32 = vpop.f32.mrb[147].mxu0  ;;  %v7731_v63 = vpop.f32.mrb[159].mxu1  ;;  %v3448_v55 = vadd.f32 %v9616_v27, %v3447_v56  ;;  %v3523_v2 = vadd.f32 %v6826_v35, %v3522_v59  ;;  %v3610_v40 = vpack.c.bf16 %v3445_v20, %v3445_v20 }
0x15eb   :  { %v3627_v33 = vsel %vm521_vm3, %v3614_v60, 0  ;;  %8153 = vmatprep.subr.msk.bf16.mxu1 %vm521_vm3, %v3614_v60 }
0x15ec   :  { %7755 = vmatpush3.bf16.xpose.msra.mxu1 %v3627_v33 }
0x15ee   :  { %v3452_v49 = vpop.f32.mrb[148].mxu0  ;;  %v3527_v48 = vpop.f32.mrb[160].mxu1 }
0x15ef   :  { %v3453_v4 = vadd.f32 %v9616_v27, %v3452_v49  ;;  %v3528_v5 = vadd.f32 %v6826_v35, %v3527_v48  ;;  %v7718_v43 = vpop.f32.mrb[149].mxu0  ;;  %v7734_v39 = vpop.f32.mrb[161].mxu1 }
0x15f0   :  { %v3455_v6 = vpop.f32.mrb[150].mxu0  ;;  %v3530_v28 = vpop.f32.mrb[162].mxu1 }
0x15f1   :  { %v3611_v61 = vpack.c.bf16 %v3453_v4, %v3448_v55  ;;  %v3615_v8 = vpack.c.bf16 %v3528_v5, %v3523_v2  ;;  %v3531_v12 = vadd.f32 %v6826_v35, %v3530_v28  ;;  %v7719_v13 = vpop.f32.mrb[151].mxu0  ;;  %v7735_v15 = vpop.f32.mrb[163].mxu1  ;;  %v3456_v30 = vadd.f32 %v9616_v27, %v3455_v6 }
0x15f3   :  { %v3616_v3 = vpack.c.bf16 %v3531_v12, %v3531_v12  ;;  %7757 = vmatmul.mubr.msk.bf16.vlgmr.msra.gmra.mrb[164].mxu1 %vm521_vm3, %v3610_v40  ;;  %8154 = vmatprep.subr.msk.bf16.mxu0 %vm521_vm3, %v3615_v8  ;;  %v3684_v16 = vsel %vm521_vm3, %v3615_v8, 0  ;;  %v3612_v44 = vpack.c.bf16 %v3456_v30, %v3456_v30 }
0x15f4   :  { %7764 = vmatprep.mubr.msk.bf16.mxu0 %vm521_vm3, %v3611_v61  ;;  %7761 = vmatpush3.bf16.xpose.msra.mxu0 %v3684_v16 }
0x15f5   :  { %8155 = vmatprep.subr.msk.bf16.mxu0 %vm521_vm3, %v3616_v3  ;;  %v3687_v35 = vsel %vm521_vm3, %v3616_v3, 0 }
0x15f6   :  { %v3586_v51 = vpop.f32.mrb[152].mxu0 }
0x15f7   :  { %v7742_v53 = vpop.f32.mrb[153].mxu0  ;;  %v3587_v0 = vadd.f32 %v6832_v11, %v3586_v51 }
0x15f8   :  { %v3589_v18 = vpop.f32.mrb[154].mxu0 }
0x15f9   :  { %v3590_v54 = vadd.f32 %v6832_v11, %v3589_v18  ;;  %v7743_v42 = vpop.f32.mrb[155].mxu0 }
0x15fb   :  { %v3819_v31 = vpack.c.bf16 %v3590_v54, %v3587_v0 }
0x15fc   :  { %7763 = vmatpush3.bf16.xpose.msra.mxu0 %v3687_v35 }
0x15fd   :  { %7768 = vmatprep.subr.bf16.mxu1 %v3819_v31 }
0x15fe   :  { %v3594_v34 = vpop.f32.mrb[156].mxu0  ;;  %7769 = vmatpush3.bf16.msra.mxu1 %v3819_v31 }
0x15ff   :  { %v3595_v37 = vadd.f32 %v6832_v11, %v3594_v34  ;;  %v7746_v26 = vpop.f32.mrb[157].mxu0 }
0x1600   :  { %v3597_v21 = vpop.f32.mrb[158].mxu0 }
0x1601   :  { %v3820_v29 = vpack.c.bf16 %v3595_v37, %v3595_v37  ;;  %v7747_v10 = vpop.f32.mrb[159].mxu0  ;;  %v3598_v27 = vadd.f32 %v6832_v11, %v3597_v21 }
0x1603   :  { %v3830_v36 = vsel %vm735_vm4, %v3820_v29, 0  ;;  %7765 = vmatmul.mubr.msk.bf16.vlgmr.msra.gmra.mrb[164].mxu0 %vm521_vm3, %v3612_v44  ;;  %8156 = vmatprep.subr.msk.bf16.mxu1 %vm735_vm4, %v3820_v29 }
0x1604   :  { %7771 = vmatpush3.bf16.msra.mxu1 %v3830_v36 }
0x1605   :  { %7784 = vmatprep.subr.bf16.mxu1 %v8576_v1 }
0x1606   :  { %v3602_v38 = vpop.f32.mrb[160].mxu0 }
0x1607   :  { %v3603_v24 = vadd.f32 %v6832_v11, %v3602_v38  ;;  %v7750_v22 = vpop.f32.mrb[161].mxu0 }
0x1608   :  { %v3605_v46 = vpop.f32.mrb[162].mxu0 }
0x1609   :  { %v3821_v23 = vpack.c.bf16 %v3603_v24, %v3598_v27  ;;  %v3606_v57 = vadd.f32 %v6832_v11, %v3605_v46  ;;  %v7751_v58 = vpop.f32.mrb[163].mxu0 }
0x160b   :  { %v3822_v45 = vpack.c.bf16 %v3606_v57, %v3606_v57  ;;  %7776 = vmatprep.subr.bf16.mxu0 %v3821_v23 }
0x160c   :  { %7777 = vmatpush3.bf16.msra.mxu0 %v3821_v23 }
0x160d   :  { %8157 = vmatprep.subr.msk.bf16.mxu0 %vm735_vm4, %v3822_v45  ;;  %v3887_v41 = vsel %vm735_vm4, %v3822_v45, 0 }
0x1610   :  { %7779 = vmatpush3.bf16.msra.mxu0 %v3887_v41 }
0x1611   :  { %7800 = vmatprep.subr.bf16.mxu0 %v8576_v1 }
0x16c6   :  { %v7758_v56 = vpop.f32.mrb[164].mxu1 }
0x16c7   :  { %v3663_v59 = vpop.f32.mrb[165].mxu1  ;;  %v3739_v40 = vmul.f32 0.35355338, %v7758_v56 }
0x16c8   :  { %v7759_v60 = vpop.f32.mrb[166].mxu1  ;;  %v3737_v2 = vmul.f32 0.35355338, %v3663_v59 }
0x16c9   :  { %v3666_v32 = vpop.f32.mrb[167].mxu1  ;;  %v3745_v3 = vadd.f32 %v3739_v40, %v8893_v14  ;;  %v8222_v40 = vld [vmem:[%s10451_s25 + $0x50] sm:$0xff]  }
0x16ca   :  { %v3738_v43 = vmul.f32 0.35355338, %v3666_v32  ;;  %v3743_v8 = vadd.f32 %v3737_v2, %v8893_v14 }
0x16cb   :  { %v3755_v11 = vsel %vm654_vm6, %v3745_v3, -inf }
0x16cc   :  { %v3744_v13 = vadd.f32 %v3738_v43, %v8893_v14  ;;  %v3749_v15 = vsel %vm654_vm6, %v3743_v8, -inf }
0x16ce   :  { %v3752_v16 = vsel %vm654_vm6, %v3744_v13, -inf }
0x16d6   :  { %v7766_v63 = vpop.f32.mrb[164].mxu0 }
0x16d7   :  { %v3723_v33 = vpop.f32.mrb[165].mxu0  ;;  %v3742_v20 = vmul.f32 0.35355338, %v7766_v63 }
0x16d8   :  { %v3740_v49 = vmul.f32 0.35355338, %v3723_v33  ;;  %v7767_v48 = vpop.f32.mrb[166].mxu0 }
0x16d9   :  { %v3726_v55 = vpop.f32.mrb[167].mxu0  ;;  %v3748_v28 = vadd.f32 %v3742_v20, %v8893_v14 }
0x16da   :  { %v3741_v4 = vmul.f32 0.35355338, %v3726_v55  ;;  %v3746_v5 = vadd.f32 %v3740_v49, %v8893_v14 }
0x16db   :  { %v3764_v12 = vsel %vm654_vm6, %v3748_v28, -inf }
0x16dc   :  { %v3758_v39 = vsel %vm654_vm6, %v3746_v5, -inf  ;;  %v3747_v6 = vadd.f32 %v3741_v4, %v8893_v14 }
0x16dd   :  { %3759 = vmax.xlane.f32.xlu0 %v3758_v39 }
0x16de   :  { %v3761_v61 = vsel %vm654_vm6, %v3747_v6, -inf }
0x16df   :  { %3762 = vmax.xlane.f32.xlu1 %v3761_v61 }
0x16e1   :  { %3765 = vmax.xlane.f32.xlu0 %v3764_v12 }
0x16e3   :  { %3750 = vmax.xlane.f32.xlu1 %v3749_v15 }
0x16e5   :  { %3753 = vmax.xlane.f32.xlu0 %v3752_v16 }
0x16e7   :  { %3756 = vmax.xlane.f32.xlu1 %v3755_v11 }
0x176a   :  { %v3760_v51 = vpop.xlane.xlu0 %3759 }
0x176b   :  { %v3770_v53 = vsub.f32 %v3746_v5, %v3760_v51  ;;  %v8224_v51 = vld [vmem:[%s10450_s0 + $0x50] sm:$0xff]  }
0x176c   :  { %v3763_v18 = vpop.xlane.xlu1 %3762 }
0x176d   :  { %v3779_v0 = vmul.f32 1.442695, %v3770_v53  ;;  %v3771_v54 = vsub.f32 %v3747_v6, %v3763_v18  ;;  %v8225_v18 = vld [vmem:[%s10450_s0 + $0x58] sm:$0xff]  }
0x176e   :  { %v3766_v42 = vpop.xlane.xlu0 %3765 }
0x176f   :  { %8380 = vpow2.f32 %v3779_v0  ;;  %v3781_v35 = vmul.f32 1.442695, %v3771_v54  ;;  %v3772_v31 = vsub.f32 %v3748_v28, %v3766_v42  ;;  %v8226_v0 = vld [vmem:[%s10453_s7 + $0x50] sm:$0xff]   ;;  %v8227_v54 = vld [vmem:[%s10453_s7 + $0x58] sm:$0xff]  }
0x1770   :  { %v3751_v30 = vpop.xlane.xlu1 %3750 }
0x1771   :  { %8382 = vpow2.f32 %v3781_v35  ;;  %v3783_v34 = vmul.f32 1.442695, %v3772_v31  ;;  %v3767_v37 = vsub.f32 %v3743_v8, %v3751_v30 }
0x1772   :  { %v3754_v26 = vpop.xlane.xlu0 %3753 }
0x1773   :  { %8384 = vpow2.f32 %v3783_v34  ;;  %v3773_v21 = vmul.f32 1.442695, %v3767_v37  ;;  %v3768_v44 = vsub.f32 %v3744_v13, %v3754_v26 }
0x1774   :  { %v3757_v29 = vpop.xlane.xlu1 %3756 }
0x1775   :  { %8386 = vpow2.f32 %v3773_v21  ;;  %v3775_v10 = vmul.f32 1.442695, %v3768_v44  ;;  %v3769_v36 = vsub.f32 %v3745_v3, %v3757_v29  ;;  %v8223_v3 = vld [vmem:[%s10451_s25 + $0x58] sm:$0xff]   ;;  %v6852_v29 = vld [vmem:[%s10455_s6 + $0x5] ss:$0 sm:$0xff] }
0x1777   :  { %8388 = vpow2.f32 %v3775_v10  ;;  %v3777_v38 = vmul.f32 1.442695, %v3769_v36 }
0x1779   :  { %v8381_v27 = vpop.eup %8380  ;;  %8390 = vpow2.f32 %v3777_v38 }
0x177a   :  { %v3794_v24 = vsel %vm654_vm6, %v8381_v27, 0.0 }
0x177b   :  { %v8383_v22 = vpop.eup %8382  ;;  %3795 = vadd.xlane.f32.xlu0 %v3794_v24 }
0x177c   :  { %v3797_v46 = vsel %vm654_vm6, %v8383_v22, 0.0 }
0x177d   :  { %v8385_v23 = vpop.eup %8384  ;;  %3798 = vadd.xlane.f32.xlu1 %v3797_v46 }
0x177e   :  { %v3800_v57 = vsel %vm654_vm6, %v8385_v23, 0.0 }
0x177f   :  { %v8387_v58 = vpop.eup %8386  ;;  %3801 = vadd.xlane.f32.xlu0 %v3800_v57 }
0x1780   :  { %v3785_v45 = vsel %vm654_vm6, %v8387_v58, 0.0 }
0x1781   :  { %v8389_v41 = vpop.eup %8388  ;;  %3786 = vadd.xlane.f32.xlu1 %v3785_v45 }
0x1782   :  { %v3788_v56 = vsel %vm654_vm6, %v8389_v41, 0.0 }
0x1783   :  { %v8391_v59 = vpop.eup %8390  ;;  %3789 = vadd.xlane.f32.xlu0 %v3788_v56 }
0x1784   :  { %v3791_v60 = vsel %vm654_vm6, %v8391_v59, 0.0 }
0x1785   :  { %3792 = vadd.xlane.f32.xlu1 %v3791_v60 }
0x1808   :  { %v3796_v32 = vpop.xlane.xlu0 %3795 }
0x1809   :  { %8392 = vrcp.f32 %v3796_v32 }
0x180a   :  { %v3799_v63 = vpop.xlane.xlu1 %3798 }
0x180b   :  { %8394 = vrcp.f32 %v3799_v63 }
0x180c   :  { %v3802_v33 = vpop.xlane.xlu0 %3801 }
0x180d   :  { %8396 = vrcp.f32 %v3802_v33 }
0x180e   :  { %v3787_v20 = vpop.xlane.xlu1 %3786 }
0x180f   :  { %8398 = vrcp.f32 %v3787_v20 }
0x1810   :  { %v3790_v49 = vpop.xlane.xlu0 %3789 }
0x1811   :  { %8400 = vrcp.f32 %v3790_v49 }
0x1812   :  { %v3793_v48 = vpop.xlane.xlu1 %3792 }
0x1813   :  { %v8393_v55 = vpop.eup %8392  ;;  %8402 = vrcp.f32 %v3793_v48 }
0x1814   :  { %v3810_v4 = vmul.f32 %v8393_v55, %v8381_v27 }
0x1815   :  { %v8395_v2 = vpop.eup %8394 }
0x1816   :  { %v3812_v5 = vmul.f32 %v8395_v2, %v8383_v22 }
0x1817   :  { %v8397_v43 = vpop.eup %8396 }
0x1818   :  { %v3814_v39 = vmul.f32 %v8397_v43, %v8385_v23  ;;  %v3817_v6 = vpack.c.bf16 %v3812_v5, %v3810_v4 }
0x1819   :  { %v8399_v28 = vpop.eup %8398 }
0x181a   :  { %7780 = vmatprep.mubr.msk.bf16.mxu0 %vm654_vm6, %v3817_v6  ;;  %v3818_v61 = vpack.c.bf16 %v3814_v39, %v3814_v39  ;;  %v3804_v12 = vmul.f32 %v8399_v28, %v8387_v58  ;;  %v6846_v58 = vld [vmem:[%s10454_s26 + $0x5] ss:$0 sm:$0xff] }
0x181b   :  { %v8401_v8 = vpop.eup %8400 }
0x181c   :  { %7781 = vmatmul.mubr.msk.bf16.vlgmr.msra.gmra.mrb[168].mxu0 %vm654_vm6, %v3818_v61  ;;  %v3806_v13 = vmul.f32 %v8401_v8, %v8389_v41 }
0x181d   :  { %v8403_v15 = vpop.eup %8402  ;;  %7801 = vmatpush3.bf16.msra.mxu0 %v8222_v40  ;;  %7804 = vmatprep.mubr.msk.bf16.mxu0 %vm8577_vm0, %v8576_v1 }
0x181e   :  { %v3808_v16 = vmul.f32 %v8403_v15, %v8391_v59  ;;  %v3815_v11 = vpack.c.bf16 %v3806_v13, %v3804_v12  ;;  %7802 = vmatprep.subr.bf16.mxu0 %v8576_v1 }
0x1820   :  { %7772 = vmatprep.mubr.msk.bf16.mxu1 %vm654_vm6, %v3815_v11  ;;  %v3816_v53 = vpack.c.bf16 %v3808_v16, %v3808_v16 }
0x1821   :  { %7803 = vmatpush3.bf16.msra.mxu0 %v8223_v3 }
0x1822   :  { %7773 = vmatmul.mubr.msk.bf16.vlgmr.msra.gmra.mrb[168].mxu1 %vm654_vm6, %v3816_v53 }
0x1823   :  { %7785 = vmatpush3.bf16.msra.mxu1 %v8224_v51  ;;  %7788 = vmatprep.mubr.msk.bf16.mxu1 %vm8577_vm0, %v8576_v1 }
0x1824   :  { %7805 = vmatmul.mubr.msk.bf16.vlgmr.msra.gmra.mrb[172].mxu0 %vm296_vm2, %v9552_v7  ;;  %7786 = vmatprep.subr.bf16.mxu1 %v8576_v1 }
0x1825   :  { %7808 = vmatprep.mubr.msk.bf16.mxu0 %vm8577_vm0, %v8576_v1 }
0x1827   :  { %7787 = vmatpush3.bf16.msra.mxu1 %v8225_v18 }
0x1828   :  { %7816 = vmatprep.subr.bf16.mxu1 %v8576_v1 }
0x182a   :  { %7789 = vmatmul.mubr.msk.bf16.vlgmr.msra.gmra.mrb[172].mxu1 %vm296_vm2, %v9552_v7 }
0x182b   :  { %7792 = vmatprep.mubr.msk.bf16.mxu1 %vm8577_vm0, %v8576_v1  ;;  %7817 = vmatpush3.bf16.msra.mxu1 %v8226_v0 }
0x182c   :  { %7809 = vmatmul.mubr.msk.bf16.gmra.mrb[176].mxu0 %vm296_vm2, %v9577_v47  ;;  %7818 = vmatprep.subr.bf16.mxu1 %v8576_v1 }
0x182d   :  { %7812 = vmatprep.mubr.msk.bf16.mxu0 %vm8577_vm0, %v8576_v1 }
0x182f   :  { %7819 = vmatpush3.bf16.msra.mxu1 %v8227_v54 }
0x1832   :  { %7793 = vmatmul.mubr.msk.bf16.gmra.mrb[176].mxu1 %vm296_vm2, %v9577_v47 }
0x1833   :  { %7796 = vmatprep.mubr.msk.bf16.mxu1 %vm8577_vm0, %v8576_v1 }
0x1834   :  { %7813 = vmatmul.mubr.msk.bf16.gmra.mrb[180].mxu0 %vm296_vm2, %v9595_v62 }
0x183a   :  { %7797 = vmatmul.mubr.msk.bf16.gmra.mrb[180].mxu1 %vm296_vm2, %v9595_v62 }
0x183b   :  { %7820 = vmatprep.mubr.msk.bf16.mxu1 %vm8577_vm0, %v8576_v1 }
0x1842   :  { %7821 = vmatmul.mubr.msk.bf16.vlgmr.msra.gmra.mrb[184].mxu1 %vm296_vm2, %v9552_v7 }
0x1843   :  { %7824 = vmatprep.mubr.msk.bf16.mxu1 %vm8577_vm0, %v8576_v1 }
0x184a   :  { %7825 = vmatmul.mubr.msk.bf16.gmra.mrb[188].mxu1 %vm296_vm2, %v9577_v47 }
0x184b   :  { %7828 = vmatprep.mubr.msk.bf16.mxu1 %vm8577_vm0, %v8576_v1 }
0x1852   :  { %7829 = vmatmul.mubr.msk.bf16.gmra.mrb[192].mxu1 %vm296_vm2, %v9595_v62 }
0x18ef   :  { %v9728_v42 = vpop.f32.mrb[168].mxu0 }
0x18f0   :  { %v9730_v35 = vpop.f32.mrb[169].mxu0 }
0x18f1   :  { %v7783_v31 = vpop.f32.mrb[170].mxu0 }
0x18f2   :  { %v9732_v30 = vpop.f32.mrb[171].mxu0 }
0x18f3   :  { %v3939_v34 = vpack.c.bf16 %v9728_v42, %v9732_v30  ;;  %v6798_v42 = vld [vmem:[%s10414_s9 + $0x14] sm:$0xf] }
0x18f5   :  { %v9736_v37 = vpop.f32.mrb[168].mxu1 }
0x18f6   :  { %v3938_v26 = vpack.c.bf16 %v9730_v35, %v9736_v37  ;;  %v9740_v21 = vpop.f32.mrb[169].mxu1  ;;  %v4506_v35 = vsel %vm735_vm4, %v6798_v42, 0 }
0x18f7   :  { %v7775_v44 = vpop.f32.mrb[170].mxu1  ;;  %v4067_v10 = vpop.f32.mrb[172].mxu0 }
0x18f8   :  { %v9745_v36 = vpop.f32.mrb[171].mxu1  ;;  %v7806_v38 = vpop.f32.mrb[173].mxu0  ;;  %v4068_v22 = vadd.f32 %v6852_v29, %v4067_v10 }
0x18f9   :  { %v3937_v27 = vpack.c.bf16 %v9745_v36, %v9740_v21  ;;  %v4070_v24 = vpop.f32.mrb[174].mxu0  ;;  %v8230_v21 = vld [vmem:[%s10450_s0 + $0x60] sm:$0xff]  }
0x18fa   :  { %v4071_v46 = vadd.f32 %v6852_v29, %v4070_v24  ;;  %v7807_v23 = vpop.f32.mrb[175].mxu0 }
0x18fc   :  { %v4169_v57 = vpack.c.bf16 %v4071_v46, %v4068_v22 }
0x18fd   :  { %v3992_v45 = vpop.f32.mrb[172].mxu1 }
0x18fe   :  { %v7790_v41 = vpop.f32.mrb[173].mxu1  ;;  %8158 = vmatprep.subr.msk.bf16.mxu0 %vm521_vm3, %v4169_v57  ;;  %v4180_v56 = vsel %vm521_vm3, %v4169_v57, 0  ;;  %v3993_v32 = vadd.f32 %v6846_v58, %v3992_v45 }
0x18ff   :  { %v3995_v59 = vpop.f32.mrb[174].mxu1  ;;  %v4075_v60 = vpop.f32.mrb[176].mxu0  ;;  %7833 = vmatpush3.bf16.xpose.msra.mxu0 %v4180_v56 }
0x1900   :  { %v3996_v63 = vadd.f32 %v6846_v58, %v3995_v59  ;;  %v4076_v33 = vadd.f32 %v6852_v29, %v4075_v60  ;;  %v7791_v20 = vpop.f32.mrb[175].mxu1  ;;  %v7810_v49 = vpop.f32.mrb[177].mxu0 }
0x1901   :  { %v4078_v48 = vpop.f32.mrb[178].mxu0 }
0x1902   :  { %v4165_v55 = vpack.c.bf16 %v3996_v63, %v3993_v32  ;;  %v4170_v2 = vpack.c.bf16 %v4076_v33, %v4076_v33  ;;  %v7811_v4 = vpop.f32.mrb[179].mxu0  ;;  %v4079_v40 = vadd.f32 %v6852_v29, %v4078_v48 }
0x1904   :  { %8159 = vmatprep.subr.msk.bf16.mxu0 %vm521_vm3, %v4170_v2  ;;  %7836 = vmatprep.mubr.msk.bf16.mxu0 %vm521_vm3, %v4165_v55  ;;  %v4183_v43 = vsel %vm521_vm3, %v4170_v2, 0 }
0x1905   :  { %v4000_v5 = vpop.f32.mrb[176].mxu1 }
0x1906   :  { %v7794_v39 = vpop.f32.mrb[177].mxu1  ;;  %v4001_v61 = vadd.f32 %v6846_v58, %v4000_v5 }
0x1907   :  { %v4003_v6 = vpop.f32.mrb[178].mxu1  ;;  %v4083_v28 = vpop.f32.mrb[180].mxu0  ;;  %7835 = vmatpush3.bf16.xpose.msra.mxu0 %v4183_v43 }
0x1908   :  { %v4084_v8 = vadd.f32 %v6852_v29, %v4083_v28  ;;  %v7795_v12 = vpop.f32.mrb[179].mxu1  ;;  %v7814_v13 = vpop.f32.mrb[181].mxu0  ;;  %v4166_v51 = vpack.c.bf16 %v4001_v61, %v4001_v61  ;;  %v4004_v18 = vadd.f32 %v6846_v58, %v4003_v6 }
0x1909   :  { %v4086_v15 = vpop.f32.mrb[182].mxu0 }
0x190a   :  { %v4171_v3 = vpack.c.bf16 %v4084_v8, %v4079_v40  ;;  %v4087_v16 = vadd.f32 %v6852_v29, %v4086_v15  ;;  %v7815_v11 = vpop.f32.mrb[183].mxu0  ;;  %v6858_v29 = vld [vmem:[%s10456_s3 + $0x5] ss:$0 sm:$0xff] }
0x190c   :  { %8160 = vmatprep.subr.msk.bf16.mxu0 %vm521_vm3, %v4171_v3  ;;  %v4172_v0 = vpack.c.bf16 %v4087_v16, %v4087_v16  ;;  %v4240_v44 = vsel %vm521_vm3, %v4171_v3, 0 }
0x190d   :  { %v4008_v53 = vpop.f32.mrb[180].mxu1 }
0x190e   :  { %v4009_v54 = vadd.f32 %v6846_v58, %v4008_v53  ;;  %v7798_v31 = vpop.f32.mrb[181].mxu1  ;;  %7837 = vmatmul.mubr.msk.bf16.vlgmr.msra.gmra.mrb[184].mxu0 %vm521_vm3, %v4166_v51  ;;  %v4243_v46 = vsel %vm521_vm3, %v4172_v0, 0 }
0x190f   :  { %v4011_v10 = vpop.f32.mrb[182].mxu1  ;;  %7841 = vmatpush3.bf16.xpose.msra.mxu0 %v4240_v44 }
0x1910   :  { %v4167_v38 = vpack.c.bf16 %v4009_v54, %v4004_v18  ;;  %v7799_v24 = vpop.f32.mrb[183].mxu1  ;;  %8161 = vmatprep.subr.msk.bf16.mxu0 %vm521_vm3, %v4172_v0  ;;  %v4012_v45 = vadd.f32 %v6846_v58, %v4011_v10 }
0x1912   :  { %7844 = vmatprep.mubr.msk.bf16.mxu0 %vm521_vm3, %v4167_v38  ;;  %v4168_v32 = vpack.c.bf16 %v4012_v45, %v4012_v45 }
0x1915   :  { %v4142_v22 = vpop.f32.mrb[184].mxu1 }
0x1916   :  { %v7822_v23 = vpop.f32.mrb[185].mxu1  ;;  %v4143_v41 = vadd.f32 %v6858_v29, %v4142_v22 }
0x1917   :  { %v4145_v57 = vpop.f32.mrb[186].mxu1  ;;  %7843 = vmatpush3.bf16.xpose.msra.mxu0 %v4243_v46 }
0x1918   :  { %v4146_v56 = vadd.f32 %v6858_v29, %v4145_v57  ;;  %v7823_v59 = vpop.f32.mrb[187].mxu1 }
0x191a   :  { %v4375_v60 = vpack.c.bf16 %v4146_v56, %v4143_v41 }
0x191c   :  { %7848 = vmatprep.subr.bf16.mxu1 %v4375_v60 }
0x191d   :  { %v4150_v63 = vpop.f32.mrb[188].mxu1  ;;  %7849 = vmatpush3.bf16.msra.mxu1 %v4375_v60 }
0x191e   :  { %v4151_v33 = vadd.f32 %v6858_v29, %v4150_v63  ;;  %v7826_v20 = vpop.f32.mrb[189].mxu1  ;;  %7845 = vmatmul.mubr.msk.bf16.vlgmr.msra.gmra.mrb[188].mxu0 %vm521_vm3, %v4168_v32 }
0x191f   :  { %v4153_v49 = vpop.f32.mrb[190].mxu1 }
0x1920   :  { %v4376_v48 = vpack.c.bf16 %v4151_v33, %v4151_v33  ;;  %v7827_v55 = vpop.f32.mrb[191].mxu1  ;;  %v4154_v4 = vadd.f32 %v6858_v29, %v4153_v49 }
0x1922   :  { %v4386_v2 = vsel %vm735_vm4, %v4376_v48, 0  ;;  %8162 = vmatprep.subr.msk.bf16.mxu1 %vm735_vm4, %v4376_v48 }
0x1923   :  { %7851 = vmatpush3.bf16.msra.mxu1 %v4386_v2 }
0x1924   :  { %7864 = vmatprep.subr.bf16.mxu1 %v8576_v1 }
0x1925   :  { %v4158_v58 = vpop.f32.mrb[192].mxu1 }
0x1926   :  { %v4159_v5 = vadd.f32 %v6858_v29, %v4158_v58  ;;  %v7830_v43 = vpop.f32.mrb[193].mxu1 }
0x1927   :  { %v4161_v39 = vpop.f32.mrb[194].mxu1 }
0x1928   :  { %v4377_v6 = vpack.c.bf16 %v4159_v5, %v4154_v4  ;;  %v4162_v28 = vadd.f32 %v6858_v29, %v4161_v39  ;;  %v7831_v40 = vpop.f32.mrb[195].mxu1 }
0x192a   :  { %v4378_v61 = vpack.c.bf16 %v4162_v28, %v4162_v28  ;;  %7856 = vmatprep.subr.bf16.mxu0 %v4377_v6 }
0x192b   :  { %7857 = vmatpush3.bf16.msra.mxu0 %v4377_v6 }
0x192c   :  { %8163 = vmatprep.subr.msk.bf16.mxu0 %vm735_vm4, %v4378_v61  ;;  %v4443_v8 = vsel %vm735_vm4, %v4378_v61, 0 }
0x192f   :  { %7859 = vmatpush3.bf16.msra.mxu0 %v4443_v8 }
0x1930   :  { %7878 = vmatprep.subr.bf16.mxu0 %v8576_v1 }
0x19e1   :  { %v7838_v12 = vpop.f32.mrb[184].mxu0 }
0x19e2   :  { %v4219_v13 = vpop.f32.mrb[185].mxu0  ;;  %v4295_v15 = vmul.f32 0.35355338, %v7838_v12 }
0x19e3   :  { %v4293_v3 = vmul.f32 0.35355338, %v4219_v13  ;;  %v7839_v16 = vpop.f32.mrb[186].mxu0 }
0x19e4   :  { %v4222_v11 = vpop.f32.mrb[187].mxu0  ;;  %v4301_v54 = vadd.f32 %v4295_v15, %v8893_v14 }
0x19e5   :  { %v4294_v51 = vmul.f32 0.35355338, %v4222_v11  ;;  %v4299_v53 = vadd.f32 %v4293_v3, %v8893_v14 }
0x19e6   :  { %v4311_v44 = vsel %vm654_vm6, %v4301_v54, -inf }
0x19e7   :  { %v4305_v18 = vsel %vm654_vm6, %v4299_v53, -inf  ;;  %v4300_v0 = vadd.f32 %v4294_v51, %v8893_v14 }
0x19e8   :  { %4306 = vmax.xlane.f32.xlu0 %v4305_v18 }
0x19e9   :  { %v4308_v31 = vsel %vm654_vm6, %v4300_v0, -inf }
0x19ea   :  { %4309 = vmax.xlane.f32.xlu1 %v4308_v31 }
0x19ec   :  { %4312 = vmax.xlane.f32.xlu0 %v4311_v44 }
0x19f1   :  { %v7846_v10 = vpop.f32.mrb[188].mxu0 }
0x19f2   :  { %v4279_v38 = vpop.f32.mrb[189].mxu0  ;;  %v4298_v24 = vmul.f32 0.35355338, %v7846_v10 }
0x19f3   :  { %v4296_v29 = vmul.f32 0.35355338, %v4279_v38  ;;  %v7847_v22 = vpop.f32.mrb[190].mxu0 }
0x19f4   :  { %v4282_v46 = vpop.f32.mrb[191].mxu0  ;;  %v4304_v56 = vadd.f32 %v4298_v24, %v8893_v14 }
0x19f5   :  { %v4297_v23 = vmul.f32 0.35355338, %v4282_v46  ;;  %v4302_v57 = vadd.f32 %v4296_v29, %v8893_v14 }
0x19f6   :  { %v4320_v60 = vsel %vm654_vm6, %v4304_v56, -inf }
0x19f7   :  { %v4314_v45 = vsel %vm654_vm6, %v4302_v57, -inf  ;;  %v4303_v41 = vadd.f32 %v4297_v23, %v8893_v14 }
0x19f8   :  { %4315 = vmax.xlane.f32.xlu1 %v4314_v45 }
0x19f9   :  { %v4317_v59 = vsel %vm654_vm6, %v4303_v41, -inf }
0x19fa   :  { %4318 = vmax.xlane.f32.xlu0 %v4317_v59 }
0x19fc   :  { %4321 = vmax.xlane.f32.xlu1 %v4320_v60 }
0x1a75   :  { %v4307_v32 = vpop.xlane.xlu0 %4306 }
0x1a76   :  { %v4323_v63 = vsub.f32 %v4299_v53, %v4307_v32 }
0x1a77   :  { %v4310_v33 = vpop.xlane.xlu1 %4309 }
0x1a78   :  { %v4329_v20 = vmul.f32 1.442695, %v4323_v63  ;;  %v4324_v49 = vsub.f32 %v4300_v0, %v4310_v33 }
0x1a79   :  { %v4313_v48 = vpop.xlane.xlu0 %4312 }
0x1a7a   :  { %8404 = vpow2.f32 %v4329_v20  ;;  %v4331_v55 = vmul.f32 1.442695, %v4324_v49  ;;  %v4325_v2 = vsub.f32 %v4301_v54, %v4313_v48  ;;  %v6797_v48 = vld [vmem:[%s10414_s9 + $0x10] sm:$0xf] }
0x1a7c   :  { %8406 = vpow2.f32 %v4331_v55  ;;  %v4333_v58 = vmul.f32 1.442695, %v4325_v2 }
0x1a7e   :  { %8408 = vpow2.f32 %v4333_v58 }
0x1a84   :  { %v8405_v4 = vpop.eup %8404 }
0x1a85   :  { %v4316_v5 = vpop.xlane.xlu1 %4315  ;;  %v4341_v43 = vsel %vm654_vm6, %v8405_v4, 0.0 }
0x1a86   :  { %v8407_v39 = vpop.eup %8406  ;;  %v4326_v6 = vsub.f32 %v4302_v57, %v4316_v5  ;;  %4342 = vadd.xlane.f32.xlu0 %v4341_v43  ;;  %v8228_v5 = vld [vmem:[%s10451_s25 + $0x60] sm:$0xff]   ;;  %v8229_v43 = vld [vmem:[%s10451_s25 + $0x68] sm:$0xff]  }
0x1a87   :  { %v4319_v28 = vpop.xlane.xlu0 %4318  ;;  %v4344_v40 = vsel %vm654_vm6, %v8407_v39, 0.0 }
0x1a88   :  { %v8409_v61 = vpop.eup %8408  ;;  %v4335_v8 = vmul.f32 1.442695, %v4326_v6  ;;  %v4327_v12 = vsub.f32 %v4303_v41, %v4319_v28  ;;  %4345 = vadd.xlane.f32.xlu1 %v4344_v40 }
0x1a89   :  { %v4322_v13 = vpop.xlane.xlu1 %4321  ;;  %v4347_v15 = vsel %vm654_vm6, %v8409_v61, 0.0 }
0x1a8a   :  { %8410 = vpow2.f32 %v4335_v8  ;;  %v4337_v3 = vmul.f32 1.442695, %v4327_v12  ;;  %v4328_v16 = vsub.f32 %v4304_v56, %v4322_v13  ;;  %4348 = vadd.xlane.f32.xlu0 %v4347_v15 }
0x1a8c   :  { %8412 = vpow2.f32 %v4337_v3  ;;  %v4339_v11 = vmul.f32 1.442695, %v4328_v16 }
0x1a8e   :  { %8414 = vpow2.f32 %v4339_v11 }
0x1a94   :  { %v8411_v51 = vpop.eup %8410 }
0x1a95   :  { %v4350_v53 = vsel %vm654_vm6, %v8411_v51, 0.0 }
0x1a96   :  { %v8413_v18 = vpop.eup %8412  ;;  %4351 = vadd.xlane.f32.xlu1 %v4350_v53 }
0x1a97   :  { %v4353_v0 = vsel %vm654_vm6, %v8413_v18, 0.0 }
0x1a98   :  { %v8415_v54 = vpop.eup %8414  ;;  %4354 = vadd.xlane.f32.xlu0 %v4353_v0  ;;  %v8233_v0 = vld [vmem:[%s10453_s7 + $0x68] sm:$0xff]  }
0x1a99   :  { %v4356_v31 = vsel %vm654_vm6, %v8415_v54, 0.0 }
0x1a9a   :  { %4357 = vadd.xlane.f32.xlu1 %v4356_v31 }
0x1b13   :  { %v4343_v44 = vpop.xlane.xlu0 %4342 }
0x1b14   :  { %8416 = vrcp.f32 %v4343_v44 }
0x1b15   :  { %v4346_v10 = vpop.xlane.xlu1 %4345 }
0x1b16   :  { %8418 = vrcp.f32 %v4346_v10 }
0x1b17   :  { %v4349_v38 = vpop.xlane.xlu0 %4348 }
0x1b18   :  { %8420 = vrcp.f32 %v4349_v38  ;;  %v6884_v38 = vld [vmem:[%s10455_s6 + $0x6] ss:$0 sm:$0xff] }
0x1b1e   :  { %v8417_v24 = vpop.eup %8416 }
0x1b1f   :  { %v4360_v22 = vmul.f32 %v8417_v24, %v8405_v4  ;;  %v4575_v4 = vsel %vm735_vm4, %v6797_v48, 0 }
0x1b20   :  { %v8419_v29 = vpop.eup %8418 }
0x1b21   :  { %v4362_v46 = vmul.f32 %v8419_v29, %v8407_v39 }
0x1b22   :  { %v8421_v23 = vpop.eup %8420 }
0x1b23   :  { %v4364_v57 = vmul.f32 %v8421_v23, %v8409_v61  ;;  %v4352_v45 = vpop.xlane.xlu1 %4351  ;;  %v4371_v41 = vpack.c.bf16 %v4362_v46, %v4360_v22 }
0x1b24   :  { %8422 = vrcp.f32 %v4352_v45 }
0x1b25   :  { %v4372_v56 = vpack.c.bf16 %v4364_v57, %v4364_v57  ;;  %7852 = vmatprep.mubr.msk.bf16.mxu1 %vm654_vm6, %v4371_v41  ;;  %v4355_v59 = vpop.xlane.xlu0 %4354 }
0x1b26   :  { %8424 = vrcp.f32 %v4355_v59 }
0x1b27   :  { %v4358_v60 = vpop.xlane.xlu1 %4357  ;;  %7853 = vmatmul.mubr.msk.bf16.vlgmr.msra.gmra.mrb[196].mxu1 %vm654_vm6, %v4372_v56 }
0x1b28   :  { %8426 = vrcp.f32 %v4358_v60  ;;  %7866 = vmatprep.mubr.msk.bf16.mxu1 %vm8577_vm0, %v8576_v1  ;;  %7865 = vmatpush3.bf16.msra.mxu1 %v4506_v35 }
0x1b29   :  { %7892 = vmatprep.subr.bf16.mxu1 %v8576_v1 }
0x1b2e   :  { %v8423_v32 = vpop.eup %8422 }
0x1b2f   :  { %v4366_v33 = vmul.f32 %v8423_v32, %v8411_v51  ;;  %v8232_v51 = vld [vmem:[%s10453_s7 + $0x60] sm:$0xff]  }
0x1b30   :  { %v8425_v63 = vpop.eup %8424 }
0x1b31   :  { %v4368_v20 = vmul.f32 %v8425_v63, %v8413_v18 }
0x1b32   :  { %v8427_v49 = vpop.eup %8426 }
0x1b33   :  { %v4370_v55 = vmul.f32 %v8427_v49, %v8415_v54  ;;  %v4373_v2 = vpack.c.bf16 %v4368_v20, %v4366_v33 }
0x1b35   :  { %7860 = vmatprep.mubr.msk.bf16.mxu0 %vm654_vm6, %v4373_v2  ;;  %v4374_v58 = vpack.c.bf16 %v4370_v55, %v4370_v55 }
0x1b37   :  { %7861 = vmatmul.mubr.msk.bf16.vlgmr.msra.gmra.mrb[192].mxu0 %vm654_vm6, %v4374_v58 }
0x1b38   :  { %7879 = vmatpush3.bf16.msra.mxu0 %v4575_v4  ;;  %7880 = vmatprep.mubr.msk.bf16.mxu0 %vm8577_vm0, %v8576_v1 }
0x1b39   :  { %7908 = vmatprep.subr.bf16.mxu0 %v8576_v1 }
0x1b3f   :  { %7881 = vmatmul.mubr.msk.bf16.vlgmr.msra.gmra.mrb[196].mxu0 %vm521_vm3, %v3937_v27  ;;  %v8231_v27 = vld [vmem:[%s10450_s0 + $0x68] sm:$0xff]  }
0x1b40   :  { %7884 = vmatprep.mubr.msk.bf16.mxu0 %vm8577_vm0, %v8576_v1  ;;  %7909 = vmatpush3.bf16.msra.mxu0 %v8228_v5 }
0x1b41   :  { %7910 = vmatprep.subr.bf16.mxu0 %v8576_v1 }
0x1b44   :  { %7911 = vmatpush3.bf16.msra.mxu0 %v8229_v43 }
0x1b47   :  { %7885 = vmatmul.mubr.msk.bf16.gmra.mrb[200].mxu0 %vm521_vm3, %v3938_v26 }
0x1b48   :  { %7888 = vmatprep.mubr.msk.bf16.mxu0 %vm8577_vm0, %v8576_v1 }
0x1b4f   :  { %7889 = vmatmul.mubr.msk.bf16.gmra.mrb[204].mxu0 %vm521_vm3, %v3939_v34 }
0x1b50   :  { %7912 = vmatprep.mubr.msk.bf16.mxu0 %vm8577_vm0, %v8576_v1 }
0x1b57   :  { %7913 = vmatmul.mubr.msk.bf16.vlgmr.msra.gmra.mrb[208].mxu0 %vm296_vm2, %v9552_v7 }
0x1b58   :  { %7916 = vmatprep.mubr.msk.bf16.mxu0 %vm8577_vm0, %v8576_v1 }
0x1b5f   :  { %7917 = vmatmul.mubr.msk.bf16.gmra.mrb[212].mxu0 %vm296_vm2, %v9577_v47 }
0x1b60   :  { %7920 = vmatprep.mubr.msk.bf16.mxu0 %vm8577_vm0, %v8576_v1 }
0x1b67   :  { %7921 = vmatmul.mubr.msk.bf16.gmra.mrb[216].mxu0 %vm296_vm2, %v9595_v62 }
0x1bfa   :  { %v7854_v30 = vpop.f32.mrb[196].mxu1 }
0x1bfb   :  { %v4422_v34 = vpop.f32.mrb[197].mxu1 }
0x1bfc   :  { %v7855_v37 = vpop.f32.mrb[198].mxu1 }
0x1bfd   :  { %v4425_v26 = vpop.f32.mrb[199].mxu1 }
0x1bfe   :  { %v4493_v36 = vpack.c.bf16 %v4425_v26, %v4422_v34 }
0x1c00   :  { %7867 = vmatmul.mubr.msk.bf16.vlgmr.msra.gmra.mrb[200].mxu1 %vm521_vm3, %v4493_v36 }
0x1c01   :  { %7870 = vmatprep.mubr.msk.bf16.mxu1 %vm8577_vm0, %v8576_v1  ;;  %7893 = vmatpush3.bf16.msra.mxu1 %v8230_v21 }
0x1c02   :  { %7894 = vmatprep.subr.bf16.mxu1 %v8576_v1 }
0x1c05   :  { %7895 = vmatpush3.bf16.msra.mxu1 %v8231_v27 }
0x1c06   :  { %7924 = vmatprep.subr.bf16.mxu1 %v8576_v1 }
0x1c0a   :  { %v7862_v39 = vpop.f32.mrb[192].mxu0 }
0x1c0b   :  { %v4479_v6 = vpop.f32.mrb[193].mxu0 }
0x1c0c   :  { %v4494_v28 = vpack.c.bf16 %v4479_v6, %v7854_v30  ;;  %v7863_v40 = vpop.f32.mrb[194].mxu0 }
0x1c0d   :  { %v4482_v61 = vpop.f32.mrb[195].mxu0 }
0x1c0e   :  { %v4495_v8 = vpack.c.bf16 %v7862_v39, %v4482_v61  ;;  %7871 = vmatmul.mubr.msk.bf16.gmra.mrb[204].mxu1 %vm521_vm3, %v4494_v28 }
0x1c0f   :  { %7874 = vmatprep.mubr.msk.bf16.mxu1 %vm8577_vm0, %v8576_v1 }
0x1c12   :  { %v4611_v12 = vpop.f32.mrb[196].mxu0 }
0x1c13   :  { %v7882_v13 = vpop.f32.mrb[197].mxu0 }
0x1c14   :  { %v4614_v15 = vpop.f32.mrb[198].mxu0 }
0x1c15   :  { %v7883_v3 = vpop.f32.mrb[199].mxu0 }
0x1c16   :  { %7875 = vmatmul.mubr.msk.bf16.gmra.mrb[208].mxu1 %vm521_vm3, %v4495_v8 }
0x1c17   :  { %7896 = vmatprep.mubr.msk.bf16.mxu1 %vm8577_vm0, %v8576_v1 }
0x1c1a   :  { %v4619_v16 = vpop.f32.mrb[200].mxu0 }
0x1c1b   :  { %v7886_v11 = vpop.f32.mrb[201].mxu0 }
0x1c1c   :  { %v4622_v53 = vpop.f32.mrb[202].mxu0 }
0x1c1d   :  { %v7887_v18 = vpop.f32.mrb[203].mxu0 }
0x1c1e   :  { %7897 = vmatmul.mubr.msk.bf16.vlgmr.msra.gmra.mrb[212].mxu1 %vm296_vm2, %v9552_v7 }
0x1c1f   :  { %7900 = vmatprep.mubr.msk.bf16.mxu1 %vm8577_vm0, %v8576_v1  ;;  %7925 = vmatpush3.bf16.msra.mxu1 %v8232_v51 }
0x1c20   :  { %7926 = vmatprep.subr.bf16.mxu1 %v8576_v1 }
0x1c22   :  { %v4627_v54 = vpop.f32.mrb[204].mxu0 }
0x1c23   :  { %v7890_v31 = vpop.f32.mrb[205].mxu0  ;;  %7927 = vmatpush3.bf16.msra.mxu1 %v8233_v0 }
0x1c24   :  { %v4630_v44 = vpop.f32.mrb[206].mxu0 }
0x1c25   :  { %v7891_v10 = vpop.f32.mrb[207].mxu0 }
0x1c26   :  { %7901 = vmatmul.mubr.msk.bf16.gmra.mrb[216].mxu1 %vm296_vm2, %v9577_v47 }
0x1c27   :  { %7904 = vmatprep.mubr.msk.bf16.mxu1 %vm8577_vm0, %v8576_v1 }
0x1c2a   :  { %v4761_v24 = vpop.f32.mrb[208].mxu0 }
0x1c2b   :  { %v7914_v29 = vpop.f32.mrb[209].mxu0  ;;  %v4762_v46 = vadd.f32 %v6884_v38, %v4761_v24 }
0x1c2c   :  { %v4764_v22 = vpop.f32.mrb[210].mxu0 }
0x1c2d   :  { %v4765_v23 = vadd.f32 %v6884_v38, %v4764_v22  ;;  %v7915_v57 = vpop.f32.mrb[211].mxu0 }
0x1c2e   :  { %7905 = vmatmul.mubr.msk.bf16.gmra.mrb[220].mxu1 %vm296_vm2, %v9595_v62 }
0x1c2f   :  { %v4863_v45 = vpack.c.bf16 %v4765_v23, %v4762_v46  ;;  %7928 = vmatprep.mubr.msk.bf16.mxu1 %vm8577_vm0, %v8576_v1 }
0x1c31   :  { %8164 = vmatprep.subr.msk.bf16.mxu0 %vm521_vm3, %v4863_v45  ;;  %v4874_v41 = vsel %vm521_vm3, %v4863_v45, 0 }
0x1c32   :  { %v4769_v56 = vpop.f32.mrb[212].mxu0  ;;  %7941 = vmatpush3.bf16.xpose.msra.mxu0 %v4874_v41 }
0x1c33   :  { %v4770_v59 = vadd.f32 %v6884_v38, %v4769_v56  ;;  %v7918_v60 = vpop.f32.mrb[213].mxu0 }
0x1c34   :  { %v4772_v32 = vpop.f32.mrb[214].mxu0 }
0x1c35   :  { %v4864_v63 = vpack.c.bf16 %v4770_v59, %v4770_v59  ;;  %v7919_v33 = vpop.f32.mrb[215].mxu0  ;;  %v4773_v48 = vadd.f32 %v6884_v38, %v4772_v32 }
0x1c36   :  { %7929 = vmatmul.mubr.msk.bf16.vlgmr.msra.gmra.mrb[224].mxu1 %vm296_vm2, %v9552_v7  ;;  %v6890_v33 = vld [vmem:[%s10456_s3 + $0x6] ss:$0 sm:$0xff] }
0x1c37   :  { %8165 = vmatprep.subr.msk.bf16.mxu0 %vm521_vm3, %v4864_v63  ;;  %7932 = vmatprep.mubr.msk.bf16.mxu1 %vm8577_vm0, %v8576_v1  ;;  %v4877_v20 = vsel %vm521_vm3, %v4864_v63, 0 }
0x1c3a   :  { %v4777_v49 = vpop.f32.mrb[216].mxu0  ;;  %7943 = vmatpush3.bf16.xpose.msra.mxu0 %v4877_v20 }
0x1c3b   :  { %v4778_v55 = vadd.f32 %v6884_v38, %v4777_v49  ;;  %v7922_v2 = vpop.f32.mrb[217].mxu0 }
0x1c3c   :  { %v4780_v58 = vpop.f32.mrb[218].mxu0 }
0x1c3d   :  { %v4865_v4 = vpack.c.bf16 %v4778_v55, %v4773_v48  ;;  %v4781_v5 = vadd.f32 %v6884_v38, %v4780_v58  ;;  %v7923_v43 = vpop.f32.mrb[219].mxu0 }
0x1c3e   :  { %7933 = vmatmul.mubr.msk.bf16.gmra.mrb[228].mxu1 %vm296_vm2, %v9577_v47 }
0x1c3f   :  { %8166 = vmatprep.subr.msk.bf16.mxu0 %vm521_vm3, %v4865_v4  ;;  %7936 = vmatprep.mubr.msk.bf16.mxu1 %vm8577_vm0, %v8576_v1  ;;  %v4866_v22 = vpack.c.bf16 %v4781_v5, %v4781_v5  ;;  %v4934_v46 = vsel %vm521_vm3, %v4865_v4, 0 }
0x1c41   :  { %v4937_v32 = vsel %vm521_vm3, %v4866_v22, 0 }
0x1c46   :  { %7937 = vmatmul.mubr.msk.bf16.gmra.mrb[232].mxu1 %vm296_vm2, %v9595_v62 }
0x1cd3   :  { %v4542_v42 = vpop.f32.mrb[200].mxu1 }
0x1cd4   :  { %v9898_v35 = vadd.f32 %v4611_v12, %v4542_v42  ;;  %v7868_v30 = vpop.f32.mrb[201].mxu1 }
0x1cd5   :  { %v4545_v34 = vpop.f32.mrb[202].mxu1 }
0x1cd6   :  { %v9900_v37 = vadd.f32 %v4614_v15, %v4545_v34  ;;  %v7869_v26 = vpop.f32.mrb[203].mxu1  ;;  %v6878_v15 = vld [vmem:[%s10454_s26 + $0x6] ss:$0 sm:$0xff] }
0x1ce1   :  { %v4550_v21 = vpop.f32.mrb[204].mxu1 }
0x1ce2   :  { %v9902_v36 = vadd.f32 %v4619_v16, %v4550_v21  ;;  %v7872_v27 = vpop.f32.mrb[205].mxu1 }
0x1ce3   :  { %v4553_v39 = vpop.f32.mrb[206].mxu1 }
0x1ce4   :  { %v9904_v6 = vadd.f32 %v4622_v53, %v4553_v39  ;;  %v7873_v28 = vpop.f32.mrb[207].mxu1 }
0x1ce9   :  { %v4558_v40 = vpop.f32.mrb[208].mxu1 }
0x1cea   :  { %v9906_v61 = vadd.f32 %v4627_v54, %v4558_v40  ;;  %v7876_v8 = vpop.f32.mrb[209].mxu1 }
0x1ceb   :  { %v4561_v13 = vpop.f32.mrb[210].mxu1 }
0x1cec   :  { %v9908_v12 = vadd.f32 %v4630_v44, %v4561_v13  ;;  %v7877_v3 = vpop.f32.mrb[211].mxu1 }
0x1cf1   :  { %v4686_v11 = vpop.f32.mrb[212].mxu1 }
0x1cf2   :  { %v7898_v16 = vpop.f32.mrb[213].mxu1  ;;  %v4687_v18 = vadd.f32 %v6878_v15, %v4686_v11 }
0x1cf3   :  { %v4689_v51 = vpop.f32.mrb[214].mxu1 }
0x1cf4   :  { %v4690_v0 = vadd.f32 %v6878_v15, %v4689_v51  ;;  %v7899_v53 = vpop.f32.mrb[215].mxu1 }
0x1cf6   :  { %v4859_v31 = vpack.c.bf16 %v4690_v0, %v4687_v18 }
0x1cf8   :  { %7944 = vmatprep.mubr.msk.bf16.mxu0 %vm521_vm3, %v4859_v31 }
0x1cf9   :  { %v4694_v54 = vpop.f32.mrb[216].mxu1 }
0x1cfa   :  { %v4695_v10 = vadd.f32 %v6878_v15, %v4694_v54  ;;  %v7902_v38 = vpop.f32.mrb[217].mxu1 }
0x1cfb   :  { %v4697_v24 = vpop.f32.mrb[218].mxu1 }
0x1cfc   :  { %v4860_v44 = vpack.c.bf16 %v4695_v10, %v4695_v10  ;;  %v7903_v29 = vpop.f32.mrb[219].mxu1  ;;  %v4698_v57 = vadd.f32 %v6878_v15, %v4697_v24 }
0x1cfe   :  { %7945 = vmatmul.mubr.msk.bf16.vlgmr.msra.gmra.mrb[220].mxu0 %vm521_vm3, %v4860_v44 }
0x1cff   :  { %7949 = vmatpush3.bf16.xpose.msra.mxu0 %v4934_v46 }
0x1d00   :  { %8167 = vmatprep.subr.msk.bf16.mxu0 %vm521_vm3, %v4866_v22 }
0x1d01   :  { %v4702_v23 = vpop.f32.mrb[220].mxu1 }
0x1d02   :  { %v4703_v45 = vadd.f32 %v6878_v15, %v4702_v23  ;;  %v7906_v41 = vpop.f32.mrb[221].mxu1 }
0x1d03   :  { %v4705_v56 = vpop.f32.mrb[222].mxu1 }
0x1d04   :  { %v4861_v59 = vpack.c.bf16 %v4703_v45, %v4698_v57  ;;  %v7907_v60 = vpop.f32.mrb[223].mxu1  ;;  %v4706_v63 = vadd.f32 %v6878_v15, %v4705_v56 }
0x1d06   :  { %7952 = vmatprep.mubr.msk.bf16.mxu0 %vm521_vm3, %v4861_v59  ;;  %v4862_v55 = vpack.c.bf16 %v4706_v63, %v4706_v63 }
0x1d07   :  { %7951 = vmatpush3.bf16.xpose.msra.mxu0 %v4937_v32 }
0x1d09   :  { %v4836_v20 = vpop.f32.mrb[224].mxu1 }
0x1d0a   :  { %v7930_v49 = vpop.f32.mrb[225].mxu1  ;;  %v4837_v2 = vadd.f32 %v6890_v33, %v4836_v20 }
0x1d0b   :  { %v4839_v48 = vpop.f32.mrb[226].mxu1 }
0x1d0c   :  { %v4840_v58 = vadd.f32 %v6890_v33, %v4839_v48  ;;  %v7931_v4 = vpop.f32.mrb[227].mxu1 }
0x1d0e   :  { %v5069_v5 = vpack.c.bf16 %v4840_v58, %v4837_v2  ;;  %7953 = vmatmul.mubr.msk.bf16.vlgmr.msra.gmra.mrb[224].mxu0 %vm521_vm3, %v4862_v55 }
0x1d10   :  { %7956 = vmatprep.subr.bf16.mxu1 %v5069_v5 }
0x1d11   :  { %v4844_v43 = vpop.f32.mrb[228].mxu1  ;;  %7957 = vmatpush3.bf16.msra.mxu1 %v5069_v5 }
0x1d12   :  { %v4845_v42 = vadd.f32 %v6890_v33, %v4844_v43  ;;  %v7934_v30 = vpop.f32.mrb[229].mxu1 }
0x1d13   :  { %v4847_v34 = vpop.f32.mrb[230].mxu1 }
0x1d14   :  { %v5070_v26 = vpack.c.bf16 %v4845_v42, %v4845_v42  ;;  %v7935_v21 = vpop.f32.mrb[231].mxu1  ;;  %v4848_v28 = vadd.f32 %v6890_v33, %v4847_v34 }
0x1d16   :  { %v5080_v27 = vsel %vm735_vm4, %v5070_v26, 0  ;;  %8168 = vmatprep.subr.msk.bf16.mxu1 %vm735_vm4, %v5070_v26 }
0x1d17   :  { %7959 = vmatpush3.bf16.msra.mxu1 %v5080_v27 }
0x1d18   :  { %7972 = vmatprep.subr.bf16.mxu1 %v8576_v1 }
0x1d19   :  { %v4852_v39 = vpop.f32.mrb[232].mxu1 }
0x1d1a   :  { %v4853_v40 = vadd.f32 %v6890_v33, %v4852_v39  ;;  %v7938_v8 = vpop.f32.mrb[233].mxu1 }
0x1d1b   :  { %v4855_v13 = vpop.f32.mrb[234].mxu1 }
0x1d1c   :  { %v5071_v3 = vpack.c.bf16 %v4853_v40, %v4848_v28  ;;  %v4856_v15 = vadd.f32 %v6890_v33, %v4855_v13  ;;  %v7939_v11 = vpop.f32.mrb[235].mxu1 }
0x1d1e   :  { %v5072_v16 = vpack.c.bf16 %v4856_v15, %v4856_v15  ;;  %7964 = vmatprep.subr.bf16.mxu0 %v5071_v3 }
0x1d1f   :  { %7965 = vmatpush3.bf16.msra.mxu0 %v5071_v3 }
0x1d20   :  { %8169 = vmatprep.subr.msk.bf16.mxu0 %vm735_vm4, %v5072_v16  ;;  %v5137_v51 = vsel %vm735_vm4, %v5072_v16, 0 }
0x1d23   :  { %7967 = vmatpush3.bf16.msra.mxu0 %v5137_v51 }
0x1d24   :  { %7986 = vmatprep.subr.bf16.mxu0 %v8576_v1 }
0x1dd1   :  { %v7946_v18 = vpop.f32.mrb[220].mxu0 }
0x1dd2   :  { %v4913_v0 = vpop.f32.mrb[221].mxu0  ;;  %v4989_v53 = vmul.f32 0.35355338, %v7946_v18 }
0x1dd3   :  { %v4987_v31 = vmul.f32 0.35355338, %v4913_v0  ;;  %v7947_v54 = vpop.f32.mrb[222].mxu0 }
0x1dd4   :  { %v4916_v10 = vpop.f32.mrb[223].mxu0  ;;  %v4995_v44 = vadd.f32 %v4989_v53, %v8893_v14 }
0x1dd5   :  { %v4988_v38 = vmul.f32 0.35355338, %v4916_v10  ;;  %v4993_v24 = vadd.f32 %v4987_v31, %v8893_v14 }
0x1dd6   :  { %v5005_v23 = vsel %vm654_vm6, %v4995_v44, -inf }
0x1dd7   :  { %v4999_v29 = vsel %vm654_vm6, %v4993_v24, -inf  ;;  %v4994_v22 = vadd.f32 %v4988_v38, %v8893_v14 }
0x1dd8   :  { %5000 = vmax.xlane.f32.xlu0 %v4999_v29 }
0x1dd9   :  { %v5002_v46 = vsel %vm654_vm6, %v4994_v22, -inf }
0x1dda   :  { %5003 = vmax.xlane.f32.xlu1 %v5002_v46 }
0x1ddc   :  { %5006 = vmax.xlane.f32.xlu0 %v5005_v23 }
0x1de1   :  { %v7954_v57 = vpop.f32.mrb[224].mxu0 }
0x1de2   :  { %v4973_v45 = vpop.f32.mrb[225].mxu0  ;;  %v4992_v41 = vmul.f32 0.35355338, %v7954_v57 }
0x1de3   :  { %v4990_v56 = vmul.f32 0.35355338, %v4973_v45  ;;  %v7955_v59 = vpop.f32.mrb[226].mxu0 }
0x1de4   :  { %v4976_v60 = vpop.f32.mrb[227].mxu0  ;;  %v4998_v33 = vadd.f32 %v4992_v41, %v8893_v14 }
0x1de5   :  { %v4996_v32 = vadd.f32 %v4990_v56, %v8893_v14  ;;  %v4991_v63 = vmul.f32 0.35355338, %v4976_v60 }
0x1de6   :  { %v5014_v55 = vsel %vm654_vm6, %v4998_v33, -inf }
0x1de7   :  { %v4997_v20 = vadd.f32 %v4991_v63, %v8893_v14  ;;  %v5008_v49 = vsel %vm654_vm6, %v4996_v32, -inf }
0x1de8   :  { %5009 = vmax.xlane.f32.xlu1 %v5008_v49 }
0x1de9   :  { %v5011_v48 = vsel %vm654_vm6, %v4997_v20, -inf }
0x1dea   :  { %5012 = vmax.xlane.f32.xlu0 %v5011_v48 }
0x1dec   :  { %5015 = vmax.xlane.f32.xlu1 %v5014_v55 }
0x1e65   :  { %v5001_v2 = vpop.xlane.xlu0 %5000 }
0x1e66   :  { %v5017_v58 = vsub.f32 %v4993_v24, %v5001_v2 }
0x1e67   :  { %v5004_v4 = vpop.xlane.xlu1 %5003 }
0x1e68   :  { %v5023_v5 = vmul.f32 1.442695, %v5017_v58  ;;  %v5018_v43 = vsub.f32 %v4994_v22, %v5004_v4 }
0x1e69   :  { %v5007_v42 = vpop.xlane.xlu0 %5006 }
0x1e6a   :  { %8428 = vpow2.f32 %v5023_v5  ;;  %v5025_v30 = vmul.f32 1.442695, %v5018_v43  ;;  %v5019_v34 = vsub.f32 %v4995_v44, %v5007_v42  ;;  %v8234_v43 = vld [vmem:[%s10450_s0 + $0x70] sm:$0xff]  }
0x1e6c   :  { %8430 = vpow2.f32 %v5025_v30  ;;  %v5027_v26 = vmul.f32 1.442695, %v5019_v34  ;;  %v8235_v30 = vld [vmem:[%s10450_s0 + $0x78] sm:$0xff]   ;;  %v8236_v34 = vld [vmem:[%s10453_s7 + $0x70] sm:$0xff]  }
0x1e6e   :  { %8432 = vpow2.f32 %v5027_v26  ;;  %v8237_v26 = vld [vmem:[%s10453_s7 + $0x78] sm:$0xff]  }
0x1e74   :  { %v8429_v21 = vpop.eup %8428 }
0x1e75   :  { %v5010_v27 = vpop.xlane.xlu1 %5009  ;;  %v5035_v39 = vsel %vm654_vm6, %v8429_v21, 0.0 }
0x1e76   :  { %v8431_v28 = vpop.eup %8430  ;;  %v5020_v40 = vsub.f32 %v4996_v32, %v5010_v27  ;;  %5036 = vadd.xlane.f32.xlu0 %v5035_v39 }
0x1e77   :  { %v5013_v8 = vpop.xlane.xlu0 %5012  ;;  %v5038_v13 = vsel %vm654_vm6, %v8431_v28, 0.0 }
0x1e78   :  { %v8433_v3 = vpop.eup %8432  ;;  %v5029_v15 = vmul.f32 1.442695, %v5020_v40  ;;  %v5021_v11 = vsub.f32 %v4997_v20, %v5013_v8  ;;  %5039 = vadd.xlane.f32.xlu1 %v5038_v13  ;;  %v8238_v13 = vld [vmem:[%s10451_s25 + $0x70] sm:$0xff]  }
0x1e79   :  { %v5016_v16 = vpop.xlane.xlu1 %5015  ;;  %v5041_v51 = vsel %vm654_vm6, %v8433_v3, 0.0 }
0x1e7a   :  { %8434 = vpow2.f32 %v5029_v15  ;;  %v5031_v18 = vmul.f32 1.442695, %v5021_v11  ;;  %v5022_v0 = vsub.f32 %v4998_v33, %v5016_v16  ;;  %5042 = vadd.xlane.f32.xlu0 %v5041_v51  ;;  %v8239_v15 = vld [vmem:[%s10451_s25 + $0x78] sm:$0xff]  }
0x1e7c   :  { %8436 = vpow2.f32 %v5031_v18  ;;  %v5033_v53 = vmul.f32 1.442695, %v5022_v0 }
0x1e7e   :  { %8438 = vpow2.f32 %v5033_v53 }
0x1e84   :  { %v8435_v31 = vpop.eup %8434 }
0x1e85   :  { %v5044_v54 = vsel %vm654_vm6, %v8435_v31, 0.0 }
0x1e86   :  { %v8437_v10 = vpop.eup %8436  ;;  %5045 = vadd.xlane.f32.xlu1 %v5044_v54 }
0x1e87   :  { %v5047_v38 = vsel %vm654_vm6, %v8437_v10, 0.0 }
0x1e88   :  { %v8439_v24 = vpop.eup %8438  ;;  %5048 = vadd.xlane.f32.xlu0 %v5047_v38 }
0x1e89   :  { %v5050_v44 = vsel %vm654_vm6, %v8439_v24, 0.0 }
0x1e8a   :  { %5051 = vadd.xlane.f32.xlu1 %v5050_v44 }
0x1f03   :  { %v5037_v29 = vpop.xlane.xlu0 %5036 }
0x1f04   :  { %8440 = vrcp.f32 %v5037_v29 }
0x1f05   :  { %v5040_v22 = vpop.xlane.xlu1 %5039 }
0x1f06   :  { %8442 = vrcp.f32 %v5040_v22 }
0x1f07   :  { %v5043_v46 = vpop.xlane.xlu0 %5042 }
0x1f08   :  { %8444 = vrcp.f32 %v5043_v46 }
0x1f0e   :  { %v8441_v23 = vpop.eup %8440 }
0x1f0f   :  { %v5054_v45 = vmul.f32 %v8441_v23, %v8429_v21  ;;  %v6799_v21 = vld [vmem:[%s10414_s9 + $0x18] sm:$0xf] }
0x1f10   :  { %v8443_v57 = vpop.eup %8442  ;;  %v5200_v27 = vsel %vm735_vm4, %v6799_v21, 0 }
0x1f11   :  { %v5056_v41 = vmul.f32 %v8443_v57, %v8431_v28 }
0x1f12   :  { %v8445_v56 = vpop.eup %8444 }
0x1f13   :  { %v5058_v59 = vmul.f32 %v8445_v56, %v8433_v3  ;;  %v5046_v60 = vpop.xlane.xlu1 %5045  ;;  %v5065_v32 = vpack.c.bf16 %v5056_v41, %v5054_v45 }
0x1f14   :  { %8446 = vrcp.f32 %v5046_v60 }
0x1f15   :  { %v5066_v63 = vpack.c.bf16 %v5058_v59, %v5058_v59  ;;  %v5049_v33 = vpop.xlane.xlu0 %5048  ;;  %7960 = vmatprep.mubr.msk.bf16.mxu1 %vm654_vm6, %v5065_v32 }
0x1f16   :  { %8448 = vrcp.f32 %v5049_v33 }
0x1f17   :  { %v5052_v20 = vpop.xlane.xlu1 %5051  ;;  %7961 = vmatmul.mubr.msk.bf16.vlgmr.msra.gmra.mrb[236].mxu1 %vm654_vm6, %v5066_v63 }
0x1f18   :  { %8450 = vrcp.f32 %v5052_v20  ;;  %7974 = vmatprep.mubr.msk.bf16.mxu1 %vm8577_vm0, %v8576_v1  ;;  %7973 = vmatpush3.bf16.msra.mxu1 %v5200_v27 }
0x1f19   :  { %8002 = vmatprep.subr.bf16.mxu1 %v8576_v1 }
0x1f1e   :  { %v8447_v49 = vpop.eup %8446 }
0x1f1f   :  { %v5060_v55 = vmul.f32 %v8447_v49, %v8435_v31  ;;  %v6907_v31 = vld [vmem:[%s10454_s26 + $0x7] ss:$0 sm:$0xff] }
0x1f20   :  { %v8449_v48 = vpop.eup %8448 }
0x1f21   :  { %v5062_v2 = vmul.f32 %v8449_v48, %v8437_v10 }
0x1f22   :  { %v8451_v58 = vpop.eup %8450 }
0x1f23   :  { %v5064_v4 = vmul.f32 %v8451_v58, %v8439_v24  ;;  %v5067_v5 = vpack.c.bf16 %v5062_v2, %v5060_v55 }
0x1f25   :  { %7968 = vmatprep.mubr.msk.bf16.mxu0 %vm654_vm6, %v5067_v5  ;;  %v5068_v42 = vpack.c.bf16 %v5064_v4, %v5064_v4 }
0x1f27   :  { %7969 = vmatmul.mubr.msk.bf16.vlgmr.msra.gmra.mrb[228].mxu0 %vm654_vm6, %v5068_v42 }
0x1f28   :  { %7987 = vmatpush3.bf16.msra.mxu0 %v8234_v43  ;;  %7990 = vmatprep.mubr.msk.bf16.mxu0 %vm8577_vm0, %v8576_v1 }
0x1f29   :  { %7988 = vmatprep.subr.bf16.mxu0 %v8576_v1 }
0x1f2c   :  { %7989 = vmatpush3.bf16.msra.mxu0 %v8235_v30 }
0x1f2d   :  { %8018 = vmatprep.subr.bf16.mxu0 %v8576_v1 }
0x1f2f   :  { %7991 = vmatmul.mubr.msk.bf16.vlgmr.msra.gmra.mrb[232].mxu0 %vm296_vm2, %v9552_v7 }
0x1f30   :  { %7994 = vmatprep.mubr.msk.bf16.mxu0 %vm8577_vm0, %v8576_v1  ;;  %8019 = vmatpush3.bf16.msra.mxu0 %v8236_v34 }
0x1f31   :  { %8020 = vmatprep.subr.bf16.mxu0 %v8576_v1 }
0x1f34   :  { %8021 = vmatpush3.bf16.msra.mxu0 %v8237_v26 }
0x1f37   :  { %7995 = vmatmul.mubr.msk.bf16.gmra.mrb[236].mxu0 %vm296_vm2, %v9577_v47 }
0x1f38   :  { %7998 = vmatprep.mubr.msk.bf16.mxu0 %vm8577_vm0, %v8576_v1 }
0x1f3f   :  { %7999 = vmatmul.mubr.msk.bf16.gmra.mrb[240].mxu0 %vm296_vm2, %v9595_v62 }
0x1f40   :  { %8022 = vmatprep.mubr.msk.bf16.mxu0 %vm8577_vm0, %v8576_v1 }
0x1f47   :  { %8023 = vmatmul.mubr.msk.bf16.vlgmr.msra.gmra.mrb[244].mxu0 %vm296_vm2, %v9552_v7 }
0x1f48   :  { %8026 = vmatprep.mubr.msk.bf16.mxu0 %vm8577_vm0, %v8576_v1 }
0x1f4f   :  { %8027 = vmatmul.mubr.msk.bf16.gmra.mrb[248].mxu0 %vm296_vm2, %v9577_v47 }
0x1f50   :  { %8030 = vmatprep.mubr.msk.bf16.mxu0 %vm8577_vm0, %v8576_v1 }
0x1f57   :  { %8031 = vmatmul.mubr.msk.bf16.gmra.mrb[252].mxu0 %vm296_vm2, %v9595_v62 }
0x1fea   :  { %v7962_v39 = vpop.f32.mrb[236].mxu1 }
0x1feb   :  { %v5116_v28 = vpop.f32.mrb[237].mxu1 }
0x1fec   :  { %v7963_v40 = vpop.f32.mrb[238].mxu1 }
0x1fed   :  { %v5119_v8 = vpop.f32.mrb[239].mxu1 }
0x1fee   :  { %v5187_v3 = vpack.c.bf16 %v5119_v8, %v5116_v28 }
0x1ff0   :  { %7975 = vmatmul.mubr.msk.bf16.vlgmr.msra.gmra.mrb[240].mxu1 %vm521_vm3, %v5187_v3 }
0x1ff1   :  { %7978 = vmatprep.mubr.msk.bf16.mxu1 %vm8577_vm0, %v8576_v1  ;;  %8003 = vmatpush3.bf16.msra.mxu1 %v8238_v13 }
0x1ff2   :  { %8004 = vmatprep.subr.bf16.mxu1 %v8576_v1 }
0x1ff5   :  { %8005 = vmatpush3.bf16.msra.mxu1 %v8239_v15 }
0x1ffa   :  { %v7970_v11 = vpop.f32.mrb[228].mxu0 }
0x1ffb   :  { %v5173_v16 = vpop.f32.mrb[229].mxu0 }
0x1ffc   :  { %v5188_v51 = vpack.c.bf16 %v5173_v16, %v7962_v39  ;;  %v7971_v18 = vpop.f32.mrb[230].mxu0 }
0x1ffd   :  { %v5176_v0 = vpop.f32.mrb[231].mxu0 }
0x1ffe   :  { %v5189_v53 = vpack.c.bf16 %v7970_v11, %v5176_v0  ;;  %7979 = vmatmul.mubr.msk.bf16.gmra.mrb[244].mxu1 %vm521_vm3, %v5188_v51 }
0x1fff   :  { %7982 = vmatprep.mubr.msk.bf16.mxu1 %vm8577_vm0, %v8576_v1 }
0x2002   :  { %v5317_v54 = vpop.f32.mrb[232].mxu0 }
0x2003   :  { %v7992_v10 = vpop.f32.mrb[233].mxu0  ;;  %v5318_v24 = vadd.f32 %v6907_v31, %v5317_v54 }
0x2004   :  { %v5320_v38 = vpop.f32.mrb[234].mxu0 }
0x2005   :  { %v5321_v44 = vadd.f32 %v6907_v31, %v5320_v38  ;;  %v7993_v29 = vpop.f32.mrb[235].mxu0 }
0x2006   :  { %7983 = vmatmul.mubr.msk.bf16.gmra.mrb[248].mxu1 %vm521_vm3, %v5189_v53 }
0x2007   :  { %v5490_v22 = vpack.c.bf16 %v5321_v44, %v5318_v24  ;;  %8006 = vmatprep.mubr.msk.bf16.mxu1 %vm8577_vm0, %v8576_v1 }
0x200a   :  { %v5325_v46 = vpop.f32.mrb[236].mxu0 }
0x200b   :  { %v10016_v23 = vadd.f32 %v6907_v31, %v5325_v46  ;;  %v7996_v57 = vpop.f32.mrb[237].mxu0 }
0x200c   :  { %v5328_v45 = vpop.f32.mrb[238].mxu0 }
0x200d   :  { %v7997_v41 = vpop.f32.mrb[239].mxu0  ;;  %v5329_v59 = vadd.f32 %v6907_v31, %v5328_v45 }
0x200e   :  { %8007 = vmatmul.mubr.msk.bf16.vlgmr.msra.gmra.mrb[252].mxu1 %vm296_vm2, %v9552_v7  ;;  %v10032_v7 = vld [vmem:[%s10456_s3 + $0x7] ss:$0 sm:$0xff] }
0x200f   :  { %8010 = vmatprep.mubr.msk.bf16.mxu1 %vm8577_vm0, %v8576_v1 }
0x2012   :  { %v5333_v56 = vpop.f32.mrb[240].mxu0 }
0x2013   :  { %v5334_v60 = vadd.f32 %v6907_v31, %v5333_v56  ;;  %v8000_v32 = vpop.f32.mrb[241].mxu0 }
0x2014   :  { %v5336_v63 = vpop.f32.mrb[242].mxu0 }
0x2015   :  { %v5492_v33 = vpack.c.bf16 %v5334_v60, %v5329_v59  ;;  %v10022_v20 = vadd.f32 %v6907_v31, %v5336_v63  ;;  %v8001_v49 = vpop.f32.mrb[243].mxu0 }
0x2016   :  { %8011 = vmatmul.mubr.msk.bf16.gmra.mrb[0].mxu1 %vm296_vm2, %v9577_v47 }
0x2017   :  { %8046 = vmatprep.mubr.msk.bf16.mxu0 %vm521_vm3, %v5492_v33  ;;  %8014 = vmatprep.mubr.msk.bf16.mxu1 %vm8577_vm0, %v8576_v1 }
0x201a   :  { %v5467_v48 = vpop.f32.mrb[244].mxu0 }
0x201b   :  { %v8024_v55 = vpop.f32.mrb[245].mxu0  ;;  %v5468_v58 = vadd.f32 %v10032_v7, %v5467_v48 }
0x201c   :  { %v5470_v2 = vpop.f32.mrb[246].mxu0 }
0x201d   :  { %v5471_v4 = vadd.f32 %v10032_v7, %v5470_v2  ;;  %v8025_v5 = vpop.f32.mrb[247].mxu0 }
0x201e   :  { %8015 = vmatmul.mubr.msk.bf16.gmra.mrb[4].mxu1 %vm296_vm2, %v9595_v62 }
0x201f   :  { %v10038_v47 = vpack.c.bf16 %v5471_v4, %v5468_v58  ;;  %8038 = vmatprep.mubr.msk.bf16.mxu1 %vm521_vm3, %v5490_v22 }
0x2022   :  { %v5475_v43 = vpop.f32.mrb[248].mxu0 }
0x2023   :  { %v8028_v42 = vpop.f32.mrb[249].mxu0  ;;  %v5476_v4 = vadd.f32 %v10032_v7, %v5475_v43 }
0x2024   :  { %v5478_v30 = vpop.f32.mrb[250].mxu0 }
0x2025   :  { %v8029_v34 = vpop.f32.mrb[251].mxu0  ;;  %v5479_v21 = vadd.f32 %v10032_v7, %v5478_v30 }
0x2026   :  { %v5491_v34 = vpack.c.bf16 %v10016_v23, %v10016_v23 }
0x202a   :  { %v5483_v26 = vpop.f32.mrb[252].mxu0 }
0x202b   :  { %v5484_v27 = vadd.f32 %v10032_v7, %v5483_v26  ;;  %v8032_v39 = vpop.f32.mrb[253].mxu0 }
0x202c   :  { %v10043_v28 = vpop.f32.mrb[254].mxu0 }
0x202d   :  { %v10045_v40 = vpack.c.bf16 %v5484_v27, %v5479_v21  ;;  %v8033_v8 = vpop.f32.mrb[255].mxu0  ;;  %v5701_v27 = vpack.c.bf16 %v5476_v4, %v5476_v4  ;;  %v5487_v39 = vadd.f32 %v10032_v7, %v10043_v28 }
0x202e   :  { %v5493_v8 = vpack.c.bf16 %v10022_v20, %v10022_v20 }
0x202f   :  { %v5711_v43 = vsel %vm735_vm4, %v5701_v27, 0 }
0x20c3   :  { %v5236_v62 = vpop.f32.mrb[240].mxu1 }
0x20c4   :  { %v10048_v13 = vadd.f32 %v5236_v62, %v9898_v35  ;;  %v7976_v3 = vpop.f32.mrb[241].mxu1  ;;  %v5703_v62 = vpack.c.bf16 %v5487_v39, %v5487_v39 }
0x20c5   :  { %v5239_v15 = vpop.f32.mrb[242].mxu1 }
0x20c6   :  { %v10051_v11 = vadd.f32 %v5239_v15, %v9900_v37  ;;  %v7977_v16 = vpop.f32.mrb[243].mxu1 }
0x20d1   :  { %v5244_v51 = vpop.f32.mrb[244].mxu1 }
0x20d2   :  { %v10054_v18 = vadd.f32 %v5244_v51, %v9902_v36  ;;  %v7980_v0 = vpop.f32.mrb[245].mxu1  ;;  %v6913_v36 = vld [vmem:[%s10455_s6 + $0x7] ss:$0 sm:$0xff] }
0x20d3   :  { %v5247_v53 = vpop.f32.mrb[246].mxu1 }
0x20d4   :  { %v10057_v31 = vadd.f32 %v5247_v53, %v9904_v6  ;;  %v7981_v54 = vpop.f32.mrb[247].mxu1 }
0x20d9   :  { %v5252_v10 = vpop.f32.mrb[248].mxu1 }
0x20da   :  { %v10060_v35 = vadd.f32 %v5252_v10, %v9906_v61  ;;  %v7984_v38 = vpop.f32.mrb[249].mxu1 }
0x20db   :  { %v5255_v24 = vpop.f32.mrb[250].mxu1 }
0x20dc   :  { %v10063_v37 = vadd.f32 %v5255_v24, %v9908_v12  ;;  %v7985_v44 = vpop.f32.mrb[251].mxu1 }
0x20e1   :  { %v5392_v29 = vpop.f32.mrb[252].mxu1 }
0x20e2   :  { %v8008_v22 = vpop.f32.mrb[253].mxu1  ;;  %v5393_v6 = vadd.f32 %v6913_v36, %v5392_v29 }
0x20e3   :  { %v5395_v46 = vpop.f32.mrb[254].mxu1 }
0x20e4   :  { %v5396_v57 = vadd.f32 %v6913_v36, %v5395_v46  ;;  %v8009_v45 = vpop.f32.mrb[255].mxu1 }
0x20e6   :  { %v5494_v41 = vpack.c.bf16 %v5396_v57, %v5393_v6 }
0x20e8   :  { %8170 = vmatprep.subr.msk.bf16.mxu1 %vm521_vm3, %v5494_v41  ;;  %v5505_v61 = vsel %vm521_vm3, %v5494_v41, 0 }
0x20e9   :  { %v5400_v56 = vpop.f32.mrb[0].mxu1  ;;  %8035 = vmatpush3.bf16.xpose.msra.mxu1 %v5505_v61 }
0x20ea   :  { %v5401_v12 = vadd.f32 %v6913_v36, %v5400_v56  ;;  %v8012_v59 = vpop.f32.mrb[1].mxu1 }
0x20eb   :  { %v5403_v60 = vpop.f32.mrb[2].mxu1 }
0x20ec   :  { %v5495_v32 = vpack.c.bf16 %v5401_v12, %v5401_v12  ;;  %v8013_v63 = vpop.f32.mrb[3].mxu1  ;;  %v5404_v48 = vadd.f32 %v6913_v36, %v5403_v60 }
0x20ee   :  { %8171 = vmatprep.subr.msk.bf16.mxu1 %vm521_vm3, %v5495_v32  ;;  %v5508_v33 = vsel %vm521_vm3, %v5495_v32, 0 }
0x20f1   :  { %v5408_v49 = vpop.f32.mrb[4].mxu1  ;;  %8037 = vmatpush3.bf16.xpose.msra.mxu1 %v5508_v33 }
0x20f2   :  { %v5409_v55 = vadd.f32 %v6913_v36, %v5408_v49  ;;  %v8016_v2 = vpop.f32.mrb[5].mxu1  ;;  %8050 = vmatprep.subr.bf16.mxu1 %v10038_v47 }
0x20f3   :  { %v5411_v58 = vpop.f32.mrb[6].mxu1 }
0x20f4   :  { %v5496_v5 = vpack.c.bf16 %v5409_v55, %v5404_v48  ;;  %v5412_v42 = vadd.f32 %v6913_v36, %v5411_v58  ;;  %v8017_v30 = vpop.f32.mrb[7].mxu1 }
0x20f6   :  { %v5497_v26 = vpack.c.bf16 %v5412_v42, %v5412_v42  ;;  %8172 = vmatprep.subr.msk.bf16.mxu0 %vm521_vm3, %v5496_v5  ;;  %v5565_v21 = vsel %vm521_vm3, %v5496_v5, 0 }
0x20f7   :  { %8043 = vmatpush3.bf16.xpose.msra.mxu0 %v5565_v21 }
0x20f8   :  { %8039 = vmatmul.mubr.msk.bf16.vlgmr.msra.gmra.mrb[8].mxu1 %vm521_vm3, %v5491_v34  ;;  %8173 = vmatprep.subr.msk.bf16.mxu0 %vm521_vm3, %v5497_v26  ;;  %v5568_v23 = vsel %vm521_vm3, %v5497_v26, 0 }
0x20f9   :  { %8051 = vmatpush3.bf16.msra.mxu1 %v10038_v47  ;;  %v5768_v47 = vsel %vm735_vm4, %v5703_v62, 0 }
0x20fa   :  { %8174 = vmatprep.subr.msk.bf16.mxu1 %vm735_vm4, %v5701_v27 }
0x20fd   :  { %8053 = vmatpush3.bf16.msra.mxu1 %v5711_v43 }
0x20fe   :  { %8066 = vmatprep.subr.bf16.mxu1 %v8576_v1 }
0x20ff   :  { %8045 = vmatpush3.bf16.xpose.msra.mxu0 %v5568_v23 }
0x2100   :  { %8058 = vmatprep.subr.bf16.mxu0 %v10045_v40 }
0x2106   :  { %8047 = vmatmul.mubr.msk.bf16.vlgmr.msra.gmra.mrb[0].mxu0 %vm521_vm3, %v5493_v8 }
0x2107   :  { %8059 = vmatpush3.bf16.msra.mxu0 %v10045_v40 }
0x2108   :  { %8175 = vmatprep.subr.msk.bf16.mxu0 %vm735_vm4, %v5703_v62 }
0x210b   :  { %8061 = vmatpush3.bf16.msra.mxu0 %v5768_v47 }
0x210c   :  { %8080 = vmatprep.subr.bf16.mxu0 %v8576_v1 }
0x21cb   :  { %v8040_v3 = vpop.f32.mrb[8].mxu1 }
0x21cc   :  { %v5544_v15 = vpop.f32.mrb[9].mxu1  ;;  %v5620_v16 = vmul.f32 0.35355338, %v8040_v3 }
0x21cd   :  { %v5618_v51 = vmul.f32 0.35355338, %v5544_v15  ;;  %v8041_v7 = vpop.f32.mrb[10].mxu1 }
0x21ce   :  { %v5547_v28 = vpop.f32.mrb[11].mxu1  ;;  %v5626_v53 = vadd.f32 %v5620_v16, %v8893_v14 }
0x21cf   :  { %v5624_v20 = vadd.f32 %v5618_v51, %v8893_v14  ;;  %v5619_v0 = vmul.f32 0.35355338, %v5547_v28 }
0x21d0   :  { %v5636_v38 = vsel %vm654_vm6, %v5626_v53, -inf }
0x21d1   :  { %v5625_v40 = vadd.f32 %v5619_v0, %v8893_v14  ;;  %v5630_v54 = vsel %vm654_vm6, %v5624_v20, -inf }
0x21d2   :  { %5631 = vmax.xlane.f32.xlu0 %v5630_v54 }
0x21d3   :  { %v5633_v10 = vsel %vm654_vm6, %v5625_v40, -inf }
0x21d4   :  { %5634 = vmax.xlane.f32.xlu1 %v5633_v10 }
0x21d6   :  { %5637 = vmax.xlane.f32.xlu0 %v5636_v38 }
0x21d9   :  { %v8048_v24 = vpop.f32.mrb[0].mxu0 }
0x21da   :  { %v5604_v44 = vpop.f32.mrb[1].mxu0  ;;  %v5623_v36 = vmul.f32 0.35355338, %v8048_v24 }
0x21db   :  { %v5621_v29 = vmul.f32 0.35355338, %v5604_v44  ;;  %v8049_v22 = vpop.f32.mrb[2].mxu0 }
0x21dc   :  { %v5607_v46 = vpop.f32.mrb[3].mxu0  ;;  %v5629_v45 = vadd.f32 %v5623_v36, %v8893_v14 }
0x21dd   :  { %v5627_v6 = vadd.f32 %v5621_v29, %v8893_v14  ;;  %v5622_v57 = vmul.f32 0.35355338, %v5607_v46 }
0x21de   :  { %v5645_v12 = vsel %vm654_vm6, %v5629_v45, -inf }
0x21df   :  { %v5628_v41 = vadd.f32 %v5622_v57, %v8893_v14  ;;  %v5639_v61 = vsel %vm654_vm6, %v5627_v6, -inf }
0x21e0   :  { %5640 = vmax.xlane.f32.xlu1 %v5639_v61 }
0x21e1   :  { %v5642_v56 = vsel %vm654_vm6, %v5628_v41, -inf }
0x21e2   :  { %5643 = vmax.xlane.f32.xlu0 %v5642_v56 }
0x21e4   :  { %5646 = vmax.xlane.f32.xlu1 %v5645_v12 }
0x225f   :  { %v5632_v59 = vpop.xlane.xlu0 %5631 }
0x2260   :  { %v5648_v60 = vsub.f32 %v5624_v20, %v5632_v59 }
0x2261   :  { %v5635_v32 = vpop.xlane.xlu1 %5634 }
0x2262   :  { %v5654_v63 = vmul.f32 1.442695, %v5648_v60  ;;  %v5649_v33 = vsub.f32 %v5625_v40, %v5635_v32  ;;  %v6800_v60 = vld [vmem:[%s10414_s9 + $0x1c] sm:$0xf] }
0x2263   :  { %v5638_v49 = vpop.xlane.xlu0 %5637  ;;  %v5831_v32 = vsel %vm735_vm4, %v6800_v60, 0 }
0x2264   :  { %8452 = vpow2.f32 %v5654_v63  ;;  %v5656_v48 = vmul.f32 1.442695, %v5649_v33  ;;  %v5650_v55 = vsub.f32 %v5626_v53, %v5638_v49 }
0x2266   :  { %8454 = vpow2.f32 %v5656_v48  ;;  %v5658_v14 = vmul.f32 1.442695, %v5650_v55 }
0x2268   :  { %8456 = vpow2.f32 %v5658_v14 }
0x226d   :  { %v5641_v2 = vpop.xlane.xlu1 %5640 }
0x226e   :  { %v8453_v58 = vpop.eup %8452  ;;  %v5651_v4 = vsub.f32 %v5627_v6, %v5641_v2 }
0x226f   :  { %v5644_v5 = vpop.xlane.xlu0 %5643  ;;  %v5666_v42 = vsel %vm654_vm6, %v8453_v58, 0.0 }
0x2270   :  { %v8455_v30 = vpop.eup %8454  ;;  %v5660_v34 = vmul.f32 1.442695, %v5651_v4  ;;  %v5652_v26 = vsub.f32 %v5628_v41, %v5644_v5  ;;  %5667 = vadd.xlane.f32.xlu0 %v5666_v42 }
0x2271   :  { %v5647_v21 = vpop.xlane.xlu1 %5646  ;;  %v5669_v27 = vsel %vm654_vm6, %v8455_v30, 0.0 }
0x2272   :  { %v8457_v43 = vpop.eup %8456  ;;  %8458 = vpow2.f32 %v5660_v34  ;;  %v5662_v23 = vmul.f32 1.442695, %v5652_v26  ;;  %v5653_v39 = vsub.f32 %v5629_v45, %v5647_v21  ;;  %5670 = vadd.xlane.f32.xlu1 %v5669_v27 }
0x2273   :  { %v5672_v8 = vsel %vm654_vm6, %v8457_v43, 0.0 }
0x2274   :  { %8460 = vpow2.f32 %v5662_v23  ;;  %v5664_v62 = vmul.f32 1.442695, %v5653_v39  ;;  %5673 = vadd.xlane.f32.xlu0 %v5672_v8 }
0x2276   :  { %8462 = vpow2.f32 %v5664_v62 }
0x227c   :  { %v8459_v47 = vpop.eup %8458 }
0x227d   :  { %v5675_v3 = vsel %vm654_vm6, %v8459_v47, 0.0 }
0x227e   :  { %v8461_v15 = vpop.eup %8460  ;;  %5676 = vadd.xlane.f32.xlu1 %v5675_v3 }
0x227f   :  { %v5678_v16 = vsel %vm654_vm6, %v8461_v15, 0.0 }
0x2280   :  { %v8463_v51 = vpop.eup %8462  ;;  %5679 = vadd.xlane.f32.xlu0 %v5678_v16 }
0x2281   :  { %v5681_v7 = vsel %vm654_vm6, %v8463_v51, 0.0 }
0x2282   :  { %5682 = vadd.xlane.f32.xlu1 %v5681_v7 }
0x22fd   :  { %v5668_v28 = vpop.xlane.xlu0 %5667 }
0x22fe   :  { %8464 = vrcp.f32 %v5668_v28 }
0x22ff   :  { %v5671_v20 = vpop.xlane.xlu1 %5670 }
0x2300   :  { %8466 = vrcp.f32 %v5671_v20 }
0x2301   :  { %v5674_v0 = vpop.xlane.xlu0 %5673 }
0x2302   :  { %8468 = vrcp.f32 %v5674_v0 }
0x2308   :  { %v8465_v53 = vpop.eup %8464 }
0x2309   :  { %v5685_v10 = vmul.f32 %v8465_v53, %v8453_v58 }
0x230a   :  { %v8467_v40 = vpop.eup %8466 }
0x230b   :  { %v5677_v54 = vpop.xlane.xlu1 %5676  ;;  %v5687_v38 = vmul.f32 %v8467_v40, %v8455_v30  ;;  %v6936_v30 = vld [vmem:[%s10415_s10 + $0x1] ss:$0 sm:$0xff] }
0x230c   :  { %v8469_v24 = vpop.eup %8468  ;;  %8470 = vrcp.f32 %v5677_v54 }
0x230d   :  { %v5689_v44 = vmul.f32 %v8469_v24, %v8457_v43  ;;  %v5680_v36 = vpop.xlane.xlu0 %5679  ;;  %v5696_v29 = vpack.c.bf16 %v5687_v38, %v5685_v10 }
0x230e   :  { %8472 = vrcp.f32 %v5680_v36 }
0x230f   :  { %v5697_v22 = vpack.c.bf16 %v5689_v44, %v5689_v44  ;;  %8054 = vmatprep.mubr.msk.bf16.mxu1 %vm654_vm6, %v5696_v29  ;;  %v5683_v46 = vpop.xlane.xlu1 %5682 }
0x2310   :  { %8474 = vrcp.f32 %v5683_v46 }
0x2311   :  { %8055 = vmatmul.mubr.msk.bf16.vlgmr.msra.gmra.mrb[12].mxu1 %vm654_vm6, %v5697_v22 }
0x2312   :  { %8068 = vmatprep.mubr.msk.bf16.mxu1 %vm8577_vm0, %v8576_v1  ;;  %8067 = vmatpush3.bf16.msra.mxu1 %v5831_v32 }
0x2313   :  { %8096 = vmatprep.subr.bf16.mxu1 %v8576_v1 }
0x2316   :  { %v8471_v6 = vpop.eup %8470 }
0x2317   :  { %v5691_v45 = vmul.f32 %v8471_v6, %v8459_v47 }
0x2318   :  { %v8473_v57 = vpop.eup %8472 }
0x2319   :  { %v5693_v41 = vmul.f32 %v8473_v57, %v8461_v15 }
0x231a   :  { %v8475_v61 = vpop.eup %8474 }
0x231b   :  { %v5695_v56 = vmul.f32 %v8475_v61, %v8463_v51  ;;  %v5698_v12 = vpack.c.bf16 %v5693_v41, %v5691_v45 }
0x231d   :  { %v5699_v59 = vpack.c.bf16 %v5695_v56, %v5695_v56  ;;  %8062 = vmatprep.mubr.msk.bf16.mxu0 %vm654_vm6, %v5698_v12 }
0x231f   :  { %8063 = vmatmul.mubr.msk.bf16.vlgmr.msra.gmra.mrb[4].mxu0 %vm654_vm6, %v5699_v59 }
0x2320   :  { %8084 = vmatprep.mubr.msk.bf16.mxu0 %vm8577_vm0, %v8576_v1 }
0x23e4   :  { %v8056_v63 = vpop.f32.mrb[12].mxu1 }
0x23e5   :  { %v5747_v33 = vpop.f32.mrb[13].mxu1 }
0x23e6   :  { %v8057_v49 = vpop.f32.mrb[14].mxu1 }
0x23e7   :  { %v5750_v48 = vpop.f32.mrb[15].mxu1 }
0x23e8   :  { %v5818_v55 = vpack.c.bf16 %v5750_v48, %v5747_v33 }
0x23ea   :  { %8069 = vmatmul.mubr.msk.bf16.vlgmr.msra.gmra.mrb[16].mxu1 %vm521_vm3, %v5818_v55 }
0x23eb   :  { %8072 = vmatprep.mubr.msk.bf16.mxu1 %vm8577_vm0, %v8576_v1 }
0x23f2   :  { %v8064_v14 = vpop.f32.mrb[4].mxu0 }
0x23f3   :  { %v5804_v2 = vpop.f32.mrb[5].mxu0 }
0x23f4   :  { %v5819_v58 = vpack.c.bf16 %v5804_v2, %v8056_v63  ;;  %v8065_v4 = vpop.f32.mrb[6].mxu0 }
0x23f5   :  { %v5807_v5 = vpop.f32.mrb[7].mxu0 }
0x23f6   :  { %v5820_v42 = vpack.c.bf16 %v8064_v14, %v5807_v5  ;;  %8073 = vmatmul.mubr.msk.bf16.gmra.mrb[20].mxu1 %vm521_vm3, %v5819_v58  ;;  %v8240_v58 = vld [vmem:[%s10418_s13 + $0x10] sm:$0xff]  }
0x23f7   :  { %8076 = vmatprep.mubr.msk.bf16.mxu1 %vm8577_vm0, %v8576_v1  ;;  %8081 = vmatpush3.bf16.msra.mxu0 %v8240_v58  ;;  %v10239_v58 = vld [vmem:[%s10419_s14 + $0x1] ss:$0 sm:$0xff] }
0x23f8   :  { %8082 = vmatprep.subr.bf16.mxu0 %v8576_v1 }
0x23fe   :  { %8077 = vmatmul.mubr.msk.bf16.gmra.mrb[24].mxu1 %vm521_vm3, %v5820_v42 }
0x23ff   :  { %8104 = vmatprep.mubr.msk.bf16.mxu1 %vm8577_vm0, %v8576_v1 }
0x24bd   :  { %v5867_v34 = vpop.f32.mrb[16].mxu1 }
0x24be   :  { %v5890_v26 = vadd.f32 %v5867_v34, %v10048_v13  ;;  %v8070_v21 = vpop.f32.mrb[17].mxu1 }
0x24bf   :  { %v5870_v27 = vpop.f32.mrb[18].mxu1 }
0x24c0   :  { %v5902_v43 = vadd.f32 %v6936_v30, %v5890_v26  ;;  %v5891_v23 = vadd.f32 %v5870_v27, %v10051_v11  ;;  %v8071_v39 = vpop.f32.mrb[19].mxu1 }
0x24c2   :  { %v5903_v8 = vadd.f32 %v6936_v30, %v5891_v23  ;;  %v5908_v62 = vadd.f32 %v5902_v43, %v9546_v25  ;;  %v10179_v23 = vld [vmem:[%s10416_s11 + $0x1] ss:$0 sm:$0xff] }
0x24c4   :  { %v5914_v47 = vsel %vm296_vm2, %v5908_v62, 0.0  ;;  %v5909_v3 = vadd.f32 %v5903_v8, %v9548_v52 }
0x24c5   :  { %5915 = vadd.xlane.f32.xlu0 %v5914_v47 }
0x24c6   :  { %v5917_v15 = vsel %vm296_vm2, %v5909_v3, 0.0 }
0x24c7   :  { %5918 = vadd.xlane.f32.xlu1 %v5917_v15 }
0x24c9   :  { %v5875_v16 = vpop.f32.mrb[20].mxu1 }
0x24ca   :  { %v5892_v13 = vadd.f32 %v5875_v16, %v10054_v18  ;;  %v8074_v51 = vpop.f32.mrb[21].mxu1 }
0x24cb   :  { %v5878_v7 = vpop.f32.mrb[22].mxu1 }
0x24cc   :  { %v5904_v28 = vadd.f32 %v6936_v30, %v5892_v13  ;;  %v5893_v11 = vadd.f32 %v5878_v7, %v10057_v31  ;;  %v8075_v20 = vpop.f32.mrb[23].mxu1 }
0x24ce   :  { %v5905_v0 = vadd.f32 %v6936_v30, %v5893_v11  ;;  %v5910_v25 = vadd.f32 %v5904_v28, %v9571_v9  ;;  %v6938_v28 = vld [vmem:[%s10417_s12 + $0x1] ss:$0 sm:$0xff] }
0x24d0   :  { %v5920_v53 = vsel %vm296_vm2, %v5910_v25, 0.0  ;;  %v5911_v52 = vadd.f32 %v5905_v0, %v9573_v17 }
0x24d1   :  { %5921 = vadd.xlane.f32.xlu0 %v5920_v53  ;;  %v5883_v40 = vpop.f32.mrb[24].mxu1 }
0x24d2   :  { %v5894_v54 = vadd.f32 %v5883_v40, %v10060_v35  ;;  %v8078_v10 = vpop.f32.mrb[25].mxu1  ;;  %v5923_v18 = vsel %vm296_vm2, %v5911_v52, 0.0 }
0x24d3   :  { %5924 = vadd.xlane.f32.xlu1 %v5923_v18  ;;  %v5886_v38 = vpop.f32.mrb[26].mxu1 }
0x24d4   :  { %v5906_v24 = vadd.f32 %v6936_v30, %v5894_v54  ;;  %v5895_v31 = vadd.f32 %v5886_v38, %v10063_v37  ;;  %v8079_v44 = vpop.f32.mrb[27].mxu1 }
0x24d6   :  { %v5907_v36 = vadd.f32 %v6936_v30, %v5895_v31  ;;  %v5912_v49 = vadd.f32 %v5906_v24, %v9589_v19  ;;  %v8241_v19 = vld [vmem:[%s10418_s13 + $0x18] sm:$0xff]  }
0x24d7   :  { %8083 = vmatpush3.bf16.msra.mxu0 %v8241_v19 }
0x24d8   :  { %v5913_v55 = vadd.f32 %v5907_v36, %v9591_v50  ;;  %v5926_v14 = vsel %vm296_vm2, %v5912_v49, 0.0  ;;  %8116 = vmatprep.subr.bf16.mxu0 %v8576_v1 }
0x24da   :  { %v5929_v2 = vsel %vm296_vm2, %v5913_v55, 0.0 }
0x2552   :  { %v5916_v29 = vpop.xlane.xlu0 %5915 }
0x2553   :  { %v5932_v9 = vmul.f32 0.03125, %v5916_v29 }
0x2554   :  { %v5919_v22 = vpop.xlane.xlu1 %5918 }
0x2555   :  { %v5938_v46 = vsub.f32 %v5908_v62, %v5932_v9  ;;  %v5933_v6 = vmul.f32 0.03125, %v5919_v22 }
0x2557   :  { %v5939_v17 = vsub.f32 %v5909_v3, %v5933_v6  ;;  %v5944_v57 = vmul.f32 %v5938_v46, %v5938_v46 }
0x2559   :  { %v5950_v45 = vsel %vm296_vm2, %v5944_v57, 0.0  ;;  %v5945_v35 = vmul.f32 %v5939_v17, %v5939_v17  ;;  %v8243_v57 = vld [vmem:[%s10420_s15 + $0x28] sm:$0xff]  }
0x255a   :  { %5951 = vadd.xlane.f32.xlu0 %v5950_v45  ;;  %v8244_v45 = vld [vmem:[%s10420_s15 + $0x30] sm:$0xff]  }
0x255b   :  { %v5953_v41 = vsel %vm296_vm2, %v5945_v35, 0.0  ;;  %v8245_v35 = vld [vmem:[%s10420_s15 + $0x38] sm:$0xff]  }
0x255c   :  { %5954 = vadd.xlane.f32.xlu1 %v5953_v41 }
0x255e   :  { %v5922_v61 = vpop.xlane.xlu0 %5921 }
0x255f   :  { %v5934_v56 = vmul.f32 0.03125, %v5922_v61 }
0x2560   :  { %v5925_v12 = vpop.xlane.xlu1 %5924 }
0x2561   :  { %v10154_v37 = vsub.f32 %v5910_v25, %v5934_v56  ;;  %v5935_v59 = vmul.f32 0.03125, %v5925_v12 }
0x2563   :  { %v10156_v60 = vsub.f32 %v5911_v52, %v5935_v59  ;;  %v5946_v32 = vmul.f32 %v10154_v37, %v10154_v37 }
0x2565   :  { %v5956_v63 = vsel %vm296_vm2, %v5946_v32, 0.0  ;;  %v5947_v33 = vmul.f32 %v10156_v60, %v10156_v60 }
0x2566   :  { %5957 = vadd.xlane.f32.xlu0 %v5956_v63 }
0x2567   :  { %v5959_v48 = vsel %vm296_vm2, %v5947_v33, 0.0 }
0x2568   :  { %5960 = vadd.xlane.f32.xlu1 %v5959_v48 }
0x256a   :  { %5927 = vadd.xlane.f32.xlu0 %v5926_v14 }
0x256c   :  { %5930 = vadd.xlane.f32.xlu1 %v5929_v2 }
0x25e7   :  { %v5952_v50 = vpop.xlane.xlu0 %5951 }
0x25e8   :  { %v5968_v4 = vmul.f32 0.03125, %v5952_v50 }
0x25e9   :  { %v5955_v5 = vpop.xlane.xlu1 %5954 }
0x25ea   :  { %v5974_v42 = vadd.f32 1e-12, %v5968_v4  ;;  %v5969_v30 = vmul.f32 0.03125, %v5955_v5 }
0x25ec   :  { %8476 = vrsqrt.f32 %v5974_v42  ;;  %v5975_v34 = vadd.f32 1e-12, %v5969_v30 }
0x25ee   :  { %8478 = vrsqrt.f32 %v5975_v34 }
0x25f3   :  { %v5958_v26 = vpop.xlane.xlu0 %5957 }
0x25f4   :  { %v5970_v21 = vmul.f32 0.03125, %v5958_v26 }
0x25f5   :  { %v5961_v27 = vpop.xlane.xlu1 %5960 }
0x25f6   :  { %v8477_v43 = vpop.eup %8476  ;;  %v5976_v39 = vadd.f32 1e-12, %v5970_v21  ;;  %v5971_v8 = vmul.f32 0.03125, %v5961_v27 }
0x25f7   :  { %v5986_v62 = vmul.f32 %v8477_v43, %v5938_v46  ;;  %v5928_v47 = vpop.xlane.xlu0 %5927 }
0x25f8   :  { %v8479_v3 = vpop.eup %8478  ;;  %8480 = vrsqrt.f32 %v5976_v39  ;;  %v5977_v15 = vadd.f32 1e-12, %v5971_v8  ;;  %v5936_v16 = vmul.f32 0.03125, %v5928_v47 }
0x25f9   :  { %v5998_v13 = vmul.f32 %v10179_v23, %v5986_v62  ;;  %v5987_v51 = vmul.f32 %v8479_v3, %v5939_v17  ;;  %v5931_v7 = vpop.xlane.xlu1 %5930  ;;  %v8242_v17 = vld [vmem:[%s10420_s15 + $0x20] sm:$0xff]  }
0x25fa   :  { %8482 = vrsqrt.f32 %v5977_v15  ;;  %v5942_v11 = vsub.f32 %v5912_v49, %v5936_v16  ;;  %v5937_v20 = vmul.f32 0.03125, %v5931_v7  ;;  %8097 = vmatpush3.bf16.msra.mxu1 %v8242_v17 }
0x25fb   :  { %v5999_v0 = vmul.f32 %v10179_v23, %v5987_v51  ;;  %v10186_v52 = vadd.f32 %v6938_v28, %v5998_v13  ;;  %8098 = vmatprep.subr.bf16.mxu1 %v8576_v1 }
0x25fc   :  { %v5943_v25 = vsub.f32 %v5913_v55, %v5937_v20  ;;  %v5948_v53 = vmul.f32 %v5942_v11, %v5942_v11 }
0x25fd   :  { %v10188_v40 = vadd.f32 %v6938_v28, %v5999_v0 }
0x25fe   :  { %v5962_v54 = vsel %vm296_vm2, %v5948_v53, 0.0  ;;  %v5949_v10 = vmul.f32 %v5943_v25, %v5943_v25  ;;  %8099 = vmatpush3.bf16.msra.mxu1 %v8243_v57 }
0x25ff   :  { %v6016_v18 = vpack.c.bf16 %v10188_v40, %v10186_v52  ;;  %5963 = vadd.xlane.f32.xlu0 %v5962_v54  ;;  %8100 = vmatprep.subr.bf16.mxu1 %v8576_v1 }
0x2600   :  { %v5965_v38 = vsel %vm296_vm2, %v5949_v10, 0.0 }
0x2601   :  { %8085 = vmatmul.mubr.msk.bf16.vlgmr.msra.gmra.mrb[8].mxu0 %vm296_vm2, %v6016_v18  ;;  %5966 = vadd.xlane.f32.xlu1 %v5965_v38 }
0x2602   :  { %v8481_v24 = vpop.eup %8480  ;;  %8088 = vmatprep.mubr.msk.bf16.mxu0 %vm8577_vm0, %v8576_v1  ;;  %8101 = vmatpush3.bf16.msra.mxu1 %v8244_v45 }
0x2603   :  { %v5988_v31 = vmul.f32 %v8481_v24, %v10154_v37  ;;  %8102 = vmatprep.subr.bf16.mxu1 %v8576_v1 }
0x2604   :  { %v8483_v44 = vpop.eup %8482 }
0x2605   :  { %v6000_v36 = vmul.f32 %v10179_v23, %v5988_v31  ;;  %v5989_v29 = vmul.f32 %v8483_v44, %v10156_v60 }
0x2606   :  { %8103 = vmatpush3.bf16.msra.mxu1 %v8245_v35 }
0x2607   :  { %v6001_v9 = vmul.f32 %v10179_v23, %v5989_v29  ;;  %v10201_v22 = vadd.f32 %v6938_v28, %v6000_v36 }
0x2609   :  { %v10203_v46 = vadd.f32 %v6938_v28, %v6001_v9 }
0x260b   :  { %v6017_v6 = vpack.c.bf16 %v10203_v46, %v10201_v22 }
0x260d   :  { %8089 = vmatmul.mubr.msk.bf16.gmra.mrb[12].mxu0 %vm296_vm2, %v6017_v6 }
0x260e   :  { %8092 = vmatprep.mubr.msk.bf16.mxu0 %vm8577_vm0, %v8576_v1 }
0x268c   :  { %v5964_v41 = vpop.xlane.xlu0 %5963 }
0x268d   :  { %v5972_v61 = vmul.f32 0.03125, %v5964_v41 }
0x268e   :  { %v5967_v56 = vpop.xlane.xlu1 %5966 }
0x268f   :  { %v5978_v12 = vadd.f32 1e-12, %v5972_v61  ;;  %v5973_v37 = vmul.f32 0.03125, %v5967_v56 }
0x2691   :  { %8484 = vrsqrt.f32 %v5978_v12  ;;  %v5979_v59 = vadd.f32 1e-12, %v5973_v37 }
0x2693   :  { %8486 = vrsqrt.f32 %v5979_v59 }
0x269b   :  { %v8485_v60 = vpop.eup %8484 }
0x269c   :  { %v5990_v32 = vmul.f32 %v8485_v60, %v5942_v11 }
0x269d   :  { %v8487_v63 = vpop.eup %8486 }
0x269e   :  { %v6002_v33 = vmul.f32 %v10179_v23, %v5990_v32  ;;  %v5991_v49 = vmul.f32 %v8487_v63, %v5943_v25 }
0x26a0   :  { %v6003_v48 = vmul.f32 %v10179_v23, %v5991_v49  ;;  %v10227_v55 = vadd.f32 %v6938_v28, %v6002_v33 }
0x26a2   :  { %v10229_v14 = vadd.f32 %v6938_v28, %v6003_v48 }
0x26a4   :  { %v6018_v2 = vpack.c.bf16 %v10229_v14, %v10227_v55 }
0x26a6   :  { %8093 = vmatmul.mubr.msk.bf16.gmra.mrb[16].mxu0 %vm296_vm2, %v6018_v2 }
0x26a7   :  { %8120 = vmatprep.mubr.msk.bf16.mxu0 %vm8577_vm0, %v8576_v1 }
0x26d4   :  { %v6080_v19 = vpop.f32.mrb[8].mxu0 }
0x26d5   :  { %v6081_v50 = vadd.f32 %v10239_v58, %v6080_v19  ;;  %v8086_v4 = vpop.f32.mrb[9].mxu0 }
0x26d6   :  { %v6083_v5 = vpop.f32.mrb[10].mxu0 }
0x26d7   :  { %v6103_v42 = vmul.f32 %v6081_v50, %v6081_v50  ;;  %v6084_v30 = vadd.f32 %v10239_v58, %v6083_v5  ;;  %v8087_v34 = vpop.f32.mrb[11].mxu0 }
0x26d9   :  { %v6109_v26 = vmul.f32 %v6103_v42, %v6081_v50  ;;  %v6104_v21 = vmul.f32 %v6084_v30, %v6084_v30 }
0x26db   :  { %v6115_v27 = vmul.f32 0.044715, %v6109_v26  ;;  %v6110_v43 = vmul.f32 %v6104_v21, %v6084_v30 }
0x26dd   :  { %v6121_v23 = vadd.f32 %v6115_v27, %v6081_v50  ;;  %v6116_v39 = vmul.f32 0.044715, %v6110_v43 }
0x26df   :  { %v6127_v8 = vmul.f32 0.7978846, %v6121_v23  ;;  %v6122_v62 = vadd.f32 %v6116_v39, %v6084_v30 }
0x26e0   :  { %v6088_v47 = vpop.f32.mrb[12].mxu0 }
0x26e1   :  { %8488 = vtanh.f32 %v6127_v8  ;;  %v6128_v3 = vmul.f32 0.7978846, %v6122_v62  ;;  %v6089_v15 = vadd.f32 %v10239_v58, %v6088_v47  ;;  %v8090_v16 = vpop.f32.mrb[13].mxu0 }
0x26e2   :  { %v6091_v13 = vpop.f32.mrb[14].mxu0  ;;  %v10257_v16 = vld [vmem:[%s10421_s16 + $0x1] ss:$0 sm:$0xff] }
0x26e3   :  { %8490 = vtanh.f32 %v6128_v3  ;;  %v6105_v51 = vmul.f32 %v6089_v15, %v6089_v15  ;;  %v6092_v7 = vadd.f32 %v10239_v58, %v6091_v13  ;;  %v8091_v28 = vpop.f32.mrb[15].mxu0 }
0x26e5   :  { %v6111_v11 = vmul.f32 %v6105_v51, %v6089_v15  ;;  %v6106_v20 = vmul.f32 %v6092_v7, %v6092_v7 }
0x26e7   :  { %v6117_v0 = vmul.f32 0.044715, %v6111_v11  ;;  %v6112_v25 = vmul.f32 %v6106_v20, %v6092_v7 }
0x26e9   :  { %v6123_v53 = vadd.f32 %v6117_v0, %v6089_v15  ;;  %v6118_v54 = vmul.f32 0.044715, %v6112_v25 }
0x26eb   :  { %v8489_v10 = vpop.eup %8488  ;;  %v6129_v18 = vmul.f32 0.7978846, %v6123_v53  ;;  %v6124_v38 = vadd.f32 %v6118_v54, %v6092_v7 }
0x26ec   :  { %v6139_v24 = vadd.f32 1.0, %v8489_v10 }
0x26ed   :  { %v8491_v31 = vpop.eup %8490  ;;  %8492 = vtanh.f32 %v6129_v18  ;;  %v6130_v44 = vmul.f32 0.7978846, %v6124_v38 }
0x26ee   :  { %v6145_v36 = vmul.f32 0.5, %v6139_v24  ;;  %v6140_v29 = vadd.f32 1.0, %v8491_v31 }
0x26ef   :  { %8494 = vtanh.f32 %v6130_v44 }
0x26f0   :  { %v6146_v9 = vmul.f32 0.5, %v6140_v29  ;;  %v6151_v6 = vmul.f32 %v6145_v36, %v6081_v50 }
0x26f2   :  { %v6152_v17 = vmul.f32 %v6146_v9, %v6084_v30 }
0x26f4   :  { %v6157_v57 = vpack.c.bf16 %v6152_v17, %v6151_v6 }
0x26f6   :  { %8105 = vmatmul.mubr.msk.bf16.vlgmr.msra.gmra.mrb[28].mxu1 %vm3098_vm7, %v6157_v57 }
0x26f7   :  { %v8493_v45 = vpop.eup %8492  ;;  %8108 = vmatprep.mubr.msk.bf16.mxu1 %vm8577_vm0, %v8576_v1 }
0x26f8   :  { %v6141_v35 = vadd.f32 1.0, %v8493_v45 }
0x26f9   :  { %v8495_v41 = vpop.eup %8494 }
0x26fa   :  { %v6147_v61 = vmul.f32 0.5, %v6141_v35  ;;  %v6142_v56 = vadd.f32 1.0, %v8495_v41 }
0x26fc   :  { %v6148_v12 = vmul.f32 0.5, %v6142_v56  ;;  %v6153_v37 = vmul.f32 %v6147_v61, %v6089_v15 }
0x26fe   :  { %v6154_v59 = vmul.f32 %v6148_v12, %v6092_v7 }
0x2700   :  { %v6158_v60 = vpack.c.bf16 %v6154_v59, %v6153_v37 }
0x2702   :  { %8109 = vmatmul.mubr.msk.bf16.gmra.mrb[32].mxu1 %vm3098_vm7, %v6158_v60 }
0x2703   :  { %8112 = vmatprep.mubr.msk.bf16.mxu1 %vm8577_vm0, %v8576_v1 }
0x2779   :  { %v6096_v32 = vpop.f32.mrb[16].mxu0 }
0x277a   :  { %v6097_v63 = vadd.f32 %v10239_v58, %v6096_v32  ;;  %v8094_v33 = vpop.f32.mrb[17].mxu0 }
0x277b   :  { %v6099_v49 = vpop.f32.mrb[18].mxu0 }
0x277c   :  { %v6107_v48 = vmul.f32 %v6097_v63, %v6097_v63  ;;  %v6100_v2 = vadd.f32 %v10239_v58, %v6099_v49  ;;  %v8095_v19 = vpop.f32.mrb[19].mxu0 }
0x277e   :  { %v6113_v50 = vmul.f32 %v6107_v48, %v6097_v63  ;;  %v6108_v4 = vmul.f32 %v6100_v2, %v6100_v2  ;;  %v10277_v48 = vld [vmem:[%s10423_s18 + $0x1] ss:$0 sm:$0xff] }
0x2780   :  { %v6119_v5 = vmul.f32 0.044715, %v6113_v50  ;;  %v6114_v42 = vmul.f32 %v6108_v4, %v6100_v2 }
0x2782   :  { %v6125_v30 = vadd.f32 %v6119_v5, %v6097_v63  ;;  %v6120_v34 = vmul.f32 0.044715, %v6114_v42 }
0x2784   :  { %v6131_v26 = vmul.f32 0.7978846, %v6125_v30  ;;  %v6126_v21 = vadd.f32 %v6120_v34, %v6100_v2 }
0x2786   :  { %8496 = vtanh.f32 %v6131_v26  ;;  %v6132_v27 = vmul.f32 0.7978846, %v6126_v21 }
0x2788   :  { %8498 = vtanh.f32 %v6132_v27 }
0x2790   :  { %v8497_v43 = vpop.eup %8496 }
0x2791   :  { %v6143_v23 = vadd.f32 1.0, %v8497_v43 }
0x2792   :  { %v8499_v39 = vpop.eup %8498 }
0x2793   :  { %v6149_v8 = vmul.f32 0.5, %v6143_v23  ;;  %v6144_v62 = vadd.f32 1.0, %v8499_v39 }
0x2795   :  { %v6150_v47 = vmul.f32 0.5, %v6144_v62  ;;  %v6155_v3 = vmul.f32 %v6149_v8, %v6097_v63  ;;  %v10272_v63 = vld [vmem:[%s10422_s17 + $0x1] ss:$0 sm:$0xff] }
0x2797   :  { %v6156_v58 = vmul.f32 %v6150_v47, %v6100_v2 }
0x2799   :  { %v6159_v15 = vpack.c.bf16 %v6156_v58, %v6155_v3 }
0x279b   :  { %8113 = vmatmul.mubr.msk.bf16.gmra.mrb[36].mxu1 %vm3098_vm7, %v6159_v15 }
0x27c9   :  { %v6233_v13 = vpop.f32.mrb[28].mxu1 }
0x27ca   :  { %v6234_v51 = vadd.f32 %v10257_v16, %v6233_v13  ;;  %v8106_v7 = vpop.f32.mrb[29].mxu1 }
0x27cb   :  { %v10260_v28 = vpop.f32.mrb[30].mxu1 }
0x27cc   :  { %v6256_v11 = vadd.f32 %v6234_v51, %v10186_v52  ;;  %v8107_v20 = vpop.f32.mrb[31].mxu1  ;;  %v6237_v51 = vadd.f32 %v10257_v16, %v10260_v28  ;;  %v8246_v28 = vld [vmem:[%s10426_s21] sm:$0xff]  }
0x27cd   :  { %8117 = vmatpush3.bf16.msra.mxu0 %v8246_v28 }
0x27ce   :  { %v6262_v0 = vsel %vm296_vm2, %v6256_v11, 0.0  ;;  %8118 = vmatprep.subr.bf16.mxu0 %v8576_v1 }
0x27cf   :  { %6263 = vadd.xlane.f32.xlu1 %v6262_v0 }
0x27d5   :  { %v6241_v25 = vpop.f32.mrb[32].mxu1 }
0x27d6   :  { %v8110_v53 = vpop.f32.mrb[33].mxu1  ;;  %v6242_v27 = vadd.f32 %v10257_v16, %v6241_v25 }
0x27d7   :  { %v6244_v54 = vpop.f32.mrb[34].mxu1 }
0x27d8   :  { %v6245_v10 = vadd.f32 %v10257_v16, %v6244_v54  ;;  %v8111_v18 = vpop.f32.mrb[35].mxu1  ;;  %v6258_v39 = vadd.f32 %v6242_v27, %v10201_v22 }
0x27da   :  { %v6259_v38 = vadd.f32 %v6245_v10, %v10203_v46  ;;  %v6268_v3 = vsel %vm296_vm2, %v6258_v39, 0.0 }
0x27dc   :  { %v6271_v24 = vsel %vm296_vm2, %v6259_v38, 0.0 }
0x27dd   :  { %6272 = vadd.xlane.f32.xlu0 %v6271_v24 }
0x285c   :  { %v6264_v31 = vpop.xlane.xlu1 %6263 }
0x285d   :  { %v6280_v44 = vmul.f32 0.03125, %v6264_v31 }
0x285f   :  { %v6286_v36 = vsub.f32 %v6256_v11, %v6280_v44  ;;  %v6257_v11 = vadd.f32 %v6237_v51, %v10188_v40  ;;  %v8247_v40 = vld [vmem:[%s10426_s21 + $0x8] sm:$0xff]  }
0x2860   :  { %8119 = vmatpush3.bf16.msra.mxu0 %v8247_v40 }
0x2861   :  { %v6292_v29 = vmul.f32 %v6286_v36, %v6286_v36  ;;  %v6265_v25 = vsel %vm296_vm2, %v6257_v11, 0.0 }
0x2863   :  { %v6298_v52 = vsel %vm296_vm2, %v6292_v29, 0.0 }
0x2864   :  { %6299 = vadd.xlane.f32.xlu1 %v6298_v52 }
0x286a   :  { %v6273_v9 = vpop.xlane.xlu0 %6272 }
0x286b   :  { %v6283_v6 = vmul.f32 0.03125, %v6273_v9 }
0x286d   :  { %v6289_v17 = vsub.f32 %v6259_v38, %v6283_v6  ;;  %v10311_v6 = vld [vmem:[%s10424_s19] ss:$0 sm:$0xff] }
0x286e   :  { %v6249_v57 = vpop.f32.mrb[36].mxu1 }
0x286f   :  { %v8114_v45 = vpop.f32.mrb[37].mxu1  ;;  %v6295_v35 = vmul.f32 %v6289_v17, %v6289_v17  ;;  %v6250_v20 = vadd.f32 %v10257_v16, %v6249_v57 }
0x2870   :  { %v6252_v41 = vpop.f32.mrb[38].mxu1 }
0x2871   :  { %v8115_v61 = vpop.f32.mrb[39].mxu1  ;;  %v6307_v46 = vsel %vm296_vm2, %v6295_v35, 0.0  ;;  %v6253_v8 = vadd.f32 %v10257_v16, %v6252_v41  ;;  %v10317_v35 = vld [vmem:[%s10425_s20] ss:$0 sm:$0xff] }
0x2872   :  { %6308 = vadd.xlane.f32.xlu0 %v6307_v46 }
0x2873   :  { %v6261_v47 = vadd.f32 %v6253_v8, %v10229_v14  ;;  %v6260_v14 = vadd.f32 %v6250_v20, %v10227_v55 }
0x2875   :  { %v6277_v13 = vsel %vm296_vm2, %v6261_v47, 0.0  ;;  %v6274_v53 = vsel %vm296_vm2, %v6260_v14, 0.0 }
0x28f1   :  { %v6300_v56 = vpop.xlane.xlu1 %6299 }
0x28f2   :  { %v6316_v12 = vmul.f32 0.03125, %v6300_v56 }
0x28f4   :  { %v6322_v37 = vadd.f32 1e-12, %v6316_v12 }
0x28f6   :  { %8500 = vrsqrt.f32 %v6322_v37 }
0x28ff   :  { %v6309_v59 = vpop.xlane.xlu0 %6308 }
0x2900   :  { %v8501_v60 = vpop.eup %8500  ;;  %v6319_v32 = vmul.f32 0.03125, %v6309_v59 }
0x2901   :  { %v6334_v33 = vmul.f32 %v8501_v60, %v6286_v36 }
0x2902   :  { %v6325_v49 = vadd.f32 1e-12, %v6319_v32 }
0x2903   :  { %v6346_v2 = vmul.f32 %v10272_v63, %v6334_v33 }
0x2904   :  { %8502 = vrsqrt.f32 %v6325_v49 }
0x2905   :  { %v6358_v19 = vadd.f32 %v10277_v48, %v6346_v2 }
0x2907   :  { %v6366_v50 = vsel %vm296_vm2, %v6358_v19, 0.0 }
0x2908   :  { %6367 = vadd.xlane.f32.xlu1 %v6366_v50 }
0x290e   :  { %v8503_v4 = vpop.eup %8502 }
0x290f   :  { %v6337_v5 = vmul.f32 %v8503_v4, %v6289_v17 }
0x2911   :  { %v6349_v42 = vmul.f32 %v10272_v63, %v6337_v5 }
0x2913   :  { %v6361_v30 = vadd.f32 %v10277_v48, %v6349_v42 }
0x2915   :  { %v6375_v34 = vsel %vm296_vm2, %v6361_v30, 0.0 }
0x2916   :  { %6376 = vadd.xlane.f32.xlu0 %v6375_v34 }
0x2995   :  { %v6368_v26 = vpop.xlane.xlu1 %6367 }
0x2996   :  { %v6384_v21 = vmul.f32 0.03125, %v6368_v26 }
0x2998   :  { %v6390_v43 = vsub.f32 %v6358_v19, %v6384_v21 }
0x299a   :  { %v6396_v23 = vmul.f32 %v6390_v43, %v6390_v43 }
0x299c   :  { %v6402_v62 = vsel %vm296_vm2, %v6396_v23, 0.0 }
0x299d   :  { %6403 = vadd.xlane.f32.xlu1 %v6402_v62 }
0x29a1   :  { %6269 = vadd.xlane.f32.xlu1 %v6268_v3 }
0x29a3   :  { %v6377_v58 = vpop.xlane.xlu0 %6376 }
0x29a4   :  { %v6387_v15 = vmul.f32 0.03125, %v6377_v58 }
0x29a5   :  { %6278 = vadd.xlane.f32.xlu1 %v6277_v13 }
0x29a6   :  { %v6393_v7 = vsub.f32 %v6361_v30, %v6387_v15 }
0x29a8   :  { %v6399_v22 = vmul.f32 %v6393_v7, %v6393_v7 }
0x29aa   :  { %v6411_v0 = vsel %vm296_vm2, %v6399_v22, 0.0 }
0x29ab   :  { %6412 = vadd.xlane.f32.xlu0 %v6411_v0 }
0x29af   :  { %6266 = vadd.xlane.f32.xlu0 %v6265_v25 }
0x29b3   :  { %6275 = vadd.xlane.f32.xlu0 %v6274_v53 }
0x2a2a   :  { %v6404_v16 = vpop.xlane.xlu1 %6403 }
0x2a2b   :  { %v6420_v55 = vmul.f32 0.03125, %v6404_v16 }
0x2a2d   :  { %v6426_v54 = vadd.f32 1e-12, %v6420_v55 }
0x2a2e   :  { %v6270_v10 = vpop.xlane.xlu1 %6269 }
0x2a2f   :  { %8504 = vrsqrt.f32 %v6426_v54  ;;  %v6282_v18 = vmul.f32 0.03125, %v6270_v10 }
0x2a31   :  { %v6288_v38 = vsub.f32 %v6258_v39, %v6282_v18 }
0x2a32   :  { %v6279_v24 = vpop.xlane.xlu1 %6278 }
0x2a33   :  { %v6285_v31 = vmul.f32 0.03125, %v6279_v24  ;;  %v6294_v44 = vmul.f32 %v6288_v38, %v6288_v38 }
0x2a35   :  { %v6291_v36 = vsub.f32 %v6261_v47, %v6285_v31  ;;  %v6304_v29 = vsel %vm296_vm2, %v6294_v44, 0.0 }
0x2a36   :  { %6305 = vadd.xlane.f32.xlu1 %v6304_v29 }
0x2a37   :  { %v6297_v1 = vmul.f32 %v6291_v36, %v6291_v36 }
0x2a38   :  { %v6413_v52 = vpop.xlane.xlu0 %6412 }
0x2a39   :  { %v8505_v9 = vpop.eup %8504  ;;  %v6423_v17 = vmul.f32 0.03125, %v6413_v52  ;;  %v6313_v57 = vsel %vm296_vm2, %v6297_v1, 0.0 }
0x2a3a   :  { %v6438_v45 = vmul.f32 %v8505_v9, %v6390_v43  ;;  %6314 = vadd.xlane.f32.xlu1 %v6313_v57  ;;  %v6957_v9 = vld [vmem:[%s10427_s22] ss:$0 sm:$0xff]  ;;  %s8579_s22 = smov [#allocation4]  }
0x2a3b   :  { %v6429_v41 = vadd.f32 1e-12, %v6423_v17  ;;  %s6584_s13 = sshll.u32 %s8579_s22, 4  ;;  %s6585_s13 = int_to_ptr.vmem [resolvable:$true] %s6584_s13 }
0x2a3c   :  { %v6450_v61 = vmul.f32 %v10311_v6, %v6438_v45  ;;  %v6267_v46 = vpop.xlane.xlu0 %6266  ;;  %s8528_s5 = scalar_lea.vmem %s6585_s13, 32  ;;  %p8533_p1 = scmp.lt.s32.totalorder %s6585_s13, %s6585_s13 }
0x2a3d   :  { %8506 = vrsqrt.f32 %v6429_v41  ;;  %v6281_v56 = vmul.f32 0.03125, %v6267_v46  ;;  %p8529_p0 = scmp.ne.s32.totalorder %s6585_s13, %s8528_s5  ;;  %p8534_p2 = scmp.lt.s32.totalorder %s8528_s5, %s8528_s5 }
0x2a3e   :  { %v6462_v12 = vadd.f32 %v10317_v35, %v6450_v61 }
0x2a3f   :  { %v6287_v37 = vsub.f32 %v6257_v11, %v6281_v56  ;;  %p8535_p3 = por %p8534_p2, %p8533_p1 }
0x2a40   :  { %6468 = vst.msk [vmem:[#allocation2] sm:$0xff] %vm296_vm2, %v6462_v12  ;;  %v6276_v59 = vpop.xlane.xlu0 %6275  ;;  %v6478_v30 = vpack.c.bf16 %v6462_v12, %v6462_v12 }
0x2a41   :  { %v6284_v60 = vmul.f32 0.03125, %v6276_v59  ;;  %v6293_v32 = vmul.f32 %v6287_v37, %v6287_v37  ;;  %p8536_p4 = pnand %p8535_p3, %p8529_p0 }
0x2a42   :  { %v6489_v21 = vunpack.c.l.b16 %v6478_v30 }
0x2a43   :  { %v6290_v33 = vsub.f32 %v6260_v14, %v6284_v60  ;;  %v6301_v49 = vsel %vm296_vm2, %v6293_v32, 0.0 }
0x2a44   :  { %6302 = vadd.xlane.f32.xlu0 %v6301_v49 }
0x2a45   :  { %v6296_v2 = vmul.f32 %v6290_v33, %v6290_v33 }
0x2a47   :  { %v8507_v19 = vpop.eup %8506  ;;  %v6310_v50 = vsel %vm296_vm2, %v6296_v2, 0.0 }
0x2a48   :  { %v6441_v4 = vmul.f32 %v8507_v19, %v6393_v7  ;;  %6311 = vadd.xlane.f32.xlu0 %v6310_v50 }
0x2a4a   :  { %v6453_v5 = vmul.f32 %v10311_v6, %v6441_v4 }
0x2a4c   :  { %v6465_v42 = vadd.f32 %v10317_v35, %v6453_v5 }
0x2a4e   :  { %6471 = vst.msk [vmem:[#allocation2 + $0x18] sm:$0xff] %vm296_vm2, %v6465_v42  ;;  %v6479_v34 = vpack.c.bf16 %v6465_v42, %v6465_v42 }
0x2a50   :  { %v6490_v26 = vunpack.c.l.b16 %v6479_v34 }
0x2a52   :  { %v6491_v27 = vrot.slane %v6490_v26, 7 }
0x2a54   :  { %v6493_v43 = vsel %vm6492_vm8, %v6491_v27, %v6489_v21 }
0x2a55   :  { %v6494_v23 = vpack.c.b16 %v6493_v43, %v6493_v43 }
0x2a57   :  { %8121 = vmatmul.mubr.msk.bf16.vlgmr.msra.gmra.mrb[20].mxu0 %vm296_vm2, %v6494_v23 }
0x2ac3   :  { %v6306_v39 = vpop.xlane.xlu1 %6305 }
0x2ac4   :  { %v6318_v8 = vmul.f32 0.03125, %v6306_v39 }
0x2ac6   :  { %v6324_v62 = vadd.f32 1e-12, %v6318_v8 }
0x2ac7   :  { %v6315_v47 = vpop.xlane.xlu1 %6314 }
0x2ac8   :  { %8508 = vrsqrt.f32 %v6324_v62  ;;  %v6321_v3 = vmul.f32 0.03125, %v6315_v47 }
0x2aca   :  { %v6327_v58 = vadd.f32 1e-12, %v6321_v3 }
0x2acc   :  { %8510 = vrsqrt.f32 %v6327_v58 }
0x2ad1   :  { %v6303_v15 = vpop.xlane.xlu0 %6302 }
0x2ad2   :  { %v8509_v13 = vpop.eup %8508  ;;  %v6317_v51 = vmul.f32 0.03125, %v6303_v15 }
0x2ad3   :  { %v6336_v7 = vmul.f32 %v8509_v13, %v6288_v38 }
0x2ad4   :  { %v6323_v22 = vadd.f32 1e-12, %v6317_v51 }
0x2ad5   :  { %v6312_v11 = vpop.xlane.xlu0 %6311  ;;  %v6348_v20 = vmul.f32 %v10272_v63, %v6336_v7 }
0x2ad6   :  { %v8511_v0 = vpop.eup %8510  ;;  %8512 = vrsqrt.f32 %v6323_v22  ;;  %v6320_v14 = vmul.f32 0.03125, %v6312_v11 }
0x2ad7   :  { %v6360_v25 = vadd.f32 %v10277_v48, %v6348_v20  ;;  %v6339_v53 = vmul.f32 %v8511_v0, %v6291_v36 }
0x2ad8   :  { %v6326_v28 = vadd.f32 1e-12, %v6320_v14 }
0x2ad9   :  { %v6372_v40 = vsel %vm296_vm2, %v6360_v25, 0.0  ;;  %v6351_v16 = vmul.f32 %v10272_v63, %v6339_v53 }
0x2ada   :  { %8514 = vrsqrt.f32 %v6326_v28  ;;  %6373 = vadd.xlane.f32.xlu1 %v6372_v40 }
0x2adb   :  { %v6363_v55 = vadd.f32 %v10277_v48, %v6351_v16 }
0x2add   :  { %v6381_v54 = vsel %vm296_vm2, %v6363_v55, 0.0 }
0x2ade   :  { %6382 = vadd.xlane.f32.xlu1 %v6381_v54 }
0x2ae0   :  { %v8513_v10 = vpop.eup %8512 }
0x2ae1   :  { %v6335_v18 = vmul.f32 %v8513_v10, %v6287_v37 }
0x2ae3   :  { %v6347_v38 = vmul.f32 %v10272_v63, %v6335_v18 }
0x2ae4   :  { %v8515_v24 = vpop.eup %8514 }
0x2ae5   :  { %v6359_v31 = vadd.f32 %v10277_v48, %v6347_v38  ;;  %v6338_v44 = vmul.f32 %v8515_v24, %v6290_v33 }
0x2ae7   :  { %v6369_v36 = vsel %vm296_vm2, %v6359_v31, 0.0  ;;  %v6350_v29 = vmul.f32 %v10272_v63, %v6338_v44 }
0x2ae8   :  { %6370 = vadd.xlane.f32.xlu0 %v6369_v36 }
0x2ae9   :  { %v6362_v1 = vadd.f32 %v10277_v48, %v6350_v29 }
0x2aeb   :  { %v6378_v52 = vsel %vm296_vm2, %v6362_v1, 0.0 }
0x2aec   :  { %6379 = vadd.xlane.f32.xlu0 %v6378_v52 }
0x2b2a   :  { %v6544_v17 = vpop.f32.mrb[20].mxu0 }
0x2b2b   :  { %v6545_v57 = vadd.f32 %v6957_v9, %v6544_v17  ;;  %v8122_v45 = vpop.f32.mrb[21].mxu0 }
0x2b2c   :  { %v6547_v41 = vpop.f32.mrb[22].mxu0 }
0x2b2d   :  { %v6550_v61 = vmul.f32 %v6545_v57, %v6545_v57  ;;  %v8123_v46 = vpop.f32.mrb[23].mxu0 }
0x2b2f   :  { %v6552_v56 = vsel %vm6551_vm9, %v6550_v61, 0.0 }
0x2b30   :  { %6553 = vadd.xlane.f32.xlu0 %v6552_v56 }
0x2b67   :  { %v6374_v63 = vpop.xlane.xlu1 %6373 }
0x2b68   :  { %v6386_v12 = vmul.f32 0.03125, %v6374_v63 }
0x2b6a   :  { %v10344_v48 = vsub.f32 %v6360_v25, %v6386_v12 }
0x2b6b   :  { %v6383_v37 = vpop.xlane.xlu1 %6382 }
0x2b6c   :  { %v6389_v59 = vmul.f32 0.03125, %v6383_v37  ;;  %v6398_v60 = vmul.f32 %v10344_v48, %v10344_v48 }
0x2b6e   :  { %v10348_v32 = vsub.f32 %v6363_v55, %v6389_v59  ;;  %v6408_v33 = vsel %vm296_vm2, %v6398_v60, 0.0 }
0x2b6f   :  { %6409 = vadd.xlane.f32.xlu0 %v6408_v33 }
0x2b70   :  { %v6401_v49 = vmul.f32 %v10348_v32, %v10348_v32 }
0x2b72   :  { %v6417_v2 = vsel %vm296_vm2, %v6401_v49, 0.0 }
0x2b73   :  { %6418 = vadd.xlane.f32.xlu0 %v6417_v2 }
0x2b75   :  { %v6371_v19 = vpop.xlane.xlu0 %6370 }
0x2b76   :  { %v6385_v50 = vmul.f32 0.03125, %v6371_v19 }
0x2b78   :  { %v10354_v4 = vsub.f32 %v6359_v31, %v6385_v50 }
0x2b79   :  { %v6380_v5 = vpop.xlane.xlu0 %6379 }
0x2b7a   :  { %v6388_v42 = vmul.f32 0.03125, %v6380_v5  ;;  %v6397_v30 = vmul.f32 %v10354_v4, %v10354_v4 }
0x2b7c   :  { %v10358_v34 = vsub.f32 %v6362_v1, %v6388_v42  ;;  %v6405_v26 = vsel %vm296_vm2, %v6397_v30, 0.0 }
0x2b7d   :  { %6406 = vadd.xlane.f32.xlu1 %v6405_v26 }
0x2b7e   :  { %v6400_v21 = vmul.f32 %v10358_v34, %v10358_v34 }
0x2b80   :  { %v6414_v27 = vsel %vm296_vm2, %v6400_v21, 0.0 }
0x2b81   :  { %6415 = vadd.xlane.f32.xlu1 %v6414_v27 }
0x2bbd   :  { %v6554_v43 = vpop.xlane.xlu0 %6553 }
0x2bbe   :  { %8516 = vrsqrt.f32 %v6554_v43  ;;  %vm6557_vm10 = vcmp.eq.f32.partialorder %v6554_v43, inf  ;;  %v6560_v8 = vand.u32 2147483648, %v6554_v43  ;;  %vm6559_vm11 = vcmp.eq.f32.partialorder %v6554_v43, 0.0 }
0x2bc8   :  { %v8517_v23 = vpop.eup %8516 }
0x2bc9   :  { %v6556_v39 = vmul.f32 %v8517_v23, %v6554_v43 }
0x2bcb   :  { %v6558_v62 = vsel %vm6557_vm10, %v6554_v43, %v6556_v39 }
0x2bcc   :  { %v6561_v47 = vsel %vm6559_vm11, %v6560_v8, %v6558_v62 }
0x2bcd   :  { %v6562_v3 = vmax.f32 %v6561_v47, 1e-12 }
0x2bcf   :  { %8518 = vrcp.f32 %v6562_v3 }
0x2bd9   :  { %v8519_v58 = vpop.eup %8518 }
0x2bda   :  { %v6564_v15 = vmul.f32 %v8519_v58, %v6545_v57 }
0x2bdc   :  { %6565 = vst.msk [vmem:[#allocation4] sm:$0x3] %vm6551_vm9, %v6564_v15 }
0x2bdd   :  { %8539 = shalt.err (!%p8536_p4)
}
0x2bde   :  { %s8540_s27 = scalar_lea.hbm %s10429_s24, 32 }
0x2bdf   :  { %p8541_p5 = scmp.ne.s32.totalorder %s10429_s24, %s8540_s27  ;;  %p8544_p6 = scmp.lt.u32.totalorder %s8540_s27, %s10429_s24 }
0x2be1   :  { %p8546_p7 = pnand %p8544_p6, %p8541_p5 }
0x2be3   :  { %8549 = shalt.err (!%p8546_p7)
}
0x2be4   :  { %6587 = dma.vmem_to_hbm [thread:$0]  %s6585_s13, 32, %s10429_s24, [#allocation5]  }
0x2be5   :  { %s8580_s24 = smov [#allocation2]  }
0x2be6   :  { %s6571_s6 = sshll.u32 %s8580_s24, 4  ;;  %s6572_s6 = int_to_ptr.vmem [resolvable:$true] %s6571_s6 }
0x2be7   :  { %s8550_s14 = scalar_lea.vmem %s6572_s6, 768  ;;  %p8555_p9 = scmp.lt.s32.totalorder %s6572_s6, %s6572_s6 }
0x2be8   :  { %p8551_p8 = scmp.ne.s32.totalorder %s6572_s6, %s8550_s14  ;;  %p8556_p10 = scmp.lt.s32.totalorder %s8550_s14, %s8550_s14 }
0x2bea   :  { %p8557_p11 = por %p8556_p10, %p8555_p9 }
0x2bec   :  { %p8558_p12 = pnand %p8557_p11, %p8551_p8 }
0x2bfc   :  { %v6410_v13 = vpop.xlane.xlu0 %6409 }
0x2bfd   :  { %v6422_v51 = vmul.f32 0.03125, %v6410_v13 }
0x2bff   :  { %v6428_v7 = vadd.f32 1e-12, %v6422_v51 }
0x2c00   :  { %v6419_v22 = vpop.xlane.xlu0 %6418 }
0x2c01   :  { %8520 = vrsqrt.f32 %v6428_v7  ;;  %v6425_v11 = vmul.f32 0.03125, %v6419_v22 }
0x2c03   :  { %v6431_v20 = vadd.f32 1e-12, %v6425_v11 }
0x2c05   :  { %8522 = vrsqrt.f32 %v6431_v20 }
0x2c0a   :  { %v6407_v0 = vpop.xlane.xlu1 %6406 }
0x2c0b   :  { %v8521_v14 = vpop.eup %8520  ;;  %v6421_v25 = vmul.f32 0.03125, %v6407_v0 }
0x2c0c   :  { %v6440_v53 = vmul.f32 %v8521_v14, %v10344_v48 }
0x2c0d   :  { %v6427_v28 = vadd.f32 1e-12, %v6421_v25 }
0x2c0e   :  { %v6452_v40 = vmul.f32 %v10311_v6, %v6440_v53  ;;  %v6416_v16 = vpop.xlane.xlu1 %6415 }
0x2c0f   :  { %v8523_v55 = vpop.eup %8522  ;;  %8524 = vrsqrt.f32 %v6427_v28  ;;  %v6424_v54 = vmul.f32 0.03125, %v6416_v16 }
0x2c10   :  { %v6464_v10 = vadd.f32 %v10317_v35, %v6452_v40  ;;  %v6443_v18 = vmul.f32 %v8523_v55, %v10348_v32 }
0x2c11   :  { %v6430_v38 = vadd.f32 1e-12, %v6424_v54 }
0x2c12   :  { %6470 = vst.msk [vmem:[#allocation2 + $0x10] sm:$0xff] %vm296_vm2, %v6464_v10  ;;  %v6455_v24 = vmul.f32 %v10311_v6, %v6443_v18 }
0x2c13   :  { %8526 = vrsqrt.f32 %v6430_v38 }
0x2c14   :  { %v6467_v31 = vadd.f32 %v10317_v35, %v6455_v24 }
0x2c16   :  { %6473 = vst.msk [vmem:[#allocation2 + $0x28] sm:$0xff] %vm296_vm2, %v6467_v31 }
0x2c19   :  { %v8525_v44 = vpop.eup %8524 }
0x2c1a   :  { %v6439_v36 = vmul.f32 %v8525_v44, %v10354_v4 }
0x2c1c   :  { %v6451_v29 = vmul.f32 %v10311_v6, %v6439_v36 }
0x2c1d   :  { %v8527_v1 = vpop.eup %8526 }
0x2c1e   :  { %v6463_v52 = vadd.f32 %v10317_v35, %v6451_v29  ;;  %v6442_v9 = vmul.f32 %v8527_v1, %v10358_v34 }
0x2c20   :  { %6469 = vst.msk [vmem:[#allocation2 + $0x8] sm:$0xff] %vm296_vm2, %v6463_v52  ;;  %v6454_v17 = vmul.f32 %v10311_v6, %v6442_v9 }
0x2c22   :  { %v6466_v57 = vadd.f32 %v10317_v35, %v6454_v17 }
0x2c24   :  { %6472 = vst.msk [vmem:[#allocation2 + $0x20] sm:$0xff] %vm296_vm2, %v6466_v57 }
0x2c25   :  { %8561 = shalt.err (!%p8558_p12)
}
0x2c26   :  { %s8562_s9 = scalar_lea.hbm %s10428_s23, 768 }
0x2c27   :  { %p8563_p13 = scmp.ne.s32.totalorder %s10428_s23, %s8562_s9  ;;  %p8566_p0 = scmp.lt.u32.totalorder %s8562_s9, %s10428_s23 }
0x2c29   :  { %p8568_p1 = pnand %p8566_p0, %p8563_p13 }
0x2c2b   :  { %8571 = shalt.err (!%p8568_p1)
}
0x2c2c   :  { %s8581_s7 = smov 128   ;;  %s8582_s30 = smov 8  }
0x2c2d   :  { %6577 = dma.vmem_to_hbm [thread:$0]  %s6572_s6, 768, %s10428_s23, [#allocation3], %s8581_s7, %s8581_s7, %s8582_s30  }
0x2c2e   :  { %8572 = dma.done.wait [#allocation3], 768  }
0x2c2f   :  { %8573 = vsyncadd [#allocation3], 4294966528 }
0x2c30   :  { %8574 = dma.done.wait [#allocation5], 32  }
0x2c31   :  { %8575 = vsyncadd [#allocation5], 4294967264 }
0x2c32   :  { %6594 = vsyncpa [#allocation3], 1 }
0x2c33   :  { %6595 = vsyncpa [#allocation5], 1 }

</bundles_post_ra>
